<compile_context>
chip_gen: v7x
topology: tpu7x:2x2x1
jax: 0.10.0
libtpu: 0.0.40
codegen_flags: <defaults>
</compile_context>

<pallas_src>
import numpy as np

import jax
import jax.numpy as jnp
from jax.experimental import pallas as pl
from jax.experimental.pallas import tpu as pltpu

TB = 32            # batch tile (multiple of 8; raise to 64+ on v5e/v6e if desired)
CP = 128           # lane width of all matmul N dims / activations
K_BLK = 128        # per-kernel-row K block (= activation lane width)
KCONV = 5 * K_BLK  # packed K for each conv matmul (5 kernel rows)


# ----------------------------------------------------------------------------
# Fused kernel: conv1+ReLU+pool -> conv2+ReLU+pool -> conv3+ReLU -> fc1 -> fc2
# ----------------------------------------------------------------------------
def _lenet_kernel(x_ref, w1_ref, w2_ref, w3_ref, f1_ref, f2_ref, b_ref, o_ref):
    """Whole LeNet-5 forward for one batch tile of TB images (VMEM resident).

    x_ref : (32, TB, 128) bf16 image tile; lane w<32 is image column w, rest 0
    w?_ref: (2, 640, 128) bf16 conv weights, column-Toeplitz packed, leading
            dim = even/odd output-column half (for the fused 2x2 max-pool)
    w3_ref: (640, 128)    bf16 conv3 weights (single output position)
    f?_ref: (128, 128)    bf16 fc weights (zero padded)
    b_ref : (8, 128)      f32 biases; rows = conv1, conv2, conv3, fc1, fc2
    o_ref : (TB, 128)     f32 logits (first 10 lanes are real)
    """
    tb = x_ref.shape[1]

    def conv_pool(src, w_ref, bias, out_rows):
        # src: (in_rows, tb, 128) bf16.  K-pack the 5 kernel rows along lanes
        # (all pieces are exactly 128 lanes -> aligned concat), then one matmul
        # per pooling parity (even / odd output columns).
        lhs = jnp.concatenate([src[ki:ki + out_rows] for ki in range(5)], axis=-1)
        lhs = lhs.reshape(out_rows * tb, KCONV)
        ye = jnp.dot(lhs, w_ref[0], preferred_element_type=jnp.float32)
        yo = jnp.dot(lhs, w_ref[1], preferred_element_type=jnp.float32)
        ye = jnp.maximum(ye + bias, 0.0).reshape(out_rows, tb, CP)
        yo = jnp.maximum(yo + bias, 0.0).reshape(out_rows, tb, CP)
        c = jnp.maximum(ye, yo)                       # column max-pool (2j, 2j+1)
        c = c.reshape(out_rows // 2, 2, tb, CP)
        return jnp.maximum(c[:, 0], c[:, 1]).astype(jnp.bfloat16)  # row max-pool

    b1, b2, b3 = b_ref[0:1, :], b_ref[1:2, :], b_ref[2:3, :]
    b4, b5 = b_ref[3:4, :], b_ref[4:5, :]

    x = x_ref[...]                                    # (32, tb, 128) bf16
    p1 = conv_pool(x, w1_ref, b1, 28)                 # (14, tb, 128): 14 cols x 6 ch
    p2 = conv_pool(p1, w2_ref, b2, 10)                # (5, tb, 128): 5 cols x 16 ch

    # conv3: the 5x5 kernel covers the whole 5x5 map -> one output position.
    lhs3 = jnp.concatenate([p2[ki] for ki in range(5)], axis=-1)     # (tb, 640)
    feat = jnp.maximum(
        jnp.dot(lhs3, w3_ref[...], preferred_element_type=jnp.float32) + b3, 0.0)

    # fc1 + ReLU
    h = jnp.maximum(
        jnp.dot(feat.astype(jnp.bfloat16), f1_ref[...],
                preferred_element_type=jnp.float32) + b4, 0.0)
    # TODO(synk): nn.Dropout(p=0.5) is identity in eval mode; training-mode
    # stochastic masking (and 1/(1-p) scaling) is not implemented here.
    logits = jnp.dot(h.astype(jnp.bfloat16), f2_ref[...],
                     preferred_element_type=jnp.float32) + b5
    o_ref[...] = logits.astype(o_ref.dtype)


# ----------------------------------------------------------------------------
# Host-side weight repacking (one time, off the hot path)
# ----------------------------------------------------------------------------
def _pack_conv(w, parity, out_cols):
    """Column-Toeplitz packing of a 5x5 conv (PyTorch OIHW weights).

    Input K layout: index = ki * 128 + (j_in * Cin + cin); output lane =
    j' * Cout + cout where the real output column is j = 2*j' + parity
    (parity=None -> j = j', no pooling split).  Returns (640, 128) f32.
    """
    cout, cin, kh, kw = w.shape
    assert kh == 5 and kw == 5
    m = np.zeros((KCONV, CP), np.float32)
    for jp in range(out_cols):
        j = jp if parity is None else 2 * jp + parity
        for ki in range(5):
            for kj in range(5):
                for ci in range(cin):
                    row = ki * K_BLK + (j + kj) * cin + ci
                    m[row, jp * cout:(jp + 1) * cout] = w[:, ci, ki, kj]
    return m


def prepare_params(p):
    """One-time repack of PyTorch-layout params into the kernel layout.

    Expected layouts (PyTorch): conv weights (Cout, Cin, 5, 5); Linear weights
    (out_features, in_features); all biases (out,).
    """
    c1 = np.asarray(p["conv1_w"], np.float32)
    c2 = np.asarray(p["conv2_w"], np.float32)
    c3 = np.asarray(p["conv3_w"], np.float32)
    w1 = np.stack([_pack_conv(c1, 0, 14), _pack_conv(c1, 1, 14)])
    w2 = np.stack([_pack_conv(c2, 0, 5), _pack_conv(c2, 1, 5)])
    w3 = _pack_conv(c3, None, 1)

    f1 = np.zeros((CP, CP), np.float32)
    f1[:120, :84] = np.asarray(p["fc1_w"], np.float32).T   # (out,in) -> (in,out)
    f2 = np.zeros((CP, CP), np.float32)
    f2[:84, :10] = np.asarray(p["fc2_w"], np.float32).T

    b = np.zeros((8, CP), np.float32)
    b[0, :84] = np.tile(np.asarray(p["conv1_b"], np.float32), 14)
    b[1, :80] = np.tile(np.asarray(p["conv2_b"], np.float32), 5)
    b[2, :120] = np.asarray(p["conv3_b"], np.float32)
    b[3, :84] = np.asarray(p["fc1_b"], np.float32)
    b[4, :10] = np.asarray(p["fc2_b"], np.float32)

    return {
        "w1": jnp.asarray(w1, jnp.bfloat16),
        "w2": jnp.asarray(w2, jnp.bfloat16),
        "w3": jnp.asarray(w3, jnp.bfloat16),
        "f1": jnp.asarray(f1, jnp.bfloat16),
        "f2": jnp.asarray(f2, jnp.bfloat16),
        "b": jnp.asarray(b, jnp.float32),
    }


# ----------------------------------------------------------------------------
# Forward pass (mirrors ModernLeNet.forward, eval mode)
# ----------------------------------------------------------------------------
@jax.jit
def modern_lenet_forward(prep, x):
    """x: (B, 1, 32, 32) f32 NCHW -> logits (B, 10) f32."""
    B = x.shape[0]
    b_pad = pl.cdiv(B, TB) * TB
    # Single boundary layout change: NCHW -> (H, B_pad, 128) bf16
    # (image rows leading, batch on sublanes, image columns on lanes).
    xt = jnp.transpose(x[:, 0, :, :], (1, 0, 2)).astype(jnp.bfloat16)  # (32, B, 32)
    xt = jnp.pad(xt, ((0, 0), (0, b_pad - B), (0, K_BLK - 32)))

    out = pl.pallas_call(
        _lenet_kernel,
        out_shape=jax.ShapeDtypeStruct((b_pad, CP), jnp.float32),
        grid=(b_pad // TB,),
        in_specs=[
            pl.BlockSpec((32, TB, K_BLK), lambda i: (0, i, 0)),   # image tile
            pl.BlockSpec((2, KCONV, CP), lambda i: (0, 0, 0)),    # conv1 weights
            pl.BlockSpec((2, KCONV, CP), lambda i: (0, 0, 0)),    # conv2 weights
            pl.BlockSpec((KCONV, CP), lambda i: (0, 0)),          # conv3 weights
            pl.BlockSpec((CP, CP), lambda i: (0, 0)),             # fc1 weights
            pl.BlockSpec((CP, CP), lambda i: (0, 0)),             # fc2 weights
            pl.BlockSpec((8, CP), lambda i: (0, 0)),              # biases
        ],
        out_specs=pl.BlockSpec((TB, CP), lambda i: (i, 0)),
        compiler_params=pltpu.CompilerParams(
            dimension_semantics=("parallel",),   # shards tiles across v7x's 2 TCs
            vmem_limit_bytes=32 * 1024 * 1024,   # actual peak use is a few MB
        ),
    )(xt, prep["w1"], prep["w2"], prep["w3"], prep["f1"], prep["f2"], prep["b"])
    return out[:B, :10]


# ----------------------------------------------------------------------------
# Deterministic PyTorch-default-style init (conv: OIHW; Linear: (out, in))
# ----------------------------------------------------------------------------
def init_params(seed=42):
    keys = jax.random.split(jax.random.PRNGKey(seed), 10)

    def u(k, shape, bound):
        return jax.random.uniform(k, shape, jnp.float32, -bound, bound)

    def conv_init(kw, kb, cout, cin, k):
        bound = 1.0 / (cin * k * k) ** 0.5
        return u(kw, (cout, cin, k, k), bound), u(kb, (cout,), bound)

    def fc_init(kw, kb, nout, nin):   # PyTorch nn.Linear layout: (out, in)
        bound = 1.0 / nin ** 0.5
        return u(kw, (nout, nin), bound), u(kb, (nout,), bound)

    p = {}
    p["conv1_w"], p["conv1_b"] = conv_init(keys[0], keys[1], 6, 1, 5)
    p["conv2_w"], p["conv2_b"] = conv_init(keys[2], keys[3], 16, 6, 5)
    p["conv3_w"], p["conv3_b"] = conv_init(keys[4], keys[5], 120, 16, 5)
    p["fc1_w"], p["fc1_b"] = fc_init(keys[6], keys[7], 84, 120)
    p["fc2_w"], p["fc2_b"] = fc_init(keys[8], keys[9], 10, 84)
    return p


# ----------------------------------------------------------------------------
# Pure-JAX (XLA) reference for validation
# ----------------------------------------------------------------------------
def _reference_forward(params, x):
    def conv(x, w, b):
        y = jax.lax.conv_general_dilated(
            x, w, (1, 1), "VALID", dimension_numbers=("NCHW", "OIHW", "NCHW"))
        return jax.nn.relu(y + b.reshape(1, -1, 1, 1))

    def pool(x):
        return jax.lax.reduce_window(x, -jnp.inf, jax.lax.max,
                                     (1, 1, 2, 2), (1, 1, 2, 2), "VALID")

    x = pool(conv(x, params["conv1_w"], params["conv1_b"]))
    x = pool(conv(x, params["conv2_w"], params["conv2_b"]))
    x = conv(x, params["conv3_w"], params["conv3_b"]).reshape(-1, 120)
    x = jax.nn.relu(x @ params["fc1_w"].T + params["fc1_b"])
    # dropout: identity in eval mode
    return x @ params["fc2_w"].T + params["fc2_b"]


if __name__ == "__main__":
    B = 2
    x = jax.random.normal(jax.random.PRNGKey(0), (B, 1, 32, 32), jnp.float32)
    params = init_params(seed=42)
    prep = prepare_params(params)

    out = jax.block_until_ready(modern_lenet_forward(prep, x))
    assert out.shape == (B, 10), out.shape

    # Reference with the same bf16 weight/input rounding as the kernel so the
    # tolerance can be meaningfully tight (remaining error: bf16 activation
    # casts between layers + MXU accumulation order).
    bf = lambda a: a.astype(jnp.bfloat16).astype(jnp.float32)
    params_q = {k: (bf(v) if k.endswith("_w") else v) for k, v in params.items()}
    ref = jax.block_until_ready(_reference_forward(params_q, bf(x)))

    err = float(jnp.max(jnp.abs(out - ref)))
    assert jnp.allclose(out, ref, atol=2e-2, rtol=2e-2), f"max abs err {err:.5f}"
    print("KERNEL_OK")
</pallas_src>

<mosaic_0001>
module attributes {stable_mosaic.version = 11 : i64} {
  func.func @_lenet_kernel(%arg0: i32, %arg1: memref<32x32x128xbf16, #tpu.memory_space<vmem>>, %arg2: memref<2x640x128xbf16, #tpu.memory_space<vmem>>, %arg3: memref<2x640x128xbf16, #tpu.memory_space<vmem>>, %arg4: memref<640x128xbf16, #tpu.memory_space<vmem>>, %arg5: memref<128x128xbf16, #tpu.memory_space<vmem>>, %arg6: memref<128x128xbf16, #tpu.memory_space<vmem>>, %arg7: memref<8x128xf32, #tpu.memory_space<vmem>>, %arg8: memref<32x128xf32, #tpu.memory_space<vmem>>) attributes {dimension_semantics = [#tpu.dimension_semantics<parallel>], iteration_bounds = array<i64: 1>, scalar_prefetch = 0 : i64, scratch_operands = 0 : i64, tpu.core_type = #tpu.core_type<tc>, window_params = [{transform_indices = @transform_0, window_bounds = array<i64: 32, 32, 128>}, {pipeline_mode = #tpu.pipeline_mode<synchronous>, transform_indices = @transform_1, window_bounds = array<i64: 2, 640, 128>}, {pipeline_mode = #tpu.pipeline_mode<synchronous>, transform_indices = @transform_2, window_bounds = array<i64: 2, 640, 128>}, {pipeline_mode = #tpu.pipeline_mode<synchronous>, transform_indices = @transform_3, window_bounds = array<i64: 640, 128>}, {pipeline_mode = #tpu.pipeline_mode<synchronous>, transform_indices = @transform_4, window_bounds = array<i64: 128, 128>}, {pipeline_mode = #tpu.pipeline_mode<synchronous>, transform_indices = @transform_5, window_bounds = array<i64: 128, 128>}, {pipeline_mode = #tpu.pipeline_mode<synchronous>, transform_indices = @transform_6, window_bounds = array<i64: 8, 128>}, {transform_indices = @transform_7, window_bounds = array<i64: 32, 128>}]} {
    %c0 = arith.constant 0 : index
    %c0_0 = arith.constant 0 : index
    %0 = vector.load %arg7[%c0, %c0_0] : memref<8x128xf32, #tpu.memory_space<vmem>>, vector<1x128xf32>
    %c1 = arith.constant 1 : index
    %c0_1 = arith.constant 0 : index
    %1 = vector.load %arg7[%c1, %c0_1] : memref<8x128xf32, #tpu.memory_space<vmem>>, vector<1x128xf32>
    %c2 = arith.constant 2 : index
    %c0_2 = arith.constant 0 : index
    %2 = vector.load %arg7[%c2, %c0_2] : memref<8x128xf32, #tpu.memory_space<vmem>>, vector<1x128xf32>
    %c3 = arith.constant 3 : index
    %c0_3 = arith.constant 0 : index
    %3 = vector.load %arg7[%c3, %c0_3] : memref<8x128xf32, #tpu.memory_space<vmem>>, vector<1x128xf32>
    %c4 = arith.constant 4 : index
    %c0_4 = arith.constant 0 : index
    %4 = vector.load %arg7[%c4, %c0_4] : memref<8x128xf32, #tpu.memory_space<vmem>>, vector<1x128xf32>
    %c0_5 = arith.constant 0 : index
    %c0_6 = arith.constant 0 : index
    %c0_7 = arith.constant 0 : index
    %5 = vector.load %arg1[%c0_5, %c0_6, %c0_7] : memref<32x32x128xbf16, #tpu.memory_space<vmem>>, vector<32x32x128xbf16>
    %6 = vector.extract_strided_slice %5 {offsets = [0, 0, 0], sizes = [28, 32, 128], strides = [1, 1, 1]} : vector<32x32x128xbf16> to vector<28x32x128xbf16>
    %7 = vector.extract_strided_slice %5 {offsets = [1, 0, 0], sizes = [28, 32, 128], strides = [1, 1, 1]} : vector<32x32x128xbf16> to vector<28x32x128xbf16>
    %8 = vector.extract_strided_slice %5 {offsets = [2, 0, 0], sizes = [28, 32, 128], strides = [1, 1, 1]} : vector<32x32x128xbf16> to vector<28x32x128xbf16>
    %9 = vector.extract_strided_slice %5 {offsets = [3, 0, 0], sizes = [28, 32, 128], strides = [1, 1, 1]} : vector<32x32x128xbf16> to vector<28x32x128xbf16>
    %10 = vector.extract_strided_slice %5 {offsets = [4, 0, 0], sizes = [28, 32, 128], strides = [1, 1, 1]} : vector<32x32x128xbf16> to vector<28x32x128xbf16>
    %11 = tpu.concatenate %6, %7, %8, %9, %10 in 2 : vector<28x32x128xbf16>, vector<28x32x128xbf16>, vector<28x32x128xbf16>, vector<28x32x128xbf16>, vector<28x32x128xbf16> -> vector<28x32x640xbf16>
    %12 = vector.shape_cast %11 : vector<28x32x640xbf16> to vector<896x640xbf16>
    %c0_8 = arith.constant 0 : index
    %c0_9 = arith.constant 0 : index
    %c0_10 = arith.constant 0 : index
    %13 = vector.load %arg2[%c0_8, %c0_9, %c0_10] : memref<2x640x128xbf16, #tpu.memory_space<vmem>>, vector<1x640x128xbf16>
    %14 = vector.shape_cast %13 : vector<1x640x128xbf16> to vector<640x128xbf16>
    %cst = arith.constant dense<0.000000e+00> : vector<896x128xf32>
    %15 = tpu.matmul %12, %14, %cst {dimension_numbers = #tpu.dot_dimension_numbers<[1], [0], [0], [1], [0, 0, 1, 1], [], []>} : vector<896x640xbf16>, vector<640x128xbf16>, vector<896x128xf32> -> vector<896x128xf32>
    %c1_11 = arith.constant 1 : index
    %c0_12 = arith.constant 0 : index
    %c0_13 = arith.constant 0 : index
    %16 = vector.load %arg2[%c1_11, %c0_12, %c0_13] : memref<2x640x128xbf16, #tpu.memory_space<vmem>>, vector<1x640x128xbf16>
    %17 = vector.shape_cast %16 : vector<1x640x128xbf16> to vector<640x128xbf16>
    %cst_14 = arith.constant dense<0.000000e+00> : vector<896x128xf32>
    %18 = tpu.matmul %12, %17, %cst_14 {dimension_numbers = #tpu.dot_dimension_numbers<[1], [0], [0], [1], [0, 0, 1, 1], [], []>} : vector<896x640xbf16>, vector<640x128xbf16>, vector<896x128xf32> -> vector<896x128xf32>
    %19 = vector.broadcast %0 : vector<1x128xf32> to vector<896x128xf32>
    %20 = arith.addf %15, %19 : vector<896x128xf32>
    %cst_15 = arith.constant 0.000000e+00 : f32
    %21 = vector.broadcast %cst_15 : f32 to vector<896x128xf32>
    %22 = arith.maximumf %20, %21 : vector<896x128xf32>
    %23 = vector.shape_cast %22 : vector<896x128xf32> to vector<28x32x128xf32>
    %24 = vector.broadcast %0 : vector<1x128xf32> to vector<896x128xf32>
    %25 = arith.addf %18, %24 : vector<896x128xf32>
    %cst_16 = arith.constant 0.000000e+00 : f32
    %26 = vector.broadcast %cst_16 : f32 to vector<896x128xf32>
    %27 = arith.maximumf %25, %26 : vector<896x128xf32>
    %28 = vector.shape_cast %27 : vector<896x128xf32> to vector<28x32x128xf32>
    %29 = arith.maximumf %23, %28 : vector<28x32x128xf32>
    %30 = vector.shape_cast %29 : vector<28x32x128xf32> to vector<14x2x32x128xf32>
    %31 = vector.extract_strided_slice %30 {offsets = [0, 0, 0, 0], sizes = [14, 1, 32, 128], strides = [1, 1, 1, 1]} : vector<14x2x32x128xf32> to vector<14x1x32x128xf32>
    %32 = vector.shape_cast %31 : vector<14x1x32x128xf32> to vector<14x32x128xf32>
    %33 = vector.extract_strided_slice %30 {offsets = [0, 1, 0, 0], sizes = [14, 1, 32, 128], strides = [1, 1, 1, 1]} : vector<14x2x32x128xf32> to vector<14x1x32x128xf32>
    %34 = vector.shape_cast %33 : vector<14x1x32x128xf32> to vector<14x32x128xf32>
    %35 = arith.maximumf %32, %34 : vector<14x32x128xf32>
    %36 = arith.truncf %35 : vector<14x32x128xf32> to vector<14x32x128xbf16>
    %37 = vector.extract_strided_slice %36 {offsets = [0, 0, 0], sizes = [10, 32, 128], strides = [1, 1, 1]} : vector<14x32x128xbf16> to vector<10x32x128xbf16>
    %38 = vector.extract_strided_slice %36 {offsets = [1, 0, 0], sizes = [10, 32, 128], strides = [1, 1, 1]} : vector<14x32x128xbf16> to vector<10x32x128xbf16>
    %39 = vector.extract_strided_slice %36 {offsets = [2, 0, 0], sizes = [10, 32, 128], strides = [1, 1, 1]} : vector<14x32x128xbf16> to vector<10x32x128xbf16>
    %40 = vector.extract_strided_slice %36 {offsets = [3, 0, 0], sizes = [10, 32, 128], strides = [1, 1, 1]} : vector<14x32x128xbf16> to vector<10x32x128xbf16>
    %41 = vector.extract_strided_slice %36 {offsets = [4, 0, 0], sizes = [10, 32, 128], strides = [1, 1, 1]} : vector<14x32x128xbf16> to vector<10x32x128xbf16>
    %42 = tpu.concatenate %37, %38, %39, %40, %41 in 2 : vector<10x32x128xbf16>, vector<10x32x128xbf16>, vector<10x32x128xbf16>, vector<10x32x128xbf16>, vector<10x32x128xbf16> -> vector<10x32x640xbf16>
    %43 = vector.shape_cast %42 : vector<10x32x640xbf16> to vector<320x640xbf16>
    %c0_17 = arith.constant 0 : index
    %c0_18 = arith.constant 0 : index
    %c0_19 = arith.constant 0 : index
    %44 = vector.load %arg3[%c0_17, %c0_18, %c0_19] : memref<2x640x128xbf16, #tpu.memory_space<vmem>>, vector<1x640x128xbf16>
    %45 = vector.shape_cast %44 : vector<1x640x128xbf16> to vector<640x128xbf16>
    %cst_20 = arith.constant dense<0.000000e+00> : vector<320x128xf32>
    %46 = tpu.matmul %43, %45, %cst_20 {dimension_numbers = #tpu.dot_dimension_numbers<[1], [0], [0], [1], [0, 0, 1, 1], [], []>} : vector<320x640xbf16>, vector<640x128xbf16>, vector<320x128xf32> -> vector<320x128xf32>
    %c1_21 = arith.constant 1 : index
    %c0_22 = arith.constant 0 : index
    %c0_23 = arith.constant 0 : index
    %47 = vector.load %arg3[%c1_21, %c0_22, %c0_23] : memref<2x640x128xbf16, #tpu.memory_space<vmem>>, vector<1x640x128xbf16>
    %48 = vector.shape_cast %47 : vector<1x640x128xbf16> to vector<640x128xbf16>
    %cst_24 = arith.constant dense<0.000000e+00> : vector<320x128xf32>
    %49 = tpu.matmul %43, %48, %cst_24 {dimension_numbers = #tpu.dot_dimension_numbers<[1], [0], [0], [1], [0, 0, 1, 1], [], []>} : vector<320x640xbf16>, vector<640x128xbf16>, vector<320x128xf32> -> vector<320x128xf32>
    %50 = vector.broadcast %1 : vector<1x128xf32> to vector<320x128xf32>
    %51 = arith.addf %46, %50 : vector<320x128xf32>
    %cst_25 = arith.constant 0.000000e+00 : f32
    %52 = vector.broadcast %cst_25 : f32 to vector<320x128xf32>
    %53 = arith.maximumf %51, %52 : vector<320x128xf32>
    %54 = vector.shape_cast %53 : vector<320x128xf32> to vector<10x32x128xf32>
    %55 = vector.broadcast %1 : vector<1x128xf32> to vector<320x128xf32>
    %56 = arith.addf %49, %55 : vector<320x128xf32>
    %cst_26 = arith.constant 0.000000e+00 : f32
    %57 = vector.broadcast %cst_26 : f32 to vector<320x128xf32>
    %58 = arith.maximumf %56, %57 : vector<320x128xf32>
    %59 = vector.shape_cast %58 : vector<320x128xf32> to vector<10x32x128xf32>
    %60 = arith.maximumf %54, %59 : vector<10x32x128xf32>
    %61 = vector.shape_cast %60 : vector<10x32x128xf32> to vector<5x2x32x128xf32>
    %62 = vector.extract_strided_slice %61 {offsets = [0, 0, 0, 0], sizes = [5, 1, 32, 128], strides = [1, 1, 1, 1]} : vector<5x2x32x128xf32> to vector<5x1x32x128xf32>
    %63 = vector.shape_cast %62 : vector<5x1x32x128xf32> to vector<5x32x128xf32>
    %64 = vector.extract_strided_slice %61 {offsets = [0, 1, 0, 0], sizes = [5, 1, 32, 128], strides = [1, 1, 1, 1]} : vector<5x2x32x128xf32> to vector<5x1x32x128xf32>
    %65 = vector.shape_cast %64 : vector<5x1x32x128xf32> to vector<5x32x128xf32>
    %66 = arith.maximumf %63, %65 : vector<5x32x128xf32>
    %67 = arith.truncf %66 : vector<5x32x128xf32> to vector<5x32x128xbf16>
    %68 = vector.extract_strided_slice %67 {offsets = [0, 0, 0], sizes = [1, 32, 128], strides = [1, 1, 1]} : vector<5x32x128xbf16> to vector<1x32x128xbf16>
    %69 = vector.shape_cast %68 : vector<1x32x128xbf16> to vector<32x128xbf16>
    %70 = vector.extract_strided_slice %67 {offsets = [1, 0, 0], sizes = [1, 32, 128], strides = [1, 1, 1]} : vector<5x32x128xbf16> to vector<1x32x128xbf16>
    %71 = vector.shape_cast %70 : vector<1x32x128xbf16> to vector<32x128xbf16>
    %72 = vector.extract_strided_slice %67 {offsets = [2, 0, 0], sizes = [1, 32, 128], strides = [1, 1, 1]} : vector<5x32x128xbf16> to vector<1x32x128xbf16>
    %73 = vector.shape_cast %72 : vector<1x32x128xbf16> to vector<32x128xbf16>
    %74 = vector.extract_strided_slice %67 {offsets = [3, 0, 0], sizes = [1, 32, 128], strides = [1, 1, 1]} : vector<5x32x128xbf16> to vector<1x32x128xbf16>
    %75 = vector.shape_cast %74 : vector<1x32x128xbf16> to vector<32x128xbf16>
    %76 = vector.extract_strided_slice %67 {offsets = [4, 0, 0], sizes = [1, 32, 128], strides = [1, 1, 1]} : vector<5x32x128xbf16> to vector<1x32x128xbf16>
    %77 = vector.shape_cast %76 : vector<1x32x128xbf16> to vector<32x128xbf16>
    %78 = tpu.concatenate %69, %71, %73, %75, %77 in 1 : vector<32x128xbf16>, vector<32x128xbf16>, vector<32x128xbf16>, vector<32x128xbf16>, vector<32x128xbf16> -> vector<32x640xbf16>
    %c0_27 = arith.constant 0 : index
    %c0_28 = arith.constant 0 : index
    %79 = vector.load %arg4[%c0_27, %c0_28] : memref<640x128xbf16, #tpu.memory_space<vmem>>, vector<640x128xbf16>
    %cst_29 = arith.constant dense<0.000000e+00> : vector<32x128xf32>
    %80 = tpu.matmul %78, %79, %cst_29 {dimension_numbers = #tpu.dot_dimension_numbers<[1], [0], [0], [1], [0, 0, 1, 1], [], []>} : vector<32x640xbf16>, vector<640x128xbf16>, vector<32x128xf32> -> vector<32x128xf32>
    %81 = vector.broadcast %2 : vector<1x128xf32> to vector<32x128xf32>
    %82 = arith.addf %80, %81 : vector<32x128xf32>
    %cst_30 = arith.constant 0.000000e+00 : f32
    %83 = vector.broadcast %cst_30 : f32 to vector<32x128xf32>
    %84 = arith.maximumf %82, %83 : vector<32x128xf32>
    %85 = arith.truncf %84 : vector<32x128xf32> to vector<32x128xbf16>
    %c0_31 = arith.constant 0 : index
    %c0_32 = arith.constant 0 : index
    %86 = vector.load %arg5[%c0_31, %c0_32] : memref<128x128xbf16, #tpu.memory_space<vmem>>, vector<128x128xbf16>
    %cst_33 = arith.constant dense<0.000000e+00> : vector<32x128xf32>
    %87 = tpu.matmul %85, %86, %cst_33 {dimension_numbers = #tpu.dot_dimension_numbers<[1], [0], [0], [1], [0, 0, 1, 1], [], []>} : vector<32x128xbf16>, vector<128x128xbf16>, vector<32x128xf32> -> vector<32x128xf32>
    %88 = vector.broadcast %3 : vector<1x128xf32> to vector<32x128xf32>
    %89 = arith.addf %87, %88 : vector<32x128xf32>
    %cst_34 = arith.constant 0.000000e+00 : f32
    %90 = vector.broadcast %cst_34 : f32 to vector<32x128xf32>
    %91 = arith.maximumf %89, %90 : vector<32x128xf32>
    %92 = arith.truncf %91 : vector<32x128xf32> to vector<32x128xbf16>
    %c0_35 = arith.constant 0 : index
    %c0_36 = arith.constant 0 : index
    %93 = vector.load %arg6[%c0_35, %c0_36] : memref<128x128xbf16, #tpu.memory_space<vmem>>, vector<128x128xbf16>
    %cst_37 = arith.constant dense<0.000000e+00> : vector<32x128xf32>
    %94 = tpu.matmul %92, %93, %cst_37 {dimension_numbers = #tpu.dot_dimension_numbers<[1], [0], [0], [1], [0, 0, 1, 1], [], []>} : vector<32x128xbf16>, vector<128x128xbf16>, vector<32x128xf32> -> vector<32x128xf32>
    %95 = vector.broadcast %4 : vector<1x128xf32> to vector<32x128xf32>
    %96 = arith.addf %94, %95 : vector<32x128xf32>
    %c0_38 = arith.constant 0 : index
    %c0_39 = arith.constant 0 : index
    %97 = vector.load %arg8[%c0_38, %c0_39] : memref<32x128xf32, #tpu.memory_space<vmem>>, vector<32x128xf32>
    tpu.vector_store %arg8[%c0_38, %c0_39], %96 {strides = array<i32>} : memref<32x128xf32, #tpu.memory_space<vmem>>, vector<32x128xf32>,
    return
  }
  func.func @transform_0(%arg0: i32) -> (i32, i32, i32) {
    %c0_i32 = arith.constant 0 : i32
    %c0_i32_0 = arith.constant 0 : i32
    %c0_i32_1 = arith.constant 0 : i32
    return %c0_i32, %arg0, %c0_i32_0 : i32, i32, i32
  }
  func.func @transform_1(%arg0: i32) -> (i32, i32, i32) {
    %c0_i32 = arith.constant 0 : i32
    %c0_i32_0 = arith.constant 0 : i32
    %c0_i32_1 = arith.constant 0 : i32
    %c0_i32_2 = arith.constant 0 : i32
    return %c0_i32, %c0_i32_0, %c0_i32_1 : i32, i32, i32
  }
  func.func @transform_2(%arg0: i32) -> (i32, i32, i32) {
    %c0_i32 = arith.constant 0 : i32
    %c0_i32_0 = arith.constant 0 : i32
    %c0_i32_1 = arith.constant 0 : i32
    %c0_i32_2 = arith.constant 0 : i32
    return %c0_i32, %c0_i32_0, %c0_i32_1 : i32, i32, i32
  }
  func.func @transform_3(%arg0: i32) -> (i32, i32) {
    %c0_i32 = arith.constant 0 : i32
    %c0_i32_0 = arith.constant 0 : i32
    %c0_i32_1 = arith.constant 0 : i32
    return %c0_i32, %c0_i32_0 : i32, i32
  }
  func.func @transform_4(%arg0: i32) -> (i32, i32) {
    %c0_i32 = arith.constant 0 : i32
    %c0_i32_0 = arith.constant 0 : i32
    %c0_i32_1 = arith.constant 0 : i32
    return %c0_i32, %c0_i32_0 : i32, i32
  }
  func.func @transform_5(%arg0: i32) -> (i32, i32) {
    %c0_i32 = arith.constant 0 : i32
    %c0_i32_0 = arith.constant 0 : i32
    %c0_i32_1 = arith.constant 0 : i32
    return %c0_i32, %c0_i32_0 : i32, i32
  }
  func.func @transform_6(%arg0: i32) -> (i32, i32) {
    %c0_i32 = arith.constant 0 : i32
    %c0_i32_0 = arith.constant 0 : i32
    %c0_i32_1 = arith.constant 0 : i32
    return %c0_i32, %c0_i32_0 : i32, i32
  }
  func.func @transform_7(%arg0: i32) -> (i32, i32) {
    %c0_i32 = arith.constant 0 : i32
    %c0_i32_0 = arith.constant 0 : i32
    return %arg0, %c0_i32 : i32, i32
  }
}

</mosaic_0001>

<bundles_post_ra>
// kernel: modern_lenet_forward.1
= control target key start
LH: loop header
LB: loop body
LE: loop exit
PB: predicated region body
PF: predicated region fallthrough
CT: control target
= control target key end

     0   :  { %12 = vsyncpa [#allocation3], 0  ;;  %s13570_s0 = inlined_call_operand.vmem [shape: bf16[32,32,128], index: 0, kind: input, shape index: {}]   ;;  %s13571_s1 = inlined_call_operand.vmem [shape: bf16[2,640,128], index: 1, kind: input, shape index: {}]   ;;  %s13572_s2 = inlined_call_operand.hbm [shape: bf16[2,640,128], index: 2, kind: input, shape index: {}]   ;;  %s13573_s3 = inlined_call_operand.hbm [shape: bf16[640,128], index: 3, kind: input, shape index: {}]   ;;  %s13574_s4 = inlined_call_operand.hbm [shape: bf16[128,128], index: 4, kind: input, shape index: {}]   ;;  %s13575_s5 = inlined_call_operand.hbm [shape: bf16[128,128], index: 5, kind: input, shape index: {}]   ;;  %s13576_s6 = inlined_call_operand.vmem [shape: f32[8,128], index: 6, kind: input, shape index: {}]   ;;  %s13577_s7 = inlined_call_operand.vmem [shape: f32[32,128], index: 7, kind: output, shape index: {}]  }
   0x1   :  { %13 = vsyncpa [#allocation5], 0 }
   0x2   :  { %14 = vsyncpa [#allocation8], 0  ;;  %s9707_s24 = smov [#allocation4]   ;;  %s9708_s26 = smov [#allocation2]  }
   0x3   :  { %s36_s25 = sshll.u32 %s9707_s24, 4  ;;  %s24_s27 = sshll.u32 %s9708_s26, 4  ;;  %s37_s25 = int_to_ptr.vmem [resolvable:$true] %s36_s25  ;;  %s9754_s27 = int_to_ptr.vmem [resolvable:$true] %s24_s27 }
   0x4   :  { %s9613_s30 = scalar_lea.hbm %s13573_s3, 5120 }
   0x5   :  { %p9614_p0 = scmp.ne.s32.totalorder %s13573_s3, %s9613_s30  ;;  %p9617_p1 = scmp.lt.u32.totalorder %s9613_s30, %s13573_s3 }
   0x7   :  { %p9619_p2 = pnand %p9617_p1, %p9614_p0 }
   0x9   :  { %9622 = shalt.err (!%p9619_p2)
}
   0xa   :  { %s9623_s12 = scalar_lea.vmem %s37_s25, 5120  ;;  %p9628_p4 = scmp.lt.s32.totalorder %s37_s25, %s37_s25 }
   0xb   :  { %p9624_p3 = scmp.ne.s32.totalorder %s37_s25, %s9623_s12  ;;  %p9629_p5 = scmp.lt.s32.totalorder %s9623_s12, %s9623_s12 }
   0xd   :  { %p9630_p6 = por %p9629_p5, %p9628_p4 }
   0xf   :  { %p9631_p7 = pnand %p9630_p6, %p9624_p3 }
  0x11   :  { %9634 = shalt.err (!%p9631_p7)
}
  0x12   :  { %s9709_s13 = smov 64   ;;  %s9710_s14 = smov 4  }
  0x13   :  { %42 = dma.hbm_to_vmem [thread:$0]  %s13573_s3, 5120, %s37_s25, [#allocation5], %s9709_s13, %s9709_s13, %s9710_s14  }
  0x14   :  { %s9635_s19 = scalar_lea.hbm %s13572_s2, 10240 }
  0x15   :  { %p9636_p8 = scmp.ne.s32.totalorder %s13572_s2, %s9635_s19  ;;  %p9639_p9 = scmp.lt.u32.totalorder %s9635_s19, %s13572_s2 }
  0x17   :  { %p9641_p10 = pnand %p9639_p9, %p9636_p8 }
  0x19   :  { %9644 = shalt.err (!%p9641_p10)
}
  0x1a   :  { %s9645_s24 = scalar_lea.vmem %s9754_s27, 10240  ;;  %p9650_p12 = scmp.lt.s32.totalorder %s9754_s27, %s9754_s27 }
  0x1b   :  { %p9646_p11 = scmp.ne.s32.totalorder %s9754_s27, %s9645_s24  ;;  %p9651_p13 = scmp.lt.s32.totalorder %s9645_s24, %s9645_s24 }
  0x1d   :  { %p9652_p0 = por %p9651_p13, %p9650_p12 }
  0x1f   :  { %p9653_p1 = pnand %p9652_p0, %p9646_p11 }
  0x21   :  { %9656 = shalt.err (!%p9653_p1)
}
  0x22   :  { %30 = dma.hbm_to_vmem [thread:$0]  %s13572_s2, 10240, %s9754_s27, [#allocation3], %s9709_s13, %s9709_s13, %s9710_s14  }
  0x23   :  { %s9711_s26 = smov [#allocation6]   ;;  %s9712_s29 = smov [#allocation7]  }
  0x24   :  { %s48_s28 = sshll.u32 %s9711_s26, 4  ;;  %s60_s30 = sshll.u32 %s9712_s29, 4  ;;  %s49_s28 = int_to_ptr.vmem [resolvable:$true] %s48_s28  ;;  %s9791_s30 = int_to_ptr.vmem [resolvable:$true] %s60_s30 }
  0x25   :  { %s9657_s10 = scalar_lea.hbm %s13574_s4, 1024 }
  0x26   :  { %p9658_p2 = scmp.ne.s32.totalorder %s13574_s4, %s9657_s10  ;;  %p9661_p3 = scmp.lt.u32.totalorder %s9657_s10, %s13574_s4 }
  0x28   :  { %p9663_p4 = pnand %p9661_p3, %p9658_p2 }
  0x2a   :  { %9666 = shalt.err (!%p9663_p4)
}
  0x2b   :  { %s9667_s2 = scalar_lea.vmem %s49_s28, 1024  ;;  %p9672_p6 = scmp.lt.s32.totalorder %s49_s28, %s49_s28 }
  0x2c   :  { %p9668_p5 = scmp.ne.s32.totalorder %s49_s28, %s9667_s2  ;;  %p9673_p7 = scmp.lt.s32.totalorder %s9667_s2, %s9667_s2 }
  0x2e   :  { %p9674_p8 = por %p9673_p7, %p9672_p6 }
  0x30   :  { %p9675_p9 = pnand %p9674_p8, %p9668_p5 }
  0x32   :  { %9678 = shalt.err (!%p9675_p9)
}
  0x33   :  { %54 = dma.hbm_to_vmem [thread:$0]  %s13574_s4, 1024, %s49_s28, [#allocation5], %s9709_s13, %s9709_s13, %s9710_s14  }
  0x34   :  { %s9679_s20 = scalar_lea.hbm %s13575_s5, 1024 }
  0x35   :  { %p9680_p10 = scmp.ne.s32.totalorder %s13575_s5, %s9679_s20  ;;  %p9683_p11 = scmp.lt.u32.totalorder %s9679_s20, %s13575_s5 }
  0x37   :  { %p9685_p12 = pnand %p9683_p11, %p9680_p10 }
  0x39   :  { %9688 = shalt.err (!%p9685_p12)
}
  0x3a   :  { %s9689_s3 = scalar_lea.vmem %s9791_s30, 1024  ;;  %p9694_p0 = scmp.lt.s32.totalorder %s9791_s30, %s9791_s30 }
  0x3b   :  { %p9690_p13 = scmp.ne.s32.totalorder %s9791_s30, %s9689_s3  ;;  %p9695_p1 = scmp.lt.s32.totalorder %s9689_s3, %s9689_s3 }
  0x3d   :  { %p9696_p2 = por %p9695_p1, %p9694_p0 }
  0x3f   :  { %p9697_p3 = pnand %p9696_p2, %p9690_p13 }
  0x41   :  { %9700 = shalt.err (!%p9697_p3)
}
  0x42   :  { %66 = dma.hbm_to_vmem [thread:$0]  %s13575_s5, 1024, %s9791_s30, [#allocation8], %s9709_s13, %s9709_s13, %s9710_s14  }
  0x43   :  { %9701 = dma.done.wait [#allocation3], 10240  }
  0x44   :  { %9702 = vsyncadd [#allocation3], 4294957056 }
  0x45   :  { %9703 = dma.done.wait [#allocation5], 6144  }
  0x46   :  { %9704 = vsyncadd [#allocation5], 4294961152 }
  0x47   :  { %9705 = dma.done.wait [#allocation8], 1024  }
  0x48   :  { %9706 = vsyncadd [#allocation8], 4294966272  ;;  %v13578_v0 = vmov 0   ;;  %v9213_v1 = vld [vmem:[%s13571_s1] sm:$0xff]   ;;  %v9215_v3 = vld [vmem:[%s13571_s1 + $0x8] sm:$0xff]  }
  0x49   :  { %1004 = vmatprep.subr.bf16.mxu0 %v13578_v0  ;;  %v9214_v2 = vld [vmem:[%s13571_s1 + $0x100] sm:$0xff]   ;;  %v9216_v4 = vld [vmem:[%s13571_s1 + $0x108] sm:$0xff]   ;;  %v9218_v5 = vld [vmem:[%s13571_s1 + $0x110] sm:$0xff]  }
  0x4a   :  { %1005 = vmatpush1.bf16.msra.mxu0 %v9213_v1  ;;  %7866 = vmatprep.subr.bf16.mxu1 %v9214_v2  ;;  %v9217_v6 = vld [vmem:[%s13571_s1 + $0x10] sm:$0xff]   ;;  %v9220_v7 = vld [vmem:[%s13571_s1 + $0x118] sm:$0xff]   ;;  %v9222_v9 = vld [vmem:[%s13571_s1 + $0x120] sm:$0xff]  }
  0x4b   :  { %1006 = vmatprep.subr.bf16.mxu0 %v13578_v0  ;;  %7867 = vmatpush3.bf16.msra.mxu1 %v9214_v2  ;;  %v9219_v8 = vld [vmem:[%s13571_s1 + $0x18] sm:$0xff]   ;;  %v9221_v10 = vld [vmem:[%s13571_s1 + $0x20] sm:$0xff]   ;;  %v9224_v12 = vld [vmem:[%s13571_s1 + $0x128] sm:$0xff]  }
  0x4c   :  { %7868 = vmatprep.subr.bf16.mxu1 %v9216_v4  ;;  %v9866_v11 = vld [vmem:[%s13570_s0 + $0x40] sm:$0xff]   ;;  %v9223_v13 = vld [vmem:[%s13571_s1 + $0x28] sm:$0xff]   ;;  %v9226_v14 = vld [vmem:[%s13571_s1 + $0x130] sm:$0xff]  }
  0x4d   :  { %7882 = vmatprep.mubr.bf16.mxu1 %v9866_v11  ;;  %v9225_v15 = vld [vmem:[%s13571_s1 + $0x30] sm:$0xff]   ;;  %v9228_v16 = vld [vmem:[%s13571_s1 + $0x138] sm:$0xff]   ;;  %v9230_v18 = vld [vmem:[%s13571_s1 + $0x40] sm:$0xff]  }
  0x4e   :  { %1007 = vmatpush1.bf16.msra.mxu0 %v9215_v3  ;;  %v9227_v17 = vld [vmem:[%s13571_s1 + $0x38] sm:$0xff]   ;;  %v9896_v19 = vld [vmem:[%s13570_s0 + $0x48] sm:$0xff]   ;;  %v9902_v20 = vld [vmem:[%s13570_s0 + $0x50] sm:$0xff]  }
  0x4f   :  { %1008 = vmatprep.subr.bf16.mxu0 %v13578_v0  ;;  %7869 = vmatpush3.bf16.msra.mxu1 %v9216_v4  ;;  %v9907_v21 = vld [vmem:[%s13570_s0 + $0x10] sm:$0xff]   ;;  %v9232_v22 = vld [vmem:[%s13571_s1 + $0x48] sm:$0xff]   ;;  %v9250_v23 = vld [vmem:[%s13571_s1 + $0x140] sm:$0xff]  }
  0x50   :  { %7870 = vmatprep.subr.bf16.mxu1 %v9218_v5  ;;  %1036 = vmatprep.mubr.bf16.mxu0 %v9907_v21  ;;  %v9234_v24 = vld [vmem:[%s13571_s1 + $0x50] sm:$0xff]   ;;  %v9927_v25 = vld [vmem:[%s13570_s0 + $0x58] sm:$0xff]   ;;  %v9932_v26 = vld [vmem:[%s13570_s0 + $0x60] sm:$0xff]  }
  0x51   :  { %v9236_v27 = vld [vmem:[%s13571_s1 + $0x58] sm:$0xff]   ;;  %v9256_v28 = vld [vmem:[%s13571_s1 + $0x148] sm:$0xff]   ;;  %v9238_v29 = vld [vmem:[%s13571_s1 + $0x60] sm:$0xff]  }
  0x52   :  { %1009 = vmatpush1.bf16.msra.mxu0 %v9217_v6  ;;  %v9952_v30 = vld [vmem:[%s13570_s0 + $0x68] sm:$0xff]   ;;  %v9957_v31 = vld [vmem:[%s13570_s0 + $0x70] sm:$0xff]   ;;  %v9976_v35 = vld [vmem:[%s13570_s0 + $0x78] sm:$0xff]  }
  0x53   :  { %1010 = vmatprep.subr.bf16.mxu0 %v13578_v0  ;;  %7871 = vmatpush3.bf16.msra.mxu1 %v9218_v5  ;;  %v9240_v32 = vld [vmem:[%s13571_s1 + $0x68] sm:$0xff]   ;;  %v9263_v33 = vld [vmem:[%s13571_s1 + $0x150] sm:$0xff]   ;;  %v9981_v36 = vld [vmem:[%s13570_s0 + $0x80] sm:$0xff]  }
  0x54   :  { %7872 = vmatprep.subr.bf16.mxu1 %v9220_v7  ;;  %v9242_v34 = vld [vmem:[%s13571_s1 + $0x70] sm:$0xff]   ;;  %v9270_v37 = vld [vmem:[%s13571_s1 + $0x158] sm:$0xff]   ;;  %v9246_v39 = vld [vmem:[%s13570_s0] sm:$0xff]  }
  0x55   :  { %v9244_v38 = vld [vmem:[%s13571_s1 + $0x78] sm:$0xff]   ;;  %v9248_v40 = vld [vmem:[%s13571_s1 + $0x80] sm:$0xff]   ;;  %v10001_v41 = vld [vmem:[%s13570_s0 + $0x88] sm:$0xff]  }
  0x56   :  { %1011 = vmatpush1.bf16.msra.mxu0 %v9219_v8  ;;  %v9251_v42 = vld [vmem:[%s13570_s0 + $0x18] sm:$0xff]   ;;  %v9276_v43 = vld [vmem:[%s13571_s1 + $0x160] sm:$0xff]   ;;  %v10014_v44 = vld [vmem:[%s13570_s0 + $0x90] sm:$0xff]  }
  0x57   :  { %1012 = vmatprep.subr.bf16.mxu0 %v13578_v0  ;;  %7873 = vmatpush3.bf16.msra.mxu1 %v9220_v7  ;;  %v9262_v45 = vld [vmem:[%s13571_s1 + $0x88] sm:$0xff]   ;;  %v10032_v48 = vld [vmem:[%s13570_s0 + $0x98] sm:$0xff]   ;;  %v9255_v49 = vld [vmem:[%s13570_s0 + $0x20] sm:$0xff]  }
  0x58   :  { %7874 = vmatprep.subr.bf16.mxu1 %v9222_v9  ;;  %v9279_v46 = vld [vmem:[%s13571_s1 + $0x168] sm:$0xff]   ;;  %v9274_v50 = vld [vmem:[%s13571_s1 + $0x90] sm:$0xff]   ;;  %v10044_v51 = vld [vmem:[%s13570_s0 + $0xa0] sm:$0xff]  }
  0x59   :  { %v9252_v47 = vld [vmem:[%s13570_s0 + $0x8] sm:$0xff]   ;;  %v9285_v52 = vld [vmem:[%s13571_s1 + $0x170] sm:$0xff]   ;;  %v9284_v53 = vld [vmem:[%s13571_s1 + $0x98] sm:$0xff]  }
  0x5a   :  { %1013 = vmatpush1.bf16.msra.mxu0 %v9221_v10  ;;  %v9290_v54 = vld [vmem:[%s13571_s1 + $0x178] sm:$0xff]   ;;  %v9259_v55 = vld [vmem:[%s13570_s0 + $0x28] sm:$0xff]   ;;  %v9260_v57 = vld [vmem:[%s13570_s0 + $0xb0] sm:$0xff]  }
  0x5b   :  { %1014 = vmatprep.subr.bf16.mxu0 %v13578_v0  ;;  %7875 = vmatpush3.bf16.msra.mxu1 %v9222_v9  ;;  %v10066_v56 = vld [vmem:[%s13570_s0 + $0xa8] sm:$0xff]   ;;  %v9294_v58 = vld [vmem:[%s13571_s1 + $0xa0] sm:$0xff]   ;;  %v9264_v60 = vld [vmem:[%s13570_s0 + $0x30] sm:$0xff]  }
  0x5c   :  { %7876 = vmatprep.subr.bf16.mxu1 %v9224_v12  ;;  %v9296_v59 = vld [vmem:[%s13571_s1 + $0x180] sm:$0xff]   ;;  %v9299_v61 = vld [vmem:[%s13571_s1 + $0x188] sm:$0xff]   ;;  %v9261_v62 = vld [vmem:[%s13570_s0 + $0xb8] sm:$0xff]  }
  0x5d   :  { %v9265_v63 = vld [vmem:[%s13570_s0 + $0xc0] sm:$0xff]   ;;  %v9304_v1 = vld [vmem:[%s13571_s1 + $0xa8] sm:$0xff]   ;;  %v9305_v2 = vld [vmem:[%s13571_s1 + $0x190] sm:$0xff]  }
  0x5e   :  { %1015 = vmatpush1.bf16.msra.mxu0 %v9223_v13  ;;  %v9267_v3 = vld [vmem:[%s13570_s0 + $0x38] sm:$0xff]   ;;  %v9266_v4 = vld [vmem:[%s13570_s0 + $0xc8] sm:$0xff]   ;;  %v9268_v5 = vld [vmem:[%s13570_s0 + $0xd0] sm:$0xff]  }
  0x5f   :  { %1016 = vmatprep.subr.bf16.mxu0 %v13578_v0  ;;  %7877 = vmatpush3.bf16.msra.mxu1 %v9224_v12  ;;  %v9310_v6 = vld [vmem:[%s13571_s1 + $0x198] sm:$0xff]   ;;  %v9271_v8 = vld [vmem:[%s13570_s0 + $0xe0] sm:$0xff]   ;;  %v9314_v9 = vld [vmem:[%s13571_s1 + $0xb0] sm:$0xff]  }
  0x60   :  { %7878 = vmatprep.subr.bf16.mxu1 %v9226_v14  ;;  %v10119_v7 = vld [vmem:[%s13570_s0 + $0xd8] sm:$0xff]   ;;  %v9316_v10 = vld [vmem:[%s13571_s1 + $0x1a0] sm:$0xff]   ;;  %v10137_v12 = vld [vmem:[%s13570_s0 + $0xe8] sm:$0xff]  }
  0x61   :  { %v10143_v13 = vld [vmem:[%s13570_s0 + $0xf0] sm:$0xff]  }
  0x62   :  { %1017 = vmatpush1.bf16.msra.mxu0 %v9225_v15  ;;  %v10154_v15 = vld [vmem:[%s13570_s0 + $0xf8] sm:$0xff]  }
  0x63   :  { %1018 = vmatprep.subr.bf16.mxu0 %v13578_v0  ;;  %7879 = vmatpush3.bf16.msra.mxu1 %v9226_v14  ;;  %v9319_v14 = vld [vmem:[%s13571_s1 + $0x1a8] sm:$0xff]  }
  0x64   :  { %7880 = vmatprep.subr.bf16.mxu1 %v9228_v16 }
  0x66   :  { %1019 = vmatpush1.bf16.msra.mxu0 %v9227_v17  ;;  %v9322_v17 = vld [vmem:[%s13571_s1 + $0x1b0] sm:$0xff]  }
  0x67   :  { %1020 = vmatprep.subr.bf16.mxu0 %v13578_v0  ;;  %7881 = vmatpush3.bf16.msra.mxu1 %v9228_v16  ;;  %v10160_v16 = vld [vmem:[%s13570_s0 + $0x100] sm:$0xff]  }
  0x68   :  { %2799 = vmatprep.subr.bf16.mxu1 %v13578_v0 }
  0x6a   :  { %1021 = vmatpush1.bf16.msra.mxu0 %v9230_v18  ;;  %7883 = vmatmul.mubr.bf16.vlgmr.msra.gmra.mrb[0].mxu1 %v9896_v19  ;;  %v9323_v18 = vld [vmem:[%s13571_s1 + $0x1b8] sm:$0xff]  }
  0x6b   :  { %1022 = vmatprep.subr.bf16.mxu0 %v13578_v0  ;;  %7886 = vmatprep.mubr.bf16.mxu1 %v9902_v20 }
  0x6c   :  { %2800 = vmatpush1.bf16.msra.mxu1 %v9250_v23  ;;  %v9324_v23 = vld [vmem:[%s13571_s1 + $0xb8] sm:$0xff]  }
  0x6d   :  { %2801 = vmatprep.subr.bf16.mxu1 %v13578_v0 }
  0x6e   :  { %1023 = vmatpush1.bf16.msra.mxu0 %v9232_v22  ;;  %v10180_v22 = vld [vmem:[%s13570_s0 + $0x110] sm:$0xff]  }
  0x6f   :  { %1024 = vmatprep.subr.bf16.mxu0 %v13578_v0 }
  0x70   :  { %2802 = vmatpush1.bf16.msra.mxu1 %v9256_v28  ;;  %v10213_v28 = vld [vmem:[%s13570_s0 + $0x130] sm:$0xff]  }
  0x71   :  { %2803 = vmatprep.subr.bf16.mxu1 %v13578_v0 }
  0x72   :  { %1025 = vmatpush1.bf16.msra.mxu0 %v9234_v24  ;;  %7887 = vmatmul.mubr.bf16.gmra.mrb[4].mxu1 %v9927_v25  ;;  %v10193_v24 = vld [vmem:[%s13570_s0 + $0x118] sm:$0xff]  }
  0x73   :  { %1026 = vmatprep.subr.bf16.mxu0 %v13578_v0  ;;  %7890 = vmatprep.mubr.bf16.mxu1 %v9932_v26 }
  0x74   :  { %2804 = vmatpush1.bf16.msra.mxu1 %v9263_v33  ;;  %v10254_v33 = vld [vmem:[%s13570_s0 + $0x158] sm:$0xff]  }
  0x75   :  { %2805 = vmatprep.subr.bf16.mxu1 %v13578_v0 }
  0x76   :  { %1027 = vmatpush1.bf16.msra.mxu0 %v9236_v27  ;;  %v10208_v27 = vld [vmem:[%s13570_s0 + $0x128] sm:$0xff]  }
  0x77   :  { %1028 = vmatprep.subr.bf16.mxu0 %v13578_v0 }
  0x78   :  { %2806 = vmatpush1.bf16.msra.mxu1 %v9270_v37  ;;  %v10273_v37 = vld [vmem:[%s13570_s0 + $0x170] sm:$0xff]  }
  0x79   :  { %2807 = vmatprep.subr.bf16.mxu1 %v13578_v0 }
  0x7a   :  { %1029 = vmatpush1.bf16.msra.mxu0 %v9238_v29  ;;  %7891 = vmatmul.mubr.bf16.gmra.mrb[8].mxu1 %v9952_v30  ;;  %v10227_v29 = vld [vmem:[%s13570_s0 + $0x140] sm:$0xff]  }
  0x7b   :  { %1030 = vmatprep.subr.bf16.mxu0 %v13578_v0  ;;  %7894 = vmatprep.mubr.bf16.mxu1 %v9957_v31 }
  0x7c   :  { %2808 = vmatpush1.bf16.msra.mxu1 %v9276_v43  ;;  %v10338_v43 = vld [vmem:[%s13570_s0 + $0x1a8] sm:$0xff]  }
  0x7d   :  { %2809 = vmatprep.subr.bf16.mxu1 %v13578_v0 }
  0x7e   :  { %1031 = vmatpush1.bf16.msra.mxu0 %v9240_v32  ;;  %v10241_v32 = vld [vmem:[%s13570_s0 + $0x150] sm:$0xff]  }
  0x7f   :  { %1032 = vmatprep.subr.bf16.mxu0 %v13578_v0 }
  0x80   :  { %2810 = vmatpush1.bf16.msra.mxu1 %v9279_v46  ;;  %v10357_v46 = vld [vmem:[%s13570_s0 + $0x1b8] sm:$0xff]  }
  0x81   :  { %2811 = vmatprep.subr.bf16.mxu1 %v13578_v0 }
  0x82   :  { %1033 = vmatpush1.bf16.msra.mxu0 %v9242_v34  ;;  %7895 = vmatmul.mubr.bf16.gmra.mrb[12].mxu1 %v9976_v35  ;;  %v10268_v34 = vld [vmem:[%s13570_s0 + $0x168] sm:$0xff]  }
  0x83   :  { %1034 = vmatprep.subr.bf16.mxu0 %v13578_v0  ;;  %7898 = vmatprep.mubr.bf16.mxu1 %v9981_v36 }
  0x84   :  { %2812 = vmatpush1.bf16.msra.mxu1 %v9285_v52  ;;  %v9313_v52 = vld [vmem:[%s13570_s0 + $0x1d0] sm:$0xff]  }
  0x85   :  { %2813 = vmatprep.subr.bf16.mxu1 %v13578_v0 }
  0x86   :  { %1035 = vmatpush1.bf16.msra.mxu0 %v9244_v38  ;;  %v10299_v38 = vld [vmem:[%s13570_s0 + $0x188] sm:$0xff]  }
  0x87   :  { %1485 = vmatprep.subr.bf16.mxu0 %v13578_v0 }
  0x88   :  { %2814 = vmatpush1.bf16.msra.mxu1 %v9290_v54  ;;  %v10399_v54 = vld [vmem:[%s13570_s0 + $0xb8] sm:$0xff]  }
  0x89   :  { %1037 = vmatmul.mubr.bf16.vlgmr.msra.gmra.mrb[0].mxu0 %v9246_v39  ;;  %2815 = vmatprep.subr.bf16.mxu1 %v13578_v0  ;;  %v10310_v39 = vld [vmem:[%s13570_s0 + $0x80] sm:$0xff]  }
  0x8a   :  { %1486 = vmatpush1.bf16.msra.mxu0 %v9248_v40  ;;  %1044 = vmatprep.mubr.bf16.mxu0 %v9251_v42  ;;  %v10319_v40 = vld [vmem:[%s13570_s0 + $0x198] sm:$0xff]  }
  0x8b   :  { %7899 = vmatmul.mubr.bf16.gmra.mrb[16].mxu1 %v10001_v41  ;;  %1487 = vmatprep.subr.bf16.mxu0 %v13578_v0 }
  0x8c   :  { %7902 = vmatprep.mubr.bf16.mxu1 %v10014_v44  ;;  %2816 = vmatpush1.bf16.msra.mxu1 %v9296_v59  ;;  %v9318_v59 = vld [vmem:[%s13570_s0 + $0x1e8] sm:$0xff]  }
  0x8d   :  { %2817 = vmatprep.subr.bf16.mxu1 %v13578_v0 }
  0x8e   :  { %1488 = vmatpush1.bf16.msra.mxu0 %v9262_v45  ;;  %v10348_v45 = vld [vmem:[%s13570_s0 + $0x90] sm:$0xff]  }
  0x8f   :  { %1489 = vmatprep.subr.bf16.mxu0 %v13578_v0 }
  0x90   :  { %2818 = vmatpush1.bf16.msra.mxu1 %v9299_v61  ;;  %v10431_v61 = vld [vmem:[%s13570_s0 + $0xc8] sm:$0xff]  }
  0x91   :  { %1045 = vmatmul.mubr.bf16.gmra.mrb[4].mxu0 %v9252_v47  ;;  %2819 = vmatprep.subr.bf16.mxu1 %v13578_v0  ;;  %v10362_v47 = vld [vmem:[%s13570_s0 + $0x1c0] sm:$0xff]  }
  0x92   :  { %1052 = vmatprep.mubr.bf16.mxu0 %v9255_v49  ;;  %1490 = vmatpush1.bf16.msra.mxu0 %v9274_v50  ;;  %v10376_v50 = vld [vmem:[%s13570_s0 + $0xb0] sm:$0xff]  }
  0x93   :  { %7903 = vmatmul.mubr.bf16.gmra.mrb[20].mxu1 %v10032_v48  ;;  %1491 = vmatprep.subr.bf16.mxu0 %v13578_v0 }
  0x94   :  { %7906 = vmatprep.mubr.bf16.mxu1 %v10044_v51  ;;  %2820 = vmatpush1.bf16.msra.mxu1 %v9305_v2 }
  0x95   :  { %2821 = vmatprep.subr.bf16.mxu1 %v13578_v0 }
  0x96   :  { %1492 = vmatpush1.bf16.msra.mxu0 %v9284_v53  ;;  %v10393_v53 = vld [vmem:[%s13570_s0 + $0xa0] sm:$0xff]  }
  0x97   :  { %1493 = vmatprep.subr.bf16.mxu0 %v13578_v0 }
  0x98   :  { %2822 = vmatpush1.bf16.msra.mxu1 %v9310_v6  ;;  %v9504_v6 = vld [vmem:[%s13570_s0 + $0x10] sm:$0xff]  }
  0x99   :  { %1053 = vmatmul.mubr.bf16.gmra.mrb[8].mxu0 %v9907_v21  ;;  %2823 = vmatprep.subr.bf16.mxu1 %v13578_v0  ;;  %v10174_v21 = vld [vmem:[%s13570_s0 + $0x108] sm:$0xff]  }
  0x9a   :  { %1060 = vmatprep.mubr.bf16.mxu0 %v9259_v55  ;;  %1494 = vmatpush1.bf16.msra.mxu0 %v9294_v58  ;;  %v10418_v58 = vld [vmem:[%s13570_s0 + $0xc0] sm:$0xff]  }
  0x9b   :  { %7907 = vmatmul.mubr.bf16.gmra.mrb[24].mxu1 %v10066_v56  ;;  %1495 = vmatprep.subr.bf16.mxu0 %v13578_v0 }
  0x9c   :  { %7910 = vmatprep.mubr.bf16.mxu1 %v9260_v57  ;;  %2824 = vmatpush1.bf16.msra.mxu1 %v9316_v10  ;;  %v10412_v57 = vld [vmem:[%s13570_s0 + $0xa8] sm:$0xff]  }
  0x9d   :  { %2825 = vmatprep.subr.bf16.mxu1 %v13578_v0 }
  0x9e   :  { %1496 = vmatpush1.bf16.msra.mxu0 %v9304_v1  ;;  %v9321_v1 = vld [vmem:[%s13570_s0 + $0x1f8] sm:$0xff]  }
  0x9f   :  { %1497 = vmatprep.subr.bf16.mxu0 %v13578_v0 }
  0xa0   :  { %2826 = vmatpush1.bf16.msra.mxu1 %v9319_v14  ;;  %v9326_v14 = vld [vmem:[%s13571_s1 + $0x1c0] sm:$0xff]  }
  0xa1   :  { %1061 = vmatmul.mubr.bf16.gmra.mrb[12].mxu0 %v9251_v42  ;;  %2827 = vmatprep.subr.bf16.mxu1 %v13578_v0  ;;  %v10329_v42 = vld [vmem:[%s13570_s0 + $0x88] sm:$0xff]  }
  0xa2   :  { %1068 = vmatprep.mubr.bf16.mxu0 %v9264_v60  ;;  %1498 = vmatpush1.bf16.msra.mxu0 %v9314_v9 }
  0xa3   :  { %7911 = vmatmul.mubr.bf16.gmra.mrb[28].mxu1 %v9261_v62  ;;  %1499 = vmatprep.subr.bf16.mxu0 %v13578_v0  ;;  %v9331_v62 = vld [vmem:[%s13571_s1 + $0xd8] sm:$0xff]  }
  0xa4   :  { %7914 = vmatprep.mubr.bf16.mxu1 %v9265_v63  ;;  %2828 = vmatpush1.bf16.msra.mxu1 %v9322_v17 }
  0xa5   :  { %2829 = vmatprep.subr.bf16.mxu1 %v13578_v0 }
  0xa6   :  { %1500 = vmatpush1.bf16.msra.mxu0 %v9324_v23  ;;  %v9506_v23 = vld [vmem:[%s13570_s0 + $0x18] sm:$0xff]  }
  0xa7   :  { %1501 = vmatprep.subr.bf16.mxu0 %v13578_v0 }
  0xa8   :  { %2830 = vmatpush1.bf16.msra.mxu1 %v9323_v18  ;;  %v9505_v18 = vld [vmem:[%s13570_s0] sm:$0xff]  }
  0xa9   :  { %1069 = vmatmul.mubr.bf16.gmra.mrb[16].mxu0 %v9255_v49  ;;  %3280 = vmatprep.subr.bf16.mxu1 %v13578_v0  ;;  %v9329_v49 = vld [vmem:[%s13571_s1 + $0xd0] sm:$0xff]  }
  0xaa   :  { %1076 = vmatprep.mubr.bf16.mxu0 %v9267_v3 }
  0xab   :  { %7915 = vmatmul.mubr.bf16.gmra.mrb[32].mxu1 %v9266_v4 }
  0xac   :  { %7918 = vmatprep.mubr.bf16.mxu1 %v9268_v5  ;;  %v10453_v5 = vld [vmem:[%s13570_s0 + $0xd0] sm:$0xff]  }
  0xb1   :  { %1077 = vmatmul.mubr.bf16.gmra.mrb[20].mxu0 %v9259_v55  ;;  %v9315_v55 = vld [vmem:[%s13570_s0 + $0x1d8] sm:$0xff]  }
  0xb2   :  { %1084 = vmatprep.mubr.bf16.mxu0 %v9866_v11 }
  0xb3   :  { %7919 = vmatmul.mubr.bf16.gmra.mrb[36].mxu1 %v10119_v7 }
  0xb4   :  { %7922 = vmatprep.mubr.bf16.mxu1 %v9271_v8 }
  0xb9   :  { %1085 = vmatmul.mubr.bf16.gmra.mrb[24].mxu0 %v9264_v60  ;;  %v9320_v60 = vld [vmem:[%s13570_s0 + $0x1f0] sm:$0xff]  }
  0xba   :  { %1092 = vmatprep.mubr.bf16.mxu0 %v9896_v19 }
  0xbb   :  { %7923 = vmatmul.mubr.bf16.gmra.mrb[40].mxu1 %v10137_v12 }
  0xbc   :  { %7926 = vmatprep.mubr.bf16.mxu1 %v10143_v13 }
  0xc1   :  { %1093 = vmatmul.mubr.bf16.gmra.mrb[28].mxu0 %v9267_v3 }
  0xc2   :  { %1100 = vmatprep.mubr.bf16.mxu0 %v9902_v20 }
  0xc3   :  { %7927 = vmatmul.mubr.bf16.gmra.mrb[44].mxu1 %v10154_v15 }
  0xc4   :  { %7930 = vmatprep.mubr.bf16.mxu1 %v10160_v16 }
  0xc9   :  { %1101 = vmatmul.mubr.bf16.gmra.mrb[32].mxu0 %v9866_v11  ;;  %v10198_v11 = vld [vmem:[%s13570_s0 + $0x120] sm:$0xff]  }
  0xca   :  { %1108 = vmatprep.mubr.bf16.mxu0 %v9927_v25 }
  0xcb   :  { %7931 = vmatmul.mubr.bf16.gmra.mrb[48].mxu1 %v10174_v21 }
  0xcc   :  { %7934 = vmatprep.mubr.bf16.mxu1 %v10180_v22 }
  0xd1   :  { %1109 = vmatmul.mubr.bf16.gmra.mrb[36].mxu0 %v9896_v19  ;;  %v10222_v19 = vld [vmem:[%s13570_s0 + $0x138] sm:$0xff]  }
  0xd2   :  { %1116 = vmatprep.mubr.bf16.mxu0 %v9932_v26 }
  0xd3   :  { %7935 = vmatmul.mubr.bf16.gmra.mrb[52].mxu1 %v10193_v24 }
  0xd4   :  { %7938 = vmatprep.mubr.bf16.mxu1 %v10198_v11 }
  0xd9   :  { %1117 = vmatmul.mubr.bf16.gmra.mrb[40].mxu0 %v9902_v20  ;;  %v10236_v20 = vld [vmem:[%s13570_s0 + $0x148] sm:$0xff]  }
  0xda   :  { %1124 = vmatprep.mubr.bf16.mxu0 %v9952_v30 }
  0xdb   :  { %7939 = vmatmul.mubr.bf16.gmra.mrb[56].mxu1 %v10208_v27 }
  0xdc   :  { %7942 = vmatprep.mubr.bf16.mxu1 %v10213_v28 }
  0xe1   :  { %1125 = vmatmul.mubr.bf16.gmra.mrb[44].mxu0 %v9927_v25  ;;  %v9325_v25 = vld [vmem:[%s13571_s1 + $0xc0] sm:$0xff]  }
  0xe2   :  { %1132 = vmatprep.mubr.bf16.mxu0 %v9957_v31  ;;  %1502 = vmatpush1.bf16.msra.mxu0 %v9325_v25  ;;  %v9328_v25 = vld [vmem:[%s13571_s1 + $0x1c8] sm:$0xff]  }
  0xe3   :  { %7943 = vmatmul.mubr.bf16.gmra.mrb[60].mxu1 %v10222_v19  ;;  %1503 = vmatprep.subr.bf16.mxu0 %v13578_v0 }
  0xe4   :  { %7946 = vmatprep.mubr.bf16.mxu1 %v10227_v29 }
  0xe9   :  { %1133 = vmatmul.mubr.bf16.gmra.mrb[48].mxu0 %v9932_v26  ;;  %v10259_v26 = vld [vmem:[%s13570_s0 + $0x160] sm:$0xff]  }
  0xea   :  { %1140 = vmatprep.mubr.bf16.mxu0 %v9976_v35 }
  0xeb   :  { %7947 = vmatmul.mubr.bf16.gmra.mrb[64].mxu1 %v10236_v20 }
  0xec   :  { %7950 = vmatprep.mubr.bf16.mxu1 %v10241_v32 }
  0xf1   :  { %1141 = vmatmul.mubr.bf16.gmra.mrb[52].mxu0 %v9952_v30  ;;  %v10282_v30 = vld [vmem:[%s13570_s0 + $0x178] sm:$0xff]  }
  0xf2   :  { %1148 = vmatprep.mubr.bf16.mxu0 %v9981_v36  ;;  %v10287_v36 = vld [vmem:[%s13570_s0 + $0x180] sm:$0xff]  }
  0xf3   :  { %7951 = vmatmul.mubr.bf16.gmra.mrb[68].mxu1 %v10254_v33 }
  0xf4   :  { %7954 = vmatprep.mubr.bf16.mxu1 %v10259_v26 }
  0xf9   :  { %1149 = vmatmul.mubr.bf16.gmra.mrb[56].mxu0 %v9957_v31  ;;  %v9327_v31 = vld [vmem:[%s13571_s1 + $0xc8] sm:$0xff]  }
  0xfa   :  { %1156 = vmatprep.mubr.bf16.mxu0 %v10001_v41  ;;  %1504 = vmatpush1.bf16.msra.mxu0 %v9327_v31  ;;  %v10324_v41 = vld [vmem:[%s13570_s0 + $0x1a0] sm:$0xff]  }
  0xfb   :  { %7955 = vmatmul.mubr.bf16.gmra.mrb[72].mxu1 %v10268_v34  ;;  %1505 = vmatprep.subr.bf16.mxu0 %v13578_v0 }
  0xfc   :  { %7958 = vmatprep.mubr.bf16.mxu1 %v10273_v37 }
  0xfe   :  { %1506 = vmatpush1.bf16.msra.mxu0 %v9329_v49 }
  0xff   :  { %1507 = vmatprep.subr.bf16.mxu0 %v13578_v0 }
 0x101   :  { %1157 = vmatmul.mubr.bf16.gmra.mrb[60].mxu0 %v9976_v35  ;;  %v10304_v35 = vld [vmem:[%s13570_s0 + $0x190] sm:$0xff]  }
 0x102   :  { %1164 = vmatprep.mubr.bf16.mxu0 %v10014_v44  ;;  %v10343_v44 = vld [vmem:[%s13570_s0 + $0x1b0] sm:$0xff]   ;;  %1508 = vmatpush1.bf16.msra.mxu0 %v9331_v62  ;;  %v9332_v62 = vld [vmem:[%s13571_s1 + $0x1d8] sm:$0xff]  }
 0x103   :  { %7959 = vmatmul.mubr.bf16.gmra.mrb[76].mxu1 %v10282_v30  ;;  %1509 = vmatprep.subr.bf16.mxu0 %v13578_v0 }
 0x104   :  { %7962 = vmatprep.mubr.bf16.mxu1 %v10287_v36 }
 0x109   :  { %1165 = vmatmul.mubr.bf16.gmra.mrb[64].mxu0 %v10310_v39 }
 0x10a   :  { %1172 = vmatprep.mubr.bf16.mxu0 %v10032_v48  ;;  %v10367_v48 = vld [vmem:[%s13570_s0 + $0x98] sm:$0xff]  }
 0x10b   :  { %7963 = vmatmul.mubr.bf16.gmra.mrb[80].mxu1 %v10299_v38 }
 0x10c   :  { %7966 = vmatprep.mubr.bf16.mxu1 %v10304_v35 }
 0x111   :  { %1173 = vmatmul.mubr.bf16.gmra.mrb[68].mxu0 %v10329_v42 }
 0x112   :  { %1180 = vmatprep.mubr.bf16.mxu0 %v10044_v51  ;;  %v10385_v51 = vld [vmem:[%s13570_s0 + $0x1c8] sm:$0xff]  }
 0x113   :  { %7967 = vmatmul.mubr.bf16.gmra.mrb[84].mxu1 %v10319_v40 }
 0x114   :  { %7970 = vmatprep.mubr.bf16.mxu1 %v10324_v41 }
 0x119   :  { %1181 = vmatmul.mubr.bf16.gmra.mrb[72].mxu0 %v10348_v45 }
 0x11a   :  { %1188 = vmatprep.mubr.bf16.mxu0 %v10066_v56  ;;  %v9317_v56 = vld [vmem:[%s13570_s0 + $0x1e0] sm:$0xff]  }
 0x11b   :  { %7971 = vmatmul.mubr.bf16.gmra.mrb[88].mxu1 %v10338_v43 }
 0x11c   :  { %7974 = vmatprep.mubr.bf16.mxu1 %v10343_v44 }
 0x121   :  { %1189 = vmatmul.mubr.bf16.gmra.mrb[76].mxu0 %v10367_v48 }
 0x122   :  { %1196 = vmatprep.mubr.bf16.mxu0 %v10376_v50 }
 0x123   :  { %7975 = vmatmul.mubr.bf16.gmra.mrb[92].mxu1 %v10357_v46 }
 0x124   :  { %7978 = vmatprep.mubr.bf16.mxu1 %v10362_v47 }
 0x129   :  { %1197 = vmatmul.mubr.bf16.gmra.mrb[80].mxu0 %v10393_v53 }
 0x12a   :  { %1204 = vmatprep.mubr.bf16.mxu0 %v10399_v54 }
 0x12b   :  { %7979 = vmatmul.mubr.bf16.gmra.mrb[96].mxu1 %v10385_v51 }
 0x12c   :  { %7982 = vmatprep.mubr.bf16.mxu1 %v9313_v52  ;;  %v9330_v52 = vld [vmem:[%s13571_s1 + $0x1d0] sm:$0xff]  }
 0x131   :  { %1205 = vmatmul.mubr.bf16.gmra.mrb[84].mxu0 %v10412_v57 }
 0x132   :  { %1212 = vmatprep.mubr.bf16.mxu0 %v10418_v58 }
 0x133   :  { %7983 = vmatmul.mubr.bf16.gmra.mrb[100].mxu1 %v9315_v55 }
 0x134   :  { %7986 = vmatprep.mubr.bf16.mxu1 %v9317_v56  ;;  %v10498_v56 = vld [vmem:[%s13570_s0 + $0xe0] sm:$0xff]  }
 0x139   :  { %1213 = vmatmul.mubr.bf16.gmra.mrb[88].mxu0 %v10376_v50 }
 0x13a   :  { %1220 = vmatprep.mubr.bf16.mxu0 %v10431_v61 }
 0x13b   :  { %7987 = vmatmul.mubr.bf16.gmra.mrb[104].mxu1 %v9318_v59  ;;  %v9508_v59 = vld [vmem:[%s13570_s0 + $0x8] sm:$0xff]  }
 0x13c   :  { %7990 = vmatprep.mubr.bf16.mxu1 %v9320_v60  ;;  %v10507_v60 = vld [vmem:[%s13570_s0 + $0x20] sm:$0xff]  }
 0x13d   :  { %v10437_v63 = vpop.f32.mrb[0].mxu1 }
 0x13e   :  { %v10443_v2 = vpop.f32.mrb[1].mxu1 }
 0x13f   :  { %v10445_v3 = vpop.f32.mrb[2].mxu1 }
 0x140   :  { %v10448_v4 = vpop.f32.mrb[3].mxu1 }
 0x141   :  { %1221 = vmatmul.mubr.bf16.gmra.mrb[92].mxu0 %v10399_v54 }
 0x142   :  { %1228 = vmatprep.mubr.bf16.mxu0 %v10453_v5 }
 0x143   :  { %7991 = vmatmul.mubr.bf16.gmra.mrb[108].mxu1 %v9321_v1 }
 0x144   :  { %2831 = vmatprep.mubr.bf16.mxu1 %v9504_v6 }
 0x145   :  { %v10459_v8 = vpop.f32.mrb[4].mxu1 }
 0x146   :  { %13594 = vst [vmem:[#allocation12_spill] sm:$0xff] %v10459_v8  ;;  %v10461_v9 = vpop.f32.mrb[5].mxu1  ;;  %v10739_v8 = vld [vmem:[%s13570_s0 + $0x70] sm:$0xff]  }
 0x147   :  { %v10463_v10 = vpop.f32.mrb[6].mxu1 }
 0x148   :  { %13595 = vst [vmem:[#allocation13_spill] sm:$0xff] %v10463_v10  ;;  %v10469_v17 = vpop.f32.mrb[7].mxu1 }
 0x149   :  { %1229 = vmatmul.mubr.bf16.gmra.mrb[96].mxu0 %v10418_v58  ;;  %13596 = vst [vmem:[#allocation14_spill] sm:$0xff] %v10469_v17 }
 0x14a   :  { %1236 = vmatprep.mubr.bf16.mxu0 %v10119_v7 }
 0x14b   :  { %2832 = vmatmul.mubr.bf16.vlgmr.msra.gmra.mrb[112].mxu1 %v9505_v18 }
 0x14c   :  { %2839 = vmatprep.mubr.bf16.mxu1 %v9506_v23  ;;  %3281 = vmatpush1.bf16.msra.mxu1 %v9326_v14 }
 0x14d   :  { %3282 = vmatprep.subr.bf16.mxu1 %v13578_v0  ;;  %v10482_v31 = vpop.f32.mrb[8].mxu1 }
 0x14e   :  { %13597 = vst [vmem:[#allocation15_spill] sm:$0xff] %v10482_v31  ;;  %v10484_v7 = vpop.f32.mrb[9].mxu1 }
 0x14f   :  { %13598 = vst [vmem:[#allocation16_spill] sm:$0xff] %v10484_v7  ;;  %v10486_v49 = vpop.f32.mrb[10].mxu1  ;;  %v10712_v7 = vld [vmem:[%s13570_s0 + $0x110] sm:$0xff]  }
 0x150   :  { %13599 = vst [vmem:[#allocation17_spill] sm:$0xff] %v10486_v49  ;;  %3283 = vmatpush1.bf16.msra.mxu1 %v9328_v25  ;;  %v10492_v55 = vpop.f32.mrb[11].mxu1 }
 0x151   :  { %1237 = vmatmul.mubr.bf16.gmra.mrb[100].mxu0 %v10431_v61  ;;  %13600 = vst [vmem:[#allocation18_spill] sm:$0xff] %v10492_v55  ;;  %3284 = vmatprep.subr.bf16.mxu1 %v13578_v0  ;;  %v9337_v55 = vld [vmem:[%s13571_s1 + $0xf0] sm:$0xff]  }
 0x152   :  { %1244 = vmatprep.mubr.bf16.mxu0 %v10498_v56 }
 0x153   :  { %2840 = vmatmul.mubr.bf16.gmra.mrb[116].mxu1 %v9508_v59  ;;  %v9334_v59 = vld [vmem:[%s13571_s1 + $0x1e0] sm:$0xff]  }
 0x154   :  { %2847 = vmatprep.mubr.bf16.mxu1 %v10507_v60  ;;  %3285 = vmatpush1.bf16.msra.mxu1 %v9330_v52  ;;  %v9333_v52 = vld [vmem:[%s13571_s1 + $0xe0] sm:$0xff]  }
 0x155   :  { %3286 = vmatprep.subr.bf16.mxu1 %v13578_v0  ;;  %v10514_v1 = vpop.f32.mrb[12].mxu1  ;;  %1510 = vmatpush1.bf16.msra.mxu0 %v9333_v52  ;;  %v10548_v52 = vld [vmem:[%s13570_s0 + $0xd8] sm:$0xff]  }
 0x156   :  { %13601 = vst [vmem:[#allocation19_spill] sm:$0xff] %v10514_v1  ;;  %v10516_v14 = vpop.f32.mrb[13].mxu1  ;;  %1511 = vmatprep.subr.bf16.mxu0 %v13578_v0 }
 0x157   :  { %13602 = vst [vmem:[#allocation20_spill] sm:$0xff] %v10516_v14  ;;  %v10518_v18 = vpop.f32.mrb[14].mxu1 }
 0x158   :  { %13603 = vst [vmem:[#allocation21_spill] sm:$0xff] %v10518_v18  ;;  %3287 = vmatpush1.bf16.msra.mxu1 %v9332_v62  ;;  %v10521_v25 = vpop.f32.mrb[15].mxu1  ;;  %v10534_v62 = vld [vmem:[%s13570_s0 + $0x28] sm:$0xff]  }
 0x159   :  { %1245 = vmatmul.mubr.bf16.gmra.mrb[104].mxu0 %v10453_v5  ;;  %13604 = vst [vmem:[#allocation22_spill] sm:$0xff] %v10521_v25  ;;  %3288 = vmatprep.subr.bf16.mxu1 %v13578_v0  ;;  %v10616_v25 = vld [vmem:[%s13570_s0 + $0xf0] sm:$0xff]  }
 0x15a   :  { %1252 = vmatprep.mubr.bf16.mxu0 %v10137_v12 }
 0x15b   :  { %2848 = vmatmul.mubr.bf16.gmra.mrb[120].mxu1 %v9504_v6 }
 0x15c   :  { %2855 = vmatprep.mubr.bf16.mxu1 %v10534_v62  ;;  %3289 = vmatpush1.bf16.msra.mxu1 %v9334_v59  ;;  %v10557_v59 = vld [vmem:[%s13570_s0 + $0x30] sm:$0xff]  }
 0x15d   :  { %3290 = vmatprep.subr.bf16.mxu1 %v13578_v0 }
 0x15e   :  { %v10538_v18 = vpop.f32.mrb[16].mxu1 }
 0x15f   :  { %13605 = vst [vmem:[#allocation23_spill] sm:$0xff] %v10538_v18  ;;  %v10541_v12 = vpop.f32.mrb[17].mxu1 }
 0x160   :  { %13606 = vst [vmem:[#allocation24_spill] sm:$0xff] %v10541_v12  ;;  %v10543_v6 = vpop.f32.mrb[18].mxu1 }
 0x161   :  { %13607 = vst [vmem:[#allocation25_spill] sm:$0xff] %v10543_v6  ;;  %1253 = vmatmul.mubr.bf16.gmra.mrb[108].mxu0 %v10548_v52  ;;  %v10551_v1 = vpop.f32.mrb[19].mxu1 }
 0x162   :  { %13608 = vst [vmem:[#allocation26_spill] sm:$0xff] %v10551_v1  ;;  %1260 = vmatprep.mubr.bf16.mxu0 %v10143_v13  ;;  %v10574_v13 = vld [vmem:[%s13570_s0 + $0x38] sm:$0xff]  }
 0x163   :  { %2856 = vmatmul.mubr.bf16.gmra.mrb[124].mxu1 %v9506_v23 }
 0x164   :  { %2863 = vmatprep.mubr.bf16.mxu1 %v10557_v59 }
 0x166   :  { %v10560_v0 = vpop.f32.mrb[20].mxu1 }
 0x167   :  { %13609 = vst [vmem:[#allocation27_spill] sm:$0xff] %v10560_v0  ;;  %v10562_v6 = vpop.f32.mrb[21].mxu1 }
 0x168   :  { %13610 = vst [vmem:[#allocation28_spill] sm:$0xff] %v10562_v6  ;;  %v10564_v18 = vpop.f32.mrb[22].mxu1 }
 0x169   :  { %13611 = vst [vmem:[#allocation29_spill] sm:$0xff] %v10564_v18  ;;  %1261 = vmatmul.mubr.bf16.gmra.mrb[112].mxu0 %v10498_v56  ;;  %v10567_v12 = vpop.f32.mrb[23].mxu1 }
 0x16a   :  { %13612 = vst [vmem:[#allocation30_spill] sm:$0xff] %v10567_v12  ;;  %1268 = vmatprep.mubr.bf16.mxu0 %v10154_v15  ;;  %v10586_v12 = vld [vmem:[%s13570_s0 + $0xe8] sm:$0xff]  }
 0x16b   :  { %2864 = vmatmul.mubr.bf16.gmra.mrb[128].mxu1 %v10507_v60 }
 0x16c   :  { %2871 = vmatprep.mubr.bf16.mxu1 %v10574_v13 }
 0x16e   :  { %v10577_v23 = vpop.f32.mrb[24].mxu1 }
 0x16f   :  { %13613 = vst [vmem:[#allocation31_spill] sm:$0xff] %v10577_v23  ;;  %v10579_v0 = vpop.f32.mrb[25].mxu1  ;;  %v9335_v23 = vld [vmem:[%s13571_s1 + $0xe8] sm:$0xff]  }
 0x170   :  { %13614 = vst [vmem:[#allocation32_spill] sm:$0xff] %v10579_v0  ;;  %v10581_v18 = vpop.f32.mrb[26].mxu1  ;;  %v10602_v0 = vld [vmem:[%s13570_s0 + $0x40] sm:$0xff]   ;;  %1512 = vmatpush1.bf16.msra.mxu0 %v9335_v23 }
 0x171   :  { %13615 = vst [vmem:[#allocation33_spill] sm:$0xff] %v10581_v18  ;;  %1269 = vmatmul.mubr.bf16.gmra.mrb[116].mxu0 %v10586_v12  ;;  %v10589_v15 = vpop.f32.mrb[27].mxu1  ;;  %v9336_v18 = vld [vmem:[%s13571_s1 + $0x1e8] sm:$0xff]  }
 0x172   :  { %13616 = vst [vmem:[#allocation34_spill] sm:$0xff] %v10589_v15  ;;  %1276 = vmatprep.mubr.bf16.mxu0 %v10160_v16  ;;  %3291 = vmatpush1.bf16.msra.mxu1 %v9336_v18  ;;  %v13618_v15 = vmov 0   ;;  %v10626_v18 = vld [vmem:[%s13570_s0 + $0x48] sm:$0xff]  }
 0x173   :  { %2872 = vmatmul.mubr.bf16.gmra.mrb[132].mxu1 %v10534_v62  ;;  %1513 = vmatprep.subr.bf16.mxu0 %v13618_v15 }
 0x174   :  { %2879 = vmatprep.mubr.bf16.mxu1 %v10602_v0  ;;  %3292 = vmatprep.subr.bf16.mxu1 %v13618_v15 }
 0x175   :  { %1514 = vmatpush1.bf16.msra.mxu0 %v9337_v55 }
 0x176   :  { %v10605_v16 = vpop.f32.mrb[28].mxu1  ;;  %1515 = vmatprep.subr.bf16.mxu0 %v13618_v15 }
 0x177   :  { %13617 = vst [vmem:[#allocation35_spill] sm:$0xff] %v10605_v16  ;;  %v10609_v6 = vpop.f32.mrb[29].mxu1 }
 0x178   :  { %13619 = vst [vmem:[#allocation36_spill] sm:$0xff] %v10609_v6  ;;  %v10611_v1 = vpop.f32.mrb[30].mxu1 }
 0x179   :  { %13620 = vst [vmem:[#allocation37_spill] sm:$0xff] %v10611_v1  ;;  %1277 = vmatmul.mubr.bf16.gmra.mrb[120].mxu0 %v10616_v25  ;;  %v10619_v14 = vpop.f32.mrb[31].mxu1 }
 0x17a   :  { %13621 = vst [vmem:[#allocation38_spill] sm:$0xff] %v10619_v14  ;;  %1284 = vmatprep.mubr.bf16.mxu0 %v10174_v21  ;;  %v10638_v14 = vld [vmem:[%s13570_s0 + $0xf8] sm:$0xff]  }
 0x17b   :  { %2880 = vmatmul.mubr.bf16.gmra.mrb[136].mxu1 %v10557_v59 }
 0x17c   :  { %2887 = vmatprep.mubr.bf16.mxu1 %v10626_v18 }
 0x17e   :  { %v10629_v23 = vpop.f32.mrb[32].mxu1 }
 0x17f   :  { %13622 = vst [vmem:[#allocation39_spill] sm:$0xff] %v10629_v23  ;;  %v10631_v1 = vpop.f32.mrb[33].mxu1  ;;  %v10648_v23 = vld [vmem:[%s13570_s0 + $0x50] sm:$0xff]  }
 0x180   :  { %13623 = vst [vmem:[#allocation40_spill] sm:$0xff] %v10631_v1  ;;  %v10633_v16 = vpop.f32.mrb[34].mxu1 }
 0x181   :  { %13624 = vst [vmem:[#allocation41_spill] sm:$0xff] %v10633_v16  ;;  %1285 = vmatmul.mubr.bf16.gmra.mrb[124].mxu0 %v10638_v14  ;;  %v10641_v21 = vpop.f32.mrb[35].mxu1 }
 0x182   :  { %13625 = vst [vmem:[#allocation42_spill] sm:$0xff] %v10641_v21  ;;  %1292 = vmatprep.mubr.bf16.mxu0 %v10180_v22  ;;  %v10660_v21 = vld [vmem:[%s13570_s0 + $0x100] sm:$0xff]  }
 0x183   :  { %2888 = vmatmul.mubr.bf16.gmra.mrb[140].mxu1 %v10574_v13 }
 0x184   :  { %2895 = vmatprep.mubr.bf16.mxu1 %v10648_v23 }
 0x186   :  { %v10651_v16 = vpop.f32.mrb[36].mxu1 }
 0x187   :  { %13626 = vst [vmem:[#allocation43_spill] sm:$0xff] %v10651_v16  ;;  %v10653_v1 = vpop.f32.mrb[37].mxu1  ;;  %v10670_v16 = vld [vmem:[%s13570_s0 + $0x58] sm:$0xff]  }
 0x188   :  { %13627 = vst [vmem:[#allocation44_spill] sm:$0xff] %v10653_v1  ;;  %v10655_v6 = vpop.f32.mrb[38].mxu1 }
 0x189   :  { %13628 = vst [vmem:[#allocation45_spill] sm:$0xff] %v10655_v6  ;;  %1293 = vmatmul.mubr.bf16.gmra.mrb[128].mxu0 %v10660_v21  ;;  %v10663_v22 = vpop.f32.mrb[39].mxu1 }
 0x18a   :  { %13629 = vst [vmem:[#allocation46_spill] sm:$0xff] %v10663_v22  ;;  %1300 = vmatprep.mubr.bf16.mxu0 %v10193_v24  ;;  %v10682_v22 = vld [vmem:[%s13570_s0 + $0x108] sm:$0xff]  }
 0x18b   :  { %2896 = vmatmul.mubr.bf16.gmra.mrb[144].mxu1 %v10602_v0 }
 0x18c   :  { %2903 = vmatprep.mubr.bf16.mxu1 %v10670_v16 }
 0x18e   :  { %v10673_v6 = vpop.f32.mrb[40].mxu1 }
 0x18f   :  { %13630 = vst [vmem:[#allocation47_spill] sm:$0xff] %v10673_v6  ;;  %v10675_v1 = vpop.f32.mrb[41].mxu1  ;;  %v10698_v6 = vld [vmem:[%s13570_s0 + $0x60] sm:$0xff]  }
 0x190   :  { %13631 = vst [vmem:[#allocation48_spill] sm:$0xff] %v10675_v1  ;;  %v10677_v49 = vpop.f32.mrb[42].mxu1 }
 0x191   :  { %13632 = vst [vmem:[#allocation49_spill] sm:$0xff] %v10677_v49  ;;  %1301 = vmatmul.mubr.bf16.gmra.mrb[132].mxu0 %v10682_v22  ;;  %v10685_v31 = vpop.f32.mrb[43].mxu1  ;;  %v9338_v49 = vld [vmem:[%s13571_s1 + $0x1f0] sm:$0xff]  }
 0x192   :  { %13633 = vst [vmem:[#allocation50_spill] sm:$0xff] %v10685_v31  ;;  %1308 = vmatprep.mubr.bf16.mxu0 %v10198_v11  ;;  %3293 = vmatpush1.bf16.msra.mxu1 %v9338_v49  ;;  %v10722_v49 = vld [vmem:[%s13570_s0 + $0x68] sm:$0xff]  }
 0x193   :  { %2904 = vmatmul.mubr.bf16.gmra.mrb[148].mxu1 %v10626_v18  ;;  %3294 = vmatprep.subr.bf16.mxu1 %v13618_v15 }
 0x194   :  { %2911 = vmatprep.mubr.bf16.mxu1 %v10698_v6 }
 0x196   :  { %v10702_v31 = vpop.f32.mrb[44].mxu1 }
 0x197   :  { %13634 = vst [vmem:[#allocation51_spill] sm:$0xff] %v10702_v31  ;;  %v10705_v1 = vpop.f32.mrb[45].mxu1 }
 0x198   :  { %13635 = vst [vmem:[#allocation52_spill] sm:$0xff] %v10705_v1  ;;  %v10707_v55 = vpop.f32.mrb[46].mxu1 }
 0x199   :  { %13636 = vst [vmem:[#allocation53_spill] sm:$0xff] %v10707_v55  ;;  %1309 = vmatmul.mubr.bf16.gmra.mrb[136].mxu0 %v10712_v7  ;;  %v10715_v10 = vpop.f32.mrb[47].mxu1 }
 0x19a   :  { %13637 = vst [vmem:[#allocation54_spill] sm:$0xff] %v10715_v10  ;;  %1316 = vmatprep.mubr.bf16.mxu0 %v10208_v27 }
 0x19b   :  { %2912 = vmatmul.mubr.bf16.gmra.mrb[152].mxu1 %v10648_v23 }
 0x19c   :  { %2919 = vmatprep.mubr.bf16.mxu1 %v10722_v49 }
 0x19e   :  { %v10725_v55 = vpop.f32.mrb[48].mxu1 }
 0x19f   :  { %13638 = vst [vmem:[#allocation55_spill] sm:$0xff] %v10725_v55  ;;  %v10727_v31 = vpop.f32.mrb[49].mxu1 }
 0x1a0   :  { %13639 = vst [vmem:[#allocation56_spill] sm:$0xff] %v10727_v31  ;;  %v10729_v1 = vpop.f32.mrb[50].mxu1 }
 0x1a1   :  { %13640 = vst [vmem:[#allocation57_spill] sm:$0xff] %v10729_v1  ;;  %1317 = vmatmul.mubr.bf16.gmra.mrb[140].mxu0 %v10193_v24  ;;  %v10732_v10 = vpop.f32.mrb[51].mxu1 }
 0x1a2   :  { %13641 = vst [vmem:[#allocation58_spill] sm:$0xff] %v10732_v10  ;;  %1324 = vmatprep.mubr.bf16.mxu0 %v10213_v28  ;;  %v9339_v10 = vld [vmem:[%s13571_s1 + $0xf8] sm:$0xff]  }
 0x1a3   :  { %2920 = vmatmul.mubr.bf16.gmra.mrb[156].mxu1 %v10670_v16  ;;  %1516 = vmatpush1.bf16.msra.mxu0 %v9339_v10 }
 0x1a4   :  { %2927 = vmatprep.mubr.bf16.mxu1 %v10739_v8 }
 0x1a6   :  { %v10742_v55 = vpop.f32.mrb[52].mxu1 }
 0x1a7   :  { %13642 = vst [vmem:[#allocation59_spill] sm:$0xff] %v10742_v55  ;;  %v10744_v31 = vpop.f32.mrb[53].mxu1  ;;  %v9340_v55 = vld [vmem:[%s13571_s1 + $0x1f8] sm:$0xff]  }
 0x1a8   :  { %13643 = vst [vmem:[#allocation60_spill] sm:$0xff] %v10744_v31  ;;  %v10746_v1 = vpop.f32.mrb[54].mxu1  ;;  %3295 = vmatpush1.bf16.msra.mxu1 %v9340_v55 }
 0x1a9   :  { %13644 = vst [vmem:[#allocation61_spill] sm:$0xff] %v10746_v1  ;;  %1325 = vmatmul.mubr.bf16.gmra.mrb[144].mxu0 %v10198_v11  ;;  %v10749_v24 = vpop.f32.mrb[55].mxu1  ;;  %v10762_v1 = vld [vmem:[%s13570_s0 + $0x78] sm:$0xff]   ;;  %3296 = vmatprep.subr.bf16.mxu1 %v13618_v15 }
 0x1aa   :  { %13645 = vst [vmem:[#allocation62_spill] sm:$0xff] %v10749_v24  ;;  %1332 = vmatprep.mubr.bf16.mxu0 %v10222_v19 }
 0x1ab   :  { %2928 = vmatmul.mubr.bf16.gmra.mrb[160].mxu1 %v10698_v6 }
 0x1ac   :  { %2935 = vmatprep.mubr.bf16.mxu1 %v10762_v1 }
 0x1ae   :  { %v10765_v11 = vpop.f32.mrb[56].mxu1 }
 0x1af   :  { %13646 = vst [vmem:[#allocation63_spill] sm:$0xff] %v10765_v11  ;;  %v10768_v24 = vpop.f32.mrb[57].mxu1 }
 0x1b0   :  { %13647 = vst [vmem:[#allocation64_spill] sm:$0xff] %v10768_v24  ;;  %v10770_v31 = vpop.f32.mrb[58].mxu1 }
 0x1b1   :  { %13648 = vst [vmem:[#allocation65_spill] sm:$0xff] %v10770_v31  ;;  %1333 = vmatmul.mubr.bf16.gmra.mrb[148].mxu0 %v10208_v27  ;;  %v10773_v17 = vpop.f32.mrb[59].mxu1 }
 0x1b2   :  { %13649 = vst [vmem:[#allocation66_spill] sm:$0xff] %v10773_v17  ;;  %1340 = vmatprep.mubr.bf16.mxu0 %v10227_v29 }
 0x1b3   :  { %2936 = vmatmul.mubr.bf16.gmra.mrb[164].mxu1 %v10722_v49 }
 0x1b4   :  { %2943 = vmatprep.mubr.bf16.mxu1 %v10310_v39 }
 0x1b6   :  { %v10778_v10 = vpop.f32.mrb[60].mxu1 }
 0x1b7   :  { %13650 = vst [vmem:[#allocation67_spill] sm:$0xff] %v10778_v10  ;;  %v10780_v55 = vpop.f32.mrb[61].mxu1 }
 0x1b8   :  { %v10782_v11 = vpop.f32.mrb[62].mxu1 }
 0x1b9   :  { %13651 = vst [vmem:[#allocation68_spill] sm:$0xff] %v10782_v11  ;;  %1341 = vmatmul.mubr.bf16.gmra.mrb[152].mxu0 %v10213_v28  ;;  %v10785_v24 = vpop.f32.mrb[63].mxu1 }
 0x1ba   :  { %13652 = vst [vmem:[#allocation69_spill] sm:$0xff] %v10785_v24  ;;  %1348 = vmatprep.mubr.bf16.mxu0 %v10236_v20 }
 0x1bb   :  { %2944 = vmatmul.mubr.bf16.gmra.mrb[168].mxu1 %v10739_v8 }
 0x1bc   :  { %2951 = vmatprep.mubr.bf16.mxu1 %v10329_v42 }
 0x1be   :  { %v10790_v27 = vpop.f32.mrb[64].mxu1 }
 0x1bf   :  { %13653 = vst [vmem:[#allocation70_spill] sm:$0xff] %v10790_v27  ;;  %v10792_v31 = vpop.f32.mrb[65].mxu1 }
 0x1c0   :  { %v10794_v17 = vpop.f32.mrb[66].mxu1 }
 0x1c1   :  { %13654 = vst [vmem:[#allocation71_spill] sm:$0xff] %v10794_v17  ;;  %1349 = vmatmul.mubr.bf16.gmra.mrb[156].mxu0 %v10222_v19  ;;  %v10797_v10 = vpop.f32.mrb[67].mxu1  ;;  %v10814_v19 = vld [vmem:[%s13571_s1 + $0x240] sm:$0xff]  }
 0x1c2   :  { %1356 = vmatprep.mubr.bf16.mxu0 %v10241_v32  ;;  %7994 = vmatprep.subr.bf16.mxu0 %v10814_v19 }
 0x1c3   :  { %2952 = vmatmul.mubr.bf16.gmra.mrb[172].mxu1 %v10762_v1 }
 0x1c4   :  { %2959 = vmatprep.mubr.bf16.mxu1 %v10348_v45 }
 0x1c6   :  { %v10802_v28 = vpop.f32.mrb[68].mxu1 }
 0x1c7   :  { %13655 = vst [vmem:[#allocation72_spill] sm:$0xff] %v10802_v28  ;;  %v10804_v11 = vpop.f32.mrb[69].mxu1  ;;  %v9342_v28 = vld [vmem:[%s13571_s1 + $0x200] sm:$0xff]  }
 0x1c8   :  { %13656 = vst [vmem:[#allocation73_spill] sm:$0xff] %v10804_v11  ;;  %v10806_v24 = vpop.f32.mrb[70].mxu1  ;;  %3297 = vmatpush1.bf16.msra.mxu1 %v9342_v28 }
 0x1c9   :  { %13657 = vst [vmem:[#allocation74_spill] sm:$0xff] %v10806_v24  ;;  %1357 = vmatmul.mubr.bf16.gmra.mrb[160].mxu0 %v10227_v29  ;;  %v10809_v27 = vpop.f32.mrb[71].mxu1  ;;  %3298 = vmatprep.subr.bf16.mxu1 %v13618_v15 }
 0x1ca   :  { %13658 = vst [vmem:[#allocation75_spill] sm:$0xff] %v10809_v27  ;;  %1364 = vmatprep.mubr.bf16.mxu0 %v10254_v33 }
 0x1cb   :  { %2960 = vmatmul.mubr.bf16.gmra.mrb[176].mxu1 %v10310_v39 }
 0x1cc   :  { %2967 = vmatprep.mubr.bf16.mxu1 %v10367_v48 }
 0x1ce   :  { %v10823_v29 = vpop.f32.mrb[72].mxu1 }
 0x1cf   :  { %13659 = vst [vmem:[#allocation76_spill] sm:$0xff] %v10823_v29  ;;  %v10826_v24 = vpop.f32.mrb[73].mxu1 }
 0x1d0   :  { %13660 = vst [vmem:[#allocation77_spill] sm:$0xff] %v10826_v24  ;;  %v10828_v27 = vpop.f32.mrb[74].mxu1 }
 0x1d1   :  { %13661 = vst [vmem:[#allocation78_spill] sm:$0xff] %v10828_v27  ;;  %1365 = vmatmul.mubr.bf16.gmra.mrb[164].mxu0 %v10236_v20  ;;  %v10831_v11 = vpop.f32.mrb[75].mxu1 }
 0x1d2   :  { %13662 = vst [vmem:[#allocation79_spill] sm:$0xff] %v10831_v11  ;;  %1372 = vmatprep.mubr.bf16.mxu0 %v10259_v26 }
 0x1d3   :  { %2968 = vmatmul.mubr.bf16.gmra.mrb[180].mxu1 %v10329_v42 }
 0x1d4   :  { %2975 = vmatprep.mubr.bf16.mxu1 %v10393_v53 }
 0x1d6   :  { %v10836_v17 = vpop.f32.mrb[76].mxu1 }
 0x1d7   :  { %13663 = vst [vmem:[#allocation80_spill] sm:$0xff] %v10836_v17  ;;  %v10838_v28 = vpop.f32.mrb[77].mxu1 }
 0x1d8   :  { %v10840_v29 = vpop.f32.mrb[78].mxu1 }
 0x1d9   :  { %1373 = vmatmul.mubr.bf16.gmra.mrb[168].mxu0 %v10241_v32  ;;  %v10843_v24 = vpop.f32.mrb[79].mxu1  ;;  %v9343_v32 = vld [vmem:[%s13571_s1 + $0x208] sm:$0xff]  }
 0x1da   :  { %1380 = vmatprep.mubr.bf16.mxu0 %v10268_v34  ;;  %3299 = vmatpush1.bf16.msra.mxu1 %v9343_v32 }
 0x1db   :  { %2976 = vmatmul.mubr.bf16.gmra.mrb[184].mxu1 %v10348_v45  ;;  %3300 = vmatprep.subr.bf16.mxu1 %v13618_v15 }
 0x1dc   :  { %2983 = vmatprep.mubr.bf16.mxu1 %v10412_v57 }
 0x1de   :  { %v10848_v20 = vpop.f32.mrb[80].mxu1 }
 0x1df   :  { %13664 = vst [vmem:[#allocation81_spill] sm:$0xff] %v10848_v20  ;;  %v10850_v27 = vpop.f32.mrb[81].mxu1 }
 0x1e0   :  { %13665 = vst [vmem:[#allocation82_spill] sm:$0xff] %v10850_v27  ;;  %v10852_v11 = vpop.f32.mrb[82].mxu1 }
 0x1e1   :  { %13666 = vst [vmem:[#allocation83_spill] sm:$0xff] %v10852_v11  ;;  %1381 = vmatmul.mubr.bf16.gmra.mrb[172].mxu0 %v10254_v33  ;;  %v10855_v17 = vpop.f32.mrb[83].mxu1 }
 0x1e2   :  { %13667 = vst [vmem:[#allocation84_spill] sm:$0xff] %v10855_v17  ;;  %1388 = vmatprep.mubr.bf16.mxu0 %v10273_v37 }
 0x1e3   :  { %2984 = vmatmul.mubr.bf16.gmra.mrb[188].mxu1 %v10367_v48 }
 0x1e4   :  { %2991 = vmatprep.mubr.bf16.mxu1 %v10376_v50 }
 0x1e6   :  { %v10863_v20 = vpop.f32.mrb[84].mxu1 }
 0x1e7   :  { %13668 = vst [vmem:[#allocation85_spill] sm:$0xff] %v10863_v20  ;;  %v10866_v11 = vpop.f32.mrb[85].mxu1 }
 0x1e8   :  { %13669 = vst [vmem:[#allocation86_spill] sm:$0xff] %v10866_v11  ;;  %v10868_v33 = vpop.f32.mrb[86].mxu1 }
 0x1e9   :  { %13670 = vst [vmem:[#allocation87_spill] sm:$0xff] %v10868_v33  ;;  %1389 = vmatmul.mubr.bf16.gmra.mrb[176].mxu0 %v10259_v26  ;;  %v10871_v17 = vpop.f32.mrb[87].mxu1 }
 0x1ea   :  { %13671 = vst [vmem:[#allocation88_spill] sm:$0xff] %v10871_v17  ;;  %1396 = vmatprep.mubr.bf16.mxu0 %v10282_v30 }
 0x1eb   :  { %2992 = vmatmul.mubr.bf16.gmra.mrb[192].mxu1 %v10393_v53 }
 0x1ec   :  { %2999 = vmatprep.mubr.bf16.mxu1 %v10399_v54 }
 0x1ee   :  { %v10876_v27 = vpop.f32.mrb[88].mxu1 }
 0x1ef   :  { %13672 = vst [vmem:[#allocation89_spill] sm:$0xff] %v10876_v27  ;;  %v10878_v32 = vpop.f32.mrb[89].mxu1 }
 0x1f0   :  { %v10880_v20 = vpop.f32.mrb[90].mxu1 }
 0x1f1   :  { %13673 = vst [vmem:[#allocation90_spill] sm:$0xff] %v10880_v20  ;;  %1397 = vmatmul.mubr.bf16.gmra.mrb[180].mxu0 %v10268_v34  ;;  %v10883_v11 = vpop.f32.mrb[91].mxu1 }
 0x1f2   :  { %13674 = vst [vmem:[#allocation91_spill] sm:$0xff] %v10883_v11  ;;  %1404 = vmatprep.mubr.bf16.mxu0 %v10287_v36 }
 0x1f3   :  { %3000 = vmatmul.mubr.bf16.gmra.mrb[196].mxu1 %v10412_v57 }
 0x1f4   :  { %3007 = vmatprep.mubr.bf16.mxu1 %v10418_v58 }
 0x1f6   :  { %v10888_v26 = vpop.f32.mrb[92].mxu1 }
 0x1f7   :  { %13675 = vst [vmem:[#allocation92_spill] sm:$0xff] %v10888_v26  ;;  %v10890_v33 = vpop.f32.mrb[93].mxu1 }
 0x1f8   :  { %v10892_v17 = vpop.f32.mrb[94].mxu1 }
 0x1f9   :  { %13676 = vst [vmem:[#allocation93_spill] sm:$0xff] %v10892_v17  ;;  %1405 = vmatmul.mubr.bf16.gmra.mrb[184].mxu0 %v10273_v37  ;;  %v10895_v27 = vpop.f32.mrb[95].mxu1  ;;  %v9345_v37 = vld [vmem:[%s13571_s1 + $0x210] sm:$0xff]   ;;  %v9353_v17 = vld [vmem:[%s13571_s1 + $0x260] sm:$0xff]  }
 0x1fa   :  { %13677 = vst [vmem:[#allocation94_spill] sm:$0xff] %v10895_v27  ;;  %1412 = vmatprep.mubr.bf16.mxu0 %v10299_v38  ;;  %3301 = vmatpush1.bf16.msra.mxu1 %v9345_v37  ;;  %v11119_v27 = vld [vmem:[%s13570_s0 + $0x178] sm:$0xff]  }
 0x1fb   :  { %3008 = vmatmul.mubr.bf16.gmra.mrb[200].mxu1 %v10376_v50  ;;  %3302 = vmatprep.subr.bf16.mxu1 %v13618_v15 }
 0x1fc   :  { %3015 = vmatprep.mubr.bf16.mxu1 %v10431_v61 }
 0x1fe   :  { %v10900_v34 = vpop.f32.mrb[96].mxu1 }
 0x1ff   :  { %13678 = vst [vmem:[#allocation95_spill] sm:$0xff] %v10900_v34  ;;  %v10902_v20 = vpop.f32.mrb[97].mxu1 }
 0x200   :  { %13679 = vst [vmem:[#allocation96_spill] sm:$0xff] %v10902_v20  ;;  %v10904_v11 = vpop.f32.mrb[98].mxu1 }
 0x201   :  { %13680 = vst [vmem:[#allocation97_spill] sm:$0xff] %v10904_v11  ;;  %1413 = vmatmul.mubr.bf16.gmra.mrb[188].mxu0 %v10282_v30  ;;  %v10907_v26 = vpop.f32.mrb[99].mxu1 }
 0x202   :  { %13681 = vst [vmem:[#allocation98_spill] sm:$0xff] %v10907_v26  ;;  %1420 = vmatprep.mubr.bf16.mxu0 %v10304_v35 }
 0x203   :  { %3016 = vmatmul.mubr.bf16.gmra.mrb[204].mxu1 %v10399_v54 }
 0x204   :  { %3023 = vmatprep.mubr.bf16.mxu1 %v10453_v5 }
 0x206   :  { %v10915_v34 = vpop.f32.mrb[100].mxu1 }
 0x207   :  { %13682 = vst [vmem:[#allocation99_spill] sm:$0xff] %v10915_v34  ;;  %v10918_v11 = vpop.f32.mrb[101].mxu1 }
 0x208   :  { %13683 = vst [vmem:[#allocation100_spill] sm:$0xff] %v10918_v11  ;;  %v10920_v30 = vpop.f32.mrb[102].mxu1 }
 0x209   :  { %13684 = vst [vmem:[#allocation101_spill] sm:$0xff] %v10920_v30  ;;  %1421 = vmatmul.mubr.bf16.gmra.mrb[192].mxu0 %v10287_v36  ;;  %v10923_v26 = vpop.f32.mrb[103].mxu1 }
 0x20a   :  { %13685 = vst [vmem:[#allocation102_spill] sm:$0xff] %v10923_v26  ;;  %1428 = vmatprep.mubr.bf16.mxu0 %v10319_v40 }
 0x20b   :  { %3024 = vmatmul.mubr.bf16.gmra.mrb[208].mxu1 %v10418_v58 }
 0x20c   :  { %3031 = vmatprep.mubr.bf16.mxu1 %v10548_v52 }
 0x20e   :  { %v10928_v20 = vpop.f32.mrb[104].mxu1 }
 0x20f   :  { %13686 = vst [vmem:[#allocation103_spill] sm:$0xff] %v10928_v20  ;;  %v10930_v37 = vpop.f32.mrb[105].mxu1 }
 0x210   :  { %13687 = vst [vmem:[#allocation104_spill] sm:$0xff] %v10930_v37  ;;  %v10932_v34 = vpop.f32.mrb[106].mxu1  ;;  %v11107_v37 = vld [vmem:[%s13570_s0 + $0x170] sm:$0xff]  }
 0x211   :  { %13688 = vst [vmem:[#allocation105_spill] sm:$0xff] %v10932_v34  ;;  %1429 = vmatmul.mubr.bf16.gmra.mrb[196].mxu0 %v10299_v38  ;;  %v10935_v11 = vpop.f32.mrb[107].mxu1  ;;  %v9346_v38 = vld [vmem:[%s13571_s1 + $0x218] sm:$0xff]  }
 0x212   :  { %13689 = vst [vmem:[#allocation106_spill] sm:$0xff] %v10935_v11  ;;  %1436 = vmatprep.mubr.bf16.mxu0 %v10324_v41  ;;  %3303 = vmatpush1.bf16.msra.mxu1 %v9346_v38  ;;  %v10993_v38 = vld [vmem:[%s13570_s0 + $0x118] sm:$0xff]   ;;  %v11098_v11 = vld [vmem:[%s13570_s0 + $0x168] sm:$0xff]  }
 0x213   :  { %3032 = vmatmul.mubr.bf16.gmra.mrb[212].mxu1 %v10431_v61  ;;  %3304 = vmatprep.subr.bf16.mxu1 %v13618_v15  ;;  %v11080_v34 = vld [vmem:[%s13570_s0 + $0x158] sm:$0xff]  }
 0x214   :  { %3039 = vmatprep.mubr.bf16.mxu1 %v10498_v56 }
 0x216   :  { %v10940_v36 = vpop.f32.mrb[108].mxu1 }
 0x217   :  { %13690 = vst [vmem:[#allocation107_spill] sm:$0xff] %v10940_v36  ;;  %v10942_v30 = vpop.f32.mrb[109].mxu1  ;;  %v9351_v36 = vld [vmem:[%s13571_s1 + $0x230] sm:$0xff]  }
 0x218   :  { %13691 = vst [vmem:[#allocation108_spill] sm:$0xff] %v10942_v30  ;;  %v10944_v26 = vpop.f32.mrb[110].mxu1  ;;  %v11058_v30 = vld [vmem:[%s13570_s0 + $0x148] sm:$0xff]  }
 0x219   :  { %13692 = vst [vmem:[#allocation109_spill] sm:$0xff] %v10944_v26  ;;  %1437 = vmatmul.mubr.bf16.gmra.mrb[200].mxu0 %v10304_v35  ;;  %v10947_v20 = vpop.f32.mrb[111].mxu1  ;;  %v9348_v35 = vld [vmem:[%s13571_s1 + $0x220] sm:$0xff]   ;;  %v9350_v26 = vld [vmem:[%s13571_s1 + $0x258] sm:$0xff]  }
 0x21a   :  { %13693 = vst [vmem:[#allocation110_spill] sm:$0xff] %v10947_v20  ;;  %1444 = vmatprep.mubr.bf16.mxu0 %v10338_v43  ;;  %3305 = vmatpush1.bf16.msra.mxu1 %v9348_v35  ;;  %v11005_v35 = vld [vmem:[%s13570_s0 + $0x120] sm:$0xff]  }
 0x21b   :  { %3040 = vmatmul.mubr.bf16.gmra.mrb[216].mxu1 %v10453_v5  ;;  %3306 = vmatprep.subr.bf16.mxu1 %v13618_v15  ;;  %v11048_v20 = vld [vmem:[%s13570_s0 + $0x140] sm:$0xff]  }
 0x21c   :  { %3047 = vmatprep.mubr.bf16.mxu1 %v10586_v12 }
 0x221   :  { %1445 = vmatmul.mubr.bf16.gmra.mrb[204].mxu0 %v10319_v40  ;;  %v9344_v40 = vld [vmem:[%s13571_s1 + $0x248] sm:$0xff]  }
 0x222   :  { %1452 = vmatprep.mubr.bf16.mxu0 %v10343_v44 }
 0x223   :  { %3048 = vmatmul.mubr.bf16.gmra.mrb[220].mxu1 %v10548_v52 }
 0x224   :  { %3055 = vmatprep.mubr.bf16.mxu1 %v10616_v25 }
 0x229   :  { %1453 = vmatmul.mubr.bf16.gmra.mrb[208].mxu0 %v10324_v41  ;;  %v9347_v41 = vld [vmem:[%s13571_s1 + $0x250] sm:$0xff]  }
 0x22a   :  { %1460 = vmatprep.mubr.bf16.mxu0 %v10357_v46 }
 0x22b   :  { %3056 = vmatmul.mubr.bf16.gmra.mrb[224].mxu1 %v10498_v56 }
 0x22c   :  { %3063 = vmatprep.mubr.bf16.mxu1 %v10638_v14 }
 0x231   :  { %1461 = vmatmul.mubr.bf16.gmra.mrb[212].mxu0 %v10338_v43 }
 0x232   :  { %1468 = vmatprep.mubr.bf16.mxu0 %v10362_v47 }
 0x233   :  { %3064 = vmatmul.mubr.bf16.gmra.mrb[228].mxu1 %v10586_v12 }
 0x234   :  { %3071 = vmatprep.mubr.bf16.mxu1 %v10660_v21 }
 0x239   :  { %1469 = vmatmul.mubr.bf16.gmra.mrb[216].mxu0 %v10343_v44 }
 0x23a   :  { %1476 = vmatprep.mubr.bf16.mxu0 %v10385_v51 }
 0x23b   :  { %3072 = vmatmul.mubr.bf16.gmra.mrb[232].mxu1 %v10616_v25 }
 0x23c   :  { %3079 = vmatprep.mubr.bf16.mxu1 %v10682_v22 }
 0x241   :  { %1477 = vmatmul.mubr.bf16.gmra.mrb[220].mxu0 %v10357_v46 }
 0x242   :  { %1517 = vmatprep.mubr.bf16.mxu0 %v10557_v59 }
 0x243   :  { %3080 = vmatmul.mubr.bf16.gmra.mrb[236].mxu1 %v10638_v14 }
 0x244   :  { %3087 = vmatprep.mubr.bf16.mxu1 %v10712_v7 }
 0x249   :  { %1518 = vmatmul.mubr.bf16.vlgmr.msra.gmra.mrb[0].mxu0 %v10507_v60 }
 0x24a   :  { %7995 = vmatpush3.bf16.msra.mxu0 %v10814_v19  ;;  %1525 = vmatprep.mubr.bf16.mxu0 %v10574_v13  ;;  %v9349_v19 = vld [vmem:[%s13571_s1 + $0x228] sm:$0xff]  }
 0x24b   :  { %3088 = vmatmul.mubr.bf16.gmra.mrb[240].mxu1 %v10660_v21  ;;  %7996 = vmatprep.subr.bf16.mxu0 %v9344_v40 }
 0x24c   :  { %3095 = vmatprep.mubr.bf16.mxu1 %v10993_v38  ;;  %3307 = vmatpush1.bf16.msra.mxu1 %v9349_v19  ;;  %v11033_v19 = vld [vmem:[%s13570_s0 + $0x138] sm:$0xff]  }
 0x24d   :  { %3308 = vmatprep.subr.bf16.mxu1 %v13618_v15 }
 0x24e   :  { %7997 = vmatpush3.bf16.msra.mxu0 %v9344_v40  ;;  %v11015_v40 = vld [vmem:[%s13570_s0 + $0x128] sm:$0xff]  }
 0x24f   :  { %7998 = vmatprep.subr.bf16.mxu0 %v9347_v41 }
 0x250   :  { %3309 = vmatpush1.bf16.msra.mxu1 %v9351_v36  ;;  %v11070_v36 = vld [vmem:[%s13570_s0 + $0x150] sm:$0xff]  }
 0x251   :  { %1526 = vmatmul.mubr.bf16.gmra.mrb[4].mxu0 %v10534_v62  ;;  %3310 = vmatprep.subr.bf16.mxu1 %v13618_v15 }
 0x252   :  { %1533 = vmatprep.mubr.bf16.mxu0 %v10602_v0  ;;  %7999 = vmatpush3.bf16.msra.mxu0 %v9347_v41  ;;  %v11024_v41 = vld [vmem:[%s13570_s0 + $0x130] sm:$0xff]  }
 0x253   :  { %3096 = vmatmul.mubr.bf16.gmra.mrb[244].mxu1 %v10682_v22  ;;  %8000 = vmatprep.subr.bf16.mxu0 %v9350_v26 }
 0x254   :  { %3103 = vmatprep.mubr.bf16.mxu1 %v11005_v35 }
 0x256   :  { %8001 = vmatpush3.bf16.msra.mxu0 %v9350_v26  ;;  %v9352_v26 = vld [vmem:[%s13571_s1 + $0x238] sm:$0xff]  }
 0x257   :  { %3311 = vmatpush1.bf16.msra.mxu1 %v9352_v26  ;;  %v11089_v26 = vld [vmem:[%s13570_s0 + $0x160] sm:$0xff]   ;;  %8002 = vmatprep.subr.bf16.mxu0 %v9353_v17 }
 0x258   :  { %4955 = vmatprep.subr.bf16.mxu1 %v13618_v15 }
 0x259   :  { %1534 = vmatmul.mubr.bf16.gmra.mrb[8].mxu0 %v10557_v59 }
 0x25a   :  { %1541 = vmatprep.mubr.bf16.mxu0 %v10626_v18  ;;  %8003 = vmatpush3.bf16.msra.mxu0 %v9353_v17 }
 0x25b   :  { %3104 = vmatmul.mubr.bf16.gmra.mrb[248].mxu1 %v10712_v7 }
 0x25c   :  { %3111 = vmatprep.mubr.bf16.mxu1 %v11015_v40 }
 0x261   :  { %1542 = vmatmul.mubr.bf16.gmra.mrb[12].mxu0 %v10574_v13 }
 0x262   :  { %1549 = vmatprep.mubr.bf16.mxu0 %v10648_v23 }
 0x263   :  { %3112 = vmatmul.mubr.bf16.gmra.mrb[252].mxu1 %v10993_v38 }
 0x264   :  { %3119 = vmatprep.mubr.bf16.mxu1 %v11024_v41 }
 0x269   :  { %1550 = vmatmul.mubr.bf16.gmra.mrb[16].mxu0 %v10602_v0 }
 0x26a   :  { %1557 = vmatprep.mubr.bf16.mxu0 %v10670_v16 }
 0x26b   :  { %3120 = vmatmul.mubr.bf16.gmra.mrb[0].mxu1 %v11005_v35 }
 0x26c   :  { %3127 = vmatprep.mubr.bf16.mxu1 %v11033_v19 }
 0x271   :  { %1558 = vmatmul.mubr.bf16.gmra.mrb[20].mxu0 %v10626_v18 }
 0x272   :  { %1565 = vmatprep.mubr.bf16.mxu0 %v10698_v6 }
 0x273   :  { %3128 = vmatmul.mubr.bf16.gmra.mrb[4].mxu1 %v11015_v40 }
 0x274   :  { %3135 = vmatprep.mubr.bf16.mxu1 %v11048_v20 }
 0x279   :  { %1566 = vmatmul.mubr.bf16.gmra.mrb[24].mxu0 %v10648_v23 }
 0x27a   :  { %1573 = vmatprep.mubr.bf16.mxu0 %v10722_v49 }
 0x27b   :  { %3136 = vmatmul.mubr.bf16.gmra.mrb[8].mxu1 %v11024_v41 }
 0x27c   :  { %3143 = vmatprep.mubr.bf16.mxu1 %v11058_v30 }
 0x281   :  { %1574 = vmatmul.mubr.bf16.gmra.mrb[28].mxu0 %v10670_v16 }
 0x282   :  { %1581 = vmatprep.mubr.bf16.mxu0 %v10739_v8 }
 0x283   :  { %3144 = vmatmul.mubr.bf16.gmra.mrb[12].mxu1 %v11033_v19 }
 0x284   :  { %3151 = vmatprep.mubr.bf16.mxu1 %v11070_v36 }
 0x289   :  { %1582 = vmatmul.mubr.bf16.gmra.mrb[32].mxu0 %v10698_v6 }
 0x28a   :  { %1589 = vmatprep.mubr.bf16.mxu0 %v10762_v1 }
 0x28b   :  { %3152 = vmatmul.mubr.bf16.gmra.mrb[16].mxu1 %v11048_v20 }
 0x28c   :  { %3159 = vmatprep.mubr.bf16.mxu1 %v11080_v34 }
 0x291   :  { %1590 = vmatmul.mubr.bf16.gmra.mrb[36].mxu0 %v10722_v49 }
 0x292   :  { %1597 = vmatprep.mubr.bf16.mxu0 %v10310_v39 }
 0x293   :  { %3160 = vmatmul.mubr.bf16.gmra.mrb[20].mxu1 %v11058_v30 }
 0x294   :  { %3167 = vmatprep.mubr.bf16.mxu1 %v11089_v26 }
 0x299   :  { %1598 = vmatmul.mubr.bf16.gmra.mrb[40].mxu0 %v10739_v8 }
 0x29a   :  { %1605 = vmatprep.mubr.bf16.mxu0 %v10329_v42 }
 0x29b   :  { %3168 = vmatmul.mubr.bf16.gmra.mrb[24].mxu1 %v11070_v36 }
 0x29c   :  { %3175 = vmatprep.mubr.bf16.mxu1 %v11098_v11 }
 0x2a1   :  { %1606 = vmatmul.mubr.bf16.gmra.mrb[44].mxu0 %v10762_v1 }
 0x2a2   :  { %1613 = vmatprep.mubr.bf16.mxu0 %v10348_v45 }
 0x2a3   :  { %3176 = vmatmul.mubr.bf16.gmra.mrb[28].mxu1 %v11080_v34 }
 0x2a4   :  { %3183 = vmatprep.mubr.bf16.mxu1 %v11107_v37 }
 0x2a9   :  { %1614 = vmatmul.mubr.bf16.gmra.mrb[48].mxu0 %v10310_v39  ;;  %v11128_v39 = vld [vmem:[%s13570_s0 + $0x180] sm:$0xff]  }
 0x2aa   :  { %1621 = vmatprep.mubr.bf16.mxu0 %v10367_v48 }
 0x2ab   :  { %3184 = vmatmul.mubr.bf16.gmra.mrb[32].mxu1 %v11089_v26 }
 0x2ac   :  { %3191 = vmatprep.mubr.bf16.mxu1 %v11119_v27 }
 0x2b1   :  { %1622 = vmatmul.mubr.bf16.gmra.mrb[52].mxu0 %v10329_v42  ;;  %v11137_v42 = vld [vmem:[%s13570_s0 + $0x188] sm:$0xff]  }
 0x2b2   :  { %1629 = vmatprep.mubr.bf16.mxu0 %v10393_v53 }
 0x2b3   :  { %3192 = vmatmul.mubr.bf16.gmra.mrb[36].mxu1 %v11098_v11 }
 0x2b4   :  { %3199 = vmatprep.mubr.bf16.mxu1 %v11128_v39 }
 0x2b9   :  { %1630 = vmatmul.mubr.bf16.gmra.mrb[56].mxu0 %v10348_v45  ;;  %v11146_v45 = vld [vmem:[%s13570_s0 + $0x190] sm:$0xff]  }
 0x2ba   :  { %1637 = vmatprep.mubr.bf16.mxu0 %v10412_v57 }
 0x2bb   :  { %3200 = vmatmul.mubr.bf16.gmra.mrb[40].mxu1 %v11107_v37 }
 0x2bc   :  { %3207 = vmatprep.mubr.bf16.mxu1 %v11137_v42 }
 0x2c1   :  { %1638 = vmatmul.mubr.bf16.gmra.mrb[60].mxu0 %v10367_v48  ;;  %v11155_v48 = vld [vmem:[%s13570_s0 + $0x198] sm:$0xff]  }
 0x2c2   :  { %1645 = vmatprep.mubr.bf16.mxu0 %v10376_v50 }
 0x2c3   :  { %3208 = vmatmul.mubr.bf16.gmra.mrb[44].mxu1 %v11119_v27 }
 0x2c4   :  { %3215 = vmatprep.mubr.bf16.mxu1 %v11146_v45 }
 0x2c9   :  { %1646 = vmatmul.mubr.bf16.gmra.mrb[64].mxu0 %v10393_v53  ;;  %v11164_v53 = vld [vmem:[%s13570_s0 + $0x1a0] sm:$0xff]  }
 0x2ca   :  { %1653 = vmatprep.mubr.bf16.mxu0 %v10399_v54 }
 0x2cb   :  { %3216 = vmatmul.mubr.bf16.gmra.mrb[48].mxu1 %v11128_v39 }
 0x2cc   :  { %3223 = vmatprep.mubr.bf16.mxu1 %v11155_v48 }
 0x2d1   :  { %1654 = vmatmul.mubr.bf16.gmra.mrb[68].mxu0 %v10412_v57  ;;  %v9354_v57 = vld [vmem:[%s13571_s1 + $0x268] sm:$0xff]  }
 0x2d2   :  { %1661 = vmatprep.mubr.bf16.mxu0 %v10418_v58  ;;  %8004 = vmatprep.subr.bf16.mxu0 %v9354_v57 }
 0x2d3   :  { %3224 = vmatmul.mubr.bf16.gmra.mrb[52].mxu1 %v11137_v42  ;;  %8005 = vmatpush3.bf16.msra.mxu0 %v9354_v57 }
 0x2d4   :  { %3231 = vmatprep.mubr.bf16.mxu1 %v11164_v53 }
 0x2d9   :  { %1662 = vmatmul.mubr.bf16.gmra.mrb[72].mxu0 %v10376_v50 }
 0x2da   :  { %1669 = vmatprep.mubr.bf16.mxu0 %v10431_v61 }
 0x2db   :  { %3232 = vmatmul.mubr.bf16.gmra.mrb[56].mxu1 %v11146_v45 }
 0x2dc   :  { %3239 = vmatprep.mubr.bf16.mxu1 %v10338_v43 }
 0x2e1   :  { %1670 = vmatmul.mubr.bf16.gmra.mrb[76].mxu0 %v10399_v54 }
 0x2e2   :  { %1677 = vmatprep.mubr.bf16.mxu0 %v10453_v5 }
 0x2e3   :  { %3240 = vmatmul.mubr.bf16.gmra.mrb[60].mxu1 %v11155_v48 }
 0x2e4   :  { %3247 = vmatprep.mubr.bf16.mxu1 %v10343_v44 }
 0x2e9   :  { %1678 = vmatmul.mubr.bf16.gmra.mrb[80].mxu0 %v10418_v58 }
 0x2ea   :  { %1685 = vmatprep.mubr.bf16.mxu0 %v10548_v52 }
 0x2eb   :  { %3248 = vmatmul.mubr.bf16.gmra.mrb[64].mxu1 %v11164_v53 }
 0x2ec   :  { %3255 = vmatprep.mubr.bf16.mxu1 %v10357_v46 }
 0x2f1   :  { %1686 = vmatmul.mubr.bf16.gmra.mrb[84].mxu0 %v10431_v61 }
 0x2f2   :  { %1693 = vmatprep.mubr.bf16.mxu0 %v10498_v56 }
 0x2f3   :  { %3256 = vmatmul.mubr.bf16.gmra.mrb[68].mxu1 %v10338_v43  ;;  %v9355_v43 = vld [vmem:[%s13571_s1 + $0x270] sm:$0xff]  }
 0x2f4   :  { %3263 = vmatprep.mubr.bf16.mxu1 %v10362_v47  ;;  %8006 = vmatprep.subr.bf16.mxu0 %v9355_v43 }
 0x2f5   :  { %8007 = vmatpush3.bf16.msra.mxu0 %v9355_v43 }
 0x2f9   :  { %1694 = vmatmul.mubr.bf16.gmra.mrb[88].mxu0 %v10453_v5 }
 0x2fa   :  { %1701 = vmatprep.mubr.bf16.mxu0 %v10586_v12 }
 0x2fb   :  { %3264 = vmatmul.mubr.bf16.gmra.mrb[72].mxu1 %v10343_v44  ;;  %v11209_v44 = vld [vmem:[%s13576_s6] ss:$0 sm:$0xff] }
 0x2fc   :  { %3271 = vmatprep.mubr.bf16.mxu1 %v10385_v51 }
 0x301   :  { %1702 = vmatmul.mubr.bf16.gmra.mrb[92].mxu0 %v10548_v52 }
 0x302   :  { %1709 = vmatprep.mubr.bf16.mxu0 %v10616_v25 }
 0x303   :  { %3272 = vmatmul.mubr.bf16.gmra.mrb[76].mxu1 %v10357_v46 }
 0x304   :  { %3312 = vmatprep.mubr.bf16.mxu1 %v10557_v59 }
 0x309   :  { %1710 = vmatmul.mubr.bf16.gmra.mrb[96].mxu0 %v10498_v56 }
 0x30a   :  { %1717 = vmatprep.mubr.bf16.mxu0 %v10638_v14 }
 0x30b   :  { %3313 = vmatmul.mubr.bf16.vlgmr.msra.gmra.mrb[112].mxu1 %v10507_v60 }
 0x30c   :  { %3320 = vmatprep.mubr.bf16.mxu1 %v10574_v13 }
 0x311   :  { %1718 = vmatmul.mubr.bf16.gmra.mrb[100].mxu0 %v10586_v12 }
 0x312   :  { %1725 = vmatprep.mubr.bf16.mxu0 %v10660_v21 }
 0x313   :  { %3321 = vmatmul.mubr.bf16.gmra.mrb[116].mxu1 %v10534_v62 }
 0x314   :  { %3328 = vmatprep.mubr.bf16.mxu1 %v10602_v0 }
 0x319   :  { %1726 = vmatmul.mubr.bf16.gmra.mrb[104].mxu0 %v10616_v25 }
 0x31a   :  { %1733 = vmatprep.mubr.bf16.mxu0 %v10682_v22 }
 0x31b   :  { %3329 = vmatmul.mubr.bf16.gmra.mrb[120].mxu1 %v10557_v59 }
 0x31c   :  { %v1519_v46 = vpop.f32.mrb[0].mxu0  ;;  %3336 = vmatprep.mubr.bf16.mxu1 %v10626_v18 }
 0x31d   :  { %v8294_v47 = vadd.f32 %v11209_v44, %v1519_v46  ;;  %v1521_v50 = vpop.f32.mrb[1].mxu0 }
 0x31e   :  { %v1522_v51 = vpop.f32.mrb[2].mxu0 }
 0x31f   :  { %v8295_v54 = vadd.f32 %v11209_v44, %v1522_v51  ;;  %v1524_v58 = vpop.f32.mrb[3].mxu0  ;;  %v11217_v61 = vadd.f32 %v8294_v47, %v10443_v2 }
 0x321   :  { %1734 = vmatmul.mubr.bf16.gmra.mrb[108].mxu0 %v10638_v14  ;;  %v11221_v5 = vadd.f32 %v8295_v54, %v10448_v4  ;;  %v13697_v54 = vld [vmem:[#allocation12_spill] sm:$0xff] }
 0x322   :  { %1741 = vmatprep.mubr.bf16.mxu0 %v10712_v7 }
 0x323   :  { %3337 = vmatmul.mubr.bf16.gmra.mrb[124].mxu1 %v10574_v13 }
 0x324   :  { %v1527_v17 = vpop.f32.mrb[4].mxu0  ;;  %3344 = vmatprep.mubr.bf16.mxu1 %v10648_v23 }
 0x325   :  { %v8296_v56 = vadd.f32 %v11209_v44, %v1527_v17  ;;  %v1529_v60 = vpop.f32.mrb[5].mxu0 }
 0x326   :  { %v1530_v25 = vpop.f32.mrb[6].mxu0 }
 0x327   :  { %v8297_v62 = vadd.f32 %v11209_v44, %v1530_v25  ;;  %v1532_v2 = vpop.f32.mrb[7].mxu0  ;;  %v11229_v12 = vadd.f32 %v8296_v56, %v10437_v63  ;;  %v9356_v25 = vld [vmem:[#allocation2] sm:$0xff]  }
 0x328   :  { %4956 = vmatpush1.bf16.msra.mxu1 %v9356_v25  ;;  %v13709_v25 = vld [vmem:[#allocation20_spill] sm:$0xff] }
 0x329   :  { %1742 = vmatmul.mubr.bf16.gmra.mrb[112].mxu0 %v10660_v21  ;;  %v11233_v4 = vadd.f32 %v8297_v62, %v10445_v3  ;;  %v13695_v3 = vld [vmem:[#allocation14_spill] sm:$0xff]  ;;  %4957 = vmatprep.subr.bf16.mxu1 %v13618_v15 }
 0x32a   :  { %1749 = vmatprep.mubr.bf16.mxu0 %v10993_v38 }
 0x32b   :  { %3345 = vmatmul.mubr.bf16.gmra.mrb[128].mxu1 %v10602_v0 }
 0x32c   :  { %v1535_v14 = vpop.f32.mrb[8].mxu0  ;;  %3352 = vmatprep.mubr.bf16.mxu1 %v10670_v16 }
 0x32d   :  { %v8298_v52 = vadd.f32 %v11209_v44, %v1535_v14  ;;  %v1537_v59 = vpop.f32.mrb[9].mxu0 }
 0x32e   :  { %v1538_v13 = vpop.f32.mrb[10].mxu0 }
 0x32f   :  { %v8299_v57 = vadd.f32 %v11209_v44, %v1538_v13  ;;  %v1540_v63 = vpop.f32.mrb[11].mxu0  ;;  %v11241_v43 = vadd.f32 %v8298_v52, %v10461_v9 }
 0x331   :  { %13694 = vst [vmem:[#allocation111_spill] sm:$0xff] %v11241_v43  ;;  %1750 = vmatmul.mubr.bf16.gmra.mrb[116].mxu0 %v10682_v22  ;;  %v11245_v21 = vadd.f32 %v8299_v57, %v13695_v3  ;;  %v13699_v22 = vld [vmem:[#allocation13_spill] sm:$0xff] }
 0x332   :  { %1757 = vmatprep.mubr.bf16.mxu0 %v11005_v35  ;;  %v13799_v43 = vld [vmem:[#allocation61_spill] sm:$0xff] }
 0x333   :  { %13696 = vst [vmem:[#allocation14_spill] sm:$0xff] %v11245_v21  ;;  %3353 = vmatmul.mubr.bf16.gmra.mrb[132].mxu1 %v10626_v18  ;;  %v13793_v21 = vld [vmem:[#allocation62_spill] sm:$0xff] }
 0x334   :  { %v1543_v0 = vpop.f32.mrb[12].mxu0  ;;  %3360 = vmatprep.mubr.bf16.mxu1 %v10698_v6 }
 0x335   :  { %v8300_v46 = vadd.f32 %v11209_v44, %v1543_v0  ;;  %v1545_v47 = vpop.f32.mrb[13].mxu0 }
 0x336   :  { %v1546_v50 = vpop.f32.mrb[14].mxu0  ;;  %v13705_v47 = vld [vmem:[#allocation15_spill] sm:$0xff] }
 0x337   :  { %v8301_v51 = vadd.f32 %v11209_v44, %v1546_v50  ;;  %v1548_v9 = vpop.f32.mrb[15].mxu0  ;;  %v11253_v58 = vadd.f32 %v8300_v46, %v13697_v54 }
 0x339   :  { %13698 = vst [vmem:[#allocation12_spill] sm:$0xff] %v11253_v58  ;;  %1758 = vmatmul.mubr.bf16.gmra.mrb[120].mxu0 %v10712_v7  ;;  %v11257_v17 = vadd.f32 %v8301_v51, %v13699_v22  ;;  %v13701_v7 = vld [vmem:[#allocation16_spill] sm:$0xff]  ;;  %v13707_v51 = vld [vmem:[#allocation17_spill] sm:$0xff] }
 0x33a   :  { %1765 = vmatprep.mubr.bf16.mxu0 %v11015_v40 }
 0x33b   :  { %13700 = vst [vmem:[#allocation13_spill] sm:$0xff] %v11257_v17  ;;  %3361 = vmatmul.mubr.bf16.gmra.mrb[136].mxu1 %v10648_v23  ;;  %v13703_v23 = vld [vmem:[#allocation18_spill] sm:$0xff] }
 0x33c   :  { %v1551_v18 = vpop.f32.mrb[16].mxu0  ;;  %3368 = vmatprep.mubr.bf16.mxu1 %v10722_v49 }
 0x33d   :  { %v8302_v56 = vadd.f32 %v11209_v44, %v1551_v18  ;;  %v1553_v60 = vpop.f32.mrb[17].mxu0 }
 0x33e   :  { %v1554_v62 = vpop.f32.mrb[18].mxu0 }
 0x33f   :  { %v8303_v2 = vadd.f32 %v11209_v44, %v1554_v62  ;;  %v1556_v14 = vpop.f32.mrb[19].mxu0  ;;  %v11265_v52 = vadd.f32 %v8302_v56, %v13701_v7 }
 0x341   :  { %13702 = vst [vmem:[#allocation16_spill] sm:$0xff] %v11265_v52  ;;  %1766 = vmatmul.mubr.bf16.gmra.mrb[124].mxu0 %v10993_v38  ;;  %v11270_v59 = vadd.f32 %v8303_v2, %v13703_v23  ;;  %v9357_v2 = vld [vmem:[%s13571_s1 + $0x278] sm:$0xff]   ;;  %v11304_v23 = vld [vmem:[%s13570_s0 + $0x80] sm:$0xff]  }
 0x342   :  { %1773 = vmatprep.mubr.bf16.mxu0 %v11024_v41  ;;  %8008 = vmatprep.subr.bf16.mxu0 %v9357_v2 }
 0x343   :  { %13704 = vst [vmem:[#allocation18_spill] sm:$0xff] %v11270_v59  ;;  %3369 = vmatmul.mubr.bf16.gmra.mrb[140].mxu1 %v10670_v16  ;;  %8009 = vmatpush3.bf16.msra.mxu0 %v9357_v2 }
 0x344   :  { %v1559_v13 = vpop.f32.mrb[20].mxu0  ;;  %3376 = vmatprep.mubr.bf16.mxu1 %v10739_v8 }
 0x345   :  { %v8304_v57 = vadd.f32 %v11209_v44, %v1559_v13  ;;  %v1561_v63 = vpop.f32.mrb[21].mxu0 }
 0x346   :  { %v1562_v3 = vpop.f32.mrb[22].mxu0 }
 0x347   :  { %v8305_v0 = vadd.f32 %v11209_v44, %v1562_v3  ;;  %v1564_v46 = vpop.f32.mrb[23].mxu0  ;;  %v11278_v50 = vadd.f32 %v8304_v57, %v13705_v47  ;;  %v13713_v47 = vld [vmem:[#allocation19_spill] sm:$0xff] }
 0x348   :  { %v9358_v46 = vld [vmem:[#allocation2 + $0x8] sm:$0xff]  }
 0x349   :  { %13706 = vst [vmem:[#allocation15_spill] sm:$0xff] %v11278_v50  ;;  %1774 = vmatmul.mubr.bf16.gmra.mrb[128].mxu0 %v11005_v35  ;;  %v11282_v9 = vadd.f32 %v8305_v0, %v13707_v51  ;;  %4958 = vmatpush1.bf16.msra.mxu1 %v9358_v46  ;;  %v13715_v51 = vld [vmem:[#allocation21_spill] sm:$0xff] }
 0x34a   :  { %1781 = vmatprep.mubr.bf16.mxu0 %v11033_v19  ;;  %4959 = vmatprep.subr.bf16.mxu1 %v13618_v15 }
 0x34b   :  { %13708 = vst [vmem:[#allocation17_spill] sm:$0xff] %v11282_v9  ;;  %3377 = vmatmul.mubr.bf16.gmra.mrb[144].mxu1 %v10698_v6  ;;  %v13711_v6 = vld [vmem:[#allocation22_spill] sm:$0xff] }
 0x34c   :  { %v1567_v16 = vpop.f32.mrb[24].mxu0  ;;  %3384 = vmatprep.mubr.bf16.mxu1 %v10762_v1 }
 0x34d   :  { %v8306_v54 = vadd.f32 %v11209_v44, %v1567_v16  ;;  %v1569_v22 = vpop.f32.mrb[25].mxu0 }
 0x34e   :  { %v1570_v18 = vpop.f32.mrb[26].mxu0  ;;  %v11322_v22 = vld [vmem:[%s13570_s0 + $0x88] sm:$0xff]  }
 0x34f   :  { %v8307_v56 = vadd.f32 %v11209_v44, %v1570_v18  ;;  %v1572_v60 = vpop.f32.mrb[27].mxu0  ;;  %v11290_v62 = vadd.f32 %v8306_v54, %v13709_v25 }
 0x351   :  { %13710 = vst [vmem:[#allocation20_spill] sm:$0xff] %v11290_v62  ;;  %1782 = vmatmul.mubr.bf16.gmra.mrb[132].mxu0 %v11015_v40  ;;  %v11297_v14 = vadd.f32 %v8307_v56, %v13711_v6  ;;  %v13717_v6 = vld [vmem:[#allocation24_spill] sm:$0xff] }
 0x352   :  { %1789 = vmatprep.mubr.bf16.mxu0 %v11048_v20 }
 0x353   :  { %13712 = vst [vmem:[#allocation22_spill] sm:$0xff] %v11297_v14  ;;  %3385 = vmatmul.mubr.bf16.gmra.mrb[148].mxu1 %v10722_v49 }
 0x354   :  { %v1575_v7 = vpop.f32.mrb[28].mxu0  ;;  %3392 = vmatprep.mubr.bf16.mxu1 %v11304_v23 }
 0x355   :  { %v8308_v13 = vadd.f32 %v11209_v44, %v1575_v7  ;;  %v1577_v57 = vpop.f32.mrb[29].mxu0 }
 0x356   :  { %v1578_v63 = vpop.f32.mrb[30].mxu0 }
 0x357   :  { %v8309_v3 = vadd.f32 %v11209_v44, %v1578_v63  ;;  %v1580_v0 = vpop.f32.mrb[31].mxu0  ;;  %v11310_v49 = vadd.f32 %v8308_v13, %v13713_v47  ;;  %v11339_v63 = vld [vmem:[%s13570_s0 + $0x90] sm:$0xff]  }
 0x359   :  { %13714 = vst [vmem:[#allocation19_spill] sm:$0xff] %v11310_v49  ;;  %1790 = vmatmul.mubr.bf16.gmra.mrb[136].mxu0 %v11024_v41  ;;  %v11314_v16 = vadd.f32 %v8309_v3, %v13715_v51  ;;  %v13721_v51 = vld [vmem:[#allocation23_spill] sm:$0xff] }
 0x35a   :  { %1797 = vmatprep.mubr.bf16.mxu0 %v11058_v30 }
 0x35b   :  { %13716 = vst [vmem:[#allocation21_spill] sm:$0xff] %v11314_v16  ;;  %3393 = vmatmul.mubr.bf16.gmra.mrb[152].mxu1 %v10739_v8  ;;  %v13719_v8 = vld [vmem:[#allocation26_spill] sm:$0xff] }
 0x35c   :  { %v1583_v54 = vpop.f32.mrb[32].mxu0  ;;  %3400 = vmatprep.mubr.bf16.mxu1 %v11322_v22  ;;  %v13783_v16 = vld [vmem:[#allocation58_spill] sm:$0xff] }
 0x35d   :  { %v8310_v18 = vadd.f32 %v11209_v44, %v1583_v54  ;;  %v1585_v56 = vpop.f32.mrb[33].mxu0 }
 0x35e   :  { %v1586_v60 = vpop.f32.mrb[34].mxu0 }
 0x35f   :  { %v8311_v25 = vadd.f32 %v11209_v44, %v1586_v60  ;;  %v1588_v2 = vpop.f32.mrb[35].mxu0  ;;  %v11328_v7 = vadd.f32 %v8310_v18, %v13717_v6  ;;  %v11356_v60 = vld [vmem:[%s13570_s0 + $0x98] sm:$0xff]  }
 0x361   :  { %13718 = vst [vmem:[#allocation24_spill] sm:$0xff] %v11328_v7  ;;  %1798 = vmatmul.mubr.bf16.gmra.mrb[140].mxu0 %v11033_v19  ;;  %v11332_v13 = vadd.f32 %v8311_v25, %v13719_v8 }
 0x362   :  { %1805 = vmatprep.mubr.bf16.mxu0 %v11070_v36 }
 0x363   :  { %13720 = vst [vmem:[#allocation26_spill] sm:$0xff] %v11332_v13  ;;  %3401 = vmatmul.mubr.bf16.gmra.mrb[156].mxu1 %v10762_v1  ;;  %v13723_v1 = vld [vmem:[#allocation25_spill] sm:$0xff] }
 0x364   :  { %v1591_v57 = vpop.f32.mrb[36].mxu0  ;;  %3408 = vmatprep.mubr.bf16.mxu1 %v11339_v63 }
 0x365   :  { %v8312_v3 = vadd.f32 %v11209_v44, %v1591_v57  ;;  %v1593_v0 = vpop.f32.mrb[37].mxu0  ;;  %v13725_v57 = vld [vmem:[#allocation28_spill] sm:$0xff] }
 0x366   :  { %v1594_v46 = vpop.f32.mrb[38].mxu0  ;;  %v13727_v0 = vld [vmem:[#allocation30_spill] sm:$0xff] }
 0x367   :  { %v8313_v19 = vadd.f32 %v11209_v44, %v1594_v46  ;;  %v1596_v47 = vpop.f32.mrb[39].mxu0  ;;  %v11345_v54 = vadd.f32 %v8312_v3, %v13721_v51 }
 0x368   :  { %v11373_v47 = vld [vmem:[%s13570_s0 + $0xa0] sm:$0xff]  }
 0x369   :  { %13722 = vst [vmem:[#allocation23_spill] sm:$0xff] %v11345_v54  ;;  %1806 = vmatmul.mubr.bf16.gmra.mrb[144].mxu0 %v11048_v20  ;;  %v11349_v18 = vadd.f32 %v8313_v19, %v13723_v1 }
 0x36a   :  { %1813 = vmatprep.mubr.bf16.mxu0 %v11080_v34 }
 0x36b   :  { %13724 = vst [vmem:[#allocation25_spill] sm:$0xff] %v11349_v18  ;;  %3409 = vmatmul.mubr.bf16.gmra.mrb[160].mxu1 %v11304_v23  ;;  %v11616_v18 = vld [vmem:[%s13570_s0 + $0x1c8] sm:$0xff]  }
 0x36c   :  { %v1599_v56 = vpop.f32.mrb[40].mxu0  ;;  %3416 = vmatprep.mubr.bf16.mxu1 %v11356_v60 }
 0x36d   :  { %v8314_v25 = vadd.f32 %v11209_v44, %v1599_v56  ;;  %v1601_v2 = vpop.f32.mrb[41].mxu0  ;;  %v9359_v56 = vld [vmem:[#allocation2 + $0x10] sm:$0xff]  }
 0x36e   :  { %v1602_v6 = vpop.f32.mrb[42].mxu0  ;;  %4960 = vmatpush1.bf16.msra.mxu1 %v9359_v56 }
 0x36f   :  { %v8315_v20 = vadd.f32 %v11209_v44, %v1602_v6  ;;  %v1604_v8 = vpop.f32.mrb[43].mxu0  ;;  %v11362_v3 = vadd.f32 %v8314_v25, %v13725_v57  ;;  %v13729_v6 = vld [vmem:[#allocation27_spill] sm:$0xff]  ;;  %4961 = vmatprep.subr.bf16.mxu1 %v13618_v15 }
 0x370   :  { %v13731_v8 = vld [vmem:[#allocation29_spill] sm:$0xff] }
 0x371   :  { %13726 = vst [vmem:[#allocation28_spill] sm:$0xff] %v11362_v3  ;;  %1814 = vmatmul.mubr.bf16.gmra.mrb[148].mxu0 %v11058_v30  ;;  %v11366_v46 = vadd.f32 %v8315_v20, %v13727_v0 }
 0x372   :  { %1821 = vmatprep.mubr.bf16.mxu0 %v11089_v26 }
 0x373   :  { %13728 = vst [vmem:[#allocation30_spill] sm:$0xff] %v11366_v46  ;;  %3417 = vmatmul.mubr.bf16.gmra.mrb[164].mxu1 %v11322_v22 }
 0x374   :  { %v1607_v19 = vpop.f32.mrb[44].mxu0  ;;  %3424 = vmatprep.mubr.bf16.mxu1 %v11373_v47 }
 0x375   :  { %v8316_v51 = vadd.f32 %v11209_v44, %v1607_v19  ;;  %v1609_v1 = vpop.f32.mrb[45].mxu0  ;;  %v11391_v19 = vld [vmem:[%s13570_s0 + $0xa8] sm:$0xff]  }
 0x376   :  { %v1610_v30 = vpop.f32.mrb[46].mxu0 }
 0x377   :  { %v8317_v25 = vadd.f32 %v11209_v44, %v1610_v30  ;;  %v1612_v2 = vpop.f32.mrb[47].mxu0  ;;  %v11379_v20 = vadd.f32 %v8316_v51, %v13729_v6  ;;  %v13735_v6 = vld [vmem:[#allocation34_spill] sm:$0xff] }
 0x379   :  { %13730 = vst [vmem:[#allocation27_spill] sm:$0xff] %v11379_v20  ;;  %1822 = vmatmul.mubr.bf16.gmra.mrb[152].mxu0 %v11070_v36  ;;  %v11384_v57 = vadd.f32 %v8317_v25, %v13731_v8  ;;  %v13733_v25 = vld [vmem:[#allocation32_spill] sm:$0xff]  ;;  %v11571_v20 = vld [vmem:[%s13570_s0 + $0x1b8] sm:$0xff]  }
 0x37a   :  { %1829 = vmatprep.mubr.bf16.mxu0 %v11098_v11 }
 0x37b   :  { %13732 = vst [vmem:[#allocation29_spill] sm:$0xff] %v11384_v57  ;;  %3425 = vmatmul.mubr.bf16.gmra.mrb[168].mxu1 %v11339_v63 }
 0x37c   :  { %v1615_v0 = vpop.f32.mrb[48].mxu0  ;;  %3432 = vmatprep.mubr.bf16.mxu1 %v11391_v19 }
 0x37d   :  { %v8318_v51 = vadd.f32 %v11209_v44, %v1615_v0  ;;  %v1617_v1 = vpop.f32.mrb[49].mxu0  ;;  %v11408_v0 = vld [vmem:[%s13570_s0 + $0xb0] sm:$0xff]  }
 0x37e   :  { %v1618_v56 = vpop.f32.mrb[50].mxu0 }
 0x37f   :  { %v8319_v36 = vadd.f32 %v11209_v44, %v1618_v56  ;;  %v1620_v30 = vpop.f32.mrb[51].mxu0  ;;  %v11397_v2 = vadd.f32 %v8318_v51, %v13733_v25 }
 0x380   :  { %v13737_v30 = vld [vmem:[#allocation31_spill] sm:$0xff] }
 0x381   :  { %13734 = vst [vmem:[#allocation32_spill] sm:$0xff] %v11397_v2  ;;  %1830 = vmatmul.mubr.bf16.gmra.mrb[156].mxu0 %v11080_v34  ;;  %v11401_v8 = vadd.f32 %v8319_v36, %v13735_v6  ;;  %v13739_v6 = vld [vmem:[#allocation33_spill] sm:$0xff] }
 0x382   :  { %1837 = vmatprep.mubr.bf16.mxu0 %v11107_v37 }
 0x383   :  { %13736 = vst [vmem:[#allocation34_spill] sm:$0xff] %v11401_v8  ;;  %3433 = vmatmul.mubr.bf16.gmra.mrb[172].mxu1 %v11356_v60 }
 0x384   :  { %v1623_v46 = vpop.f32.mrb[52].mxu0  ;;  %3440 = vmatprep.mubr.bf16.mxu1 %v11408_v0 }
 0x385   :  { %v8320_v51 = vadd.f32 %v11209_v44, %v1623_v46  ;;  %v1625_v1 = vpop.f32.mrb[53].mxu0  ;;  %v11425_v46 = vld [vmem:[%s13570_s0 + $0xb8] sm:$0xff]  }
 0x386   :  { %v1626_v56 = vpop.f32.mrb[54].mxu0 }
 0x387   :  { %v8321_v34 = vadd.f32 %v11209_v44, %v1626_v56  ;;  %v1628_v36 = vpop.f32.mrb[55].mxu0  ;;  %v11414_v25 = vadd.f32 %v8320_v51, %v13737_v30 }
 0x388   :  { %v13741_v36 = vld [vmem:[#allocation36_spill] sm:$0xff] }
 0x389   :  { %13738 = vst [vmem:[#allocation31_spill] sm:$0xff] %v11414_v25  ;;  %1838 = vmatmul.mubr.bf16.gmra.mrb[160].mxu0 %v11089_v26  ;;  %v11418_v8 = vadd.f32 %v8321_v34, %v13739_v6  ;;  %v9360_v6 = vld [vmem:[#allocation2 + $0x18] sm:$0xff]  }
 0x38a   :  { %1845 = vmatprep.mubr.bf16.mxu0 %v11119_v27  ;;  %4962 = vmatpush1.bf16.msra.mxu1 %v9360_v6  ;;  %v11460_v6 = vld [vmem:[%s13570_s0 + $0xc8] sm:$0xff]  }
 0x38b   :  { %13740 = vst [vmem:[#allocation33_spill] sm:$0xff] %v11418_v8  ;;  %3441 = vmatmul.mubr.bf16.gmra.mrb[176].mxu1 %v11373_v47  ;;  %v13743_v8 = vld [vmem:[#allocation38_spill] sm:$0xff]  ;;  %4963 = vmatprep.subr.bf16.mxu1 %v13618_v15 }
 0x38c   :  { %v1631_v2 = vpop.f32.mrb[56].mxu0  ;;  %3448 = vmatprep.mubr.bf16.mxu1 %v11425_v46 }
 0x38d   :  { %v8322_v51 = vadd.f32 %v11209_v44, %v1631_v2  ;;  %v1633_v1 = vpop.f32.mrb[57].mxu0  ;;  %v11442_v2 = vld [vmem:[%s13570_s0 + $0xc0] sm:$0xff]  }
 0x38e   :  { %v1634_v56 = vpop.f32.mrb[58].mxu0 }
 0x38f   :  { %v8323_v26 = vadd.f32 %v11209_v44, %v1634_v56  ;;  %v1636_v34 = vpop.f32.mrb[59].mxu0  ;;  %v11431_v30 = vadd.f32 %v8322_v51, %v13741_v36  ;;  %v13747_v36 = vld [vmem:[#allocation37_spill] sm:$0xff] }
 0x391   :  { %13742 = vst [vmem:[#allocation36_spill] sm:$0xff] %v11431_v30  ;;  %1846 = vmatmul.mubr.bf16.gmra.mrb[164].mxu0 %v11098_v11  ;;  %v11435_v25 = vadd.f32 %v8323_v26, %v13743_v8  ;;  %v13745_v26 = vld [vmem:[#allocation35_spill] sm:$0xff] }
 0x392   :  { %1853 = vmatprep.mubr.bf16.mxu0 %v11128_v39 }
 0x393   :  { %13744 = vst [vmem:[#allocation38_spill] sm:$0xff] %v11435_v25  ;;  %3449 = vmatmul.mubr.bf16.gmra.mrb[180].mxu1 %v11391_v19 }
 0x394   :  { %v1639_v57 = vpop.f32.mrb[60].mxu0  ;;  %3456 = vmatprep.mubr.bf16.mxu1 %v11442_v2 }
 0x395   :  { %v8324_v51 = vadd.f32 %v11209_v44, %v1639_v57  ;;  %v1641_v11 = vpop.f32.mrb[61].mxu0 }
 0x396   :  { %v1642_v8 = vpop.f32.mrb[62].mxu0 }
 0x397   :  { %v8325_v1 = vadd.f32 %v11209_v44, %v1642_v8  ;;  %v1644_v56 = vpop.f32.mrb[63].mxu0  ;;  %v11449_v34 = vadd.f32 %v8324_v51, %v13745_v26 }
 0x398   :  { %v13749_v56 = vld [vmem:[#allocation40_spill] sm:$0xff] }
 0x399   :  { %13746 = vst [vmem:[#allocation35_spill] sm:$0xff] %v11449_v34  ;;  %1854 = vmatmul.mubr.bf16.gmra.mrb[168].mxu0 %v11107_v37  ;;  %v11453_v25 = vadd.f32 %v8325_v1, %v13747_v36  ;;  %v13751_v36 = vld [vmem:[#allocation42_spill] sm:$0xff] }
 0x39a   :  { %1861 = vmatprep.mubr.bf16.mxu0 %v11137_v42  ;;  %v11549_v34 = vld [vmem:[%s13570_s0 + $0x1b0] sm:$0xff]  }
 0x39b   :  { %13748 = vst [vmem:[#allocation37_spill] sm:$0xff] %v11453_v25  ;;  %3457 = vmatmul.mubr.bf16.gmra.mrb[184].mxu1 %v11408_v0 }
 0x39c   :  { %v1647_v57 = vpop.f32.mrb[64].mxu0  ;;  %3464 = vmatprep.mubr.bf16.mxu1 %v11460_v6 }
 0x39d   :  { %v8326_v51 = vadd.f32 %v11209_v44, %v1647_v57  ;;  %v1649_v11 = vpop.f32.mrb[65].mxu0  ;;  %v11477_v57 = vld [vmem:[%s13570_s0 + $0xd0] sm:$0xff]  }
 0x39e   :  { %v1650_v8 = vpop.f32.mrb[66].mxu0 }
 0x39f   :  { %v8327_v37 = vadd.f32 %v11209_v44, %v1650_v8  ;;  %v1652_v1 = vpop.f32.mrb[67].mxu0  ;;  %v11466_v26 = vadd.f32 %v8326_v51, %v13749_v56 }
 0x3a0   :  { %v13753_v1 = vld [vmem:[#allocation39_spill] sm:$0xff] }
 0x3a1   :  { %13750 = vst [vmem:[#allocation40_spill] sm:$0xff] %v11466_v26  ;;  %1862 = vmatmul.mubr.bf16.gmra.mrb[172].mxu0 %v11119_v27  ;;  %v11470_v25 = vadd.f32 %v8327_v37, %v13751_v36  ;;  %v13755_v36 = vld [vmem:[#allocation41_spill] sm:$0xff] }
 0x3a2   :  { %1869 = vmatprep.mubr.bf16.mxu0 %v11146_v45 }
 0x3a3   :  { %13752 = vst [vmem:[#allocation42_spill] sm:$0xff] %v11470_v25  ;;  %3465 = vmatmul.mubr.bf16.gmra.mrb[188].mxu1 %v11425_v46 }
 0x3a4   :  { %v1655_v30 = vpop.f32.mrb[68].mxu0  ;;  %3472 = vmatprep.mubr.bf16.mxu1 %v11477_v57 }
 0x3a5   :  { %v8328_v51 = vadd.f32 %v11209_v44, %v1655_v30  ;;  %v1657_v11 = vpop.f32.mrb[69].mxu0  ;;  %v11494_v30 = vld [vmem:[%s13570_s0 + $0xd8] sm:$0xff]  }
 0x3a6   :  { %v1658_v8 = vpop.f32.mrb[70].mxu0 }
 0x3a7   :  { %v8329_v27 = vadd.f32 %v11209_v44, %v1658_v8  ;;  %v1660_v37 = vpop.f32.mrb[71].mxu0  ;;  %v11483_v56 = vadd.f32 %v8328_v51, %v13753_v1  ;;  %v9361_v8 = vld [vmem:[#allocation2 + $0x20] sm:$0xff]  }
 0x3a8   :  { %4964 = vmatpush1.bf16.msra.mxu1 %v9361_v8  ;;  %v13757_v1 = vld [vmem:[#allocation44_spill] sm:$0xff] }
 0x3a9   :  { %13754 = vst [vmem:[#allocation39_spill] sm:$0xff] %v11483_v56  ;;  %1870 = vmatmul.mubr.bf16.gmra.mrb[176].mxu0 %v11128_v39  ;;  %v11487_v25 = vadd.f32 %v8329_v27, %v13755_v36  ;;  %4965 = vmatprep.subr.bf16.mxu1 %v13618_v15 }
 0x3aa   :  { %1877 = vmatprep.mubr.bf16.mxu0 %v11155_v48 }
 0x3ab   :  { %13756 = vst [vmem:[#allocation41_spill] sm:$0xff] %v11487_v25  ;;  %3473 = vmatmul.mubr.bf16.gmra.mrb[192].mxu1 %v11442_v2  ;;  %v13759_v25 = vld [vmem:[#allocation46_spill] sm:$0xff] }
 0x3ac   :  { %v1663_v26 = vpop.f32.mrb[72].mxu0  ;;  %3480 = vmatprep.mubr.bf16.mxu1 %v11494_v30 }
 0x3ad   :  { %v8330_v51 = vadd.f32 %v11209_v44, %v1663_v26  ;;  %v1665_v11 = vpop.f32.mrb[73].mxu0 }
 0x3ae   :  { %v1666_v39 = vpop.f32.mrb[74].mxu0  ;;  %v11512_v11 = vld [vmem:[%s13570_s0 + $0xe0] sm:$0xff]  }
 0x3af   :  { %v8331_v27 = vadd.f32 %v11209_v44, %v1666_v39  ;;  %v1668_v37 = vpop.f32.mrb[75].mxu0  ;;  %v11500_v36 = vadd.f32 %v8330_v51, %v13757_v1  ;;  %v13763_v1 = vld [vmem:[#allocation45_spill] sm:$0xff] }
 0x3b1   :  { %13758 = vst [vmem:[#allocation44_spill] sm:$0xff] %v11500_v36  ;;  %1878 = vmatmul.mubr.bf16.gmra.mrb[180].mxu0 %v11137_v42  ;;  %v11505_v56 = vadd.f32 %v8331_v27, %v13759_v25  ;;  %v13761_v27 = vld [vmem:[#allocation43_spill] sm:$0xff]  ;;  %v11527_v36 = vld [vmem:[%s13570_s0 + $0x1a8] sm:$0xff]  }
 0x3b2   :  { %1885 = vmatprep.mubr.bf16.mxu0 %v11164_v53 }
 0x3b3   :  { %13760 = vst [vmem:[#allocation46_spill] sm:$0xff] %v11505_v56  ;;  %3481 = vmatmul.mubr.bf16.gmra.mrb[196].mxu1 %v11460_v6 }
 0x3b4   :  { %v1671_v26 = vpop.f32.mrb[76].mxu0  ;;  %3488 = vmatprep.mubr.bf16.mxu1 %v11512_v11 }
 0x3b5   :  { %v8332_v51 = vadd.f32 %v11209_v44, %v1671_v26  ;;  %v1673_v8 = vpop.f32.mrb[77].mxu0 }
 0x3b6   :  { %v1674_v39 = vpop.f32.mrb[78].mxu0 }
 0x3b7   :  { %v8333_v42 = vadd.f32 %v11209_v44, %v1674_v39  ;;  %v1676_v25 = vpop.f32.mrb[79].mxu0  ;;  %v11518_v37 = vadd.f32 %v8332_v51, %v13761_v27  ;;  %v11534_v51 = vld [vmem:[%s13570_s0 + $0xe8] sm:$0xff]   ;;  %v13765_v27 = vld [vmem:[#allocation48_spill] sm:$0xff] }
 0x3b9   :  { %13762 = vst [vmem:[#allocation43_spill] sm:$0xff] %v11518_v37  ;;  %1886 = vmatmul.mubr.bf16.gmra.mrb[184].mxu0 %v11146_v45  ;;  %v11522_v56 = vadd.f32 %v8333_v42, %v13763_v1 }
 0x3ba   :  { %1893 = vmatprep.mubr.bf16.mxu0 %v11527_v36 }
 0x3bb   :  { %13764 = vst [vmem:[#allocation45_spill] sm:$0xff] %v11522_v56  ;;  %3489 = vmatmul.mubr.bf16.gmra.mrb[200].mxu1 %v11477_v57  ;;  %v13767_v56 = vld [vmem:[#allocation50_spill] sm:$0xff] }
 0x3bc   :  { %v1679_v26 = vpop.f32.mrb[80].mxu0  ;;  %3496 = vmatprep.mubr.bf16.mxu1 %v11534_v51 }
 0x3bd   :  { %v8334_v45 = vadd.f32 %v11209_v44, %v1679_v26  ;;  %v1681_v8 = vpop.f32.mrb[81].mxu0 }
 0x3be   :  { %v1682_v39 = vpop.f32.mrb[82].mxu0 }
 0x3bf   :  { %v8335_v42 = vadd.f32 %v11209_v44, %v1682_v39  ;;  %v1684_v25 = vpop.f32.mrb[83].mxu0  ;;  %v11540_v1 = vadd.f32 %v8334_v45, %v13765_v27  ;;  %v11556_v45 = vld [vmem:[%s13570_s0 + $0xf0] sm:$0xff]  }
 0x3c0   :  { %v13769_v25 = vld [vmem:[#allocation47_spill] sm:$0xff] }
 0x3c1   :  { %13766 = vst [vmem:[#allocation48_spill] sm:$0xff] %v11540_v1  ;;  %1894 = vmatmul.mubr.bf16.gmra.mrb[188].mxu0 %v11155_v48  ;;  %v11544_v37 = vadd.f32 %v8335_v42, %v13767_v56  ;;  %v13771_v1 = vld [vmem:[#allocation49_spill] sm:$0xff] }
 0x3c2   :  { %1901 = vmatprep.mubr.bf16.mxu0 %v11549_v34 }
 0x3c3   :  { %13768 = vst [vmem:[#allocation50_spill] sm:$0xff] %v11544_v37  ;;  %3497 = vmatmul.mubr.bf16.gmra.mrb[204].mxu1 %v11494_v30  ;;  %v9362_v37 = vld [vmem:[#allocation2 + $0x28] sm:$0xff]  }
 0x3c4   :  { %v1687_v26 = vpop.f32.mrb[84].mxu0  ;;  %3504 = vmatprep.mubr.bf16.mxu1 %v11556_v45  ;;  %4966 = vmatpush1.bf16.msra.mxu1 %v9362_v37  ;;  %v11594_v37 = vld [vmem:[%s13570_s0 + $0x1c0] sm:$0xff]  }
 0x3c5   :  { %v8336_v48 = vadd.f32 %v11209_v44, %v1687_v26  ;;  %v1689_v56 = vpop.f32.mrb[85].mxu0  ;;  %4967 = vmatprep.subr.bf16.mxu1 %v13618_v15 }
 0x3c6   :  { %v1690_v8 = vpop.f32.mrb[86].mxu0 }
 0x3c7   :  { %v8337_v39 = vadd.f32 %v11209_v44, %v1690_v8  ;;  %v1692_v42 = vpop.f32.mrb[87].mxu0  ;;  %v11562_v27 = vadd.f32 %v8336_v48, %v13769_v25  ;;  %v11578_v48 = vld [vmem:[%s13570_s0 + $0xf8] sm:$0xff]  }
 0x3c8   :  { %v13773_v42 = vld [vmem:[#allocation52_spill] sm:$0xff] }
 0x3c9   :  { %13770 = vst [vmem:[#allocation47_spill] sm:$0xff] %v11562_v27  ;;  %1902 = vmatmul.mubr.bf16.gmra.mrb[192].mxu0 %v11164_v53  ;;  %v11566_v3 = vadd.f32 %v8337_v39, %v13771_v1 }
 0x3ca   :  { %1909 = vmatprep.mubr.bf16.mxu0 %v11571_v20 }
 0x3cb   :  { %13772 = vst [vmem:[#allocation49_spill] sm:$0xff] %v11566_v3  ;;  %3505 = vmatmul.mubr.bf16.gmra.mrb[208].mxu1 %v11512_v11  ;;  %v13775_v3 = vld [vmem:[#allocation54_spill] sm:$0xff] }
 0x3cc   :  { %v1695_v26 = vpop.f32.mrb[88].mxu0  ;;  %3512 = vmatprep.mubr.bf16.mxu1 %v11578_v48 }
 0x3cd   :  { %v8338_v53 = vadd.f32 %v11209_v44, %v1695_v26  ;;  %v1697_v1 = vpop.f32.mrb[89].mxu0 }
 0x3ce   :  { %v1698_v56 = vpop.f32.mrb[90].mxu0 }
 0x3cf   :  { %v8339_v8 = vadd.f32 %v11209_v44, %v1698_v56  ;;  %v1700_v39 = vpop.f32.mrb[91].mxu0  ;;  %v11585_v25 = vadd.f32 %v8338_v53, %v13773_v42  ;;  %v11601_v53 = vld [vmem:[%s13570_s0 + $0x100] sm:$0xff]   ;;  %v13777_v42 = vld [vmem:[#allocation51_spill] sm:$0xff] }
 0x3d1   :  { %13774 = vst [vmem:[#allocation52_spill] sm:$0xff] %v11585_v25  ;;  %1910 = vmatmul.mubr.bf16.gmra.mrb[196].mxu0 %v11527_v36  ;;  %v11589_v27 = vadd.f32 %v8339_v8, %v13775_v3  ;;  %v13779_v25 = vld [vmem:[#allocation53_spill] sm:$0xff] }
 0x3d2   :  { %1917 = vmatprep.mubr.bf16.mxu0 %v11594_v37 }
 0x3d3   :  { %13776 = vst [vmem:[#allocation54_spill] sm:$0xff] %v11589_v27  ;;  %3513 = vmatmul.mubr.bf16.gmra.mrb[212].mxu1 %v11534_v51 }
 0x3d4   :  { %v1703_v26 = vpop.f32.mrb[92].mxu0  ;;  %3520 = vmatprep.mubr.bf16.mxu1 %v11601_v53 }
 0x3d5   :  { %v8340_v3 = vadd.f32 %v11209_v44, %v1703_v26  ;;  %v1705_v1 = vpop.f32.mrb[93].mxu0 }
 0x3d6   :  { %v1706_v56 = vpop.f32.mrb[94].mxu0 }
 0x3d7   :  { %v8341_v8 = vadd.f32 %v11209_v44, %v1706_v56  ;;  %v1708_v39 = vpop.f32.mrb[95].mxu0  ;;  %v11607_v27 = vadd.f32 %v8340_v3, %v13777_v42  ;;  %v11623_v3 = vld [vmem:[%s13570_s0 + $0x108] sm:$0xff]  }
 0x3d9   :  { %13778 = vst [vmem:[#allocation51_spill] sm:$0xff] %v11607_v27  ;;  %1918 = vmatmul.mubr.bf16.gmra.mrb[200].mxu0 %v11549_v34  ;;  %v11611_v13 = vadd.f32 %v8341_v8, %v13779_v25  ;;  %v13781_v27 = vld [vmem:[#allocation56_spill] sm:$0xff] }
 0x3da   :  { %1925 = vmatprep.mubr.bf16.mxu0 %v11616_v18 }
 0x3db   :  { %13780 = vst [vmem:[#allocation53_spill] sm:$0xff] %v11611_v13  ;;  %3521 = vmatmul.mubr.bf16.gmra.mrb[216].mxu1 %v11556_v45 }
 0x3dc   :  { %v1711_v26 = vpop.f32.mrb[96].mxu0  ;;  %3528 = vmatprep.mubr.bf16.mxu1 %v11623_v3 }
 0x3dd   :  { %v8342_v25 = vadd.f32 %v11209_v44, %v1711_v26  ;;  %v1713_v1 = vpop.f32.mrb[97].mxu0  ;;  %v11642_v26 = vld [vmem:[%s13570_s0 + $0x1d0] sm:$0xff]  }
 0x3de   :  { %v11627_v56 = vpop.f32.mrb[112].mxu1  ;;  %v1714_v8 = vpop.f32.mrb[98].mxu0 }
 0x3df   :  { %v8343_v39 = vadd.f32 %v11209_v44, %v1714_v8  ;;  %v3316_v42 = vpop.f32.mrb[113].mxu1  ;;  %v1716_v13 = vpop.f32.mrb[99].mxu0  ;;  %v11631_v7 = vadd.f32 %v8342_v25, %v13781_v27  ;;  %v11649_v27 = vld [vmem:[%s13570_s0 + $0x110] sm:$0xff]  }
 0x3e0   :  { %v11633_v54 = vpop.f32.mrb[114].mxu1  ;;  %v9363_v25 = vld [vmem:[#allocation2 + $0x30] sm:$0xff]  }
 0x3e1   :  { %13782 = vst [vmem:[#allocation56_spill] sm:$0xff] %v11631_v7  ;;  %v3319_v14 = vpop.f32.mrb[115].mxu1  ;;  %1926 = vmatmul.mubr.bf16.gmra.mrb[204].mxu0 %v11571_v20  ;;  %v11637_v62 = vadd.f32 %v8343_v39, %v13783_v16  ;;  %4968 = vmatpush1.bf16.msra.mxu1 %v9363_v25  ;;  %v13785_v7 = vld [vmem:[#allocation55_spill] sm:$0xff] }
 0x3e2   :  { %1933 = vmatprep.mubr.bf16.mxu0 %v11642_v26  ;;  %4969 = vmatprep.subr.bf16.mxu1 %v13618_v15 }
 0x3e3   :  { %13784 = vst [vmem:[#allocation58_spill] sm:$0xff] %v11637_v62  ;;  %3529 = vmatmul.mubr.bf16.gmra.mrb[220].mxu1 %v11578_v48 }
 0x3e4   :  { %v1719_v13 = vpop.f32.mrb[100].mxu0  ;;  %3536 = vmatprep.mubr.bf16.mxu1 %v11649_v27 }
 0x3e5   :  { %v8344_v14 = vadd.f32 %v11209_v44, %v1719_v13  ;;  %v1721_v16 = vpop.f32.mrb[101].mxu0  ;;  %v13787_v13 = vld [vmem:[#allocation57_spill] sm:$0xff] }
 0x3e6   :  { %v11653_v1 = vpop.f32.mrb[116].mxu1  ;;  %v1722_v8 = vpop.f32.mrb[102].mxu0 }
 0x3e7   :  { %v8345_v39 = vadd.f32 %v11209_v44, %v1722_v8  ;;  %v3324_v42 = vpop.f32.mrb[117].mxu1  ;;  %v1724_v62 = vpop.f32.mrb[103].mxu0  ;;  %v11657_v49 = vadd.f32 %v8344_v14, %v13785_v7  ;;  %v11669_v8 = vld [vmem:[%s13570_s0 + $0x1d8] sm:$0xff]  }
 0x3e8   :  { %v11659_v59 = vpop.f32.mrb[118].mxu1 }
 0x3e9   :  { %13786 = vst [vmem:[#allocation55_spill] sm:$0xff] %v11657_v49  ;;  %v3327_v9 = vpop.f32.mrb[119].mxu1  ;;  %1934 = vmatmul.mubr.bf16.gmra.mrb[208].mxu0 %v11594_v37  ;;  %v11664_v16 = vadd.f32 %v8345_v39, %v13787_v13 }
 0x3ea   :  { %1941 = vmatprep.mubr.bf16.mxu0 %v11669_v8 }
 0x3eb   :  { %13788 = vst [vmem:[#allocation57_spill] sm:$0xff] %v11664_v16  ;;  %3537 = vmatmul.mubr.bf16.gmra.mrb[224].mxu1 %v11601_v53  ;;  %v13790_v16 = vld [vmem:[#allocation60_spill] sm:$0xff] }
 0x3ec   :  { %v1727_v62 = vpop.f32.mrb[104].mxu0  ;;  %3544 = vmatprep.mubr.bf16.mxu1 %v10993_v38 }
 0x3ed   :  { %v8346_v7 = vadd.f32 %v11209_v44, %v1727_v62  ;;  %v1729_v9 = vpop.f32.mrb[105].mxu0  ;;  %v11690_v62 = vld [vmem:[%s13570_s0 + $0x1e0] sm:$0xff]  }
 0x3ee   :  { %v11675_v14 = vpop.f32.mrb[120].mxu1  ;;  %v1730_v25 = vpop.f32.mrb[106].mxu0 }
 0x3ef   :  { %13789 = vst [vmem:[#allocation112_spill] sm:$0xff] %v11675_v14  ;;  %v8347_v39 = vadd.f32 %v11209_v44, %v1730_v25  ;;  %v3332_v42 = vpop.f32.mrb[121].mxu1  ;;  %v1732_v13 = vpop.f32.mrb[107].mxu0  ;;  %v11679_v49 = vadd.f32 %v8346_v7, %v13790_v16  ;;  %v9584_v14 = vld [vmem:[%s13570_s0 + $0x68] sm:$0xff]  }
 0x3f0   :  { %v11681_v52 = vpop.f32.mrb[122].mxu1  ;;  %v13796_v13 = vld [vmem:[#allocation59_spill] sm:$0xff] }
 0x3f1   :  { %13791 = vst [vmem:[#allocation60_spill] sm:$0xff] %v11679_v49  ;;  %13792 = vst [vmem:[#allocation113_spill] sm:$0xff] %v11681_v52  ;;  %v3335_v50 = vpop.f32.mrb[123].mxu1  ;;  %1942 = vmatmul.mubr.bf16.gmra.mrb[212].mxu0 %v11616_v18  ;;  %v11685_v38 = vadd.f32 %v8347_v39, %v13793_v21  ;;  %v9364_v52 = vld [vmem:[#allocation2 + $0x38] sm:$0xff]  }
 0x3f2   :  { %1949 = vmatprep.mubr.bf16.mxu0 %v11690_v62  ;;  %4970 = vmatpush1.bf16.msra.mxu1 %v9364_v52  ;;  %v13811_v52 = vld [vmem:[#allocation65_spill] sm:$0xff] }
 0x3f3   :  { %13794 = vst [vmem:[#allocation62_spill] sm:$0xff] %v11685_v38  ;;  %3545 = vmatmul.mubr.bf16.gmra.mrb[228].mxu1 %v11623_v3  ;;  %4971 = vmatprep.subr.bf16.mxu1 %v13618_v15 }
 0x3f4   :  { %v1735_v9 = vpop.f32.mrb[108].mxu0  ;;  %3552 = vmatprep.mubr.bf16.mxu1 %v11005_v35 }
 0x3f5   :  { %v8348_v16 = vadd.f32 %v11209_v44, %v1735_v9  ;;  %v1737_v50 = vpop.f32.mrb[109].mxu0  ;;  %v11711_v9 = vld [vmem:[%s13570_s0 + $0x1e8] sm:$0xff]  }
 0x3f6   :  { %v11696_v7 = vpop.f32.mrb[124].mxu1  ;;  %v1738_v25 = vpop.f32.mrb[110].mxu0 }
 0x3f7   :  { %13795 = vst [vmem:[#allocation114_spill] sm:$0xff] %v11696_v7  ;;  %v8349_v21 = vadd.f32 %v11209_v44, %v1738_v25  ;;  %v3340_v39 = vpop.f32.mrb[125].mxu1  ;;  %v1740_v42 = vpop.f32.mrb[111].mxu0  ;;  %v11700_v38 = vadd.f32 %v8348_v16, %v13796_v13  ;;  %v13802_v13 = vld [vmem:[#allocation64_spill] sm:$0xff] }
 0x3f8   :  { %v11702_v49 = vpop.f32.mrb[126].mxu1 }
 0x3f9   :  { %13797 = vst [vmem:[#allocation59_spill] sm:$0xff] %v11700_v38  ;;  %13798 = vst [vmem:[#allocation115_spill] sm:$0xff] %v11702_v49  ;;  %v3343_v17 = vpop.f32.mrb[127].mxu1  ;;  %1950 = vmatmul.mubr.bf16.gmra.mrb[216].mxu0 %v11642_v26  ;;  %v11706_v35 = vadd.f32 %v8349_v21, %v13799_v43 }
 0x3fa   :  { %1957 = vmatprep.mubr.bf16.mxu0 %v11711_v9 }
 0x3fb   :  { %13800 = vst [vmem:[#allocation61_spill] sm:$0xff] %v11706_v35  ;;  %3553 = vmatmul.mubr.bf16.gmra.mrb[232].mxu1 %v11649_v27 }
 0x3fc   :  { %v1743_v50 = vpop.f32.mrb[112].mxu0  ;;  %3560 = vmatprep.mubr.bf16.mxu1 %v11015_v40  ;;  %v13805_v40 = vld [vmem:[#allocation66_spill] sm:$0xff] }
 0x3fd   :  { %v8350_v16 = vadd.f32 %v11209_v44, %v1743_v50  ;;  %v1745_v17 = vpop.f32.mrb[113].mxu0  ;;  %v9574_v50 = vld [vmem:[%s13570_s0 + $0x40] sm:$0xff]  }
 0x3fe   :  { %v11717_v25 = vpop.f32.mrb[128].mxu1  ;;  %v1746_v39 = vpop.f32.mrb[114].mxu0  ;;  %v11735_v17 = vld [vmem:[%s13570_s0 + $0x118] sm:$0xff]  }
 0x3ff   :  { %13801 = vst [vmem:[#allocation116_spill] sm:$0xff] %v11717_v25  ;;  %v8351_v43 = vadd.f32 %v11209_v44, %v1746_v39  ;;  %v3348_v21 = vpop.f32.mrb[129].mxu1  ;;  %v1748_v42 = vpop.f32.mrb[115].mxu0  ;;  %v11721_v35 = vadd.f32 %v8350_v16, %v13802_v13  ;;  %v9580_v25 = vld [vmem:[%s13570_s0 + $0x58] sm:$0xff]  }
 0x400   :  { %v11723_v38 = vpop.f32.mrb[130].mxu1 }
 0x401   :  { %13803 = vst [vmem:[#allocation64_spill] sm:$0xff] %v11721_v35  ;;  %13804 = vst [vmem:[#allocation117_spill] sm:$0xff] %v11723_v38  ;;  %v3351_v58 = vpop.f32.mrb[131].mxu1  ;;  %1958 = vmatmul.mubr.bf16.gmra.mrb[220].mxu0 %v11669_v8  ;;  %v11727_v49 = vadd.f32 %v8351_v43, %v13805_v40 }
 0x402   :  { %8010 = vmatprep.mubr.bf16.mxu0 %v9574_v50  ;;  %v13808_v50 = vld [vmem:[#allocation63_spill] sm:$0xff] }
 0x403   :  { %13806 = vst [vmem:[#allocation66_spill] sm:$0xff] %v11727_v49  ;;  %3561 = vmatmul.mubr.bf16.gmra.mrb[236].mxu1 %v11735_v17 }
 0x404   :  { %v1751_v16 = vpop.f32.mrb[116].mxu0  ;;  %3568 = vmatprep.mubr.bf16.mxu1 %v11024_v41  ;;  %v9576_v41 = vld [vmem:[%s13570_s0 + $0x48] sm:$0xff]  }
 0x405   :  { %v8352_v58 = vadd.f32 %v11209_v44, %v1751_v16  ;;  %v1753_v39 = vpop.f32.mrb[117].mxu0 }
 0x406   :  { %v11741_v43 = vpop.f32.mrb[132].mxu1  ;;  %v1754_v21 = vpop.f32.mrb[118].mxu0  ;;  %v9577_v39 = vld [vmem:[%s13570_s0 + $0x50] sm:$0xff]  }
 0x407   :  { %13807 = vst [vmem:[#allocation118_spill] sm:$0xff] %v11741_v43  ;;  %v8353_v42 = vadd.f32 %v11209_v44, %v1754_v21  ;;  %v3356_v13 = vpop.f32.mrb[133].mxu1  ;;  %v1756_v40 = vpop.f32.mrb[119].mxu0  ;;  %v11745_v49 = vadd.f32 %v8352_v58, %v13808_v50  ;;  %v11761_v58 = vld [vmem:[%s13570_s0 + $0x120] sm:$0xff]   ;;  %v11767_v21 = vld [vmem:[%s13570_s0 + $0x138] sm:$0xff]  }
 0x408   :  { %v11747_v35 = vpop.f32.mrb[134].mxu1 }
 0x409   :  { %13809 = vst [vmem:[#allocation63_spill] sm:$0xff] %v11745_v49  ;;  %13810 = vst [vmem:[#allocation119_spill] sm:$0xff] %v11747_v35  ;;  %v3359_v38 = vpop.f32.mrb[135].mxu1  ;;  %8011 = vmatmul.mubr.bf16.vlgmr.msra.gmra.mrb[224].mxu0 %v9576_v41  ;;  %v11753_v16 = vadd.f32 %v8353_v42, %v13811_v52 }
 0x40a   :  { %8014 = vmatprep.mubr.bf16.mxu0 %v9577_v39 }
 0x40b   :  { %13812 = vst [vmem:[#allocation65_spill] sm:$0xff] %v11753_v16  ;;  %3569 = vmatmul.mubr.bf16.gmra.mrb[240].mxu1 %v11761_v58 }
 0x40c   :  { %v1759_v38 = vpop.f32.mrb[120].mxu0  ;;  %3576 = vmatprep.mubr.bf16.mxu1 %v11767_v21 }
 0x40d   :  { %v8354_v42 = vadd.f32 %v11209_v44, %v1759_v38  ;;  %v1761_v13 = vpop.f32.mrb[121].mxu0  ;;  %v13816_v38 = vld [vmem:[#allocation69_spill] sm:$0xff] }
 0x40e   :  { %v11771_v40 = vpop.f32.mrb[136].mxu1  ;;  %v1762_v50 = vpop.f32.mrb[122].mxu0 }
 0x40f   :  { %13813 = vst [vmem:[#allocation120_spill] sm:$0xff] %v11771_v40  ;;  %v8355_v41 = vadd.f32 %v11209_v44, %v1762_v50  ;;  %v3364_v52 = vpop.f32.mrb[137].mxu1  ;;  %v1764_v39 = vpop.f32.mrb[123].mxu0  ;;  %v11775_v16 = vadd.f32 %v8354_v42, %v10780_v55  ;;  %v9581_v50 = vld [vmem:[%s13570_s0 + $0x60] sm:$0xff]   ;;  %v11791_v55 = vld [vmem:[%s13570_s0 + $0x128] sm:$0xff]  }
 0x410   :  { %v11777_v49 = vpop.f32.mrb[138].mxu1 }
 0x411   :  { %13814 = vst [vmem:[#allocation121_spill] sm:$0xff] %v11775_v16  ;;  %13815 = vst [vmem:[#allocation122_spill] sm:$0xff] %v11777_v49  ;;  %v3367_v35 = vpop.f32.mrb[139].mxu1  ;;  %8015 = vmatmul.mubr.bf16.gmra.mrb[228].mxu0 %v9580_v25  ;;  %v11783_v13 = vadd.f32 %v8355_v41, %v13816_v38  ;;  %v11797_v25 = vld [vmem:[%s13570_s0 + $0x140] sm:$0xff]   ;;  %v13819_v16 = vld [vmem:[#allocation67_spill] sm:$0xff] }
 0x412   :  { %8018 = vmatprep.mubr.bf16.mxu0 %v9581_v50 }
 0x413   :  { %13817 = vst [vmem:[#allocation69_spill] sm:$0xff] %v11783_v13  ;;  %3577 = vmatmul.mubr.bf16.gmra.mrb[244].mxu1 %v11791_v55 }
 0x414   :  { %v1767_v35 = vpop.f32.mrb[124].mxu0  ;;  %3584 = vmatprep.mubr.bf16.mxu1 %v11797_v25 }
 0x415   :  { %v8356_v42 = vadd.f32 %v11209_v44, %v1767_v35  ;;  %v1769_v41 = vpop.f32.mrb[125].mxu0  ;;  %v13822_v35 = vld [vmem:[#allocation68_spill] sm:$0xff] }
 0x416   :  { %v11801_v52 = vpop.f32.mrb[140].mxu1  ;;  %v1770_v39 = vpop.f32.mrb[126].mxu0 }
 0x417   :  { %13818 = vst [vmem:[#allocation123_spill] sm:$0xff] %v11801_v52  ;;  %v8357_v38 = vadd.f32 %v11209_v44, %v1770_v39  ;;  %v3372_v50 = vpop.f32.mrb[141].mxu1  ;;  %v1772_v13 = vpop.f32.mrb[127].mxu0  ;;  %v11805_v49 = vadd.f32 %v8356_v42, %v13819_v16  ;;  %v9585_v39 = vld [vmem:[%s13570_s0 + $0x70] sm:$0xff]  }
 0x418   :  { %v11807_v40 = vpop.f32.mrb[142].mxu1  ;;  %v11821_v16 = vld [vmem:[%s13570_s0 + $0x130] sm:$0xff]   ;;  %v9366_v50 = vld [vmem:[#allocation2 + $0x40] sm:$0xff]  }
 0x419   :  { %13820 = vst [vmem:[#allocation67_spill] sm:$0xff] %v11805_v49  ;;  %13821 = vst [vmem:[#allocation124_spill] sm:$0xff] %v11807_v40  ;;  %v3375_v43 = vpop.f32.mrb[143].mxu1  ;;  %8019 = vmatmul.mubr.bf16.gmra.mrb[232].mxu0 %v9584_v14  ;;  %v11813_v41 = vadd.f32 %v8357_v38, %v13822_v35  ;;  %v11827_v14 = vld [vmem:[%s13570_s0 + $0x148] sm:$0xff]   ;;  %4972 = vmatpush1.bf16.msra.mxu1 %v9366_v50 }
 0x41a   :  { %8022 = vmatprep.mubr.bf16.mxu0 %v9585_v39  ;;  %v9365_v43 = vld [vmem:[#allocation2 + $0x100] sm:$0xff]   ;;  %4973 = vmatprep.subr.bf16.mxu1 %v13618_v15 }
 0x41b   :  { %13823 = vst [vmem:[#allocation68_spill] sm:$0xff] %v11813_v41  ;;  %3585 = vmatmul.mubr.bf16.gmra.mrb[248].mxu1 %v11821_v16  ;;  %8122 = vmatprep.subr.bf16.mxu0 %v9365_v43 }
 0x41c   :  { %v1775_v13 = vpop.f32.mrb[128].mxu0  ;;  %3592 = vmatprep.mubr.bf16.mxu1 %v11827_v14  ;;  %8123 = vmatpush3.bf16.msra.mxu0 %v9365_v43 }
 0x41d   :  { %v8358_v42 = vadd.f32 %v11209_v44, %v1775_v13  ;;  %v1777_v38 = vpop.f32.mrb[129].mxu0 }
 0x41e   :  { %v11831_v35 = vpop.f32.mrb[144].mxu1  ;;  %v1778_v39 = vpop.f32.mrb[130].mxu0  ;;  %v9588_v38 = vld [vmem:[%s13570_s0 + $0x78] sm:$0xff]  }
 0x41f   :  { %13824 = vst [vmem:[#allocation125_spill] sm:$0xff] %v11831_v35  ;;  %v8359_v41 = vadd.f32 %v11209_v44, %v1778_v39  ;;  %v3380_v49 = vpop.f32.mrb[145].mxu1  ;;  %v1780_v40 = vpop.f32.mrb[131].mxu0  ;;  %v11835_v52 = vadd.f32 %v8358_v42, %v10792_v31  ;;  %v11851_v31 = vld [vmem:[%s13570_s0 + $0x150] sm:$0xff]  }
 0x420   :  { %v11837_v7 = vpop.f32.mrb[146].mxu1 }
 0x421   :  { %13825 = vst [vmem:[#allocation126_spill] sm:$0xff] %v11835_v52  ;;  %13826 = vst [vmem:[#allocation127_spill] sm:$0xff] %v11837_v7  ;;  %v3383_v13 = vpop.f32.mrb[147].mxu1  ;;  %8023 = vmatmul.mubr.bf16.gmra.mrb[236].mxu0 %v9588_v38  ;;  %v11844_v43 = vadd.f32 %v8359_v41, %v10797_v10  ;;  %v13831_v7 = vld [vmem:[#allocation71_spill] sm:$0xff] }
 0x422   :  { %8026 = vmatprep.mubr.bf16.mxu0 %v11304_v23  ;;  %v13828_v13 = vld [vmem:[#allocation70_spill] sm:$0xff] }
 0x423   :  { %13827 = vst [vmem:[#allocation128_spill] sm:$0xff] %v11844_v43  ;;  %3593 = vmatmul.mubr.bf16.gmra.mrb[252].mxu1 %v11767_v21 }
 0x424   :  { %v1783_v49 = vpop.f32.mrb[132].mxu0  ;;  %3600 = vmatprep.mubr.bf16.mxu1 %v11851_v31 }
 0x425   :  { %v8360_v40 = vadd.f32 %v11209_v44, %v1783_v49  ;;  %v1785_v42 = vpop.f32.mrb[133].mxu0 }
 0x426   :  { %v11855_v50 = vpop.f32.mrb[148].mxu1  ;;  %v1786_v39 = vpop.f32.mrb[134].mxu0  ;;  %v11872_v42 = vld [vmem:[%s13570_s0 + $0x158] sm:$0xff]  }
 0x427   :  { %v8361_v10 = vadd.f32 %v11209_v44, %v1786_v39  ;;  %v3388_v41 = vpop.f32.mrb[149].mxu1  ;;  %v1788_v23 = vpop.f32.mrb[135].mxu0  ;;  %v11859_v38 = vadd.f32 %v8360_v40, %v13828_v13 }
 0x428   :  { %v11861_v43 = vpop.f32.mrb[150].mxu1  ;;  %v13834_v41 = vld [vmem:[#allocation73_spill] sm:$0xff] }
 0x429   :  { %13829 = vst [vmem:[#allocation70_spill] sm:$0xff] %v11859_v38  ;;  %13830 = vst [vmem:[#allocation129_spill] sm:$0xff] %v11861_v43  ;;  %v3391_v52 = vpop.f32.mrb[151].mxu1  ;;  %8027 = vmatmul.mubr.bf16.gmra.mrb[240].mxu0 %v11322_v22  ;;  %v11865_v35 = vadd.f32 %v8361_v10, %v13831_v7  ;;  %v13837_v38 = vld [vmem:[#allocation75_spill] sm:$0xff] }
 0x42a   :  { %8030 = vmatprep.mubr.bf16.mxu0 %v11339_v63 }
 0x42b   :  { %13832 = vst [vmem:[#allocation71_spill] sm:$0xff] %v11865_v35  ;;  %3601 = vmatmul.mubr.bf16.gmra.mrb[0].mxu1 %v11797_v25 }
 0x42c   :  { %v1791_v49 = vpop.f32.mrb[136].mxu0  ;;  %3608 = vmatprep.mubr.bf16.mxu1 %v11872_v42 }
 0x42d   :  { %v8362_v40 = vadd.f32 %v11209_v44, %v1791_v49  ;;  %v1793_v52 = vpop.f32.mrb[137].mxu0 }
 0x42e   :  { %v11876_v39 = vpop.f32.mrb[152].mxu1  ;;  %v1794_v22 = vpop.f32.mrb[138].mxu0  ;;  %v11893_v52 = vld [vmem:[%s13570_s0 + $0x160] sm:$0xff]  }
 0x42f   :  { %13833 = vst [vmem:[#allocation130_spill] sm:$0xff] %v11876_v39  ;;  %v8363_v7 = vadd.f32 %v11209_v44, %v1794_v22  ;;  %v3396_v10 = vpop.f32.mrb[153].mxu1  ;;  %v1796_v63 = vpop.f32.mrb[139].mxu0  ;;  %v11880_v23 = vadd.f32 %v8362_v40, %v13834_v41  ;;  %v13841_v39 = vld [vmem:[#allocation74_spill] sm:$0xff] }
 0x430   :  { %v11882_v13 = vpop.f32.mrb[154].mxu1  ;;  %v13839_v10 = vld [vmem:[#allocation72_spill] sm:$0xff] }
 0x431   :  { %13835 = vst [vmem:[#allocation73_spill] sm:$0xff] %v11880_v23  ;;  %13836 = vst [vmem:[#allocation131_spill] sm:$0xff] %v11882_v13  ;;  %v3399_v35 = vpop.f32.mrb[155].mxu1  ;;  %8031 = vmatmul.mubr.bf16.gmra.mrb[244].mxu0 %v11356_v60  ;;  %v11886_v43 = vadd.f32 %v8363_v7, %v13837_v38  ;;  %v9367_v23 = vld [vmem:[#allocation2 + $0x108] sm:$0xff]  }
 0x432   :  { %8034 = vmatprep.mubr.bf16.mxu0 %v11373_v47  ;;  %v9368_v13 = vld [vmem:[#allocation2 + $0x48] sm:$0xff]   ;;  %8124 = vmatprep.subr.bf16.mxu0 %v9367_v23 }
 0x433   :  { %13838 = vst [vmem:[#allocation75_spill] sm:$0xff] %v11886_v43  ;;  %3609 = vmatmul.mubr.bf16.gmra.mrb[4].mxu1 %v11827_v14  ;;  %8125 = vmatpush3.bf16.msra.mxu0 %v9367_v23 }
 0x434   :  { %v1799_v49 = vpop.f32.mrb[140].mxu0  ;;  %3616 = vmatprep.mubr.bf16.mxu1 %v11893_v52  ;;  %4974 = vmatpush1.bf16.msra.mxu1 %v9368_v13 }
 0x435   :  { %v8364_v40 = vadd.f32 %v11209_v44, %v1799_v49  ;;  %v1801_v35 = vpop.f32.mrb[141].mxu0  ;;  %4975 = vmatprep.subr.bf16.mxu1 %v13618_v15 }
 0x436   :  { %v11897_v22 = vpop.f32.mrb[156].mxu1  ;;  %v1802_v60 = vpop.f32.mrb[142].mxu0 }
 0x437   :  { %v8365_v38 = vadd.f32 %v11209_v44, %v1802_v60  ;;  %v3404_v7 = vpop.f32.mrb[157].mxu1  ;;  %v1804_v47 = vpop.f32.mrb[143].mxu0  ;;  %v11901_v63 = vadd.f32 %v8364_v40, %v13839_v10  ;;  %v11914_v40 = vld [vmem:[%s13570_s0 + $0x168] sm:$0xff]  }
 0x438   :  { %v11903_v41 = vpop.f32.mrb[158].mxu1  ;;  %v13843_v47 = vld [vmem:[#allocation77_spill] sm:$0xff] }
 0x439   :  { %13840 = vst [vmem:[#allocation72_spill] sm:$0xff] %v11901_v63  ;;  %v3407_v43 = vpop.f32.mrb[159].mxu1  ;;  %8035 = vmatmul.mubr.bf16.gmra.mrb[248].mxu0 %v11391_v19  ;;  %v11907_v49 = vadd.f32 %v8365_v38, %v13841_v39  ;;  %v11920_v19 = vld [vmem:[%s13576_s6] ss:$0 sm:$0xff]  ;;  %v13850_v63 = vld [vmem:[#allocation78_spill] sm:$0xff] }
 0x43a   :  { %8038 = vmatprep.mubr.bf16.mxu0 %v11408_v0 }
 0x43b   :  { %13842 = vst [vmem:[#allocation74_spill] sm:$0xff] %v11907_v49  ;;  %3617 = vmatmul.mubr.bf16.gmra.mrb[8].mxu1 %v11851_v31 }
 0x43c   :  { %v1807_v44 = vpop.f32.mrb[144].mxu0  ;;  %3624 = vmatprep.mubr.bf16.mxu1 %v11914_v40 }
 0x43d   :  { %v8366_v43 = vadd.f32 %v11920_v19, %v1807_v44  ;;  %v1809_v0 = vpop.f32.mrb[145].mxu0  ;;  %v13846_v44 = vld [vmem:[#allocation79_spill] sm:$0xff] }
 0x43e   :  { %v11924_v39 = vpop.f32.mrb[160].mxu1  ;;  %v1810_v35 = vpop.f32.mrb[146].mxu0 }
 0x43f   :  { %v8367_v60 = vadd.f32 %v11920_v19, %v1810_v35  ;;  %v3412_v38 = vpop.f32.mrb[161].mxu1  ;;  %v1812_v7 = vpop.f32.mrb[147].mxu0  ;;  %v11928_v13 = vadd.f32 %v8366_v43, %v13843_v47  ;;  %v11941_v35 = vld [vmem:[%s13570_s0 + $0x170] sm:$0xff]   ;;  %v13848_v47 = vld [vmem:[#allocation76_spill] sm:$0xff] }
 0x440   :  { %v11930_v10 = vpop.f32.mrb[162].mxu1 }
 0x441   :  { %13844 = vst [vmem:[#allocation77_spill] sm:$0xff] %v11928_v13  ;;  %13845 = vst [vmem:[#allocation132_spill] sm:$0xff] %v11930_v10  ;;  %v3415_v49 = vpop.f32.mrb[163].mxu1  ;;  %8039 = vmatmul.mubr.bf16.gmra.mrb[252].mxu0 %v11425_v46  ;;  %v11934_v0 = vadd.f32 %v8367_v60, %v13846_v44 }
 0x442   :  { %8042 = vmatprep.mubr.bf16.mxu0 %v11442_v2 }
 0x443   :  { %13847 = vst [vmem:[#allocation79_spill] sm:$0xff] %v11934_v0  ;;  %3625 = vmatmul.mubr.bf16.gmra.mrb[12].mxu1 %v11872_v42 }
 0x444   :  { %v1815_v23 = vpop.f32.mrb[148].mxu0  ;;  %3632 = vmatprep.mubr.bf16.mxu1 %v11941_v35 }
 0x445   :  { %v8368_v43 = vadd.f32 %v11920_v19, %v1815_v23  ;;  %v1817_v49 = vpop.f32.mrb[149].mxu0 }
 0x446   :  { %v11945_v38 = vpop.f32.mrb[164].mxu1  ;;  %v1818_v46 = vpop.f32.mrb[150].mxu0  ;;  %v11962_v49 = vld [vmem:[%s13570_s0 + $0x178] sm:$0xff]  }
 0x447   :  { %v8369_v60 = vadd.f32 %v11920_v19, %v1818_v46  ;;  %v3420_v7 = vpop.f32.mrb[165].mxu1  ;;  %v1820_v2 = vpop.f32.mrb[151].mxu0  ;;  %v11949_v44 = vadd.f32 %v8368_v43, %v13848_v47 }
 0x448   :  { %v11951_v0 = vpop.f32.mrb[166].mxu1 }
 0x449   :  { %13849 = vst [vmem:[#allocation76_spill] sm:$0xff] %v11949_v44  ;;  %v3423_v13 = vpop.f32.mrb[167].mxu1  ;;  %8043 = vmatmul.mubr.bf16.gmra.mrb[0].mxu0 %v11460_v6  ;;  %v11955_v10 = vadd.f32 %v8369_v60, %v13850_v63  ;;  %v9370_v44 = vld [vmem:[#allocation2 + $0x50] sm:$0xff]  }
 0x44a   :  { %8046 = vmatprep.mubr.bf16.mxu0 %v11477_v57  ;;  %4976 = vmatpush1.bf16.msra.mxu1 %v9370_v44  ;;  %v13860_v44 = vld [vmem:[#allocation84_spill] sm:$0xff] }
 0x44b   :  { %13851 = vst [vmem:[#allocation78_spill] sm:$0xff] %v11955_v10  ;;  %3633 = vmatmul.mubr.bf16.gmra.mrb[16].mxu1 %v11893_v52  ;;  %4977 = vmatprep.subr.bf16.mxu1 %v13618_v15 }
 0x44c   :  { %v1823_v23 = vpop.f32.mrb[152].mxu0  ;;  %3640 = vmatprep.mubr.bf16.mxu1 %v11962_v49 }
 0x44d   :  { %v8370_v43 = vadd.f32 %v11920_v19, %v1823_v23  ;;  %v1825_v13 = vpop.f32.mrb[153].mxu0  ;;  %v9369_v23 = vld [vmem:[#allocation2 + $0x110] sm:$0xff]  }
 0x44e   :  { %v11966_v46 = vpop.f32.mrb[168].mxu1  ;;  %v1826_v6 = vpop.f32.mrb[154].mxu0  ;;  %8126 = vmatprep.subr.bf16.mxu0 %v9369_v23 }
 0x44f   :  { %v8371_v63 = vadd.f32 %v11920_v19, %v1826_v6  ;;  %v3428_v60 = vpop.f32.mrb[169].mxu1  ;;  %v1828_v57 = vpop.f32.mrb[155].mxu0  ;;  %v11970_v7 = vadd.f32 %v8370_v43, %v10838_v28  ;;  %v11983_v6 = vld [vmem:[%s13570_s0 + $0x180] sm:$0xff]   ;;  %8127 = vmatpush3.bf16.msra.mxu0 %v9369_v23 }
 0x450   :  { %v11972_v2 = vpop.f32.mrb[170].mxu1  ;;  %v13854_v57 = vld [vmem:[#allocation80_spill] sm:$0xff] }
 0x451   :  { %13852 = vst [vmem:[#allocation133_spill] sm:$0xff] %v11970_v7  ;;  %v3431_v47 = vpop.f32.mrb[171].mxu1  ;;  %8047 = vmatmul.mubr.bf16.gmra.mrb[4].mxu0 %v11494_v30  ;;  %v11976_v10 = vadd.f32 %v8371_v63, %v10843_v24 }
 0x452   :  { %8050 = vmatprep.mubr.bf16.mxu0 %v11512_v11 }
 0x453   :  { %13853 = vst [vmem:[#allocation134_spill] sm:$0xff] %v11976_v10  ;;  %3641 = vmatmul.mubr.bf16.gmra.mrb[20].mxu1 %v11914_v40 }
 0x454   :  { %v1831_v13 = vpop.f32.mrb[156].mxu0  ;;  %3648 = vmatprep.mubr.bf16.mxu1 %v11983_v6 }
 0x455   :  { %v8372_v28 = vadd.f32 %v11920_v19, %v1831_v13  ;;  %v1833_v43 = vpop.f32.mrb[157].mxu0 }
 0x456   :  { %v11987_v30 = vpop.f32.mrb[172].mxu1  ;;  %v1834_v24 = vpop.f32.mrb[158].mxu0  ;;  %v12004_v43 = vld [vmem:[%s13570_s0 + $0x188] sm:$0xff]  }
 0x457   :  { %v8373_v11 = vadd.f32 %v11920_v19, %v1834_v24  ;;  %v3436_v63 = vpop.f32.mrb[173].mxu1  ;;  %v1836_v60 = vpop.f32.mrb[159].mxu0  ;;  %v11991_v47 = vadd.f32 %v8372_v28, %v13854_v57 }
 0x458   :  { %v11993_v10 = vpop.f32.mrb[174].mxu1  ;;  %v13857_v63 = vld [vmem:[#allocation82_spill] sm:$0xff] }
 0x459   :  { %13855 = vst [vmem:[#allocation80_spill] sm:$0xff] %v11991_v47  ;;  %v3439_v7 = vpop.f32.mrb[175].mxu1  ;;  %8051 = vmatmul.mubr.bf16.gmra.mrb[8].mxu0 %v11534_v51  ;;  %v11997_v13 = vadd.f32 %v8373_v11, %v10840_v29  ;;  %v13865_v47 = vld [vmem:[#allocation83_spill] sm:$0xff] }
 0x45a   :  { %8054 = vmatprep.mubr.bf16.mxu0 %v11556_v45 }
 0x45b   :  { %13856 = vst [vmem:[#allocation135_spill] sm:$0xff] %v11997_v13  ;;  %3649 = vmatmul.mubr.bf16.gmra.mrb[24].mxu1 %v11941_v35 }
 0x45c   :  { %v1839_v23 = vpop.f32.mrb[160].mxu0  ;;  %3656 = vmatprep.mubr.bf16.mxu1 %v12004_v43 }
 0x45d   :  { %v8374_v7 = vadd.f32 %v11920_v19, %v1839_v23  ;;  %v1841_v51 = vpop.f32.mrb[161].mxu0 }
 0x45e   :  { %v12009_v29 = vpop.f32.mrb[176].mxu1  ;;  %v1842_v28 = vpop.f32.mrb[162].mxu0 }
 0x45f   :  { %v8375_v45 = vadd.f32 %v11920_v19, %v1842_v28  ;;  %v3444_v24 = vpop.f32.mrb[177].mxu1  ;;  %v1844_v11 = vpop.f32.mrb[163].mxu0  ;;  %v12013_v60 = vadd.f32 %v8374_v7, %v13857_v63  ;;  %v12026_v28 = vld [vmem:[%s13570_s0 + $0x190] sm:$0xff]   ;;  %v13862_v63 = vld [vmem:[#allocation81_spill] sm:$0xff] }
 0x460   :  { %v12015_v57 = vpop.f32.mrb[178].mxu1 }
 0x461   :  { %13858 = vst [vmem:[#allocation82_spill] sm:$0xff] %v12013_v60  ;;  %13859 = vst [vmem:[#allocation136_spill] sm:$0xff] %v12015_v57  ;;  %v3447_v13 = vpop.f32.mrb[179].mxu1  ;;  %8055 = vmatmul.mubr.bf16.gmra.mrb[12].mxu0 %v11578_v48  ;;  %v12019_v23 = vadd.f32 %v8375_v45, %v13860_v44 }
 0x462   :  { %8058 = vmatprep.mubr.bf16.mxu0 %v11601_v53 }
 0x463   :  { %13861 = vst [vmem:[#allocation84_spill] sm:$0xff] %v12019_v23  ;;  %3657 = vmatmul.mubr.bf16.gmra.mrb[28].mxu1 %v11962_v49 }
 0x464   :  { %v1847_v51 = vpop.f32.mrb[164].mxu0  ;;  %3664 = vmatprep.mubr.bf16.mxu1 %v12026_v28 }
 0x465   :  { %v8376_v7 = vadd.f32 %v11920_v19, %v1847_v51  ;;  %v1849_v13 = vpop.f32.mrb[165].mxu0 }
 0x466   :  { %v12030_v24 = vpop.f32.mrb[180].mxu1  ;;  %v1850_v48 = vpop.f32.mrb[166].mxu0  ;;  %v12047_v13 = vld [vmem:[%s13570_s0 + $0x198] sm:$0xff]  }
 0x467   :  { %v8377_v45 = vadd.f32 %v11920_v19, %v1850_v48  ;;  %v3452_v11 = vpop.f32.mrb[181].mxu1  ;;  %v1852_v53 = vpop.f32.mrb[167].mxu0  ;;  %v12034_v44 = vadd.f32 %v8376_v7, %v13862_v63 }
 0x468   :  { %v12036_v23 = vpop.f32.mrb[182].mxu1  ;;  %v9372_v11 = vld [vmem:[#allocation2 + $0x58] sm:$0xff]   ;;  %v13867_v53 = vld [vmem:[#allocation86_spill] sm:$0xff] }
 0x469   :  { %13863 = vst [vmem:[#allocation81_spill] sm:$0xff] %v12034_v44  ;;  %13864 = vst [vmem:[#allocation137_spill] sm:$0xff] %v12036_v23  ;;  %v3455_v60 = vpop.f32.mrb[183].mxu1  ;;  %8059 = vmatmul.mubr.bf16.gmra.mrb[16].mxu0 %v11623_v3  ;;  %v12040_v57 = vadd.f32 %v8377_v45, %v13865_v47  ;;  %4978 = vmatpush1.bf16.msra.mxu1 %v9372_v11  ;;  %v13870_v23 = vld [vmem:[#allocation88_spill] sm:$0xff] }
 0x46a   :  { %8062 = vmatprep.mubr.bf16.mxu0 %v11649_v27  ;;  %4979 = vmatprep.subr.bf16.mxu1 %v13618_v15 }
 0x46b   :  { %13866 = vst [vmem:[#allocation83_spill] sm:$0xff] %v12040_v57  ;;  %3665 = vmatmul.mubr.bf16.gmra.mrb[32].mxu1 %v11983_v6 }
 0x46c   :  { %v1855_v51 = vpop.f32.mrb[168].mxu0  ;;  %3672 = vmatprep.mubr.bf16.mxu1 %v12047_v13 }
 0x46d   :  { %v8378_v7 = vadd.f32 %v11920_v19, %v1855_v51  ;;  %v1857_v60 = vpop.f32.mrb[169].mxu0 }
 0x46e   :  { %v12051_v48 = vpop.f32.mrb[184].mxu1  ;;  %v1858_v3 = vpop.f32.mrb[170].mxu0  ;;  %v9373_v60 = vld [vmem:[#allocation2 + $0x60] sm:$0xff]  }
 0x46f   :  { %v8379_v47 = vadd.f32 %v11920_v19, %v1858_v3  ;;  %v3460_v45 = vpop.f32.mrb[185].mxu1  ;;  %v1860_v27 = vpop.f32.mrb[171].mxu0  ;;  %v12055_v63 = vadd.f32 %v8378_v7, %v13867_v53  ;;  %v12069_v7 = vld [vmem:[%s13570_s0 + $0x1a0] sm:$0xff]   ;;  %4980 = vmatpush1.bf16.msra.mxu1 %v9373_v60  ;;  %v9374_v53 = vld [vmem:[#allocation2 + $0x68] sm:$0xff]   ;;  %v13874_v60 = vld [vmem:[#allocation87_spill] sm:$0xff] }
 0x470   :  { %v12057_v57 = vpop.f32.mrb[186].mxu1  ;;  %4981 = vmatprep.subr.bf16.mxu1 %v13618_v15 }
 0x471   :  { %13868 = vst [vmem:[#allocation86_spill] sm:$0xff] %v12055_v63  ;;  %13869 = vst [vmem:[#allocation138_spill] sm:$0xff] %v12057_v57  ;;  %v3463_v44 = vpop.f32.mrb[187].mxu1  ;;  %8063 = vmatmul.mubr.bf16.gmra.mrb[20].mxu0 %v11735_v17  ;;  %v12061_v51 = vadd.f32 %v8379_v47, %v13870_v23  ;;  %v9371_v17 = vld [vmem:[#allocation2 + $0x118] sm:$0xff]  }
 0x472   :  { %8066 = vmatprep.mubr.bf16.mxu0 %v11761_v58  ;;  %8128 = vmatprep.subr.bf16.mxu0 %v9371_v17 }
 0x473   :  { %13871 = vst [vmem:[#allocation88_spill] sm:$0xff] %v12061_v51  ;;  %3673 = vmatmul.mubr.bf16.gmra.mrb[36].mxu1 %v12004_v43  ;;  %8129 = vmatpush3.bf16.msra.mxu0 %v9371_v17  ;;  %v13872_v51 = vld [vmem:[#allocation85_spill] sm:$0xff]  ;;  %v9375_v17 = vld [vmem:[#allocation2 + $0x70] sm:$0xff]  }
 0x474   :  { %v1863_v3 = vpop.f32.mrb[172].mxu0  ;;  %3680 = vmatprep.mubr.bf16.mxu1 %v12069_v7  ;;  %4982 = vmatpush1.bf16.msra.mxu1 %v9374_v53  ;;  %v9376_v53 = vld [vmem:[#allocation2 + $0x78] sm:$0xff]  }
 0x475   :  { %v8380_v44 = vadd.f32 %v11920_v19, %v1863_v3  ;;  %v1865_v23 = vpop.f32.mrb[173].mxu0  ;;  %4983 = vmatprep.subr.bf16.mxu1 %v13618_v15 }
 0x476   :  { %v12073_v47 = vpop.f32.mrb[188].mxu1  ;;  %v1866_v58 = vpop.f32.mrb[174].mxu0 }
 0x477   :  { %v8381_v45 = vadd.f32 %v11920_v19, %v1866_v58  ;;  %v3468_v27 = vpop.f32.mrb[189].mxu1  ;;  %v1868_v11 = vpop.f32.mrb[175].mxu0  ;;  %v12078_v63 = vadd.f32 %v8380_v44, %v13872_v51 }
 0x478   :  { %v12080_v57 = vpop.f32.mrb[190].mxu1  ;;  %4984 = vmatpush1.bf16.msra.mxu1 %v9375_v17  ;;  %v13877_v17 = vld [vmem:[#allocation91_spill] sm:$0xff] }
 0x479   :  { %13873 = vst [vmem:[#allocation85_spill] sm:$0xff] %v12078_v63  ;;  %v3471_v3 = vpop.f32.mrb[191].mxu1  ;;  %8067 = vmatmul.mubr.bf16.gmra.mrb[24].mxu0 %v11791_v55  ;;  %v12084_v23 = vadd.f32 %v8381_v45, %v13874_v60  ;;  %4985 = vmatprep.subr.bf16.mxu1 %v13618_v15 }
 0x47a   :  { %8070 = vmatprep.mubr.bf16.mxu0 %v11821_v16 }
 0x47b   :  { %13875 = vst [vmem:[#allocation87_spill] sm:$0xff] %v12084_v23  ;;  %3681 = vmatmul.mubr.bf16.gmra.mrb[40].mxu1 %v12026_v28 }
 0x47c   :  { %v1871_v58 = vpop.f32.mrb[176].mxu0  ;;  %3688 = vmatprep.mubr.bf16.mxu1 %v11527_v36  ;;  %4986 = vmatpush1.bf16.msra.mxu1 %v9376_v53 }
 0x47d   :  { %v8382_v51 = vadd.f32 %v11920_v19, %v1871_v58  ;;  %v1873_v44 = vpop.f32.mrb[177].mxu0  ;;  %5148 = vmatprep.subr.bf16.mxu1 %v13618_v15 }
 0x47e   :  { %v12091_v27 = vpop.f32.mrb[192].mxu1  ;;  %v1874_v55 = vpop.f32.mrb[178].mxu0 }
 0x47f   :  { %v8383_v45 = vadd.f32 %v11920_v19, %v1874_v55  ;;  %v3476_v16 = vpop.f32.mrb[193].mxu1  ;;  %v1876_v11 = vpop.f32.mrb[179].mxu0  ;;  %v12096_v3 = vadd.f32 %v8382_v51, %v10878_v32 }
 0x480   :  { %v12098_v60 = vpop.f32.mrb[194].mxu1  ;;  %v13879_v11 = vld [vmem:[#allocation89_spill] sm:$0xff] }
 0x481   :  { %13876 = vst [vmem:[#allocation139_spill] sm:$0xff] %v12096_v3  ;;  %v3479_v23 = vpop.f32.mrb[195].mxu1  ;;  %8071 = vmatmul.mubr.bf16.gmra.mrb[28].mxu0 %v11767_v21  ;;  %v12102_v58 = vadd.f32 %v8383_v45, %v13877_v17 }
 0x482   :  { %8074 = vmatprep.mubr.bf16.mxu0 %v11797_v25 }
 0x483   :  { %13878 = vst [vmem:[#allocation91_spill] sm:$0xff] %v12102_v58  ;;  %3689 = vmatmul.mubr.bf16.gmra.mrb[44].mxu1 %v12047_v13  ;;  %v13881_v58 = vld [vmem:[#allocation90_spill] sm:$0xff] }
 0x484   :  { %v1879_v44 = vpop.f32.mrb[180].mxu0  ;;  %3696 = vmatprep.mubr.bf16.mxu1 %v11549_v34 }
 0x485   :  { %v8384_v32 = vadd.f32 %v11920_v19, %v1879_v44  ;;  %v1881_v51 = vpop.f32.mrb[181].mxu0 }
 0x486   :  { %v12109_v55 = vpop.f32.mrb[196].mxu1  ;;  %v1882_v23 = vpop.f32.mrb[182].mxu0 }
 0x487   :  { %v8385_v21 = vadd.f32 %v11920_v19, %v1882_v23  ;;  %v3484_v16 = vpop.f32.mrb[197].mxu1  ;;  %v1884_v45 = vpop.f32.mrb[183].mxu0  ;;  %v12113_v53 = vadd.f32 %v8384_v32, %v13879_v11 }
 0x488   :  { %v12115_v25 = vpop.f32.mrb[198].mxu1 }
 0x489   :  { %13880 = vst [vmem:[#allocation89_spill] sm:$0xff] %v12113_v53  ;;  %v3487_v17 = vpop.f32.mrb[199].mxu1  ;;  %8075 = vmatmul.mubr.bf16.gmra.mrb[32].mxu0 %v11827_v14  ;;  %v12119_v3 = vadd.f32 %v8385_v21, %v13881_v58 }
 0x48a   :  { %8078 = vmatprep.mubr.bf16.mxu0 %v11851_v31  ;;  %v9377_v31 = vld [vmem:[#allocation2 + $0x120] sm:$0xff]  }
 0x48b   :  { %13882 = vst [vmem:[#allocation90_spill] sm:$0xff] %v12119_v3  ;;  %3697 = vmatmul.mubr.bf16.gmra.mrb[48].mxu1 %v12069_v7  ;;  %v13884_v3 = vld [vmem:[#allocation94_spill] sm:$0xff]  ;;  %8130 = vmatprep.subr.bf16.mxu0 %v9377_v31 }
 0x48c   :  { %v1887_v44 = vpop.f32.mrb[184].mxu0  ;;  %3704 = vmatprep.mubr.bf16.mxu1 %v11571_v20  ;;  %8131 = vmatpush3.bf16.msra.mxu0 %v9377_v31  ;;  %v13888_v31 = vld [vmem:[#allocation93_spill] sm:$0xff] }
 0x48d   :  { %v8386_v51 = vadd.f32 %v11920_v19, %v1887_v44  ;;  %v1889_v23 = vpop.f32.mrb[185].mxu0 }
 0x48e   :  { %v12125_v32 = vpop.f32.mrb[200].mxu1  ;;  %v1890_v16 = vpop.f32.mrb[186].mxu0 }
 0x48f   :  { %v8387_v45 = vadd.f32 %v11920_v19, %v1890_v16  ;;  %v3492_v11 = vpop.f32.mrb[201].mxu1  ;;  %v1892_v14 = vpop.f32.mrb[187].mxu0  ;;  %v12129_v58 = vadd.f32 %v8386_v51, %v10890_v33 }
 0x490   :  { %v12131_v21 = vpop.f32.mrb[202].mxu1 }
 0x491   :  { %13883 = vst [vmem:[#allocation140_spill] sm:$0xff] %v12129_v58  ;;  %v3495_v17 = vpop.f32.mrb[203].mxu1  ;;  %8079 = vmatmul.mubr.bf16.gmra.mrb[36].mxu0 %v11872_v42  ;;  %v12135_v53 = vadd.f32 %v8387_v45, %v13884_v3  ;;  %v13886_v45 = vld [vmem:[#allocation92_spill] sm:$0xff]  ;;  %v13928_v58 = vld [vmem:[#allocation109_spill] sm:$0xff] }
 0x492   :  { %8082 = vmatprep.mubr.bf16.mxu0 %v11893_v52 }
 0x493   :  { %13885 = vst [vmem:[#allocation94_spill] sm:$0xff] %v12135_v53  ;;  %3705 = vmatmul.mubr.bf16.gmra.mrb[52].mxu1 %v11527_v36 }
 0x494   :  { %v1895_v44 = vpop.f32.mrb[188].mxu0  ;;  %3712 = vmatprep.mubr.bf16.mxu1 %v11594_v37 }
 0x495   :  { %v8388_v33 = vadd.f32 %v11920_v19, %v1895_v44  ;;  %v1897_v51 = vpop.f32.mrb[189].mxu0 }
 0x496   :  { %v12141_v23 = vpop.f32.mrb[204].mxu1  ;;  %v1898_v16 = vpop.f32.mrb[190].mxu0 }
 0x497   :  { %v8389_v42 = vadd.f32 %v11920_v19, %v1898_v16  ;;  %v3500_v11 = vpop.f32.mrb[205].mxu1  ;;  %v1900_v3 = vpop.f32.mrb[191].mxu0  ;;  %v12145_v14 = vadd.f32 %v8388_v33, %v13886_v45 }
 0x498   :  { %v12147_v52 = vpop.f32.mrb[206].mxu1 }
 0x499   :  { %13887 = vst [vmem:[#allocation92_spill] sm:$0xff] %v12145_v14  ;;  %v3503_v36 = vpop.f32.mrb[207].mxu1  ;;  %8083 = vmatmul.mubr.bf16.gmra.mrb[40].mxu0 %v11914_v40  ;;  %v12151_v17 = vadd.f32 %v8389_v42, %v13888_v31 }
 0x49a   :  { %8086 = vmatprep.mubr.bf16.mxu0 %v11941_v35  ;;  %v13890_v36 = vld [vmem:[#allocation96_spill] sm:$0xff] }
 0x49b   :  { %13889 = vst [vmem:[#allocation93_spill] sm:$0xff] %v12151_v17  ;;  %3713 = vmatmul.mubr.bf16.gmra.mrb[56].mxu1 %v11549_v34  ;;  %v13892_v34 = vld [vmem:[#allocation98_spill] sm:$0xff] }
 0x49c   :  { %v1903_v44 = vpop.f32.mrb[192].mxu0  ;;  %3720 = vmatprep.mubr.bf16.mxu1 %v11616_v18 }
 0x49d   :  { %v8390_v51 = vadd.f32 %v11920_v19, %v1903_v44  ;;  %v1905_v16 = vpop.f32.mrb[193].mxu0 }
 0x49e   :  { %v12157_v33 = vpop.f32.mrb[208].mxu1  ;;  %v1906_v11 = vpop.f32.mrb[194].mxu0 }
 0x49f   :  { %v8391_v3 = vadd.f32 %v11920_v19, %v1906_v11  ;;  %v3508_v45 = vpop.f32.mrb[209].mxu1  ;;  %v1908_v40 = vpop.f32.mrb[195].mxu0  ;;  %v12161_v42 = vadd.f32 %v8390_v51, %v13890_v36 }
 0x4a0   :  { %v12163_v31 = vpop.f32.mrb[210].mxu1  ;;  %v9378_v40 = vld [vmem:[#allocation2 + $0x128] sm:$0xff]  }
 0x4a1   :  { %13891 = vst [vmem:[#allocation96_spill] sm:$0xff] %v12161_v42  ;;  %v3511_v35 = vpop.f32.mrb[211].mxu1  ;;  %8087 = vmatmul.mubr.bf16.gmra.mrb[44].mxu0 %v11962_v49  ;;  %v12167_v53 = vadd.f32 %v8391_v3, %v13892_v34  ;;  %v13894_v3 = vld [vmem:[#allocation95_spill] sm:$0xff]  ;;  %8132 = vmatprep.subr.bf16.mxu0 %v9378_v40  ;;  %v13916_v42 = vld [vmem:[#allocation105_spill] sm:$0xff] }
 0x4a2   :  { %8090 = vmatprep.mubr.bf16.mxu0 %v11983_v6  ;;  %8133 = vmatpush3.bf16.msra.mxu0 %v9378_v40  ;;  %v13898_v40 = vld [vmem:[#allocation100_spill] sm:$0xff] }
 0x4a3   :  { %13893 = vst [vmem:[#allocation98_spill] sm:$0xff] %v12167_v53  ;;  %3721 = vmatmul.mubr.bf16.gmra.mrb[60].mxu1 %v11571_v20  ;;  %v13896_v53 = vld [vmem:[#allocation97_spill] sm:$0xff] }
 0x4a4   :  { %v1911_v44 = vpop.f32.mrb[196].mxu0  ;;  %3728 = vmatprep.mubr.bf16.mxu1 %v11642_v26 }
 0x4a5   :  { %v8392_v16 = vadd.f32 %v11920_v19, %v1911_v44  ;;  %v1913_v11 = vpop.f32.mrb[197].mxu0 }
 0x4a6   :  { %v12173_v51 = vpop.f32.mrb[212].mxu1  ;;  %v1914_v45 = vpop.f32.mrb[198].mxu0  ;;  %v9379_v11 = vld [vmem:[#allocation2 + $0x130] sm:$0xff]  }
 0x4a7   :  { %v8393_v36 = vadd.f32 %v11920_v19, %v1914_v45  ;;  %v3516_v49 = vpop.f32.mrb[213].mxu1  ;;  %v1916_v35 = vpop.f32.mrb[199].mxu0  ;;  %v12177_v34 = vadd.f32 %v8392_v16, %v13894_v3  ;;  %8134 = vmatprep.subr.bf16.mxu0 %v9379_v11 }
 0x4a8   :  { %v12179_v6 = vpop.f32.mrb[214].mxu1  ;;  %8135 = vmatpush3.bf16.msra.mxu0 %v9379_v11 }
 0x4a9   :  { %13895 = vst [vmem:[#allocation95_spill] sm:$0xff] %v12177_v34  ;;  %v3519_v20 = vpop.f32.mrb[215].mxu1  ;;  %8091 = vmatmul.mubr.bf16.gmra.mrb[48].mxu0 %v12004_v43  ;;  %v12183_v44 = vadd.f32 %v8393_v36, %v13896_v53  ;;  %v9380_v43 = vld [vmem:[#allocation2 + $0x138] sm:$0xff]   ;;  %v13922_v34 = vld [vmem:[#allocation110_spill] sm:$0xff] }
 0x4aa   :  { %8094 = vmatprep.mubr.bf16.mxu0 %v12026_v28  ;;  %8136 = vmatprep.subr.bf16.mxu0 %v9380_v43 }
 0x4ab   :  { %13897 = vst [vmem:[#allocation97_spill] sm:$0xff] %v12183_v44  ;;  %3729 = vmatmul.mubr.bf16.gmra.mrb[64].mxu1 %v11594_v37 }
 0x4ac   :  { %v1919_v45 = vpop.f32.mrb[200].mxu0  ;;  %3736 = vmatprep.mubr.bf16.mxu1 %v11669_v8  ;;  %8137 = vmatpush3.bf16.msra.mxu0 %v9380_v43 }
 0x4ad   :  { %v8394_v16 = vadd.f32 %v11920_v19, %v1919_v45  ;;  %v1921_v49 = vpop.f32.mrb[201].mxu0  ;;  %v13900_v45 = vld [vmem:[#allocation102_spill] sm:$0xff]  ;;  %5814 = vmatprep.subr.bf16.mxu0 %v13618_v15 }
 0x4ae   :  { %v12189_v35 = vpop.f32.mrb[216].mxu1  ;;  %v1922_v3 = vpop.f32.mrb[202].mxu0 }
 0x4af   :  { %v8395_v53 = vadd.f32 %v11920_v19, %v1922_v3  ;;  %v3524_v36 = vpop.f32.mrb[217].mxu1  ;;  %v1924_v28 = vpop.f32.mrb[203].mxu0  ;;  %v12193_v20 = vadd.f32 %v8394_v16, %v13898_v40  ;;  %v13902_v40 = vld [vmem:[#allocation99_spill] sm:$0xff] }
 0x4b0   :  { %v12195_v37 = vpop.f32.mrb[218].mxu1 }
 0x4b1   :  { %13899 = vst [vmem:[#allocation100_spill] sm:$0xff] %v12193_v20  ;;  %v3527_v44 = vpop.f32.mrb[219].mxu1  ;;  %8095 = vmatmul.mubr.bf16.gmra.mrb[52].mxu0 %v12047_v13  ;;  %v12199_v49 = vadd.f32 %v8395_v53, %v13900_v45  ;;  %v9601_v45 = vld [vmem:[%s13570_s0 + $0x1a8] sm:$0xff]  }
 0x4b2   :  { %8098 = vmatprep.mubr.bf16.mxu0 %v12069_v7 }
 0x4b3   :  { %13901 = vst [vmem:[#allocation102_spill] sm:$0xff] %v12199_v49  ;;  %3737 = vmatmul.mubr.bf16.gmra.mrb[68].mxu1 %v11616_v18  ;;  %v13907_v49 = vld [vmem:[#allocation104_spill] sm:$0xff] }
 0x4b4   :  { %v1927_v11 = vpop.f32.mrb[204].mxu0  ;;  %3744 = vmatprep.mubr.bf16.mxu1 %v11690_v62 }
 0x4b5   :  { %v8396_v16 = vadd.f32 %v11920_v19, %v1927_v11  ;;  %v1929_v3 = vpop.f32.mrb[205].mxu0  ;;  %v13904_v11 = vld [vmem:[#allocation101_spill] sm:$0xff] }
 0x4b6   :  { %v12206_v36 = vpop.f32.mrb[220].mxu1  ;;  %v1930_v44 = vpop.f32.mrb[206].mxu0 }
 0x4b7   :  { %v8397_v13 = vadd.f32 %v11920_v19, %v1930_v44  ;;  %v3532_v53 = vpop.f32.mrb[221].mxu1  ;;  %v1932_v28 = vpop.f32.mrb[207].mxu0  ;;  %v12210_v7 = vadd.f32 %v8396_v16, %v13902_v40  ;;  %v9602_v44 = vld [vmem:[%s13570_s0 + $0x1b0] sm:$0xff]  }
 0x4b8   :  { %v12212_v43 = vpop.f32.mrb[222].mxu1 }
 0x4b9   :  { %13903 = vst [vmem:[#allocation99_spill] sm:$0xff] %v12210_v7  ;;  %v3535_v18 = vpop.f32.mrb[223].mxu1  ;;  %8099 = vmatmul.mubr.bf16.gmra.mrb[56].mxu0 %v9601_v45  ;;  %v12218_v3 = vadd.f32 %v8397_v13, %v13904_v11 }
 0x4ba   :  { %8102 = vmatprep.mubr.bf16.mxu0 %v9602_v44 }
 0x4bb   :  { %13905 = vst [vmem:[#allocation101_spill] sm:$0xff] %v12218_v3  ;;  %3745 = vmatmul.mubr.bf16.gmra.mrb[72].mxu1 %v11642_v26  ;;  %v9603_v26 = vld [vmem:[%s13570_s0 + $0x1b8] sm:$0xff]  }
 0x4bc   :  { %v1935_v16 = vpop.f32.mrb[208].mxu0  ;;  %3752 = vmatprep.mubr.bf16.mxu1 %v11711_v9 }
 0x4bd   :  { %v8398_v53 = vadd.f32 %v11920_v19, %v1935_v16  ;;  %v1937_v28 = vpop.f32.mrb[209].mxu0  ;;  %v13910_v16 = vld [vmem:[#allocation106_spill] sm:$0xff] }
 0x4be   :  { %v12226_v40 = vpop.f32.mrb[224].mxu1  ;;  %v1938_v18 = vpop.f32.mrb[210].mxu0 }
 0x4bf   :  { %13906 = vst [vmem:[#allocation141_spill] sm:$0xff] %v12226_v40  ;;  %v8399_v45 = vadd.f32 %v11920_v19, %v1938_v18  ;;  %v3540_v13 = vpop.f32.mrb[225].mxu1  ;;  %v1940_v11 = vpop.f32.mrb[211].mxu0  ;;  %v12230_v3 = vadd.f32 %v8398_v53, %v13907_v49  ;;  %v9604_v18 = vld [vmem:[%s13570_s0 + $0x1c0] sm:$0xff]  }
 0x4c0   :  { %v12232_v20 = vpop.f32.mrb[226].mxu1  ;;  %v13943_v40 = vld [vmem:[#allocation116_spill] sm:$0xff] }
 0x4c1   :  { %13908 = vst [vmem:[#allocation104_spill] sm:$0xff] %v12230_v3  ;;  %13909 = vst [vmem:[#allocation142_spill] sm:$0xff] %v12232_v20  ;;  %v3543_v44 = vpop.f32.mrb[227].mxu1  ;;  %8103 = vmatmul.mubr.bf16.gmra.mrb[60].mxu0 %v9603_v26  ;;  %v12238_v28 = vadd.f32 %v8399_v45, %v13910_v16  ;;  %v13913_v3 = vld [vmem:[#allocation103_spill] sm:$0xff]  ;;  %v13941_v20 = vld [vmem:[#allocation14_spill] sm:$0xff] }
 0x4c2   :  { %8106 = vmatprep.mubr.bf16.mxu0 %v9604_v18 }
 0x4c3   :  { %13911 = vst [vmem:[#allocation106_spill] sm:$0xff] %v12238_v28  ;;  %3753 = vmatmul.mubr.bf16.gmra.mrb[76].mxu1 %v11669_v8 }
 0x4c4   :  { %v1943_v49 = vpop.f32.mrb[212].mxu0 }
 0x4c5   :  { %v8400_v53 = vadd.f32 %v11920_v19, %v1943_v49  ;;  %v1945_v13 = vpop.f32.mrb[213].mxu0  ;;  %v9605_v49 = vld [vmem:[%s13570_s0 + $0x1c8] sm:$0xff]  }
 0x4c6   :  { %v12245_v11 = vpop.f32.mrb[228].mxu1  ;;  %v1946_v44 = vpop.f32.mrb[214].mxu0 }
 0x4c7   :  { %13912 = vst [vmem:[#allocation143_spill] sm:$0xff] %v12245_v11  ;;  %v12248_v7 = vadd.f32 %v8400_v53, %v13913_v3  ;;  %v8401_v45 = vadd.f32 %v11920_v19, %v1946_v44  ;;  %v3548_v26 = vpop.f32.mrb[229].mxu1  ;;  %v1948_v16 = vpop.f32.mrb[215].mxu0  ;;  %v9606_v3 = vld [vmem:[%s13570_s0 + $0x1d0] sm:$0xff]  }
 0x4c8   :  { %v12251_v28 = vpop.f32.mrb[230].mxu1 }
 0x4c9   :  { %13914 = vst [vmem:[#allocation103_spill] sm:$0xff] %v12248_v7  ;;  %13915 = vst [vmem:[#allocation144_spill] sm:$0xff] %v12251_v28  ;;  %v12254_v18 = vadd.f32 %v8401_v45, %v13916_v42  ;;  %v3551_v8 = vpop.f32.mrb[231].mxu1  ;;  %8107 = vmatmul.mubr.bf16.gmra.mrb[64].mxu0 %v9605_v49  ;;  %v13919_v42 = vld [vmem:[#allocation108_spill] sm:$0xff] }
 0x4ca   :  { %8110 = vmatprep.mubr.bf16.mxu0 %v9606_v3 }
 0x4cb   :  { %13917 = vst [vmem:[#allocation105_spill] sm:$0xff] %v12254_v18 }
 0x4cc   :  { %v1951_v53 = vpop.f32.mrb[216].mxu0 }
 0x4cd   :  { %v8402_v13 = vadd.f32 %v11920_v19, %v1951_v53  ;;  %v1953_v44 = vpop.f32.mrb[217].mxu0  ;;  %v9607_v53 = vld [vmem:[%s13570_s0 + $0x1d8] sm:$0xff]  }
 0x4ce   :  { %v12263_v26 = vpop.f32.mrb[232].mxu1  ;;  %v1954_v16 = vpop.f32.mrb[218].mxu0 }
 0x4cf   :  { %13918 = vst [vmem:[#allocation145_spill] sm:$0xff] %v12263_v26  ;;  %v12266_v45 = vadd.f32 %v8402_v13, %v13919_v42  ;;  %v8403_v8 = vadd.f32 %v11920_v19, %v1954_v16  ;;  %v3556_v18 = vpop.f32.mrb[233].mxu1  ;;  %v1956_v7 = vpop.f32.mrb[219].mxu0  ;;  %v13940_v26 = vld [vmem:[#allocation13_spill] sm:$0xff] }
 0x4d0   :  { %v12269_v49 = vpop.f32.mrb[234].mxu1  ;;  %v13925_v18 = vld [vmem:[#allocation107_spill] sm:$0xff] }
 0x4d1   :  { %13920 = vst [vmem:[#allocation108_spill] sm:$0xff] %v12266_v45  ;;  %13921 = vst [vmem:[#allocation146_spill] sm:$0xff] %v12269_v49  ;;  %v12272_v17 = vadd.f32 %v8403_v8, %v13922_v34  ;;  %v3559_v3 = vpop.f32.mrb[235].mxu1  ;;  %8111 = vmatmul.mubr.bf16.gmra.mrb[68].mxu0 %v9607_v53  ;;  %v13938_v49 = vld [vmem:[#allocation111_spill] sm:$0xff] }
 0x4d2   :  { %8114 = vmatprep.mubr.bf16.mxu0 %v11690_v62 }
 0x4d3   :  { %13923 = vst [vmem:[#allocation110_spill] sm:$0xff] %v12272_v17 }
 0x4d4   :  { %v1959_v44 = vpop.f32.mrb[220].mxu0 }
 0x4d5   :  { %v8404_v13 = vadd.f32 %v11920_v19, %v1959_v44  ;;  %v1961_v42 = vpop.f32.mrb[221].mxu0  ;;  %v9608_v44 = vld [vmem:[%s13570_s0 + $0x1f0] sm:$0xff]  }
 0x4d6   :  { %v12279_v16 = vpop.f32.mrb[236].mxu1  ;;  %v1962_v7 = vpop.f32.mrb[222].mxu0 }
 0x4d7   :  { %13924 = vst [vmem:[#allocation147_spill] sm:$0xff] %v12279_v16  ;;  %v12282_v45 = vadd.f32 %v8404_v13, %v13925_v18  ;;  %v8405_v34 = vadd.f32 %v11920_v19, %v1962_v7  ;;  %v3564_v8 = vpop.f32.mrb[237].mxu1  ;;  %v1964_v3 = vpop.f32.mrb[223].mxu0  ;;  %v8408_v13 = vadd.f32 %v11920_v19, %v11653_v1  ;;  %v8406_v7 = vadd.f32 %v11920_v19, %v11627_v56 }
 0x4d8   :  { %v12285_v17 = vpop.f32.mrb[238].mxu1  ;;  %v2447_v56 = vmax.f32 %v11217_v61, 0.0  ;;  %v13932_v61 = vld [vmem:[#allocation114_spill] sm:$0xff] }
 0x4d9   :  { %13926 = vst [vmem:[#allocation107_spill] sm:$0xff] %v12282_v45  ;;  %13927 = vst [vmem:[#allocation148_spill] sm:$0xff] %v12285_v17  ;;  %v12288_v53 = vadd.f32 %v8405_v34, %v13928_v58  ;;  %v3567_v62 = vpop.f32.mrb[239].mxu1  ;;  %8115 = vmatmul.mubr.bf16.gmra.mrb[72].mxu0 %v11711_v9  ;;  %v8409_v58 = vadd.f32 %v11920_v19, %v11659_v59 }
 0x4da   :  { %8118 = vmatprep.mubr.bf16.mxu0 %v9608_v44  ;;  %v8407_v62 = vadd.f32 %v11920_v19, %v11633_v54  ;;  %v2449_v44 = vmax.f32 %v11229_v12, 0.0  ;;  %v9609_v54 = vld [vmem:[%s13570_s0 + $0x1f8] sm:$0xff]  }
 0x4db   :  { %13929 = vst [vmem:[#allocation109_spill] sm:$0xff] %v12288_v53 }
 0x4dc   :  { %v8012_v42 = vpop.f32.mrb[224].mxu0 }
 0x4dd   :  { %v3804_v18 = vadd.f32 %v8408_v13, %v8012_v42  ;;  %v3795_v8 = vpop.f32.mrb[225].mxu0 }
 0x4de   :  { %v12300_v34 = vpop.f32.mrb[240].mxu1  ;;  %v3796_v9 = vadd.f32 %v8406_v7, %v3795_v8  ;;  %v8013_v3 = vpop.f32.mrb[226].mxu0 }
 0x4df   :  { %13930 = vst [vmem:[#allocation149_spill] sm:$0xff] %v12300_v34  ;;  %v4244_v53 = vmax.f32 %v3804_v18, 0.0  ;;  %v3572_v1 = vpop.f32.mrb[241].mxu1  ;;  %v3807_v45 = vadd.f32 %v8409_v58, %v8013_v3  ;;  %v3798_v14 = vpop.f32.mrb[227].mxu0  ;;  %v2450_v34 = vmax.f32 %v11233_v4, 0.0  ;;  %v2448_v18 = vmax.f32 %v11221_v5, 0.0 }
 0x4e0   :  { %v4242_v13 = vmax.f32 %v3796_v9, 0.0  ;;  %v12306_v42 = vpop.f32.mrb[242].mxu1  ;;  %v3799_v63 = vadd.f32 %v8407_v62, %v3798_v14  ;;  %v8412_v9 = vadd.f32 %v11920_v19, %v13932_v61  ;;  %v13936_v5 = vld [vmem:[#allocation113_spill] sm:$0xff] }
 0x4e1   :  { %13931 = vst [vmem:[#allocation150_spill] sm:$0xff] %v12306_v42  ;;  %v4356_v59 = vmax.f32 %v2449_v44, %v4244_v53  ;;  %v4245_v7 = vmax.f32 %v3807_v45, 0.0  ;;  %v3575_v8 = vpop.f32.mrb[243].mxu1  ;;  %8119 = vmatmul.mubr.bf16.gmra.mrb[76].mxu0 %v9609_v54  ;;  %v13933_v53 = vld [vmem:[#allocation112_spill] sm:$0xff]  ;;  %v13934_v44 = vld [vmem:[#allocation115_spill] sm:$0xff] }
 0x4e2   :  { %v4354_v12 = vmax.f32 %v2447_v56, %v4242_v13  ;;  %v4243_v58 = vmax.f32 %v3799_v63, 0.0  ;;  %v8410_v4 = vadd.f32 %v11920_v19, %v13933_v53  ;;  %v8413_v8 = vadd.f32 %v11920_v19, %v13934_v44 }
 0x4e3   :  { %v4357_v3 = vmax.f32 %v2450_v34, %v4245_v7  ;;  %v8411_v63 = vadd.f32 %v11920_v19, %v13936_v5  ;;  %v13937_v34 = vld [vmem:[#allocation12_spill] sm:$0xff]  ;;  %v2451_v53 = vmax.f32 %v13938_v49, 0.0  ;;  %v2452_v5 = vmax.f32 %v13941_v20, 0.0 }
 0x4e4   :  { %v4355_v1 = vmax.f32 %v2448_v18, %v4243_v58  ;;  %v8016_v14 = vpop.f32.mrb[228].mxu0  ;;  %v2453_v7 = vmax.f32 %v13937_v34, 0.0 }
 0x4e5   :  { %v3820_v45 = vadd.f32 %v8412_v9, %v8016_v14  ;;  %v3811_v62 = vpop.f32.mrb[229].mxu0 }
 0x4e6   :  { %v12319_v42 = vpop.f32.mrb[244].mxu1  ;;  %v3812_v56 = vadd.f32 %v8410_v4, %v3811_v62  ;;  %v8017_v13 = vpop.f32.mrb[230].mxu0 }
 0x4e7   :  { %13935 = vst [vmem:[#allocation114_spill] sm:$0xff] %v12319_v42  ;;  %v4248_v54 = vmax.f32 %v3820_v45, 0.0  ;;  %v3580_v18 = vpop.f32.mrb[245].mxu1  ;;  %v3823_v58 = vadd.f32 %v8413_v8, %v8017_v13  ;;  %v3814_v61 = vpop.f32.mrb[231].mxu0  ;;  %v2454_v42 = vmax.f32 %v13940_v26, 0.0 }
 0x4e8   :  { %v4246_v9 = vmax.f32 %v3812_v56, 0.0  ;;  %v12325_v14 = vpop.f32.mrb[246].mxu1  ;;  %v3815_v17 = vadd.f32 %v8411_v63, %v3814_v61  ;;  %v13942_v18 = vld [vmem:[#allocation118_spill] sm:$0xff]  ;;  %v8414_v63 = vadd.f32 %v11920_v19, %v13943_v40 }
 0x4e9   :  { %13939 = vst [vmem:[#allocation112_spill] sm:$0xff] %v12325_v14  ;;  %v4360_v44 = vmax.f32 %v2453_v7, %v4248_v54  ;;  %v4249_v4 = vmax.f32 %v3823_v58, 0.0  ;;  %v3583_v62 = vpop.f32.mrb[247].mxu1  ;;  %v8416_v8 = vadd.f32 %v11920_v19, %v13942_v18  ;;  %v13944_v58 = vld [vmem:[#allocation119_spill] sm:$0xff]  ;;  %v13962_v14 = vld [vmem:[#allocation22_spill] sm:$0xff] }
 0x4ea   :  { %v4358_v16 = vmax.f32 %v2451_v53, %v4246_v9  ;;  %v4247_v28 = vmax.f32 %v3815_v17, 0.0  ;;  %v8417_v61 = vadd.f32 %v11920_v19, %v13944_v58  ;;  %v13953_v58 = vld [vmem:[#allocation18_spill] sm:$0xff] }
 0x4eb   :  { %v4468_v34 = vmax.f32 %v4356_v59, %v4360_v44  ;;  %v4361_v45 = vmax.f32 %v2454_v42, %v4249_v4  ;;  %v13946_v59 = vld [vmem:[#allocation117_spill] sm:$0xff] }
 0x4ec   :  { %v4466_v13 = vmax.f32 %v4354_v12, %v4358_v16  ;;  %v4359_v49 = vmax.f32 %v2452_v5, %v4247_v28  ;;  %v8020_v56 = vpop.f32.mrb[232].mxu0  ;;  %v8415_v9 = vadd.f32 %v11920_v19, %v13946_v59  ;;  %v13948_v28 = vld [vmem:[#allocation15_spill] sm:$0xff]  ;;  %v13950_v5 = vld [vmem:[#allocation16_spill] sm:$0xff]  ;;  %v2456_v59 = vmax.f32 %v13953_v58, 0.0 }
 0x4ed   :  { %v4469_v7 = vmax.f32 %v4357_v3, %v4361_v45  ;;  %v3836_v54 = vadd.f32 %v8416_v8, %v8020_v56  ;;  %v3827_v26 = vpop.f32.mrb[233].mxu0  ;;  %v2457_v12 = vmax.f32 %v13948_v28, 0.0  ;;  %v2455_v45 = vmax.f32 %v13950_v5, 0.0  ;;  %v13952_v56 = vld [vmem:[#allocation17_spill] sm:$0xff] }
 0x4ee   :  { %v4467_v53 = vmax.f32 %v4355_v1, %v4359_v49  ;;  %v12335_v20 = vpop.f32.mrb[248].mxu1  ;;  %v3828_v17 = vadd.f32 %v8414_v63, %v3827_v26  ;;  %v8021_v42 = vpop.f32.mrb[234].mxu0  ;;  %v2458_v63 = vmax.f32 %v13952_v56, 0.0  ;;  %v13959_v56 = vld [vmem:[#allocation19_spill] sm:$0xff] }
 0x4ef   :  { %13945 = vst [vmem:[#allocation115_spill] sm:$0xff] %v12335_v20  ;;  %v12339_v16 = vpack.c.bf16 %v4469_v7, %v4468_v34  ;;  %v4252_v44 = vmax.f32 %v3836_v54, 0.0  ;;  %v3588_v40 = vpop.f32.mrb[249].mxu1  ;;  %v3839_v3 = vadd.f32 %v8417_v61, %v8021_v42  ;;  %v3830_v4 = vpop.f32.mrb[235].mxu0  ;;  %v13954_v61 = vld [vmem:[#allocation123_spill] sm:$0xff] }
 0x4f0   :  { %v12342_v62 = vpack.c.bf16 %v4467_v53, %v4466_v13  ;;  %v4250_v1 = vmax.f32 %v3828_v17, 0.0  ;;  %v12345_v18 = vpop.f32.mrb[250].mxu1  ;;  %v3831_v8 = vadd.f32 %v8415_v9, %v3830_v4  ;;  %v8420_v13 = vadd.f32 %v11920_v19, %v13954_v61  ;;  %v13955_v40 = vld [vmem:[#allocation120_spill] sm:$0xff] }
 0x4f1   :  { %13947 = vst [vmem:[#allocation113_spill] sm:$0xff] %v12339_v16  ;;  %13951 = vst [vmem:[#allocation111_spill] sm:$0xff] %v12345_v18  ;;  %v4364_v49 = vmax.f32 %v2457_v12, %v4252_v44  ;;  %v4253_v26 = vmax.f32 %v3839_v3, 0.0  ;;  %v3591_v34 = vpop.f32.mrb[251].mxu1  ;;  %v8418_v17 = vadd.f32 %v11920_v19, %v13955_v40  ;;  %v13956_v12 = vld [vmem:[#allocation124_spill] sm:$0xff]  ;;  %v13961_v18 = vld [vmem:[#allocation21_spill] sm:$0xff] }
 0x4f2   :  { %13949 = vst [vmem:[#allocation12_spill] sm:$0xff] %v12342_v62  ;;  %v4362_v7 = vmax.f32 %v2455_v45, %v4250_v1  ;;  %v4251_v54 = vmax.f32 %v3831_v8, 0.0  ;;  %v8421_v44 = vadd.f32 %v11920_v19, %v13956_v12  ;;  %v13958_v1 = vld [vmem:[#allocation122_spill] sm:$0xff]  ;;  %v2462_v20 = vmax.f32 %v13961_v18, 0.0 }
 0x4f3   :  { %v4365_v28 = vmax.f32 %v2458_v63, %v4253_v26  ;;  %v8419_v8 = vadd.f32 %v11920_v19, %v13958_v1  ;;  %v2461_v63 = vmax.f32 %v13959_v56, 0.0  ;;  %v2460_v1 = vmax.f32 %v13962_v14, 0.0 }
 0x4f4   :  { %v4363_v53 = vmax.f32 %v2456_v59, %v4251_v54  ;;  %v8024_v42 = vpop.f32.mrb[236].mxu0  ;;  %v13960_v54 = vld [vmem:[#allocation20_spill] sm:$0xff] }
 0x4f5   :  { %v3852_v5 = vadd.f32 %v8420_v13, %v8024_v42  ;;  %v3843_v9 = vpop.f32.mrb[237].mxu0  ;;  %v2459_v61 = vmax.f32 %v13960_v54, 0.0  ;;  %v13963_v54 = vld [vmem:[#allocation125_spill] sm:$0xff] }
 0x4f6   :  { %v12355_v3 = vpop.f32.mrb[252].mxu1  ;;  %v3844_v4 = vadd.f32 %v8418_v17, %v3843_v9  ;;  %v8025_v45 = vpop.f32.mrb[238].mxu0 }
 0x4f7   :  { %13957 = vst [vmem:[#allocation13_spill] sm:$0xff] %v12355_v3  ;;  %v4256_v26 = vmax.f32 %v3852_v5, 0.0  ;;  %v3596_v34 = vpop.f32.mrb[253].mxu1  ;;  %v3855_v58 = vadd.f32 %v8421_v44, %v8025_v45  ;;  %v3846_v59 = vpop.f32.mrb[239].mxu0  ;;  %v8424_v44 = vadd.f32 %v11920_v19, %v11855_v50 }
 0x4f8   :  { %v4254_v13 = vmax.f32 %v3844_v4, 0.0  ;;  %v12361_v42 = vpop.f32.mrb[254].mxu1  ;;  %v3847_v40 = vadd.f32 %v8419_v8, %v3846_v59  ;;  %v8422_v8 = vadd.f32 %v11920_v19, %v13963_v54 }
 0x4f9   :  { %v4368_v12 = vmax.f32 %v2461_v63, %v4256_v26  ;;  %v4257_v17 = vmax.f32 %v3855_v58, 0.0  ;;  %v3599_v9 = vpop.f32.mrb[255].mxu1  ;;  %v13964_v58 = vld [vmem:[#allocation129_spill] sm:$0xff] }
 0x4fa   :  { %v4366_v3 = vmax.f32 %v2459_v61, %v4254_v13  ;;  %v4255_v11 = vmax.f32 %v3847_v40, 0.0  ;;  %v8425_v59 = vadd.f32 %v11920_v19, %v13964_v58  ;;  %v13965_v13 = vld [vmem:[#allocation127_spill] sm:$0xff] }
 0x4fb   :  { %v4472_v56 = vmax.f32 %v4364_v49, %v4368_v12  ;;  %v4369_v5 = vmax.f32 %v2462_v20, %v4257_v17  ;;  %v8423_v50 = vadd.f32 %v11920_v19, %v13965_v13 }
 0x4fc   :  { %v4470_v45 = vmax.f32 %v4362_v7, %v4366_v3  ;;  %v4367_v34 = vmax.f32 %v2460_v1, %v4255_v11  ;;  %v8028_v4 = vpop.f32.mrb[240].mxu0  ;;  %v13967_v11 = vld [vmem:[#allocation23_spill] sm:$0xff]  ;;  %v13969_v1 = vld [vmem:[#allocation24_spill] sm:$0xff] }
 0x4fd   :  { %v4473_v63 = vmax.f32 %v4365_v28, %v4369_v5  ;;  %v3868_v26 = vadd.f32 %v8424_v44, %v8028_v4  ;;  %v3859_v18 = vpop.f32.mrb[241].mxu0  ;;  %v2465_v3 = vmax.f32 %v13967_v11, 0.0  ;;  %v2463_v5 = vmax.f32 %v13969_v1, 0.0  ;;  %v9381_v4 = vld [vmem:[#allocation2 + $0x80] sm:$0xff]  }
 0x4fe   :  { %v4471_v61 = vmax.f32 %v4363_v53, %v4367_v34  ;;  %v12371_v14 = vpop.f32.mrb[0].mxu1  ;;  %v3860_v49 = vadd.f32 %v8422_v8, %v3859_v18  ;;  %v8029_v20 = vpop.f32.mrb[242].mxu0  ;;  %v13971_v8 = vld [vmem:[#allocation25_spill] sm:$0xff] }
 0x4ff   :  { %v12375_v7 = vpack.c.bf16 %v4473_v63, %v4472_v56  ;;  %v4260_v40 = vmax.f32 %v3868_v26, 0.0  ;;  %v3604_v12 = vpop.f32.mrb[1].mxu1  ;;  %v3871_v28 = vadd.f32 %v8425_v59, %v8029_v20  ;;  %v3862_v17 = vpop.f32.mrb[243].mxu0  ;;  %v2466_v56 = vmax.f32 %v13971_v8, 0.0  ;;  %v13972_v26 = vld [vmem:[#allocation26_spill] sm:$0xff] }
 0x500   :  { %v12378_v9 = vpack.c.bf16 %v4471_v61, %v4470_v45  ;;  %v4258_v53 = vmax.f32 %v3860_v49, 0.0  ;;  %v12381_v44 = vpop.f32.mrb[2].mxu1  ;;  %v3863_v34 = vadd.f32 %v8423_v50, %v3862_v17  ;;  %v2464_v59 = vmax.f32 %v13972_v26, 0.0  ;;  %v13973_v50 = vld [vmem:[#allocation130_spill] sm:$0xff]  ;;  %v13976_v26 = vld [vmem:[#allocation28_spill] sm:$0xff] }
 0x501   :  { %13966 = vst [vmem:[#allocation14_spill] sm:$0xff] %v12375_v7  ;;  %13970 = vst [vmem:[#allocation116_spill] sm:$0xff] %v12381_v44  ;;  %v12383_v54 = vmax.f32 %v2465_v3, %v4260_v40  ;;  %v4261_v63 = vmax.f32 %v3871_v28, 0.0  ;;  %v3607_v18 = vpop.f32.mrb[3].mxu1  ;;  %v8428_v61 = vadd.f32 %v11920_v19, %v11897_v22  ;;  %v8426_v11 = vadd.f32 %v11920_v19, %v13973_v50  ;;  %v9382_v3 = vld [vmem:[#allocation2 + $0x88] sm:$0xff]  }
 0x502   :  { %13968 = vst [vmem:[#allocation118_spill] sm:$0xff] %v12378_v9  ;;  %v12386_v58 = vmax.f32 %v2463_v5, %v4258_v53  ;;  %v4259_v20 = vmax.f32 %v3863_v34, 0.0  ;;  %4987 = vmatprep.mubr.bf16.mxu1 %v12378_v9  ;;  %v12399_v28 = vld [vmem:[%s13576_s6] ss:$0 sm:$0xff]  ;;  %v13974_v53 = vld [vmem:[#allocation131_spill] sm:$0xff] }
 0x503   :  { %v4373_v45 = vmax.f32 %v2466_v56, %v4261_v63  ;;  %4988 = vmatmul.mubr.bf16.vlgmr.msra.gmra.mrb[80].mxu1 %v12342_v62  ;;  %v8429_v17 = vadd.f32 %v12399_v28, %v11903_v41  ;;  %v8427_v19 = vadd.f32 %v12399_v28, %v13974_v53  ;;  %v13975_v34 = vld [vmem:[#allocation27_spill] sm:$0xff] }
 0x504   :  { %v4371_v49 = vmax.f32 %v2464_v59, %v4259_v20  ;;  %v8032_v13 = vpop.f32.mrb[244].mxu0  ;;  %4995 = vmatprep.mubr.bf16.mxu1 %v12375_v7  ;;  %5149 = vmatpush1.bf16.msra.mxu1 %v9381_v4  ;;  %v2469_v4 = vmax.f32 %v13975_v34, 0.0  ;;  %v2467_v59 = vmax.f32 %v13976_v26, 0.0 }
 0x505   :  { %v3884_v40 = vadd.f32 %v8428_v61, %v8032_v13  ;;  %v3875_v12 = vpop.f32.mrb[245].mxu0  ;;  %5150 = vmatprep.subr.bf16.mxu1 %v13618_v15  ;;  %v9383_v13 = vld [vmem:[#allocation2 + $0x90] sm:$0xff]  }
 0x506   :  { %v12404_v22 = vpop.f32.mrb[4].mxu1  ;;  %v3876_v1 = vadd.f32 %v8426_v11, %v3875_v12  ;;  %v8033_v5 = vpop.f32.mrb[246].mxu0  ;;  %v13977_v11 = vld [vmem:[#allocation29_spill] sm:$0xff] }
 0x507   :  { %v4264_v8 = vmax.f32 %v3884_v40, 0.0  ;;  %v3612_v56 = vpop.f32.mrb[5].mxu1  ;;  %v3887_v63 = vadd.f32 %v8429_v17, %v8033_v5  ;;  %v3878_v18 = vpop.f32.mrb[247].mxu0  ;;  %v2470_v12 = vmax.f32 %v13977_v11, 0.0  ;;  %v13978_v40 = vld [vmem:[#allocation30_spill] sm:$0xff] }
 0x508   :  { %v4262_v20 = vmax.f32 %v3876_v1, 0.0  ;;  %v12410_v61 = vpop.f32.mrb[6].mxu1  ;;  %v3879_v41 = vadd.f32 %v8427_v19, %v3878_v18  ;;  %5151 = vmatpush1.bf16.msra.mxu1 %v9382_v3  ;;  %v2468_v34 = vmax.f32 %v13978_v40, 0.0  ;;  %v8432_v3 = vadd.f32 %v12399_v28, %v11945_v38 }
 0x509   :  { %v4376_v50 = vmax.f32 %v2469_v4, %v4264_v8  ;;  %v4265_v62 = vmax.f32 %v3887_v63, 0.0  ;;  %v3615_v44 = vpop.f32.mrb[7].mxu1  ;;  %5152 = vmatprep.subr.bf16.mxu1 %v13618_v15  ;;  %v9384_v8 = vld [vmem:[#allocation2 + $0x98] sm:$0xff]  }
 0x50a   :  { %v4374_v53 = vmax.f32 %v2467_v59, %v4262_v20  ;;  %v4263_v17 = vmax.f32 %v3879_v41, 0.0  ;;  %v8430_v44 = vadd.f32 %v12399_v28, %v11924_v39  ;;  %v13979_v20 = vld [vmem:[#allocation132_spill] sm:$0xff]  ;;  %v13980_v39 = vld [vmem:[#allocation31_spill] sm:$0xff] }
 0x50b   :  { %v4476_v5 = vmax.f32 %v12383_v54, %v4376_v50  ;;  %v4377_v56 = vmax.f32 %v2470_v12, %v4265_v62  ;;  %4996 = vmatmul.mubr.bf16.gmra.mrb[84].mxu1 %v12339_v16  ;;  %v8433_v62 = vadd.f32 %v12399_v28, %v11951_v0  ;;  %v8431_v41 = vadd.f32 %v12399_v28, %v13979_v20  ;;  %v13981_v0 = vld [vmem:[#allocation32_spill] sm:$0xff] }
 0x50c   :  { %v4474_v1 = vmax.f32 %v12386_v58, %v4374_v53  ;;  %v4375_v19 = vmax.f32 %v2468_v34, %v4263_v17  ;;  %v8036_v4 = vpop.f32.mrb[248].mxu0  ;;  %5153 = vmatpush1.bf16.msra.mxu1 %v9383_v13  ;;  %v2473_v13 = vmax.f32 %v13980_v39, 0.0  ;;  %v2471_v34 = vmax.f32 %v13981_v0, 0.0  ;;  %v13984_v0 = vld [vmem:[#allocation35_spill] sm:$0xff] }
 0x50d   :  { %v4477_v63 = vmax.f32 %v4373_v45, %v4377_v56  ;;  %v3900_v18 = vadd.f32 %v8432_v3, %v8036_v4  ;;  %v3891_v26 = vpop.f32.mrb[249].mxu0  ;;  %5154 = vmatprep.subr.bf16.mxu1 %v13618_v15  ;;  %v9385_v3 = vld [vmem:[#allocation2 + $0xa0] sm:$0xff]   ;;  %v8434_v20 = vadd.f32 %v12399_v28, %v11966_v46 }
 0x50e   :  { %v4475_v54 = vmax.f32 %v4371_v49, %v4375_v19  ;;  %v12425_v59 = vpop.f32.mrb[8].mxu1  ;;  %v3892_v38 = vadd.f32 %v8430_v44, %v3891_v26  ;;  %v8037_v58 = vpop.f32.mrb[250].mxu0 }
 0x50f   :  { %v12429_v50 = vpack.c.bf16 %v4477_v63, %v4476_v5  ;;  %v4268_v45 = vmax.f32 %v3900_v18, 0.0  ;;  %v3620_v11 = vpop.f32.mrb[9].mxu1  ;;  %v3903_v12 = vadd.f32 %v8433_v62, %v8037_v58  ;;  %v3894_v53 = vpop.f32.mrb[251].mxu0  ;;  %v13982_v5 = vld [vmem:[#allocation33_spill] sm:$0xff] }
 0x510   :  { %v12432_v40 = vpack.c.bf16 %v4475_v54, %v4474_v1  ;;  %v4266_v49 = vmax.f32 %v3892_v38, 0.0  ;;  %v12435_v17 = vpop.f32.mrb[10].mxu1  ;;  %v3895_v56 = vadd.f32 %v8431_v41, %v3894_v53  ;;  %5155 = vmatpush1.bf16.msra.mxu1 %v9384_v8  ;;  %v2474_v4 = vmax.f32 %v13982_v5, 0.0  ;;  %v13983_v1 = vld [vmem:[#allocation34_spill] sm:$0xff]  ;;  %v9386_v41 = vld [vmem:[#allocation2 + $0xa8] sm:$0xff]   ;;  %v13985_v5 = vld [vmem:[#allocation36_spill] sm:$0xff] }
 0x511   :  { %v12437_v19 = vmax.f32 %v2473_v13, %v4268_v45  ;;  %v4269_v44 = vmax.f32 %v3903_v12, 0.0  ;;  %v3623_v63 = vpop.f32.mrb[11].mxu1  ;;  %5156 = vmatprep.subr.bf16.mxu1 %v13618_v15  ;;  %v2472_v26 = vmax.f32 %v13983_v1, 0.0  ;;  %v8436_v8 = vadd.f32 %v12399_v28, %v11987_v30  ;;  %v9387_v1 = vld [vmem:[#allocation2 + $0xb0] sm:$0xff]  }
 0x512   :  { %v12441_v18 = vmax.f32 %v2471_v34, %v4266_v49  ;;  %v4267_v62 = vmax.f32 %v3895_v56, 0.0  ;;  %5003 = vmatprep.mubr.bf16.mxu1 %v12432_v40  ;;  %v8437_v45 = vadd.f32 %v12399_v28, %v11993_v10  ;;  %v8435_v53 = vadd.f32 %v12399_v28, %v11972_v2 }
 0x513   :  { %v4381_v54 = vmax.f32 %v2474_v4, %v4269_v44  ;;  %5004 = vmatmul.mubr.bf16.gmra.mrb[88].mxu1 %v12378_v9  ;;  %v2477_v34 = vmax.f32 %v13984_v0, 0.0  ;;  %v2475_v4 = vmax.f32 %v13985_v5, 0.0 }
 0x514   :  { %v4379_v38 = vmax.f32 %v2472_v26, %v4267_v62  ;;  %v8040_v58 = vpop.f32.mrb[252].mxu0  ;;  %5011 = vmatprep.mubr.bf16.mxu1 %v12429_v50  ;;  %5157 = vmatpush1.bf16.msra.mxu1 %v9385_v3  ;;  %v13986_v62 = vld [vmem:[#allocation37_spill] sm:$0xff] }
 0x515   :  { %v3916_v39 = vadd.f32 %v8436_v8, %v8040_v58  ;;  %v3907_v13 = vpop.f32.mrb[253].mxu0  ;;  %5158 = vmatprep.subr.bf16.mxu1 %v13618_v15  ;;  %v2478_v8 = vmax.f32 %v13986_v62, 0.0 }
 0x516   :  { %v12454_v11 = vpop.f32.mrb[12].mxu1  ;;  %v3908_v12 = vadd.f32 %v8434_v20, %v3907_v13  ;;  %v8041_v30 = vpop.f32.mrb[254].mxu0 }
 0x517   :  { %v4272_v49 = vmax.f32 %v3916_v39, 0.0  ;;  %v3628_v46 = vpop.f32.mrb[13].mxu1  ;;  %v3919_v56 = vadd.f32 %v8437_v45, %v8041_v30  ;;  %v3910_v3 = vpop.f32.mrb[255].mxu0  ;;  %v13987_v39 = vld [vmem:[#allocation38_spill] sm:$0xff] }
 0x518   :  { %v4270_v44 = vmax.f32 %v3908_v12, 0.0  ;;  %v12460_v63 = vpop.f32.mrb[14].mxu1  ;;  %v3911_v10 = vadd.f32 %v8435_v53, %v3910_v3  ;;  %5159 = vmatpush1.bf16.msra.mxu1 %v9386_v41  ;;  %v2476_v13 = vmax.f32 %v13987_v39, 0.0  ;;  %v8440_v41 = vadd.f32 %v12399_v28, %v12030_v24  ;;  %v9389_v46 = vld [vmem:[#allocation2 + $0xb8] sm:$0xff]  }
 0x519   :  { %v4384_v26 = vmax.f32 %v2477_v34, %v4272_v49  ;;  %v4273_v58 = vmax.f32 %v3919_v56, 0.0  ;;  %v3631_v20 = vpop.f32.mrb[15].mxu1  ;;  %5160 = vmatprep.subr.bf16.mxu1 %v13618_v15  ;;  %v8438_v49 = vadd.f32 %v12399_v28, %v12009_v29  ;;  %v13990_v29 = vld [vmem:[#allocation39_spill] sm:$0xff] }
 0x51a   :  { %v4382_v2 = vmax.f32 %v2475_v4, %v4270_v44  ;;  %v4271_v45 = vmax.f32 %v3911_v10, 0.0  ;;  %v13988_v4 = vld [vmem:[#allocation137_spill] sm:$0xff] }
 0x51b   :  { %v4480_v30 = vmax.f32 %v12437_v19, %v4384_v26  ;;  %v4385_v0 = vmax.f32 %v2478_v8, %v4273_v58  ;;  %5012 = vmatmul.mubr.bf16.gmra.mrb[92].mxu1 %v12375_v7  ;;  %v8441_v19 = vadd.f32 %v12399_v28, %v13988_v4  ;;  %v13989_v26 = vld [vmem:[#allocation136_spill] sm:$0xff] }
 0x51c   :  { %v4478_v12 = vmax.f32 %v12441_v18, %v4382_v2  ;;  %v4383_v53 = vmax.f32 %v2476_v13, %v4271_v45  ;;  %v8044_v34 = vpop.f32.mrb[0].mxu0  ;;  %5161 = vmatpush1.bf16.msra.mxu1 %v9387_v1  ;;  %v8439_v62 = vadd.f32 %v12399_v28, %v13989_v26  ;;  %v2481_v1 = vmax.f32 %v13990_v29, 0.0  ;;  %v13991_v13 = vld [vmem:[#allocation40_spill] sm:$0xff] }
 0x51d   :  { %v4481_v56 = vmax.f32 %v4381_v54, %v4385_v0  ;;  %v3932_v3 = vadd.f32 %v8440_v41, %v8044_v34  ;;  %v3923_v5 = vpop.f32.mrb[1].mxu0  ;;  %5162 = vmatprep.subr.bf16.mxu1 %v13618_v15  ;;  %v2479_v45 = vmax.f32 %v13991_v13, 0.0  ;;  %v8442_v26 = vadd.f32 %v12399_v28, %v12051_v48 }
 0x51e   :  { %v4479_v44 = vmax.f32 %v4379_v38, %v4383_v53  ;;  %v12475_v10 = vpop.f32.mrb[16].mxu1  ;;  %v3924_v24 = vadd.f32 %v8438_v49, %v3923_v5  ;;  %v8045_v18 = vpop.f32.mrb[2].mxu0  ;;  %v9391_v53 = vld [vmem:[#allocation2 + $0xc0] sm:$0xff]  }
 0x51f   :  { %v12479_v8 = vpack.c.bf16 %v4481_v56, %v4480_v30  ;;  %v4276_v54 = vmax.f32 %v3932_v3, 0.0  ;;  %v3636_v58 = vpop.f32.mrb[17].mxu1  ;;  %v3935_v20 = vadd.f32 %v8441_v19, %v8045_v18  ;;  %v3926_v2 = vpop.f32.mrb[3].mxu0  ;;  %v13992_v30 = vld [vmem:[#allocation41_spill] sm:$0xff] }
 0x520   :  { %v12482_v39 = vpack.c.bf16 %v4479_v44, %v4478_v12  ;;  %v4274_v38 = vmax.f32 %v3924_v24, 0.0  ;;  %v12485_v0 = vpop.f32.mrb[18].mxu1  ;;  %v3927_v41 = vadd.f32 %v8439_v62, %v3926_v2  ;;  %5163 = vmatpush1.bf16.msra.mxu1 %v9389_v46  ;;  %v2482_v49 = vmax.f32 %v13992_v30, 0.0  ;;  %v13993_v12 = vld [vmem:[#allocation42_spill] sm:$0xff]  ;;  %v9393_v62 = vld [vmem:[#allocation2 + $0xc8] sm:$0xff]  }
 0x521   :  { %v12487_v34 = vmax.f32 %v2481_v1, %v4276_v54  ;;  %v4277_v56 = vmax.f32 %v3935_v20, 0.0  ;;  %v3639_v5 = vpop.f32.mrb[19].mxu1  ;;  %5164 = vmatprep.subr.bf16.mxu1 %v13618_v15  ;;  %v2480_v4 = vmax.f32 %v13993_v12, 0.0  ;;  %v8444_v46 = vadd.f32 %v12399_v28, %v12073_v47  ;;  %v13994_v2 = vld [vmem:[#allocation138_spill] sm:$0xff] }
 0x522   :  { %v12491_v3 = vmax.f32 %v2479_v45, %v4274_v38  ;;  %v4275_v19 = vmax.f32 %v3927_v41, 0.0  ;;  %5019 = vmatprep.mubr.bf16.mxu1 %v12482_v39  ;;  %v8445_v54 = vadd.f32 %v12399_v28, %v12080_v57  ;;  %v8443_v13 = vadd.f32 %v12399_v28, %v13994_v2  ;;  %v13995_v45 = vld [vmem:[#allocation43_spill] sm:$0xff] }
 0x523   :  { %v4389_v44 = vmax.f32 %v2482_v49, %v4277_v56  ;;  %5020 = vmatmul.mubr.bf16.gmra.mrb[96].mxu1 %v12432_v40  ;;  %v2485_v38 = vmax.f32 %v13995_v45, 0.0  ;;  %v13996_v49 = vld [vmem:[#allocation44_spill] sm:$0xff] }
 0x524   :  { %v4387_v24 = vmax.f32 %v2480_v4, %v4275_v19  ;;  %v8048_v18 = vpop.f32.mrb[4].mxu0  ;;  %5027 = vmatprep.mubr.bf16.mxu1 %v12479_v8  ;;  %5165 = vmatpush1.bf16.msra.mxu1 %v9391_v53  ;;  %v2483_v56 = vmax.f32 %v13996_v49, 0.0  ;;  %v9395_v4 = vld [vmem:[#allocation2 + $0xd0] sm:$0xff]  }
 0x525   :  { %v3948_v29 = vadd.f32 %v8444_v46, %v8048_v18  ;;  %v3939_v1 = vpop.f32.mrb[5].mxu0  ;;  %5166 = vmatprep.subr.bf16.mxu1 %v13618_v15  ;;  %v13997_v46 = vld [vmem:[#allocation45_spill] sm:$0xff] }
 0x526   :  { %v12504_v58 = vpop.f32.mrb[20].mxu1  ;;  %v3940_v20 = vadd.f32 %v8442_v26, %v3939_v1  ;;  %v8049_v47 = vpop.f32.mrb[6].mxu0  ;;  %v2486_v18 = vmax.f32 %v13997_v46, 0.0 }
 0x527   :  { %v4280_v41 = vmax.f32 %v3948_v29, 0.0  ;;  %v3644_v48 = vpop.f32.mrb[21].mxu1  ;;  %v3951_v53 = vadd.f32 %v8445_v54, %v8049_v47  ;;  %v3942_v30 = vpop.f32.mrb[7].mxu0  ;;  %v13998_v29 = vld [vmem:[#allocation46_spill] sm:$0xff] }
 0x528   :  { %v4278_v5 = vmax.f32 %v3940_v20, 0.0  ;;  %v12510_v12 = vpop.f32.mrb[22].mxu1  ;;  %v3943_v57 = vadd.f32 %v8443_v13, %v3942_v30  ;;  %5167 = vmatpush1.bf16.msra.mxu1 %v9393_v62  ;;  %v2484_v45 = vmax.f32 %v13998_v29, 0.0  ;;  %v8448_v62 = vadd.f32 %v12399_v28, %v12109_v55 }
 0x529   :  { %v4392_v19 = vmax.f32 %v2485_v38, %v4280_v41  ;;  %v4281_v26 = vmax.f32 %v3951_v53, 0.0  ;;  %v3647_v1 = vpop.f32.mrb[23].mxu1  ;;  %5168 = vmatprep.subr.bf16.mxu1 %v13618_v15  ;;  %v8446_v41 = vadd.f32 %v12399_v28, %v12091_v27  ;;  %v9396_v53 = vld [vmem:[#allocation2 + $0xd8] sm:$0xff]  }
 0x52a   :  { %v4390_v2 = vmax.f32 %v2483_v56, %v4278_v5  ;;  %v4279_v54 = vmax.f32 %v3943_v57, 0.0  ;;  %v13999_v27 = vld [vmem:[#allocation47_spill] sm:$0xff] }
 0x52b   :  { %v4484_v47 = vmax.f32 %v12487_v34, %v4392_v19  ;;  %v4393_v48 = vmax.f32 %v2486_v18, %v4281_v26  ;;  %5028 = vmatmul.mubr.bf16.gmra.mrb[100].mxu1 %v12429_v50  ;;  %v8449_v34 = vadd.f32 %v12399_v28, %v12115_v25  ;;  %v8447_v19 = vadd.f32 %v12399_v28, %v12098_v60  ;;  %v14000_v25 = vld [vmem:[#allocation48_spill] sm:$0xff]  ;;  %v14001_v60 = vld [vmem:[#allocation49_spill] sm:$0xff] }
 0x52c   :  { %v4482_v20 = vmax.f32 %v12491_v3, %v4390_v2  ;;  %v4391_v13 = vmax.f32 %v2484_v45, %v4279_v54  ;;  %v8052_v38 = vpop.f32.mrb[8].mxu0  ;;  %5169 = vmatpush1.bf16.msra.mxu1 %v9395_v4  ;;  %v2489_v4 = vmax.f32 %v13999_v27, 0.0  ;;  %v2487_v29 = vmax.f32 %v14000_v25, 0.0 }
 0x52d   :  { %v4485_v30 = vmax.f32 %v4389_v44, %v4393_v48  ;;  %v3964_v49 = vadd.f32 %v8448_v62, %v8052_v38  ;;  %v3955_v56 = vpop.f32.mrb[9].mxu0  ;;  %5170 = vmatprep.subr.bf16.mxu1 %v13618_v15  ;;  %v9388_v48 = vld [vmem:[#allocation2 + $0x140] sm:$0xff]   ;;  %v8451_v25 = vadd.f32 %v12399_v28, %v12131_v21 }
 0x52e   :  { %v4483_v5 = vmax.f32 %v4387_v24, %v4391_v13  ;;  %v12525_v57 = vpop.f32.mrb[24].mxu1  ;;  %v3956_v55 = vadd.f32 %v8446_v41, %v3955_v56  ;;  %v8053_v3 = vpop.f32.mrb[10].mxu0  ;;  %v9398_v41 = vld [vmem:[#allocation2 + $0xe0] sm:$0xff]  }
 0x52f   :  { %v12529_v46 = vpack.c.bf16 %v4485_v30, %v4484_v47  ;;  %v4284_v44 = vmax.f32 %v3964_v49, 0.0  ;;  %v3652_v18 = vpop.f32.mrb[25].mxu1  ;;  %v3967_v26 = vadd.f32 %v8449_v34, %v8053_v3  ;;  %v3958_v1 = vpop.f32.mrb[11].mxu0  ;;  %v2490_v47 = vmax.f32 %v14001_v60, 0.0 }
 0x530   :  { %v12532_v2 = vpack.c.bf16 %v4483_v5, %v4482_v20  ;;  %v4282_v24 = vmax.f32 %v3956_v55, 0.0  ;;  %v12535_v45 = vpop.f32.mrb[26].mxu1  ;;  %v3959_v54 = vadd.f32 %v8447_v19, %v3958_v1  ;;  %5171 = vmatpush1.bf16.msra.mxu1 %v9396_v53  ;;  %v14002_v20 = vld [vmem:[#allocation50_spill] sm:$0xff]  ;;  %v8452_v53 = vadd.f32 %v12399_v28, %v12141_v23  ;;  %v9390_v19 = vld [vmem:[#allocation2 + $0x148] sm:$0xff]  }
 0x531   :  { %v12537_v62 = vmax.f32 %v2489_v4, %v4284_v44  ;;  %v4285_v13 = vmax.f32 %v3967_v26, 0.0  ;;  %v3655_v38 = vpop.f32.mrb[27].mxu1  ;;  %5172 = vmatprep.subr.bf16.mxu1 %v13618_v15  ;;  %v2488_v49 = vmax.f32 %v14002_v20, 0.0  ;;  %v8450_v3 = vadd.f32 %v12399_v28, %v12125_v32  ;;  %v9400_v18 = vld [vmem:[#allocation2 + $0xe8] sm:$0xff]   ;;  %v14003_v32 = vld [vmem:[#allocation51_spill] sm:$0xff]  ;;  %v9392_v20 = vld [vmem:[#allocation2 + $0x150] sm:$0xff]  }
 0x532   :  { %v12541_v30 = vmax.f32 %v2487_v29, %v4282_v24  ;;  %v4283_v56 = vmax.f32 %v3959_v54, 0.0  ;;  %5035 = vmatprep.mubr.bf16.mxu1 %v12532_v2  ;;  %8138 = vmatprep.mubr.bf16.mxu0 %v12532_v2  ;;  %v8453_v44 = vadd.f32 %v12399_v28, %v12147_v52  ;;  %v2493_v29 = vmax.f32 %v14003_v32, 0.0  ;;  %v14004_v52 = vld [vmem:[#allocation52_spill] sm:$0xff] }
 0x533   :  { %v12546_v34 = vmax.f32 %v2490_v47, %v4285_v13  ;;  %5036 = vmatmul.mubr.bf16.gmra.mrb[104].mxu1 %v12482_v39  ;;  %8139 = vmatmul.mubr.bf16.vlgmr.msra.gmra.mrb[80].mxu0 %v12529_v46  ;;  %v2491_v47 = vmax.f32 %v14004_v52, 0.0 }
 0x534   :  { %v12552_v5 = vmax.f32 %v2488_v49, %v4283_v56  ;;  %v8056_v55 = vpop.f32.mrb[12].mxu0  ;;  %5043 = vmatprep.mubr.bf16.mxu1 %v12529_v46  ;;  %5815 = vmatpush1.bf16.msra.mxu0 %v9388_v48  ;;  %v14005_v56 = vld [vmem:[#allocation53_spill] sm:$0xff] }
 0x535   :  { %v3980_v27 = vadd.f32 %v8452_v53, %v8056_v55  ;;  %v3971_v4 = vpop.f32.mrb[13].mxu0  ;;  %5816 = vmatprep.subr.bf16.mxu0 %v13618_v15  ;;  %5173 = vmatpush1.bf16.msra.mxu1 %v9398_v41  ;;  %v2494_v53 = vmax.f32 %v14005_v56, 0.0 }
 0x536   :  { %v12560_v23 = vpop.f32.mrb[28].mxu1  ;;  %v3972_v26 = vadd.f32 %v8450_v3, %v3971_v4  ;;  %v8057_v1 = vpop.f32.mrb[14].mxu0  ;;  %5174 = vmatprep.subr.bf16.mxu1 %v13618_v15  ;;  %v9402_v3 = vld [vmem:[#allocation2 + $0xf0] sm:$0xff]  }
 0x537   :  { %v4288_v24 = vmax.f32 %v3980_v27, 0.0  ;;  %v3660_v54 = vpop.f32.mrb[29].mxu1  ;;  %v3983_v48 = vadd.f32 %v8453_v44, %v8057_v1  ;;  %v3974_v60 = vpop.f32.mrb[15].mxu0  ;;  %v14006_v4 = vld [vmem:[#allocation54_spill] sm:$0xff] }
 0x538   :  { %v4286_v13 = vmax.f32 %v3972_v26, 0.0  ;;  %v12567_v38 = vpop.f32.mrb[30].mxu1  ;;  %v3975_v41 = vadd.f32 %v8451_v25, %v3974_v60  ;;  %5817 = vmatpush1.bf16.msra.mxu0 %v9390_v19  ;;  %v2492_v44 = vmax.f32 %v14006_v4, 0.0  ;;  %v8456_v19 = vadd.f32 %v12399_v28, %v12173_v51  ;;  %v9394_v54 = vld [vmem:[#allocation2 + $0x158] sm:$0xff]  }
 0x539   :  { %v4400_v49 = vmax.f32 %v2493_v29, %v4288_v24  ;;  %v4289_v21 = vmax.f32 %v3983_v48, 0.0  ;;  %v3663_v55 = vpop.f32.mrb[31].mxu1  ;;  %5818 = vmatprep.subr.bf16.mxu0 %v13618_v15  ;;  %5175 = vmatpush1.bf16.msra.mxu1 %v9400_v18  ;;  %v8454_v18 = vadd.f32 %v12399_v28, %v12157_v33  ;;  %v9404_v51 = vld [vmem:[#allocation2 + $0xf8] sm:$0xff]   ;;  %v8455_v33 = vadd.f32 %v12399_v28, %v12163_v31  ;;  %v9397_v31 = vld [vmem:[#allocation2 + $0x160] sm:$0xff]  }
 0x53a   :  { %v4398_v27 = vmax.f32 %v2491_v47, %v4286_v13  ;;  %v4287_v1 = vmax.f32 %v3975_v41, 0.0  ;;  %5176 = vmatprep.subr.bf16.mxu1 %v13618_v15 }
 0x53b   :  { %v4488_v26 = vmax.f32 %v12537_v62, %v4400_v49  ;;  %v4401_v25 = vmax.f32 %v2494_v53, %v4289_v21  ;;  %5044 = vmatmul.mubr.bf16.gmra.mrb[108].mxu1 %v12479_v8  ;;  %v8457_v62 = vadd.f32 %v12399_v28, %v12179_v6 }
 0x53c   :  { %v4486_v32 = vmax.f32 %v12541_v30, %v4398_v27  ;;  %v4399_v29 = vmax.f32 %v2492_v44, %v4287_v1  ;;  %v8060_v24 = vpop.f32.mrb[16].mxu0  ;;  %5819 = vmatpush1.bf16.msra.mxu0 %v9392_v20  ;;  %v14008_v20 = vld [vmem:[#allocation55_spill] sm:$0xff] }
 0x53d   :  { %v4489_v48 = vmax.f32 %v12546_v34, %v4401_v25  ;;  %v3996_v60 = vadd.f32 %v8456_v19, %v8060_v24  ;;  %v3987_v52 = vpop.f32.mrb[17].mxu0  ;;  %5820 = vmatprep.subr.bf16.mxu0 %v13618_v15  ;;  %5177 = vmatpush1.bf16.msra.mxu1 %v9402_v3  ;;  %v2497_v49 = vmax.f32 %v14008_v20, 0.0 }
 0x53e   :  { %v4487_v30 = vmax.f32 %v12552_v5, %v4399_v29  ;;  %v12585_v47 = vpop.f32.mrb[32].mxu1  ;;  %v3988_v13 = vadd.f32 %v8454_v18, %v3987_v52  ;;  %v8061_v41 = vpop.f32.mrb[18].mxu0  ;;  %5178 = vmatprep.subr.bf16.mxu1 %v13618_v15  ;;  %v14010_v5 = vld [vmem:[#allocation56_spill] sm:$0xff]  ;;  %v8458_v52 = vadd.f32 %v12399_v28, %v12189_v35 }
 0x53f   :  { %v12590_v34 = vpack.c.bf16 %v4489_v48, %v4488_v26  ;;  %v4292_v6 = vmax.f32 %v3996_v60, 0.0  ;;  %v3668_v56 = vpop.f32.mrb[33].mxu1  ;;  %v3999_v53 = vadd.f32 %v8457_v62, %v8061_v41  ;;  %v3990_v21 = vpop.f32.mrb[19].mxu0  ;;  %v2495_v3 = vmax.f32 %v14010_v5, 0.0  ;;  %v14011_v26 = vld [vmem:[#allocation57_spill] sm:$0xff] }
 0x540   :  { %v12593_v55 = vpack.c.bf16 %v4487_v30, %v4486_v32  ;;  %v4290_v27 = vmax.f32 %v3988_v13, 0.0  ;;  %v12596_v4 = vpop.f32.mrb[34].mxu1  ;;  %v3991_v44 = vadd.f32 %v8455_v33, %v3990_v21  ;;  %5821 = vmatpush1.bf16.msra.mxu0 %v9394_v54  ;;  %v2498_v25 = vmax.f32 %v14011_v26, 0.0  ;;  %v14012_v32 = vld [vmem:[#allocation58_spill] sm:$0xff]  ;;  %v9399_v30 = vld [vmem:[#allocation2 + $0x168] sm:$0xff]  }
 0x541   :  { %14007 = vst [vmem:[#allocation119_spill] sm:$0xff] %v12590_v34  ;;  %v12598_v1 = vmax.f32 %v2497_v49, %v4292_v6  ;;  %v4293_v19 = vmax.f32 %v3999_v53, 0.0  ;;  %v3671_v29 = vpop.f32.mrb[35].mxu1  ;;  %5822 = vmatprep.subr.bf16.mxu0 %v13618_v15  ;;  %5179 = vmatpush1.bf16.msra.mxu1 %v9404_v51  ;;  %v2496_v18 = vmax.f32 %v14012_v32, 0.0  ;;  %v8460_v54 = vadd.f32 %v12399_v28, %v12206_v36  ;;  %v14013_v6 = vld [vmem:[#allocation59_spill] sm:$0xff] }
 0x542   :  { %14009 = vst [vmem:[#allocation117_spill] sm:$0xff] %v12593_v55  ;;  %v12602_v24 = vmax.f32 %v2495_v3, %v4290_v27  ;;  %v4291_v48 = vmax.f32 %v3991_v44, 0.0  ;;  %5051 = vmatprep.mubr.bf16.mxu1 %v12593_v55  ;;  %8142 = vmatprep.mubr.bf16.mxu0 %v12593_v55  ;;  %v8461_v13 = vadd.f32 %v12399_v28, %v12212_v43  ;;  %v2501_v56 = vmax.f32 %v14013_v6, 0.0  ;;  %v14014_v27 = vld [vmem:[#allocation60_spill] sm:$0xff] }
 0x543   :  { %v4405_v60 = vmax.f32 %v2498_v25, %v4293_v19  ;;  %5052 = vmatmul.mubr.bf16.gmra.mrb[112].mxu1 %v12532_v2  ;;  %8143 = vmatmul.mubr.bf16.gmra.mrb[84].mxu0 %v12590_v34  ;;  %v8459_v36 = vadd.f32 %v12399_v28, %v12195_v37  ;;  %v2499_v44 = vmax.f32 %v14014_v27, 0.0  ;;  %v9401_v25 = vld [vmem:[#allocation2 + $0x170] sm:$0xff]   ;;  %v14015_v37 = vld [vmem:[#allocation61_spill] sm:$0xff] }
 0x544   :  { %v4403_v62 = vmax.f32 %v2496_v18, %v4291_v48  ;;  %v8064_v51 = vpop.f32.mrb[20].mxu0  ;;  %5059 = vmatprep.mubr.bf16.mxu1 %v12590_v34  ;;  %5823 = vmatpush1.bf16.msra.mxu0 %v9397_v31  ;;  %v2502_v29 = vmax.f32 %v14015_v37, 0.0 }
 0x545   :  { %v4012_v41 = vadd.f32 %v8460_v54, %v8064_v51  ;;  %v4003_v33 = vpop.f32.mrb[21].mxu0  ;;  %5824 = vmatprep.subr.bf16.mxu0 %v13618_v15  ;;  %v14016_v54 = vld [vmem:[#allocation62_spill] sm:$0xff] }
 0x546   :  { %v12619_v20 = vpop.f32.mrb[36].mxu1  ;;  %v4004_v49 = vadd.f32 %v8458_v52, %v4003_v33  ;;  %v8065_v35 = vpop.f32.mrb[22].mxu0  ;;  %v2500_v52 = vmax.f32 %v14016_v54, 0.0 }
 0x547   :  { %v4296_v53 = vmax.f32 %v4012_v41, 0.0  ;;  %v3676_v21 = vpop.f32.mrb[37].mxu1  ;;  %v4015_v5 = vadd.f32 %v8461_v13, %v8065_v35  ;;  %v4006_v3 = vpop.f32.mrb[23].mxu0  ;;  %v14017_v13 = vld [vmem:[#allocation143_spill] sm:$0xff] }
 0x548   :  { %v4294_v43 = vmax.f32 %v4004_v49, 0.0  ;;  %v12623_v31 = vpop.f32.mrb[38].mxu1  ;;  %v4007_v26 = vadd.f32 %v8459_v36, %v4006_v3  ;;  %5825 = vmatpush1.bf16.msra.mxu0 %v9399_v30  ;;  %v8464_v41 = vadd.f32 %v12399_v28, %v14017_v13  ;;  %v14018_v30 = vld [vmem:[#allocation141_spill] sm:$0xff]  ;;  %v14019_v21 = vld [vmem:[#allocation144_spill] sm:$0xff] }
 0x549   :  { %v4408_v19 = vmax.f32 %v2501_v56, %v4296_v53  ;;  %v4297_v32 = vmax.f32 %v4015_v5, 0.0  ;;  %v3679_v18 = vpop.f32.mrb[39].mxu1  ;;  %5826 = vmatprep.subr.bf16.mxu0 %v13618_v15  ;;  %v8462_v36 = vadd.f32 %v12399_v28, %v14018_v30  ;;  %v9403_v53 = vld [vmem:[#allocation2 + $0x178] sm:$0xff]   ;;  %v8465_v5 = vadd.f32 %v12399_v28, %v14019_v21  ;;  %v9405_v30 = vld [vmem:[#allocation2 + $0x180] sm:$0xff]  }
 0x54a   :  { %v4406_v48 = vmax.f32 %v2499_v44, %v4294_v43  ;;  %v4295_v51 = vmax.f32 %v4007_v26, 0.0 }
 0x54b   :  { %v4492_v33 = vmax.f32 %v12598_v1, %v4408_v19  ;;  %v4409_v49 = vmax.f32 %v2502_v29, %v4297_v32  ;;  %5060 = vmatmul.mubr.bf16.gmra.mrb[116].mxu1 %v12529_v46  ;;  %v14020_v1 = vld [vmem:[#allocation142_spill] sm:$0xff] }
 0x54c   :  { %v4490_v35 = vmax.f32 %v12602_v24, %v4406_v48  ;;  %v4407_v6 = vmax.f32 %v2500_v52, %v4295_v51  ;;  %v8068_v56 = vpop.f32.mrb[24].mxu0  ;;  %5827 = vmatpush1.bf16.msra.mxu0 %v9401_v25  ;;  %v8463_v43 = vadd.f32 %v12399_v28, %v14020_v1  ;;  %v14021_v25 = vld [vmem:[#allocation63_spill] sm:$0xff]  ;;  %v14023_v51 = vld [vmem:[#allocation64_spill] sm:$0xff] }
 0x54d   :  { %v4493_v3 = vmax.f32 %v4405_v60, %v4409_v49  ;;  %v4028_v27 = vadd.f32 %v8464_v41, %v8068_v56  ;;  %v4019_v44 = vpop.f32.mrb[25].mxu0  ;;  %5828 = vmatprep.subr.bf16.mxu0 %v13618_v15  ;;  %v2505_v32 = vmax.f32 %v14021_v25, 0.0  ;;  %v2503_v13 = vmax.f32 %v14023_v51, 0.0  ;;  %v9406_v25 = vld [vmem:[#allocation2 + $0x188] sm:$0xff]  }
 0x54e   :  { %v4491_v26 = vmax.f32 %v4403_v62, %v4407_v6  ;;  %v12640_v19 = vpop.f32.mrb[40].mxu1  ;;  %v4020_v37 = vadd.f32 %v8462_v36, %v4019_v44  ;;  %v8069_v24 = vpop.f32.mrb[26].mxu0  ;;  %v14026_v44 = vld [vmem:[#allocation147_spill] sm:$0xff] }
 0x54f   :  { %v12642_v29 = vpack.c.bf16 %v4493_v3, %v4492_v33  ;;  %v4300_v18 = vmax.f32 %v4028_v27, 0.0  ;;  %v3684_v48 = vpop.f32.mrb[41].mxu1  ;;  %v4031_v54 = vadd.f32 %v8465_v5, %v8069_v24  ;;  %v4022_v60 = vpop.f32.mrb[27].mxu0  ;;  %v14024_v33 = vld [vmem:[#allocation65_spill] sm:$0xff] }
 0x550   :  { %v12645_v52 = vpack.c.bf16 %v4491_v26, %v4490_v35  ;;  %v4298_v41 = vmax.f32 %v4020_v37, 0.0  ;;  %v12648_v49 = vpop.f32.mrb[42].mxu1  ;;  %v4023_v62 = vadd.f32 %v8463_v43, %v4022_v60  ;;  %5829 = vmatpush1.bf16.msra.mxu0 %v9403_v53  ;;  %v2506_v6 = vmax.f32 %v14024_v33, 0.0  ;;  %v14025_v35 = vld [vmem:[#allocation66_spill] sm:$0xff]  ;;  %v14027_v43 = vld [vmem:[#allocation145_spill] sm:$0xff]  ;;  %v14030_v33 = vld [vmem:[#allocation67_spill] sm:$0xff] }
 0x551   :  { %v12650_v36 = vmax.f32 %v2505_v32, %v4300_v18  ;;  %v4301_v56 = vmax.f32 %v4031_v54, 0.0  ;;  %v3687_v21 = vpop.f32.mrb[43].mxu1  ;;  %5830 = vmatprep.subr.bf16.mxu0 %v13618_v15  ;;  %v2504_v3 = vmax.f32 %v14025_v35, 0.0  ;;  %v8468_v53 = vadd.f32 %v12399_v28, %v14026_v44  ;;  %v14028_v32 = vld [vmem:[#allocation148_spill] sm:$0xff]  ;;  %v14029_v60 = vld [vmem:[#allocation146_spill] sm:$0xff] }
 0x552   :  { %14022 = vst [vmem:[#allocation15_spill] sm:$0xff] %v12645_v52  ;;  %v12654_v5 = vmax.f32 %v2503_v13, %v4298_v41  ;;  %v4299_v27 = vmax.f32 %v4023_v62, 0.0  ;;  %5067 = vmatprep.mubr.bf16.mxu1 %v12645_v52  ;;  %8146 = vmatprep.mubr.bf16.mxu0 %v12645_v52  ;;  %v8466_v26 = vadd.f32 %v12399_v28, %v14027_v43 }
 0x553   :  { %v4413_v1 = vmax.f32 %v2506_v6, %v4301_v56  ;;  %5068 = vmatmul.mubr.bf16.gmra.mrb[120].mxu1 %v12593_v55  ;;  %8147 = vmatmul.mubr.bf16.gmra.mrb[88].mxu0 %v12642_v29  ;;  %v8469_v18 = vadd.f32 %v12399_v28, %v14028_v32  ;;  %v8467_v51 = vadd.f32 %v12399_v28, %v14029_v60  ;;  %v2509_v6 = vmax.f32 %v14030_v33, 0.0  ;;  %v14032_v60 = vld [vmem:[#allocation68_spill] sm:$0xff] }
 0x554   :  { %v4411_v37 = vmax.f32 %v2504_v3, %v4299_v27  ;;  %v8072_v24 = vpop.f32.mrb[28].mxu0  ;;  %5075 = vmatprep.mubr.bf16.mxu1 %v12642_v29  ;;  %5831 = vmatpush1.bf16.msra.mxu0 %v9405_v30  ;;  %v14031_v3 = vld [vmem:[#allocation121_spill] sm:$0xff]  ;;  %v2510_v16 = vmax.f32 %v14032_v60, 0.0 }
 0x555   :  { %v4044_v48 = vadd.f32 %v8468_v53, %v8072_v24  ;;  %v4035_v54 = vpop.f32.mrb[29].mxu0  ;;  %5832 = vmatprep.subr.bf16.mxu0 %v13618_v15  ;;  %v2507_v27 = vmax.f32 %v14031_v3, 0.0  ;;  %v9407_v24 = vld [vmem:[#allocation2 + $0x190] sm:$0xff]  }
 0x556   :  { %v12671_v13 = vpop.f32.mrb[44].mxu1  ;;  %v4036_v41 = vadd.f32 %v8466_v26, %v4035_v54  ;;  %v8073_v62 = vpop.f32.mrb[30].mxu0 }
 0x557   :  { %v4304_v56 = vmax.f32 %v4044_v48, 0.0  ;;  %v3692_v21 = vpop.f32.mrb[45].mxu1  ;;  %v4047_v30 = vadd.f32 %v8469_v18, %v8073_v62  ;;  %v4038_v35 = vpop.f32.mrb[31].mxu0  ;;  %v14033_v48 = vld [vmem:[#allocation69_spill] sm:$0xff]  ;;  %v14034_v62 = vld [vmem:[#allocation114_spill] sm:$0xff] }
 0x558   :  { %v4302_v44 = vmax.f32 %v4036_v41, 0.0  ;;  %v12675_v53 = vpop.f32.mrb[46].mxu1  ;;  %v4039_v43 = vadd.f32 %v8467_v51, %v4038_v35  ;;  %5833 = vmatpush1.bf16.msra.mxu0 %v9406_v25  ;;  %v2508_v33 = vmax.f32 %v14033_v48, 0.0  ;;  %v8472_v21 = vadd.f32 %v12399_v28, %v14034_v62  ;;  %v14035_v25 = vld [vmem:[#allocation149_spill] sm:$0xff]  ;;  %v9408_v35 = vld [vmem:[#allocation2 + $0x198] sm:$0xff]  }
 0x559   :  { %v4416_v32 = vmax.f32 %v2509_v6, %v4304_v56  ;;  %v4305_v7 = vmax.f32 %v4047_v30, 0.0  ;;  %v3695_v26 = vpop.f32.mrb[47].mxu1  ;;  %5834 = vmatprep.subr.bf16.mxu0 %v13618_v15  ;;  %v8470_v51 = vadd.f32 %v12399_v28, %v14035_v25 }
 0x55a   :  { %v4414_v54 = vmax.f32 %v2507_v27, %v4302_v44  ;;  %v4303_v18 = vmax.f32 %v4039_v43, 0.0  ;;  %v14036_v27 = vld [vmem:[#allocation112_spill] sm:$0xff] }
 0x55b   :  { %v4496_v41 = vmax.f32 %v12650_v36, %v4416_v32  ;;  %v4417_v3 = vmax.f32 %v2510_v16, %v4305_v7  ;;  %5076 = vmatmul.mubr.bf16.gmra.mrb[124].mxu1 %v12590_v34  ;;  %v8473_v44 = vadd.f32 %v12399_v28, %v14036_v27  ;;  %v14037_v16 = vld [vmem:[#allocation150_spill] sm:$0xff] }
 0x55c   :  { %v4494_v6 = vmax.f32 %v12654_v5, %v4414_v54  ;;  %v4415_v56 = vmax.f32 %v2508_v33, %v4303_v18  ;;  %v8076_v30 = vpop.f32.mrb[32].mxu0  ;;  %5835 = vmatpush1.bf16.msra.mxu0 %v9407_v24  ;;  %v8471_v7 = vadd.f32 %v12399_v28, %v14037_v16  ;;  %v14038_v24 = vld [vmem:[#allocation70_spill] sm:$0xff] }
 0x55d   :  { %v4497_v43 = vmax.f32 %v4413_v1, %v4417_v3  ;;  %v4060_v60 = vadd.f32 %v8472_v21, %v8076_v30  ;;  %v4051_v26 = vpop.f32.mrb[33].mxu0  ;;  %5836 = vmatprep.subr.bf16.mxu0 %v13618_v15  ;;  %v2513_v33 = vmax.f32 %v14038_v24, 0.0  ;;  %v14040_v3 = vld [vmem:[#allocation126_spill] sm:$0xff] }
 0x55e   :  { %v4495_v36 = vmax.f32 %v4411_v37, %v4415_v56  ;;  %v12692_v32 = vpop.f32.mrb[48].mxu1  ;;  %v4052_v48 = vadd.f32 %v8470_v51, %v4051_v26  ;;  %v8077_v5 = vpop.f32.mrb[34].mxu0  ;;  %v2511_v30 = vmax.f32 %v14040_v3, 0.0  ;;  %v9409_v56 = vld [vmem:[#allocation2 + $0x1a0] sm:$0xff]  }
 0x55f   :  { %v12694_v54 = vpack.c.bf16 %v4497_v43, %v4496_v41  ;;  %v4308_v18 = vmax.f32 %v4060_v60, 0.0  ;;  %v3700_v62 = vpop.f32.mrb[49].mxu1  ;;  %v4063_v25 = vadd.f32 %v8473_v44, %v8077_v5  ;;  %v4054_v1 = vpop.f32.mrb[35].mxu0  ;;  %v14041_v41 = vld [vmem:[#allocation71_spill] sm:$0xff] }
 0x560   :  { %v12697_v21 = vpack.c.bf16 %v4495_v36, %v4494_v6  ;;  %v4306_v27 = vmax.f32 %v4052_v48, 0.0  ;;  %v12700_v9 = vpop.f32.mrb[50].mxu1  ;;  %v4055_v37 = vadd.f32 %v8471_v7, %v4054_v1  ;;  %5837 = vmatpush1.bf16.msra.mxu0 %v9408_v35  ;;  %v2514_v43 = vmax.f32 %v14041_v41, 0.0  ;;  %v14042_v6 = vld [vmem:[#allocation128_spill] sm:$0xff]  ;;  %v14043_v7 = vld [vmem:[#allocation13_spill] sm:$0xff]  ;;  %v14044_v5 = vld [vmem:[#allocation115_spill] sm:$0xff] }
 0x561   :  { %v12702_v51 = vmax.f32 %v2513_v33, %v4308_v18  ;;  %v4309_v26 = vmax.f32 %v4063_v25, 0.0  ;;  %v3703_v16 = vpop.f32.mrb[51].mxu1  ;;  %5838 = vmatprep.subr.bf16.mxu0 %v13618_v15  ;;  %v2512_v60 = vmax.f32 %v14042_v6, 0.0  ;;  %v8476_v35 = vadd.f32 %v12399_v28, %v14043_v7  ;;  %v9410_v62 = vld [vmem:[#allocation2 + $0x1a8] sm:$0xff]  }
 0x562   :  { %14039 = vst [vmem:[#allocation16_spill] sm:$0xff] %v12697_v21  ;;  %v12706_v44 = vmax.f32 %v2511_v30, %v4306_v27  ;;  %v4307_v36 = vmax.f32 %v4055_v37, 0.0  ;;  %5083 = vmatprep.mubr.bf16.mxu1 %v12697_v21  ;;  %8150 = vmatprep.mubr.bf16.mxu0 %v12697_v21  ;;  %v8474_v24 = vadd.f32 %v12399_v28, %v14044_v5  ;;  %v14045_v30 = vld [vmem:[#allocation111_spill] sm:$0xff]  ;;  %v14047_v7 = vld [vmem:[#allocation73_spill] sm:$0xff] }
 0x563   :  { %v4421_v48 = vmax.f32 %v2514_v43, %v4309_v26  ;;  %5084 = vmatmul.mubr.bf16.gmra.mrb[128].mxu1 %v12645_v52  ;;  %8151 = vmatmul.mubr.bf16.gmra.mrb[92].mxu0 %v12694_v54  ;;  %v8477_v25 = vadd.f32 %v12399_v28, %v12361_v42  ;;  %v8475_v27 = vadd.f32 %v12399_v28, %v14045_v30  ;;  %v14046_v26 = vld [vmem:[#allocation72_spill] sm:$0xff]  ;;  %v2515_v5 = vmax.f32 %v14047_v7, 0.0  ;;  %v9411_v52 = vld [vmem:[#allocation2 + $0x1b0] sm:$0xff]  }
 0x564   :  { %v4419_v33 = vmax.f32 %v2512_v60, %v4307_v36  ;;  %v8080_v18 = vpop.f32.mrb[36].mxu0  ;;  %5091 = vmatprep.mubr.bf16.mxu1 %v12694_v54  ;;  %5839 = vmatpush1.bf16.msra.mxu0 %v9409_v56  ;;  %v2517_v16 = vmax.f32 %v14046_v26, 0.0  ;;  %v14048_v28 = vld [vmem:[#allocation74_spill] sm:$0xff] }
 0x565   :  { %v4076_v1 = vadd.f32 %v8476_v35, %v8080_v18  ;;  %v4067_v3 = vpop.f32.mrb[37].mxu0  ;;  %5840 = vmatprep.subr.bf16.mxu0 %v13618_v15  ;;  %v2518_v30 = vmax.f32 %v14048_v28, 0.0 }
 0x566   :  { %v12723_v37 = vpop.f32.mrb[52].mxu1  ;;  %v4068_v41 = vadd.f32 %v8474_v24, %v4067_v3  ;;  %v8081_v43 = vpop.f32.mrb[38].mxu0 }
 0x567   :  { %v4312_v6 = vmax.f32 %v4076_v1, 0.0  ;;  %v3708_v60 = vpop.f32.mrb[53].mxu1  ;;  %v4079_v56 = vadd.f32 %v8477_v25, %v8081_v43  ;;  %v4070_v36 = vpop.f32.mrb[39].mxu0  ;;  %v14049_v1 = vld [vmem:[#allocation75_spill] sm:$0xff] }
 0x568   :  { %v4310_v42 = vmax.f32 %v4068_v41, 0.0  ;;  %v12727_v35 = vpop.f32.mrb[54].mxu1  ;;  %v4071_v18 = vadd.f32 %v8475_v27, %v4070_v36  ;;  %5841 = vmatpush1.bf16.msra.mxu0 %v9410_v62  ;;  %v2516_v26 = vmax.f32 %v14049_v1, 0.0  ;;  %v12735_v41 = vld [vmem:[%s13576_s6] ss:$0 sm:$0xff]  ;;  %v9412_v36 = vld [vmem:[#allocation2 + $0x1b8] sm:$0xff]  }
 0x569   :  { %v4424_v34 = vmax.f32 %v2517_v16, %v4312_v6  ;;  %v4313_v55 = vmax.f32 %v4079_v56, 0.0  ;;  %v3711_v24 = vpop.f32.mrb[55].mxu1  ;;  %5842 = vmatprep.subr.bf16.mxu0 %v13618_v15  ;;  %v8480_v62 = vadd.f32 %v12735_v41, %v12404_v22  ;;  %v8478_v16 = vadd.f32 %v12735_v41, %v12371_v14 }
 0x56a   :  { %v4422_v3 = vmax.f32 %v2515_v5, %v4310_v42  ;;  %v4311_v25 = vmax.f32 %v4071_v18, 0.0  ;;  %v8481_v7 = vadd.f32 %v12735_v41, %v12410_v61 }
 0x56b   :  { %v4500_v27 = vmax.f32 %v12702_v51, %v4424_v34  ;;  %v4425_v43 = vmax.f32 %v2518_v30, %v4313_v55  ;;  %5092 = vmatmul.mubr.bf16.gmra.mrb[132].mxu1 %v12642_v29  ;;  %v14050_v34 = vld [vmem:[#allocation116_spill] sm:$0xff] }
 0x56c   :  { %v4498_v6 = vmax.f32 %v12706_v44, %v4422_v3  ;;  %v4423_v60 = vmax.f32 %v2516_v26, %v4311_v25  ;;  %v8084_v56 = vpop.f32.mrb[40].mxu0  ;;  %5843 = vmatpush1.bf16.msra.mxu0 %v9411_v52  ;;  %v8479_v55 = vadd.f32 %v12735_v41, %v14050_v34  ;;  %v14051_v52 = vld [vmem:[#allocation76_spill] sm:$0xff]  ;;  %v14052_v26 = vld [vmem:[#allocation77_spill] sm:$0xff] }
 0x56d   :  { %v4501_v5 = vmax.f32 %v4421_v48, %v4425_v43  ;;  %v4092_v42 = vadd.f32 %v8480_v62, %v8084_v56  ;;  %v4083_v22 = vpop.f32.mrb[41].mxu0  ;;  %5844 = vmatprep.subr.bf16.mxu0 %v13618_v15  ;;  %v2521_v30 = vmax.f32 %v14051_v52, 0.0  ;;  %v2519_v25 = vmax.f32 %v14052_v26, 0.0 }
 0x56e   :  { %v4499_v51 = vmax.f32 %v4419_v33, %v4423_v60  ;;  %v12749_v18 = vpop.f32.mrb[56].mxu1  ;;  %v4084_v14 = vadd.f32 %v8478_v16, %v4083_v22  ;;  %v8085_v44 = vpop.f32.mrb[42].mxu0  ;;  %v14053_v16 = vld [vmem:[#allocation78_spill] sm:$0xff]  ;;  %v14054_v22 = vld [vmem:[#allocation79_spill] sm:$0xff] }
 0x56f   :  { %v12751_v28 = vpack.c.bf16 %v4501_v5, %v4500_v27  ;;  %v4316_v24 = vmax.f32 %v4092_v42, 0.0  ;;  %v3716_v3 = vpop.f32.mrb[57].mxu1  ;;  %v4095_v61 = vadd.f32 %v8481_v7, %v8085_v44  ;;  %v4086_v48 = vpop.f32.mrb[43].mxu0  ;;  %v2522_v56 = vmax.f32 %v14053_v16, 0.0  ;;  %v14056_v16 = vld [vmem:[#allocation133_spill] sm:$0xff] }
 0x570   :  { %v12754_v1 = vpack.c.bf16 %v4499_v51, %v4498_v6  ;;  %v4314_v62 = vmax.f32 %v4084_v14, 0.0  ;;  %v12757_v43 = vpop.f32.mrb[58].mxu1  ;;  %v4087_v33 = vadd.f32 %v8479_v55, %v4086_v48  ;;  %5845 = vmatpush1.bf16.msra.mxu0 %v9412_v36  ;;  %v2520_v7 = vmax.f32 %v14054_v22, 0.0  ;;  %v14055_v48 = vld [vmem:[#allocation80_spill] sm:$0xff] }
 0x571   :  { %v4428_v60 = vmax.f32 %v2521_v30, %v4316_v24  ;;  %v4317_v27 = vmax.f32 %v4095_v61, 0.0  ;;  %v3719_v5 = vpop.f32.mrb[59].mxu1  ;;  %6007 = vmatprep.subr.bf16.mxu0 %v13618_v15  ;;  %v8484_v6 = vadd.f32 %v12735_v41, %v12454_v11  ;;  %v8482_v36 = vadd.f32 %v12735_v41, %v12425_v59 }
 0x572   :  { %v4426_v42 = vmax.f32 %v2519_v25, %v4314_v62  ;;  %v4315_v34 = vmax.f32 %v4087_v33, 0.0  ;;  %5099 = vmatprep.mubr.bf16.mxu1 %v12754_v1  ;;  %8154 = vmatprep.mubr.bf16.mxu0 %v12754_v1  ;;  %v8485_v44 = vadd.f32 %v12735_v41, %v12460_v63  ;;  %v8483_v11 = vadd.f32 %v12735_v41, %v12435_v17 }
 0x573   :  { %v4429_v55 = vmax.f32 %v2522_v56, %v4317_v27  ;;  %5100 = vmatmul.mubr.bf16.gmra.mrb[136].mxu1 %v12697_v21  ;;  %8155 = vmatmul.mubr.bf16.gmra.mrb[96].mxu0 %v12751_v28  ;;  %v2525_v26 = vmax.f32 %v14055_v48, 0.0  ;;  %v2523_v56 = vmax.f32 %v14056_v16, 0.0  ;;  %v8487_v16 = vadd.f32 %v12735_v41, %v12485_v0 }
 0x574   :  { %v4427_v51 = vmax.f32 %v2520_v7, %v4315_v34  ;;  %v8088_v14 = vpop.f32.mrb[44].mxu0  ;;  %5107 = vmatprep.mubr.bf16.mxu1 %v12751_v28  ;;  %v14057_v7 = vld [vmem:[#allocation135_spill] sm:$0xff] }
 0x575   :  { %v4108_v52 = vadd.f32 %v8484_v6, %v8088_v14  ;;  %v4099_v30 = vpop.f32.mrb[45].mxu0  ;;  %v2526_v34 = vmax.f32 %v14057_v7, 0.0 }
 0x576   :  { %v12775_v24 = vpop.f32.mrb[60].mxu1  ;;  %v4100_v3 = vadd.f32 %v8482_v36, %v4099_v30  ;;  %v8089_v61 = vpop.f32.mrb[46].mxu0  ;;  %v14058_v36 = vld [vmem:[#allocation134_spill] sm:$0xff] }
 0x577   :  { %v4320_v25 = vmax.f32 %v4108_v52, 0.0  ;;  %v3724_v59 = vpop.f32.mrb[61].mxu1  ;;  %v4111_v62 = vadd.f32 %v8485_v44, %v8089_v61  ;;  %v4102_v33 = vpop.f32.mrb[47].mxu0  ;;  %v2524_v30 = vmax.f32 %v14058_v36, 0.0  ;;  %v8488_v52 = vadd.f32 %v12735_v41, %v12504_v58  ;;  %v14061_v36 = vld [vmem:[#allocation83_spill] sm:$0xff] }
 0x578   :  { %v4318_v27 = vmax.f32 %v4100_v3, 0.0  ;;  %v12779_v5 = vpop.f32.mrb[62].mxu1  ;;  %v4103_v63 = vadd.f32 %v8483_v11, %v4102_v33  ;;  %v8486_v3 = vadd.f32 %v12735_v41, %v12475_v10  ;;  %v14059_v10 = vld [vmem:[#allocation81_spill] sm:$0xff] }
 0x579   :  { %v4432_v22 = vmax.f32 %v2525_v26, %v4320_v25  ;;  %v4321_v17 = vmax.f32 %v4111_v62, 0.0  ;;  %v3727_v6 = vpop.f32.mrb[63].mxu1  ;;  %v8489_v25 = vadd.f32 %v12735_v41, %v12510_v12 }
 0x57a   :  { %v4430_v14 = vmax.f32 %v2523_v56, %v4318_v27  ;;  %v4319_v21 = vmax.f32 %v4103_v63, 0.0 }
 0x57b   :  { %v4504_v44 = vmax.f32 %v4428_v60, %v4432_v22  ;;  %v4433_v61 = vmax.f32 %v2526_v34, %v4321_v17  ;;  %5108 = vmatmul.mubr.bf16.gmra.mrb[140].mxu1 %v12694_v54 }
 0x57c   :  { %v4502_v11 = vmax.f32 %v4426_v42, %v4430_v14  ;;  %v4431_v48 = vmax.f32 %v2524_v30, %v4319_v21  ;;  %v8092_v26 = vpop.f32.mrb[48].mxu0  ;;  %v2529_v42 = vmax.f32 %v14059_v10, 0.0  ;;  %v2530_v30 = vmax.f32 %v14061_v36, 0.0 }
 0x57d   :  { %v4505_v59 = vmax.f32 %v4429_v55, %v4433_v61  ;;  %v4124_v62 = vadd.f32 %v8488_v52, %v8092_v26  ;;  %v4115_v33 = vpop.f32.mrb[49].mxu0  ;;  %v14060_v55 = vld [vmem:[#allocation82_spill] sm:$0xff] }
 0x57e   :  { %v4503_v58 = vmax.f32 %v4427_v51, %v4431_v48  ;;  %v12792_v60 = vpop.f32.mrb[64].mxu1  ;;  %v4116_v56 = vadd.f32 %v8486_v3, %v4115_v33  ;;  %v8093_v27 = vpop.f32.mrb[50].mxu0  ;;  %v2527_v17 = vmax.f32 %v14060_v55, 0.0  ;;  %v14062_v3 = vld [vmem:[#allocation84_spill] sm:$0xff] }
 0x57f   :  { %v12794_v63 = vpack.c.bf16 %v4505_v59, %v4504_v44  ;;  %v4324_v21 = vmax.f32 %v4124_v62, 0.0  ;;  %v3732_v22 = vpop.f32.mrb[65].mxu1  ;;  %v4127_v7 = vadd.f32 %v8489_v25, %v8093_v27  ;;  %v4118_v34 = vpop.f32.mrb[51].mxu0  ;;  %v2528_v48 = vmax.f32 %v14062_v3, 0.0 }
 0x580   :  { %v12797_v12 = vpack.c.bf16 %v4503_v58, %v4502_v11  ;;  %v4322_v6 = vmax.f32 %v4116_v56, 0.0  ;;  %v12800_v14 = vpop.f32.mrb[66].mxu1  ;;  %v4119_v0 = vadd.f32 %v8487_v16, %v4118_v34  ;;  %v8492_v11 = vadd.f32 %v12735_v41, %v12560_v23 }
 0x581   :  { %v4436_v51 = vmax.f32 %v2529_v42, %v4324_v21  ;;  %v4325_v52 = vmax.f32 %v4127_v7, 0.0  ;;  %v3735_v44 = vpop.f32.mrb[67].mxu1  ;;  %v8490_v59 = vadd.f32 %v12735_v41, %v12525_v57  ;;  %v8493_v16 = vadd.f32 %v12735_v41, %v12567_v38  ;;  %v14063_v21 = vld [vmem:[#allocation85_spill] sm:$0xff] }
 0x582   :  { %v4434_v61 = vmax.f32 %v2527_v17, %v4322_v6  ;;  %v4323_v26 = vmax.f32 %v4119_v0, 0.0  ;;  %5115 = vmatprep.mubr.bf16.mxu1 %v12797_v12  ;;  %8158 = vmatprep.mubr.bf16.mxu0 %v12797_v12  ;;  %v8491_v23 = vadd.f32 %v12735_v41, %v12535_v45  ;;  %v2533_v22 = vmax.f32 %v14063_v21, 0.0  ;;  %v14064_v17 = vld [vmem:[#allocation86_spill] sm:$0xff] }
 0x583   :  { %v4437_v25 = vmax.f32 %v2530_v30, %v4325_v52  ;;  %5116 = vmatmul.mubr.bf16.gmra.mrb[144].mxu1 %v12754_v1  ;;  %8159 = vmatmul.mubr.bf16.gmra.mrb[100].mxu0 %v12794_v63  ;;  %v2531_v6 = vmax.f32 %v14064_v17, 0.0  ;;  %v14065_v52 = vld [vmem:[#allocation87_spill] sm:$0xff]  ;;  %v8497_v21 = vadd.f32 %v12735_v41, %v12623_v31 }
 0x584   :  { %v4435_v62 = vmax.f32 %v2528_v48, %v4323_v26  ;;  %v8096_v33 = vpop.f32.mrb[52].mxu0  ;;  %5123 = vmatprep.mubr.bf16.mxu1 %v12794_v63  ;;  %v2534_v44 = vmax.f32 %v14065_v52, 0.0  ;;  %v14066_v26 = vld [vmem:[#allocation88_spill] sm:$0xff] }
 0x585   :  { %v4140_v58 = vadd.f32 %v8492_v11, %v8096_v33  ;;  %v4131_v56 = vpop.f32.mrb[53].mxu0  ;;  %v2532_v11 = vmax.f32 %v14066_v26, 0.0  ;;  %v8496_v33 = vadd.f32 %v12735_v41, %v12619_v20 }
 0x586   :  { %v12817_v27 = vpop.f32.mrb[68].mxu1  ;;  %v4132_v10 = vadd.f32 %v8490_v59, %v4131_v56  ;;  %v8097_v42 = vpop.f32.mrb[54].mxu0  ;;  %v8494_v56 = vadd.f32 %v12735_v41, %v12585_v47  ;;  %v14067_v47 = vld [vmem:[#allocation89_spill] sm:$0xff] }
 0x587   :  { %v4328_v7 = vmax.f32 %v4140_v58, 0.0  ;;  %v3740_v57 = vpop.f32.mrb[69].mxu1  ;;  %v4143_v34 = vadd.f32 %v8493_v16, %v8097_v42  ;;  %v4134_v55 = vpop.f32.mrb[55].mxu0 }
 0x588   :  { %v4326_v0 = vmax.f32 %v4132_v10, 0.0  ;;  %v12821_v36 = vpop.f32.mrb[70].mxu1  ;;  %v4135_v38 = vadd.f32 %v8491_v23, %v4134_v55 }
 0x589   :  { %v4440_v30 = vmax.f32 %v2533_v22, %v4328_v7  ;;  %v4329_v45 = vmax.f32 %v4143_v34, 0.0  ;;  %v3743_v3 = vpop.f32.mrb[71].mxu1  ;;  %v8495_v34 = vadd.f32 %v12735_v41, %v12596_v4 }
 0x58a   :  { %v4438_v48 = vmax.f32 %v2531_v6, %v4326_v0  ;;  %v4327_v59 = vmax.f32 %v4135_v38, 0.0 }
 0x58b   :  { %v4508_v16 = vmax.f32 %v4436_v51, %v4440_v30  ;;  %v4441_v58 = vmax.f32 %v2534_v44, %v4329_v45  ;;  %5124 = vmatmul.mubr.bf16.gmra.mrb[148].mxu1 %v12751_v28 }
 0x58c   :  { %v4506_v23 = vmax.f32 %v4434_v61, %v4438_v48  ;;  %v4439_v10 = vmax.f32 %v2532_v11, %v4327_v59  ;;  %v8100_v42 = vpop.f32.mrb[56].mxu0  ;;  %v2537_v61 = vmax.f32 %v14067_v47, 0.0  ;;  %v14069_v48 = vld [vmem:[#allocation90_spill] sm:$0xff]  ;;  %v14071_v47 = vld [vmem:[#allocation92_spill] sm:$0xff] }
 0x58d   :  { %v4509_v22 = vmax.f32 %v4437_v25, %v4441_v58  ;;  %v4156_v7 = vadd.f32 %v8496_v33, %v8100_v42  ;;  %v4147_v57 = vpop.f32.mrb[57].mxu0  ;;  %v14068_v25 = vld [vmem:[#allocation139_spill] sm:$0xff]  ;;  %v2538_v26 = vmax.f32 %v14069_v48, 0.0  ;;  %v8498_v42 = vadd.f32 %v12735_v41, %v12640_v19  ;;  %v14073_v48 = vld [vmem:[#allocation93_spill] sm:$0xff] }
 0x58e   :  { %v4507_v20 = vmax.f32 %v4435_v62, %v4439_v10  ;;  %v12834_v51 = vpop.f32.mrb[72].mxu1  ;;  %v4148_v55 = vadd.f32 %v8494_v56, %v4147_v57  ;;  %v8101_v17 = vpop.f32.mrb[58].mxu0  ;;  %v2535_v44 = vmax.f32 %v14068_v25, 0.0 }
 0x58f   :  { %v12836_v6 = vpack.c.bf16 %v4509_v22, %v4508_v16  ;;  %v4332_v0 = vmax.f32 %v4156_v7, 0.0  ;;  %v3748_v38 = vpop.f32.mrb[73].mxu1  ;;  %v4159_v30 = vadd.f32 %v8497_v21, %v8101_v17  ;;  %v4150_v52 = vpop.f32.mrb[59].mxu0  ;;  %v14070_v16 = vld [vmem:[#allocation91_spill] sm:$0xff]  ;;  %v8501_v7 = vadd.f32 %v12735_v41, %v12675_v53 }
 0x590   :  { %v12839_v31 = vpack.c.bf16 %v4507_v20, %v4506_v23  ;;  %v4330_v45 = vmax.f32 %v4148_v55, 0.0  ;;  %v12842_v3 = vpop.f32.mrb[74].mxu1  ;;  %v4151_v4 = vadd.f32 %v8495_v34, %v4150_v52  ;;  %v2536_v58 = vmax.f32 %v14070_v16, 0.0  ;;  %v14072_v52 = vld [vmem:[#allocation140_spill] sm:$0xff]  ;;  %v14074_v16 = vld [vmem:[#allocation94_spill] sm:$0xff] }
 0x591   :  { %v4444_v62 = vmax.f32 %v2537_v61, %v4332_v0  ;;  %v4333_v11 = vmax.f32 %v4159_v30, 0.0  ;;  %v3751_v59 = vpop.f32.mrb[75].mxu1  ;;  %v8500_v23 = vadd.f32 %v12735_v41, %v12671_v13  ;;  %v8499_v13 = vadd.f32 %v12735_v41, %v12648_v49 }
 0x592   :  { %v4442_v33 = vmax.f32 %v2535_v44, %v4330_v45  ;;  %v4331_v56 = vmax.f32 %v4151_v4, 0.0  ;;  %5131 = vmatprep.mubr.bf16.mxu1 %v12839_v31  ;;  %8162 = vmatprep.mubr.bf16.mxu0 %v12839_v31  ;;  %v2541_v61 = vmax.f32 %v14071_v47, 0.0  ;;  %v2539_v25 = vmax.f32 %v14072_v52, 0.0 }
 0x593   :  { %v4445_v10 = vmax.f32 %v2538_v26, %v4333_v11  ;;  %5132 = vmatmul.mubr.bf16.gmra.mrb[152].mxu1 %v12797_v12  ;;  %8163 = vmatmul.mubr.bf16.gmra.mrb[104].mxu0 %v12836_v6  ;;  %v2542_v26 = vmax.f32 %v14073_v48, 0.0 }
 0x594   :  { %v4443_v21 = vmax.f32 %v2536_v58, %v4331_v56  ;;  %v8104_v22 = vpop.f32.mrb[60].mxu0  ;;  %5139 = vmatprep.mubr.bf16.mxu1 %v12836_v6  ;;  %v2540_v58 = vmax.f32 %v14074_v16, 0.0 }
 0x595   :  { %v4172_v57 = vadd.f32 %v8500_v23, %v8104_v22  ;;  %v4163_v34 = vpop.f32.mrb[61].mxu0  ;;  %v8504_v23 = vadd.f32 %v12735_v41, %v12723_v37  ;;  %v8503_v37 = vadd.f32 %v12735_v41, %v12700_v9 }
 0x596   :  { %v12859_v20 = vpop.f32.mrb[76].mxu1  ;;  %v4164_v55 = vadd.f32 %v8498_v42, %v4163_v34  ;;  %v8105_v17 = vpop.f32.mrb[62].mxu0 }
 0x597   :  { %v4336_v0 = vmax.f32 %v4172_v57, 0.0  ;;  %v3756_v19 = vpop.f32.mrb[77].mxu1  ;;  %v4175_v38 = vadd.f32 %v8501_v7, %v8105_v17  ;;  %v4166_v30 = vpop.f32.mrb[63].mxu0  ;;  %v9421_v7 = vld [vmem:[#allocation2 + $0x240] sm:$0xff]   ;;  %v8502_v57 = vadd.f32 %v12735_v41, %v12692_v32  ;;  %v8505_v17 = vadd.f32 %v12735_v41, %v12727_v35  ;;  %v14075_v32 = vld [vmem:[#allocation95_spill] sm:$0xff] }
 0x598   :  { %v4334_v44 = vmax.f32 %v4164_v55, 0.0  ;;  %v12863_v45 = vpop.f32.mrb[78].mxu1  ;;  %v4167_v53 = vadd.f32 %v8499_v13, %v4166_v30  ;;  %8178 = vmatprep.subr.bf16.mxu1 %v9421_v7  ;;  %v14076_v35 = vld [vmem:[#allocation96_spill] sm:$0xff] }
 0x599   :  { %v4448_v4 = vmax.f32 %v2541_v61, %v4336_v0  ;;  %v4337_v49 = vmax.f32 %v4175_v38, 0.0  ;;  %v3759_v11 = vpop.f32.mrb[79].mxu1 }
 0x59a   :  { %v4446_v59 = vmax.f32 %v2539_v25, %v4334_v44  ;;  %v4335_v56 = vmax.f32 %v4167_v53, 0.0 }
 0x59b   :  { %v4512_v42 = vmax.f32 %v4444_v62, %v4448_v4  ;;  %v4449_v22 = vmax.f32 %v2542_v26, %v4337_v49  ;;  %5140 = vmatmul.mubr.bf16.gmra.mrb[156].mxu1 %v12794_v63  ;;  %v14077_v49 = vld [vmem:[#allocation97_spill] sm:$0xff] }
 0x59c   :  { %v4510_v34 = vmax.f32 %v4442_v33, %v4446_v59  ;;  %v4447_v13 = vmax.f32 %v2540_v58, %v4335_v56  ;;  %v8108_v55 = vpop.f32.mrb[64].mxu0  ;;  %5180 = vmatprep.mubr.bf16.mxu1 %v12482_v39  ;;  %v2545_v33 = vmax.f32 %v14075_v32, 0.0  ;;  %v2546_v11 = vmax.f32 %v14077_v49, 0.0  ;;  %v14078_v59 = vld [vmem:[#allocation98_spill] sm:$0xff] }
 0x59d   :  { %v4513_v47 = vmax.f32 %v4445_v10, %v4449_v22  ;;  %v4188_v61 = vadd.f32 %v8504_v23, %v8108_v55  ;;  %v4179_v0 = vpop.f32.mrb[65].mxu0  ;;  %v2543_v10 = vmax.f32 %v14076_v35, 0.0  ;;  %v2544_v16 = vmax.f32 %v14078_v59, 0.0 }
 0x59e   :  { %v4511_v62 = vmax.f32 %v4443_v21, %v4447_v13  ;;  %v4180_v19 = vadd.f32 %v8502_v57, %v4179_v0  ;;  %v8109_v38 = vpop.f32.mrb[66].mxu0  ;;  %v8508_v56 = vadd.f32 %v12735_v41, %v12775_v24  ;;  %v8507_v24 = vadd.f32 %v12735_v41, %v12757_v43  ;;  %v14079_v0 = vld [vmem:[#allocation99_spill] sm:$0xff]  ;;  %v14082_v43 = vld [vmem:[#allocation102_spill] sm:$0xff] }
 0x59f   :  { %v12877_v30 = vpack.c.bf16 %v4513_v47, %v4512_v42  ;;  %v4340_v52 = vmax.f32 %v4188_v61, 0.0  ;;  %v4191_v25 = vadd.f32 %v8505_v17, %v8109_v38  ;;  %v4182_v44 = vpop.f32.mrb[67].mxu0  ;;  %v8506_v42 = vadd.f32 %v12735_v41, %v12749_v18  ;;  %v9424_v61 = vld [vmem:[#allocation2 + $0x248] sm:$0xff]   ;;  %v14080_v38 = vld [vmem:[#allocation100_spill] sm:$0xff] }
 0x5a0   :  { %v12880_v53 = vpack.c.bf16 %v4511_v62, %v4510_v34  ;;  %v4338_v4 = vmax.f32 %v4180_v19, 0.0  ;;  %v4183_v48 = vadd.f32 %v8503_v37, %v4182_v44  ;;  %v8509_v34 = vadd.f32 %v12735_v41, %v12779_v5  ;;  %v14081_v5 = vld [vmem:[#allocation101_spill] sm:$0xff] }
 0x5a1   :  { %v4452_v26 = vmax.f32 %v2545_v33, %v4340_v52  ;;  %v4341_v9 = vmax.f32 %v4191_v25, 0.0  ;;  %v2549_v37 = vmax.f32 %v14079_v0, 0.0  ;;  %v2547_v32 = vmax.f32 %v14080_v38, 0.0  ;;  %v14085_v38 = vld [vmem:[#allocation105_spill] sm:$0xff] }
 0x5a2   :  { %v12884_v21 = vmax.f32 %v2543_v10, %v4338_v4  ;;  %v4339_v58 = vmax.f32 %v4183_v48, 0.0  ;;  %8166 = vmatprep.mubr.bf16.mxu0 %v12880_v53  ;;  %v2550_v25 = vmax.f32 %v14081_v5, 0.0  ;;  %v2548_v10 = vmax.f32 %v14082_v43, 0.0  ;;  %v9425_v48 = vld [vmem:[#allocation2 + $0x250] sm:$0xff]  }
 0x5a3   :  { %v4453_v23 = vmax.f32 %v2546_v11, %v4341_v9  ;;  %5181 = vmatmul.mubr.bf16.vlgmr.msra.gmra.mrb[80].mxu1 %v12432_v40  ;;  %8167 = vmatmul.mubr.bf16.gmra.mrb[108].mxu0 %v12877_v30  ;;  %v8512_v49 = vadd.f32 %v12735_v41, %v12817_v27  ;;  %v8510_v59 = vadd.f32 %v12735_v41, %v12792_v60 }
 0x5a4   :  { %v4451_v22 = vmax.f32 %v2544_v16, %v4339_v58  ;;  %v8112_v57 = vpop.f32.mrb[68].mxu0  ;;  %5188 = vmatprep.mubr.bf16.mxu1 %v12479_v8  ;;  %8179 = vmatpush3.bf16.msra.mxu1 %v9421_v7  ;;  %v8514_v43 = vadd.f32 %v12735_v41, %v12834_v51 }
 0x5a5   :  { %v4204_v13 = vadd.f32 %v8508_v56, %v8112_v57  ;;  %v4195_v55 = vpop.f32.mrb[69].mxu0  ;;  %8180 = vmatprep.subr.bf16.mxu1 %v9424_v61  ;;  %v8513_v57 = vadd.f32 %v12735_v41, %v12821_v36  ;;  %v14084_v36 = vld [vmem:[#allocation104_spill] sm:$0xff] }
 0x5a6   :  { %v4196_v17 = vadd.f32 %v8506_v42, %v4195_v55  ;;  %v8113_v47 = vpop.f32.mrb[70].mxu0  ;;  %v9426_v42 = vld [vmem:[#allocation2 + $0x258] sm:$0xff]  }
 0x5a7   :  { %v4344_v62 = vmax.f32 %v4204_v13, 0.0  ;;  %v4207_v18 = vadd.f32 %v8509_v34, %v8113_v47  ;;  %v4198_v19 = vpop.f32.mrb[71].mxu0  ;;  %v8511_v13 = vadd.f32 %v12735_v41, %v12800_v14 }
 0x5a8   :  { %v4342_v33 = vmax.f32 %v4196_v17, 0.0  ;;  %v4199_v7 = vadd.f32 %v8507_v24, %v4198_v19  ;;  %8181 = vmatpush3.bf16.msra.mxu1 %v9424_v61 }
 0x5a9   :  { %v4456_v52 = vmax.f32 %v2549_v37, %v4344_v62  ;;  %v4345_v44 = vmax.f32 %v4207_v18, 0.0  ;;  %8182 = vmatprep.subr.bf16.mxu1 %v9425_v48 }
 0x5aa   :  { %v4454_v35 = vmax.f32 %v2547_v32, %v4342_v33  ;;  %v4343_v4 = vmax.f32 %v4199_v7, 0.0  ;;  %v2554_v32 = vmax.f32 %v14085_v38, 0.0  ;;  %v14086_v7 = vld [vmem:[#allocation106_spill] sm:$0xff] }
 0x5ab   :  { %v4516_v11 = vmax.f32 %v4452_v26, %v4456_v52  ;;  %v4457_v9 = vmax.f32 %v2550_v25, %v4345_v44  ;;  %5189 = vmatmul.mubr.bf16.gmra.mrb[84].mxu1 %v12429_v50  ;;  %v2552_v52 = vmax.f32 %v14086_v7, 0.0  ;;  %v9428_v25 = vld [vmem:[#allocation2 + $0x260] sm:$0xff]   ;;  %v8516_v44 = vadd.f32 %v12735_v41, %v12859_v20 }
 0x5ac   :  { %v4514_v16 = vmax.f32 %v12884_v21, %v4454_v35  ;;  %v4455_v58 = vmax.f32 %v2548_v10, %v4343_v4  ;;  %v8116_v56 = vpop.f32.mrb[72].mxu0  ;;  %5196 = vmatprep.mubr.bf16.mxu1 %v12532_v2  ;;  %8183 = vmatpush3.bf16.msra.mxu1 %v9425_v48  ;;  %v14083_v21 = vld [vmem:[#allocation103_spill] sm:$0xff]  ;;  %v8517_v48 = vadd.f32 %v12735_v41, %v12863_v45  ;;  %v14089_v45 = vld [vmem:[#allocation109_spill] sm:$0xff] }
 0x5ad   :  { %v4517_v34 = vmax.f32 %v4453_v23, %v4457_v9  ;;  %v4220_v27 = vadd.f32 %v8512_v49, %v8116_v56  ;;  %v4211_v26 = vpop.f32.mrb[73].mxu0  ;;  %8184 = vmatprep.subr.bf16.mxu1 %v9426_v42  ;;  %v2553_v17 = vmax.f32 %v14083_v21, 0.0  ;;  %v2551_v23 = vmax.f32 %v14084_v36, 0.0  ;;  %v14090_v21 = vld [vmem:[#allocation110_spill] sm:$0xff] }
 0x5ae   :  { %v4515_v55 = vmax.f32 %v4451_v22, %v4455_v58  ;;  %v4212_v60 = vadd.f32 %v8510_v59, %v4211_v26  ;;  %v8117_v24 = vpop.f32.mrb[74].mxu0  ;;  %v8515_v20 = vadd.f32 %v12735_v41, %v12842_v3  ;;  %v14087_v58 = vld [vmem:[#allocation107_spill] sm:$0xff]  ;;  %v2556_v41 = vmax.f32 %v14090_v21, 0.0 }
 0x5af   :  { %v12915_v47 = vpack.c.bf16 %v4517_v34, %v4516_v11  ;;  %v4348_v61 = vmax.f32 %v4220_v27, 0.0  ;;  %v4223_v0 = vadd.f32 %v8513_v57, %v8117_v24  ;;  %v4214_v37 = vpop.f32.mrb[75].mxu0  ;;  %v2557_v56 = vmax.f32 %v14087_v58, 0.0  ;;  %v14088_v34 = vld [vmem:[#allocation108_spill] sm:$0xff]  ;;  %v9427_v58 = vld [vmem:[#allocation2 + $0x210] sm:$0xff]  }
 0x5b0   :  { %v12917_v62 = vpack.c.bf16 %v4515_v55, %v4514_v16  ;;  %v4346_v18 = vmax.f32 %v4212_v60, 0.0  ;;  %v4215_v19 = vadd.f32 %v8511_v13, %v4214_v37  ;;  %8185 = vmatpush3.bf16.msra.mxu1 %v9426_v42  ;;  %v9429_v16 = vld [vmem:[#allocation2 + $0x268] sm:$0xff]   ;;  %v2555_v27 = vmax.f32 %v14088_v34, 0.0  ;;  %v9436_v34 = vld [vmem:[#allocation2 + $0x238] sm:$0xff]  }
 0x5b1   :  { %v4460_v14 = vmax.f32 %v2553_v17, %v4348_v61  ;;  %v4349_v22 = vmax.f32 %v4223_v0, 0.0  ;;  %8186 = vmatprep.subr.bf16.mxu1 %v9428_v25  ;;  %v2558_v55 = vmax.f32 %v14089_v45, 0.0  ;;  %v9431_v61 = vld [vmem:[#allocation2 + $0x270] sm:$0xff]  }
 0x5b2   :  { %v4458_v33 = vmax.f32 %v2551_v23, %v4346_v18  ;;  %v4347_v5 = vmax.f32 %v4215_v19, 0.0  ;;  %8170 = vmatprep.mubr.bf16.mxu0 %v12917_v62  ;;  %v14091_v18 = vld [vmem:[#allocation117_spill] sm:$0xff]  ;;  %v9432_v19 = vld [vmem:[#allocation2 + $0x278] sm:$0xff]  }
 0x5b3   :  { %v4461_v35 = vmax.f32 %v2554_v32, %v4349_v22  ;;  %5197 = vmatmul.mubr.bf16.gmra.mrb[88].mxu1 %v12482_v39  ;;  %8171 = vmatmul.mubr.bf16.gmra.mrb[112].mxu0 %v12915_v47 }
 0x5b4   :  { %v4459_v10 = vmax.f32 %v2552_v52, %v4347_v5  ;;  %v8120_v4 = vpop.f32.mrb[76].mxu0  ;;  %5204 = vmatprep.mubr.bf16.mxu1 %v12529_v46  ;;  %8187 = vmatpush3.bf16.msra.mxu1 %v9428_v25  ;;  %v9413_v52 = vld [vmem:[#allocation2 + $0x1c0] sm:$0xff]   ;;  %v14095_v25 = vld [vmem:[#allocation15_spill] sm:$0xff] }
 0x5b5   :  { %v4236_v49 = vadd.f32 %v8516_v44, %v8120_v4  ;;  %v4227_v11 = vpop.f32.mrb[77].mxu0  ;;  %8188 = vmatprep.subr.bf16.mxu1 %v9429_v16  ;;  %v14094_v5 = vld [vmem:[#allocation12_spill] sm:$0xff]  ;;  %v14096_v44 = vld [vmem:[#allocation14_spill] sm:$0xff]  ;;  %v9416_v4 = vld [vmem:[#allocation2 + $0x1d8] sm:$0xff]  }
 0x5b6   :  { %v4228_v9 = vadd.f32 %v8514_v43, %v4227_v11  ;;  %v8121_v59 = vpop.f32.mrb[78].mxu0  ;;  %v9415_v43 = vld [vmem:[#allocation2 + $0x1d0] sm:$0xff]   ;;  %v9418_v11 = vld [vmem:[#allocation2 + $0x1e8] sm:$0xff]  }
 0x5b7   :  { %v4352_v51 = vmax.f32 %v4236_v49, 0.0  ;;  %v4239_v42 = vadd.f32 %v8517_v48, %v8121_v59  ;;  %v4230_v57 = vpop.f32.mrb[79].mxu0  ;;  %v9417_v48 = vld [vmem:[#allocation2 + $0x1e0] sm:$0xff]  }
 0x5b8   :  { %v4350_v26 = vmax.f32 %v4228_v9, 0.0  ;;  %v4231_v13 = vadd.f32 %v8515_v20, %v4230_v57  ;;  %8189 = vmatpush3.bf16.msra.mxu1 %v9429_v16  ;;  %v14098_v49 = vld [vmem:[#allocation16_spill] sm:$0xff]  ;;  %v9419_v20 = vld [vmem:[#allocation2 + $0x1f0] sm:$0xff]   ;;  %v9420_v9 = vld [vmem:[#allocation2 + $0x1f8] sm:$0xff]  }
 0x5b9   :  { %v4464_v60 = vmax.f32 %v2557_v56, %v4352_v51  ;;  %v4353_v24 = vmax.f32 %v4239_v42, 0.0  ;;  %8190 = vmatprep.subr.bf16.mxu1 %v9431_v61  ;;  %v9422_v59 = vld [vmem:[#allocation2 + $0x200] sm:$0xff]   ;;  %v9423_v16 = vld [vmem:[#allocation2 + $0x208] sm:$0xff]   ;;  %v9430_v56 = vld [vmem:[#allocation2 + $0x218] sm:$0xff]  }
 0x5ba   :  { %v4462_v3 = vmax.f32 %v2555_v27, %v4350_v26  ;;  %v4351_v17 = vmax.f32 %v4231_v13, 0.0  ;;  %v9433_v51 = vld [vmem:[#allocation2 + $0x220] sm:$0xff]   ;;  %v9434_v42 = vld [vmem:[#allocation2 + $0x228] sm:$0xff]   ;;  %v9435_v57 = vld [vmem:[#allocation2 + $0x230] sm:$0xff]  }
 0x5bb   :  { %v4520_v0 = vmax.f32 %v4460_v14, %v4464_v60  ;;  %v4465_v37 = vmax.f32 %v2558_v55, %v4353_v24  ;;  %5205 = vmatmul.mubr.bf16.gmra.mrb[92].mxu1 %v12479_v8  ;;  %v14092_v14 = vld [vmem:[#allocation119_spill] sm:$0xff] }
 0x5bc   :  { %v4518_v36 = vmax.f32 %v4458_v33, %v4462_v3  ;;  %v4463_v23 = vmax.f32 %v2556_v41, %v4351_v17  ;;  %5212 = vmatprep.mubr.bf16.mxu1 %v14091_v18  ;;  %8191 = vmatpush3.bf16.msra.mxu1 %v9431_v61  ;;  %v14093_v33 = vld [vmem:[#allocation118_spill] sm:$0xff] }
 0x5bd   :  { %v4521_v38 = vmax.f32 %v4461_v35, %v4465_v37  ;;  %8192 = vmatprep.subr.bf16.mxu1 %v9432_v19  ;;  %v9414_v35 = vld [vmem:[#allocation2 + $0x1c8] sm:$0xff]  }
 0x5be   :  { %v4519_v32 = vmax.f32 %v4459_v10, %v4463_v23  ;;  %v14097_v10 = vld [vmem:[#allocation113_spill] sm:$0xff] }
 0x5bf   :  { %v12940_v22 = vpack.c.bf16 %v4521_v38, %v4520_v0 }
 0x5c0   :  { %v12942_v7 = vpack.c.bf16 %v4519_v32, %v4518_v36  ;;  %8193 = vmatpush3.bf16.msra.mxu1 %v9432_v19 }
 0x5c2   :  { %8174 = vmatprep.mubr.bf16.mxu0 %v12942_v7 }
 0x5c3   :  { %5213 = vmatmul.mubr.bf16.gmra.mrb[96].mxu1 %v12532_v2  ;;  %8175 = vmatmul.mubr.bf16.gmra.mrb[116].mxu0 %v12940_v22 }
 0x5c4   :  { %5220 = vmatprep.mubr.bf16.mxu1 %v14092_v14  ;;  %5846 = vmatprep.mubr.bf16.mxu0 %v14093_v33 }
 0x5cb   :  { %5221 = vmatmul.mubr.bf16.gmra.mrb[100].mxu1 %v12529_v46  ;;  %5847 = vmatmul.mubr.bf16.vlgmr.msra.gmra.mrb[120].mxu0 %v14094_v5 }
 0x5cc   :  { %5228 = vmatprep.mubr.bf16.mxu1 %v14095_v25  ;;  %5854 = vmatprep.mubr.bf16.mxu0 %v14096_v44 }
 0x5cd   :  { %6008 = vmatpush1.bf16.msra.mxu0 %v9413_v52 }
 0x5ce   :  { %6009 = vmatprep.subr.bf16.mxu0 %v13618_v15 }
 0x5d1   :  { %6010 = vmatpush1.bf16.msra.mxu0 %v9414_v35 }
 0x5d2   :  { %6011 = vmatprep.subr.bf16.mxu0 %v13618_v15 }
 0x5d3   :  { %5229 = vmatmul.mubr.bf16.gmra.mrb[104].mxu1 %v14091_v18  ;;  %5855 = vmatmul.mubr.bf16.gmra.mrb[124].mxu0 %v14097_v10 }
 0x5d4   :  { %5236 = vmatprep.mubr.bf16.mxu1 %v12642_v29  ;;  %5862 = vmatprep.mubr.bf16.mxu0 %v12432_v40 }
 0x5d5   :  { %6012 = vmatpush1.bf16.msra.mxu0 %v9415_v43 }
 0x5d6   :  { %6013 = vmatprep.subr.bf16.mxu0 %v13618_v15 }
 0x5d9   :  { %6014 = vmatpush1.bf16.msra.mxu0 %v9416_v4 }
 0x5da   :  { %6015 = vmatprep.subr.bf16.mxu0 %v13618_v15 }
 0x5db   :  { %5237 = vmatmul.mubr.bf16.gmra.mrb[108].mxu1 %v14092_v14  ;;  %5863 = vmatmul.mubr.bf16.gmra.mrb[128].mxu0 %v14093_v33 }
 0x5dc   :  { %5244 = vmatprep.mubr.bf16.mxu1 %v14098_v49  ;;  %5870 = vmatprep.mubr.bf16.mxu0 %v12429_v50 }
 0x5dd   :  { %6016 = vmatpush1.bf16.msra.mxu0 %v9417_v48  ;;  %v13111_v48 = vld [vmem:[%s13576_s6 + $0x1] ss:$0 sm:$0xff] }
 0x5de   :  { %6017 = vmatprep.subr.bf16.mxu0 %v13618_v15 }
 0x5e1   :  { %6018 = vmatpush1.bf16.msra.mxu0 %v9418_v11 }
 0x5e2   :  { %6019 = vmatprep.subr.bf16.mxu0 %v13618_v15 }
 0x5e3   :  { %5245 = vmatmul.mubr.bf16.gmra.mrb[112].mxu1 %v14095_v25  ;;  %5871 = vmatmul.mubr.bf16.gmra.mrb[132].mxu0 %v14096_v44 }
 0x5e4   :  { %5252 = vmatprep.mubr.bf16.mxu1 %v12694_v54  ;;  %5878 = vmatprep.mubr.bf16.mxu0 %v12482_v39 }
 0x5e5   :  { %6020 = vmatpush1.bf16.msra.mxu0 %v9419_v20 }
 0x5e6   :  { %6021 = vmatprep.subr.bf16.mxu0 %v13618_v15 }
 0x5e9   :  { %6022 = vmatpush1.bf16.msra.mxu0 %v9420_v9 }
 0x5ea   :  { %6023 = vmatprep.subr.bf16.mxu0 %v13618_v15 }
 0x5eb   :  { %5253 = vmatmul.mubr.bf16.gmra.mrb[116].mxu1 %v12642_v29  ;;  %5879 = vmatmul.mubr.bf16.gmra.mrb[136].mxu0 %v12432_v40 }
 0x5ec   :  { %5260 = vmatprep.mubr.bf16.mxu1 %v12754_v1  ;;  %5886 = vmatprep.mubr.bf16.mxu0 %v12479_v8 }
 0x5ed   :  { %6024 = vmatpush1.bf16.msra.mxu0 %v9422_v59 }
 0x5ee   :  { %6025 = vmatprep.subr.bf16.mxu0 %v13618_v15 }
 0x5f1   :  { %6026 = vmatpush1.bf16.msra.mxu0 %v9423_v16 }
 0x5f2   :  { %6027 = vmatprep.subr.bf16.mxu0 %v13618_v15 }
 0x5f3   :  { %5261 = vmatmul.mubr.bf16.gmra.mrb[120].mxu1 %v14098_v49  ;;  %5887 = vmatmul.mubr.bf16.gmra.mrb[140].mxu0 %v12429_v50 }
 0x5f4   :  { %5268 = vmatprep.mubr.bf16.mxu1 %v12751_v28  ;;  %5894 = vmatprep.mubr.bf16.mxu0 %v12532_v2 }
 0x5f5   :  { %6028 = vmatpush1.bf16.msra.mxu0 %v9427_v58 }
 0x5f6   :  { %6029 = vmatprep.subr.bf16.mxu0 %v13618_v15 }
 0x5f9   :  { %6030 = vmatpush1.bf16.msra.mxu0 %v9430_v56 }
 0x5fa   :  { %6031 = vmatprep.subr.bf16.mxu0 %v13618_v15 }
 0x5fb   :  { %5269 = vmatmul.mubr.bf16.gmra.mrb[124].mxu1 %v12694_v54  ;;  %5895 = vmatmul.mubr.bf16.gmra.mrb[144].mxu0 %v12482_v39 }
 0x5fc   :  { %5276 = vmatprep.mubr.bf16.mxu1 %v12797_v12  ;;  %5902 = vmatprep.mubr.bf16.mxu0 %v12529_v46 }
 0x5fd   :  { %6032 = vmatpush1.bf16.msra.mxu0 %v9433_v51 }
 0x5fe   :  { %6033 = vmatprep.subr.bf16.mxu0 %v13618_v15 }
 0x601   :  { %6034 = vmatpush1.bf16.msra.mxu0 %v9434_v42 }
 0x602   :  { %6035 = vmatprep.subr.bf16.mxu0 %v13618_v15 }
 0x603   :  { %5277 = vmatmul.mubr.bf16.gmra.mrb[128].mxu1 %v12754_v1  ;;  %5903 = vmatmul.mubr.bf16.gmra.mrb[148].mxu0 %v12479_v8 }
 0x604   :  { %5284 = vmatprep.mubr.bf16.mxu1 %v12794_v63  ;;  %5910 = vmatprep.mubr.bf16.mxu0 %v14091_v18 }
 0x605   :  { %6036 = vmatpush1.bf16.msra.mxu0 %v9435_v57 }
 0x606   :  { %v12995_v27 = vpop.f32.mrb[80].mxu0  ;;  %6037 = vmatprep.subr.bf16.mxu0 %v13618_v15 }
 0x607   :  { %v12998_v26 = vpop.f32.mrb[81].mxu0 }
 0x608   :  { %v13000_v13 = vpop.f32.mrb[82].mxu0 }
 0x609   :  { %v13002_v45 = vpop.f32.mrb[83].mxu0  ;;  %6038 = vmatpush1.bf16.msra.mxu0 %v9436_v34 }
 0x60b   :  { %5285 = vmatmul.mubr.bf16.gmra.mrb[132].mxu1 %v12751_v28  ;;  %5911 = vmatmul.mubr.bf16.gmra.mrb[152].mxu0 %v12532_v2 }
 0x60c   :  { %5292 = vmatprep.mubr.bf16.mxu1 %v12839_v31  ;;  %5918 = vmatprep.mubr.bf16.mxu0 %v14092_v14 }
 0x613   :  { %5293 = vmatmul.mubr.bf16.gmra.mrb[136].mxu1 %v12797_v12  ;;  %5919 = vmatmul.mubr.bf16.gmra.mrb[156].mxu0 %v12529_v46 }
 0x614   :  { %5300 = vmatprep.mubr.bf16.mxu1 %v12836_v6  ;;  %5926 = vmatprep.mubr.bf16.mxu0 %v14095_v25 }
 0x616   :  { %v13012_v15 = vpop.f32.mrb[84].mxu0 }
 0x617   :  { %v13014_v55 = vpop.f32.mrb[85].mxu0 }
 0x618   :  { %v13016_v60 = vpop.f32.mrb[86].mxu0 }
 0x619   :  { %v13018_v24 = vpop.f32.mrb[87].mxu0 }
 0x61b   :  { %5301 = vmatmul.mubr.bf16.gmra.mrb[140].mxu1 %v12794_v63  ;;  %5927 = vmatmul.mubr.bf16.gmra.mrb[160].mxu0 %v14091_v18 }
 0x61c   :  { %5308 = vmatprep.mubr.bf16.mxu1 %v12880_v53  ;;  %5934 = vmatprep.mubr.bf16.mxu0 %v12642_v29 }
 0x623   :  { %5309 = vmatmul.mubr.bf16.gmra.mrb[144].mxu1 %v12839_v31  ;;  %5935 = vmatmul.mubr.bf16.gmra.mrb[164].mxu0 %v14092_v14 }
 0x624   :  { %5316 = vmatprep.mubr.bf16.mxu1 %v12877_v30  ;;  %5942 = vmatprep.mubr.bf16.mxu0 %v14098_v49 }
 0x626   :  { %v13028_v21 = vpop.f32.mrb[88].mxu0 }
 0x627   :  { %v13030_v41 = vpop.f32.mrb[89].mxu0 }
 0x628   :  { %v13032_v3 = vpop.f32.mrb[90].mxu0 }
 0x629   :  { %v13034_v17 = vpop.f32.mrb[91].mxu0 }
 0x62b   :  { %5317 = vmatmul.mubr.bf16.gmra.mrb[148].mxu1 %v12836_v6  ;;  %5943 = vmatmul.mubr.bf16.gmra.mrb[168].mxu0 %v14095_v25 }
 0x62c   :  { %5324 = vmatprep.mubr.bf16.mxu1 %v12917_v62  ;;  %5950 = vmatprep.mubr.bf16.mxu0 %v12694_v54 }
 0x633   :  { %5325 = vmatmul.mubr.bf16.gmra.mrb[152].mxu1 %v12880_v53  ;;  %5951 = vmatmul.mubr.bf16.gmra.mrb[172].mxu0 %v12642_v29 }
 0x634   :  { %5332 = vmatprep.mubr.bf16.mxu1 %v12915_v47  ;;  %5958 = vmatprep.mubr.bf16.mxu0 %v12754_v1 }
 0x636   :  { %v13044_v61 = vpop.f32.mrb[92].mxu0 }
 0x637   :  { %v13046_v0 = vpop.f32.mrb[93].mxu0 }
 0x638   :  { %v13048_v37 = vpop.f32.mrb[94].mxu0 }
 0x639   :  { %v13050_v36 = vpop.f32.mrb[95].mxu0 }
 0x63b   :  { %5333 = vmatmul.mubr.bf16.gmra.mrb[156].mxu1 %v12877_v30  ;;  %5959 = vmatmul.mubr.bf16.gmra.mrb[176].mxu0 %v14098_v49 }
 0x63c   :  { %5966 = vmatprep.mubr.bf16.mxu0 %v12751_v28  ;;  %8194 = vmatprep.mubr.bf16.mxu1 %v12532_v2 }
 0x643   :  { %5967 = vmatmul.mubr.bf16.gmra.mrb[180].mxu0 %v12694_v54  ;;  %8195 = vmatmul.mubr.bf16.vlgmr.msra.gmra.mrb[160].mxu1 %v12529_v46 }
 0x644   :  { %5974 = vmatprep.mubr.bf16.mxu0 %v12797_v12  ;;  %8198 = vmatprep.mubr.bf16.mxu1 %v14091_v18 }
 0x646   :  { %v13060_v23 = vpop.f32.mrb[96].mxu0 }
 0x647   :  { %v13062_v19 = vpop.f32.mrb[97].mxu0 }
 0x648   :  { %v13064_v38 = vpop.f32.mrb[98].mxu0 }
 0x649   :  { %v13066_v32 = vpop.f32.mrb[99].mxu0 }
 0x64b   :  { %5975 = vmatmul.mubr.bf16.gmra.mrb[184].mxu0 %v12754_v1  ;;  %8199 = vmatmul.mubr.bf16.gmra.mrb[164].mxu1 %v14092_v14 }
 0x64c   :  { %5982 = vmatprep.mubr.bf16.mxu0 %v12794_v63  ;;  %8202 = vmatprep.mubr.bf16.mxu1 %v14095_v25 }
 0x653   :  { %5983 = vmatmul.mubr.bf16.gmra.mrb[188].mxu0 %v12751_v28  ;;  %8203 = vmatmul.mubr.bf16.gmra.mrb[168].mxu1 %v12642_v29 }
 0x654   :  { %5990 = vmatprep.mubr.bf16.mxu0 %v12839_v31  ;;  %8206 = vmatprep.mubr.bf16.mxu1 %v14098_v49 }
 0x656   :  { %v13076_v33 = vpop.f32.mrb[100].mxu0 }
 0x657   :  { %v13078_v52 = vpop.f32.mrb[101].mxu0 }
 0x658   :  { %v13080_v5 = vpop.f32.mrb[102].mxu0 }
 0x659   :  { %v13082_v44 = vpop.f32.mrb[103].mxu0 }
 0x65b   :  { %5991 = vmatmul.mubr.bf16.gmra.mrb[192].mxu0 %v12797_v12  ;;  %8207 = vmatmul.mubr.bf16.gmra.mrb[172].mxu1 %v12694_v54 }
 0x65c   :  { %5998 = vmatprep.mubr.bf16.mxu0 %v12836_v6  ;;  %8210 = vmatprep.mubr.bf16.mxu1 %v12754_v1 }
 0x663   :  { %5999 = vmatmul.mubr.bf16.gmra.mrb[196].mxu0 %v12794_v63  ;;  %8211 = vmatmul.mubr.bf16.gmra.mrb[176].mxu1 %v12751_v28 }
 0x664   :  { %6039 = vmatprep.mubr.bf16.mxu0 %v12482_v39  ;;  %8214 = vmatprep.mubr.bf16.mxu1 %v12797_v12 }
 0x666   :  { %v13092_v35 = vpop.f32.mrb[104].mxu0 }
 0x667   :  { %v13094_v43 = vpop.f32.mrb[105].mxu0 }
 0x668   :  { %v13096_v10 = vpop.f32.mrb[106].mxu0 }
 0x669   :  { %v13098_v4 = vpop.f32.mrb[107].mxu0 }
 0x66b   :  { %6040 = vmatmul.mubr.bf16.vlgmr.msra.gmra.mrb[120].mxu0 %v12432_v40  ;;  %8215 = vmatmul.mubr.bf16.gmra.mrb[180].mxu1 %v12794_v63 }
 0x66c   :  { %6047 = vmatprep.mubr.bf16.mxu0 %v12479_v8  ;;  %8218 = vmatprep.mubr.bf16.mxu1 %v12839_v31 }
 0x673   :  { %6048 = vmatmul.mubr.bf16.gmra.mrb[124].mxu0 %v12429_v50  ;;  %8219 = vmatmul.mubr.bf16.gmra.mrb[184].mxu1 %v12836_v6 }
 0x674   :  { %6055 = vmatprep.mubr.bf16.mxu0 %v12532_v2  ;;  %8222 = vmatprep.mubr.bf16.mxu1 %v12880_v53 }
 0x676   :  { %v5182_v40 = vpop.f32.mrb[80].mxu1  ;;  %v13113_v11 = vpop.f32.mrb[108].mxu0 }
 0x677   :  { %v8518_v20 = vadd.f32 %v13111_v48, %v5182_v40  ;;  %v5184_v9 = vpop.f32.mrb[81].mxu1  ;;  %v13116_v59 = vpop.f32.mrb[109].mxu0 }
 0x678   :  { %v5185_v50 = vpop.f32.mrb[82].mxu1  ;;  %v13118_v16 = vpop.f32.mrb[110].mxu0 }
 0x679   :  { %v13121_v58 = vadd.f32 %v8518_v20, %v12998_v26  ;;  %v8519_v56 = vadd.f32 %v13111_v48, %v5185_v50  ;;  %v5187_v51 = vpop.f32.mrb[83].mxu1  ;;  %v13124_v42 = vpop.f32.mrb[111].mxu0 }
 0x67b   :  { %v13127_v57 = vadd.f32 %v8519_v56, %v13002_v45  ;;  %6056 = vmatmul.mubr.bf16.gmra.mrb[128].mxu0 %v12482_v39  ;;  %8223 = vmatmul.mubr.bf16.gmra.mrb[188].mxu1 %v12877_v30 }
 0x67c   :  { %6063 = vmatprep.mubr.bf16.mxu0 %v12529_v46  ;;  %8226 = vmatprep.mubr.bf16.mxu1 %v12917_v62 }
 0x67e   :  { %v5190_v34 = vpop.f32.mrb[84].mxu1 }
 0x67f   :  { %v8520_v26 = vadd.f32 %v13111_v48, %v5190_v34  ;;  %v5192_v40 = vpop.f32.mrb[85].mxu1 }
 0x680   :  { %v5193_v20 = vpop.f32.mrb[86].mxu1 }
 0x681   :  { %v13135_v9 = vadd.f32 %v8520_v26, %v12995_v27  ;;  %v8521_v50 = vadd.f32 %v13111_v48, %v5193_v20  ;;  %v5195_v45 = vpop.f32.mrb[87].mxu1 }
 0x683   :  { %v13139_v56 = vadd.f32 %v8521_v50, %v13000_v13  ;;  %6064 = vmatmul.mubr.bf16.gmra.mrb[132].mxu0 %v12479_v8  ;;  %8227 = vmatmul.mubr.bf16.gmra.mrb[192].mxu1 %v12915_v47 }
 0x684   :  { %6071 = vmatprep.mubr.bf16.mxu0 %v14091_v18  ;;  %8230 = vmatprep.mubr.bf16.mxu1 %v12942_v7 }
 0x685   :  { %14099 = vst [vmem:[#allocation17_spill] sm:$0xff] %v13139_v56 }
 0x686   :  { %v5198_v39 = vpop.f32.mrb[88].mxu1  ;;  %v13145_v51 = vpop.f32.mrb[112].mxu0 }
 0x687   :  { %v8522_v27 = vadd.f32 %v13111_v48, %v5198_v39  ;;  %v5200_v34 = vpop.f32.mrb[89].mxu1  ;;  %v13148_v26 = vpop.f32.mrb[113].mxu0 }
 0x688   :  { %v5201_v40 = vpop.f32.mrb[90].mxu1  ;;  %v13150_v20 = vpop.f32.mrb[114].mxu0 }
 0x689   :  { %v13153_v13 = vadd.f32 %v8522_v27, %v13014_v55  ;;  %v8523_v8 = vadd.f32 %v13111_v48, %v5201_v40  ;;  %v5203_v50 = vpop.f32.mrb[91].mxu1  ;;  %v13156_v45 = vpop.f32.mrb[115].mxu0 }
 0x68b   :  { %v13159_v7 = vadd.f32 %v8523_v8, %v13018_v24  ;;  %6072 = vmatmul.mubr.bf16.gmra.mrb[136].mxu0 %v12532_v2  ;;  %8231 = vmatmul.mubr.bf16.gmra.mrb[196].mxu1 %v12940_v22 }
 0x68c   :  { %6079 = vmatprep.mubr.bf16.mxu0 %v14092_v14 }
 0x68e   :  { %v5206_v39 = vpop.f32.mrb[92].mxu1 }
 0x68f   :  { %v8524_v34 = vadd.f32 %v13111_v48, %v5206_v39  ;;  %v5208_v56 = vpop.f32.mrb[93].mxu1 }
 0x690   :  { %v5209_v55 = vpop.f32.mrb[94].mxu1 }
 0x691   :  { %v13166_v27 = vadd.f32 %v8524_v34, %v13012_v15  ;;  %v8525_v40 = vadd.f32 %v13111_v48, %v5209_v55  ;;  %v5211_v50 = vpop.f32.mrb[95].mxu1 }
 0x693   :  { %14100 = vst [vmem:[#allocation18_spill] sm:$0xff] %v13166_v27  ;;  %v13170_v24 = vadd.f32 %v8525_v40, %v13016_v60  ;;  %6080 = vmatmul.mubr.bf16.gmra.mrb[140].mxu0 %v12529_v46 }
 0x694   :  { %6087 = vmatprep.mubr.bf16.mxu0 %v14095_v25 }
 0x695   :  { %14101 = vst [vmem:[#allocation123_spill] sm:$0xff] %v13170_v24 }
 0x696   :  { %v5214_v2 = vpop.f32.mrb[96].mxu1  ;;  %v13174_v22 = vpop.f32.mrb[116].mxu0 }
 0x697   :  { %v8526_v8 = vadd.f32 %v13111_v48, %v5214_v2  ;;  %v5216_v56 = vpop.f32.mrb[97].mxu1  ;;  %v13177_v39 = vpop.f32.mrb[117].mxu0 }
 0x698   :  { %v5217_v15 = vpop.f32.mrb[98].mxu1  ;;  %v13179_v34 = vpop.f32.mrb[118].mxu0 }
 0x699   :  { %v13182_v55 = vadd.f32 %v8526_v8, %v13030_v41  ;;  %v8527_v60 = vadd.f32 %v13111_v48, %v5217_v15  ;;  %v5219_v40 = vpop.f32.mrb[99].mxu1  ;;  %v13185_v46 = vpop.f32.mrb[119].mxu0 }
 0x69b   :  { %v13188_v50 = vadd.f32 %v8527_v60, %v13034_v17  ;;  %6088 = vmatmul.mubr.bf16.gmra.mrb[144].mxu0 %v14091_v18 }
 0x69c   :  { %6095 = vmatprep.mubr.bf16.mxu0 %v12642_v29 }
 0x69e   :  { %v5222_v2 = vpop.f32.mrb[100].mxu1 }
 0x69f   :  { %v8528_v56 = vadd.f32 %v13111_v48, %v5222_v2  ;;  %v5224_v24 = vpop.f32.mrb[101].mxu1 }
 0x6a0   :  { %v5225_v27 = vpop.f32.mrb[102].mxu1 }
 0x6a1   :  { %v13194_v41 = vadd.f32 %v8528_v56, %v13028_v21  ;;  %v8529_v8 = vadd.f32 %v13111_v48, %v5225_v27  ;;  %v5227_v15 = vpop.f32.mrb[103].mxu1 }
 0x6a3   :  { %v13198_v40 = vadd.f32 %v8529_v8, %v13032_v3  ;;  %6096 = vmatmul.mubr.bf16.gmra.mrb[148].mxu0 %v14092_v14 }
 0x6a4   :  { %6103 = vmatprep.mubr.bf16.mxu0 %v14098_v49 }
 0x6a6   :  { %v5230_v18 = vpop.f32.mrb[104].mxu1 }
 0x6a7   :  { %v8530_v17 = vadd.f32 %v13111_v48, %v5230_v18  ;;  %v5232_v60 = vpop.f32.mrb[105].mxu1 }
 0x6a8   :  { %v5233_v2 = vpop.f32.mrb[106].mxu1 }
 0x6a9   :  { %v13204_v24 = vadd.f32 %v8530_v17, %v13046_v0  ;;  %v8531_v21 = vadd.f32 %v13111_v48, %v5233_v2  ;;  %v5235_v56 = vpop.f32.mrb[107].mxu1 }
 0x6ab   :  { %v13208_v27 = vadd.f32 %v8531_v21, %v13050_v36  ;;  %6104 = vmatmul.mubr.bf16.gmra.mrb[152].mxu0 %v14095_v25 }
 0x6ac   :  { %6111 = vmatprep.mubr.bf16.mxu0 %v12694_v54 }
 0x6ae   :  { %v5238_v14 = vpop.f32.mrb[108].mxu1 }
 0x6af   :  { %v8532_v3 = vadd.f32 %v13111_v48, %v5238_v14  ;;  %v5240_v8 = vpop.f32.mrb[109].mxu1 }
 0x6b0   :  { %v5241_v15 = vpop.f32.mrb[110].mxu1  ;;  %v9438_v8 = vld [vmem:[#allocation4 + $0x80] sm:$0xff]  }
 0x6b1   :  { %v13214_v18 = vadd.f32 %v8532_v3, %v13044_v61  ;;  %v8533_v0 = vadd.f32 %v13111_v48, %v5241_v15  ;;  %v5243_v17 = vpop.f32.mrb[111].mxu1  ;;  %v9437_v3 = vld [vmem:[#allocation4 + $0xc0] sm:$0xff]  }
 0x6b2   :  { %7808 = vmatprep.subr.bf16.mxu0 %v9437_v3 }
 0x6b3   :  { %v13218_v60 = vadd.f32 %v8533_v0, %v13048_v37  ;;  %6112 = vmatmul.mubr.bf16.gmra.mrb[156].mxu0 %v12642_v29 }
 0x6b4   :  { %6119 = vmatprep.mubr.bf16.mxu0 %v12754_v1  ;;  %7809 = vmatpush3.bf16.msra.mxu0 %v9438_v8 }
 0x6b6   :  { %v5246_v25 = vpop.f32.mrb[112].mxu1 }
 0x6b7   :  { %v8534_v36 = vadd.f32 %v13111_v48, %v5246_v25  ;;  %v5248_v2 = vpop.f32.mrb[113].mxu1 }
 0x6b8   :  { %v5249_v21 = vpop.f32.mrb[114].mxu1 }
 0x6b9   :  { %v13224_v56 = vadd.f32 %v8534_v36, %v13062_v19  ;;  %v8535_v61 = vadd.f32 %v13111_v48, %v5249_v21  ;;  %v5251_v14 = vpop.f32.mrb[115].mxu1 }
 0x6bb   :  { %v13228_v37 = vadd.f32 %v8535_v61, %v13066_v32  ;;  %6120 = vmatmul.mubr.bf16.gmra.mrb[160].mxu0 %v14098_v49 }
 0x6bc   :  { %6127 = vmatprep.mubr.bf16.mxu0 %v12751_v28 }
 0x6be   :  { %v5254_v29 = vpop.f32.mrb[116].mxu1 }
 0x6bf   :  { %v8536_v15 = vadd.f32 %v13111_v48, %v5254_v29  ;;  %v5256_v0 = vpop.f32.mrb[117].mxu1 }
 0x6c0   :  { %v5257_v19 = vpop.f32.mrb[118].mxu1 }
 0x6c1   :  { %v13234_v17 = vadd.f32 %v8536_v15, %v13060_v23  ;;  %v8537_v25 = vadd.f32 %v13111_v48, %v5257_v19  ;;  %v5259_v36 = vpop.f32.mrb[119].mxu1 }
 0x6c3   :  { %v13238_v32 = vadd.f32 %v8537_v25, %v13064_v38  ;;  %6128 = vmatmul.mubr.bf16.gmra.mrb[164].mxu0 %v12694_v54 }
 0x6c4   :  { %6135 = vmatprep.mubr.bf16.mxu0 %v12797_v12 }
 0x6c6   :  { %v5262_v49 = vpop.f32.mrb[120].mxu1 }
 0x6c7   :  { %v8538_v2 = vadd.f32 %v13111_v48, %v5262_v49  ;;  %v5264_v21 = vpop.f32.mrb[121].mxu1  ;;  %v9439_v49 = vld [vmem:[#allocation4 + $0xc8] sm:$0xff]  }
 0x6c8   :  { %v5265_v61 = vpop.f32.mrb[122].mxu1  ;;  %7810 = vmatprep.subr.bf16.mxu0 %v9439_v49  ;;  %v9448_v49 = vld [vmem:[#allocation4 + $0x10] sm:$0xff]  }
 0x6c9   :  { %v13244_v14 = vadd.f32 %v8538_v2, %v13078_v52  ;;  %v8539_v23 = vadd.f32 %v13111_v48, %v5265_v61  ;;  %v5267_v3 = vpop.f32.mrb[123].mxu1  ;;  %v9440_v2 = vld [vmem:[#allocation4 + $0x88] sm:$0xff]  }
 0x6ca   :  { %7811 = vmatpush3.bf16.msra.mxu0 %v9440_v2 }
 0x6cb   :  { %v13248_v8 = vadd.f32 %v8539_v23, %v13082_v44  ;;  %6136 = vmatmul.mubr.bf16.gmra.mrb[168].mxu0 %v12754_v1 }
 0x6cc   :  { %6143 = vmatprep.mubr.bf16.mxu0 %v12794_v63 }
 0x6ce   :  { %v5270_v54 = vpop.f32.mrb[124].mxu1 }
 0x6cf   :  { %v8540_v38 = vadd.f32 %v13111_v48, %v5270_v54  ;;  %v5272_v29 = vpop.f32.mrb[125].mxu1  ;;  %v9442_v54 = vld [vmem:[#allocation4] sm:$0xff]  }
 0x6d0   :  { %v5273_v15 = vpop.f32.mrb[126].mxu1 }
 0x6d1   :  { %v13254_v0 = vadd.f32 %v8540_v38, %v13076_v33  ;;  %v8541_v52 = vadd.f32 %v13111_v48, %v5273_v15  ;;  %v5275_v19 = vpop.f32.mrb[127].mxu1 }
 0x6d2   :  { %v9443_v19 = vld [vmem:[#allocation4 + $0x48] sm:$0xff]  }
 0x6d3   :  { %v13258_v25 = vadd.f32 %v8541_v52, %v13080_v5  ;;  %6144 = vmatmul.mubr.bf16.gmra.mrb[172].mxu0 %v12751_v28  ;;  %v9441_v28 = vld [vmem:[#allocation4 + $0x40] sm:$0xff]  }
 0x6d4   :  { %6151 = vmatprep.mubr.bf16.mxu0 %v12839_v31  ;;  %7780 = vmatprep.subr.bf16.mxu1 %v9441_v28 }
 0x6d5   :  { %7781 = vmatpush3.bf16.msra.mxu1 %v9442_v54  ;;  %v9450_v54 = vld [vmem:[#allocation4 + $0x18] sm:$0xff]  }
 0x6d6   :  { %v5278_v1 = vpop.f32.mrb[128].mxu1  ;;  %7782 = vmatprep.subr.bf16.mxu1 %v9443_v19 }
 0x6d7   :  { %v8542_v44 = vadd.f32 %v13111_v48, %v5278_v1  ;;  %v5280_v36 = vpop.f32.mrb[129].mxu1  ;;  %v9445_v1 = vld [vmem:[#allocation4 + $0x8] sm:$0xff]  }
 0x6d8   :  { %v5281_v21 = vpop.f32.mrb[130].mxu1 }
 0x6d9   :  { %v13264_v33 = vadd.f32 %v8542_v44, %v13094_v43  ;;  %v8543_v61 = vadd.f32 %v13111_v48, %v5281_v21  ;;  %v5283_v23 = vpop.f32.mrb[131].mxu1  ;;  %7783 = vmatpush3.bf16.msra.mxu1 %v9445_v1  ;;  %v9447_v44 = vld [vmem:[#allocation4 + $0x50] sm:$0xff]  }
 0x6da   :  { %v9444_v21 = vld [vmem:[#allocation4 + $0xd0] sm:$0xff]   ;;  %7784 = vmatprep.subr.bf16.mxu1 %v9447_v44 }
 0x6db   :  { %v13268_v5 = vadd.f32 %v8543_v61, %v13098_v4  ;;  %6152 = vmatmul.mubr.bf16.gmra.mrb[176].mxu0 %v12797_v12  ;;  %v9446_v61 = vld [vmem:[#allocation4 + $0x90] sm:$0xff]   ;;  %7812 = vmatprep.subr.bf16.mxu0 %v9444_v21 }
 0x6dc   :  { %6159 = vmatprep.mubr.bf16.mxu0 %v12836_v6  ;;  %7813 = vmatpush3.bf16.msra.mxu0 %v9446_v61  ;;  %v9457_v21 = vld [vmem:[#allocation4 + $0x30] sm:$0xff]  }
 0x6dd   :  { %14102 = vst [vmem:[#allocation120_spill] sm:$0xff] %v13268_v5  ;;  %7785 = vmatpush3.bf16.msra.mxu1 %v9448_v49 }
 0x6de   :  { %v5286_v3 = vpop.f32.mrb[132].mxu1 }
 0x6df   :  { %v8544_v38 = vadd.f32 %v13111_v48, %v5286_v3  ;;  %v5288_v29 = vpop.f32.mrb[133].mxu1  ;;  %v9449_v3 = vld [vmem:[#allocation4 + $0x58] sm:$0xff]  }
 0x6e0   :  { %v5289_v43 = vpop.f32.mrb[134].mxu1  ;;  %7786 = vmatprep.subr.bf16.mxu1 %v9449_v3  ;;  %v9451_v29 = vld [vmem:[#allocation4 + $0x60] sm:$0xff]   ;;  %v9460_v3 = vld [vmem:[#allocation4 + $0x38] sm:$0xff]  }
 0x6e1   :  { %v13274_v15 = vadd.f32 %v8544_v38, %v13092_v35  ;;  %v8545_v52 = vadd.f32 %v13111_v48, %v5289_v43  ;;  %v5291_v4 = vpop.f32.mrb[135].mxu1  ;;  %7787 = vmatpush3.bf16.msra.mxu1 %v9450_v54  ;;  %v9456_v54 = vld [vmem:[#allocation4 + $0xd8] sm:$0xff]  }
 0x6e2   :  { %7788 = vmatprep.subr.bf16.mxu1 %v9451_v29  ;;  %v9458_v29 = vld [vmem:[#allocation4 + $0x98] sm:$0xff]   ;;  %7814 = vmatprep.subr.bf16.mxu0 %v9456_v54 }
 0x6e3   :  { %14103 = vst [vmem:[#allocation124_spill] sm:$0xff] %v13274_v15  ;;  %v13278_v12 = vadd.f32 %v8545_v52, %v13096_v10  ;;  %6160 = vmatmul.mubr.bf16.gmra.mrb[180].mxu0 %v12794_v63 }
 0x6e4   :  { %6167 = vmatprep.mubr.bf16.mxu0 %v12880_v53  ;;  %7815 = vmatpush3.bf16.msra.mxu0 %v9458_v29 }
 0x6e5   :  { %14104 = vst [vmem:[#allocation122_spill] sm:$0xff] %v13278_v12 }
 0x6e6   :  { %v5294_v36 = vpop.f32.mrb[136].mxu1 }
 0x6e7   :  { %v8546_v35 = vadd.f32 %v13111_v48, %v5294_v36  ;;  %v5296_v2 = vpop.f32.mrb[137].mxu1  ;;  %v9454_v36 = vld [vmem:[#allocation4 + $0x28] sm:$0xff]  }
 0x6e8   :  { %v5297_v23 = vpop.f32.mrb[138].mxu1 }
 0x6e9   :  { %v13284_v10 = vadd.f32 %v8546_v35, %v13116_v59  ;;  %v8547_v63 = vadd.f32 %v13111_v48, %v5297_v23  ;;  %v5299_v28 = vpop.f32.mrb[139].mxu1  ;;  %v9452_v59 = vld [vmem:[#allocation4 + $0x20] sm:$0xff]   ;;  %v9455_v35 = vld [vmem:[#allocation4 + $0x70] sm:$0xff]  }
 0x6ea   :  { %7789 = vmatpush3.bf16.msra.mxu1 %v9452_v59 }
 0x6eb   :  { %14105 = vst [vmem:[#allocation19_spill] sm:$0xff] %v13284_v10  ;;  %v13288_v38 = vadd.f32 %v8547_v63, %v13124_v42  ;;  %6168 = vmatmul.mubr.bf16.gmra.mrb[184].mxu0 %v12839_v31  ;;  %v9453_v31 = vld [vmem:[#allocation4 + $0x68] sm:$0xff]  }
 0x6ec   :  { %6175 = vmatprep.mubr.bf16.mxu0 %v12877_v30  ;;  %7790 = vmatprep.subr.bf16.mxu1 %v9453_v31 }
 0x6ed   :  { %14106 = vst [vmem:[#allocation20_spill] sm:$0xff] %v13288_v38 }
 0x6ee   :  { %v5302_v43 = vpop.f32.mrb[140].mxu1  ;;  %7791 = vmatpush3.bf16.msra.mxu1 %v9454_v36 }
 0x6ef   :  { %v8548_v52 = vadd.f32 %v13111_v48, %v5302_v43  ;;  %v5304_v4 = vpop.f32.mrb[141].mxu1  ;;  %7792 = vmatprep.subr.bf16.mxu1 %v9455_v35 }
 0x6f0   :  { %v5305_v19 = vpop.f32.mrb[142].mxu1 }
 0x6f1   :  { %v13294_v1 = vadd.f32 %v8548_v52, %v13113_v11  ;;  %v8549_v42 = vadd.f32 %v13111_v48, %v5305_v19  ;;  %v5307_v44 = vpop.f32.mrb[143].mxu1 }
 0x6f2   :  { %7793 = vmatpush3.bf16.msra.mxu1 %v9457_v21 }
 0x6f3   :  { %14107 = vst [vmem:[#allocation21_spill] sm:$0xff] %v13294_v1  ;;  %v13298_v49 = vadd.f32 %v8549_v42, %v13118_v16  ;;  %6176 = vmatmul.mubr.bf16.gmra.mrb[188].mxu0 %v12836_v6  ;;  %v9459_v6 = vld [vmem:[#allocation4 + $0x78] sm:$0xff]  }
 0x6f4   :  { %6183 = vmatprep.mubr.bf16.mxu0 %v12917_v62  ;;  %7794 = vmatprep.subr.bf16.mxu1 %v9459_v6 }
 0x6f5   :  { %14108 = vst [vmem:[#allocation22_spill] sm:$0xff] %v13298_v49  ;;  %v13382_v49 = vld [vmem:[#allocation4 + $0x100] sm:$0xff]  }
 0x6f6   :  { %v5310_v2 = vpop.f32.mrb[144].mxu1  ;;  %7795 = vmatpush3.bf16.msra.mxu1 %v9460_v3 }
 0x6f7   :  { %v8550_v11 = vadd.f32 %v13111_v48, %v5310_v2  ;;  %v5312_v61 = vpop.f32.mrb[145].mxu1  ;;  %8234 = vmatprep.subr.bf16.mxu1 %v13382_v49 }
 0x6f8   :  { %v5313_v23 = vpop.f32.mrb[146].mxu1  ;;  %v9461_v61 = vld [vmem:[#allocation4 + $0xe0] sm:$0xff]  }
 0x6f9   :  { %v13304_v63 = vadd.f32 %v8550_v11, %v13148_v26  ;;  %v8551_v16 = vadd.f32 %v13111_v48, %v5313_v23  ;;  %v5315_v28 = vpop.f32.mrb[147].mxu1  ;;  %7816 = vmatprep.subr.bf16.mxu0 %v9461_v61 }
 0x6fb   :  { %14109 = vst [vmem:[#allocation125_spill] sm:$0xff] %v13304_v63  ;;  %v13308_v62 = vadd.f32 %v8551_v16, %v13156_v45  ;;  %6184 = vmatmul.mubr.bf16.gmra.mrb[192].mxu0 %v12880_v53 }
 0x6fc   :  { %6191 = vmatprep.mubr.bf16.mxu0 %v12915_v47 }
 0x6fd   :  { %14110 = vst [vmem:[#allocation129_spill] sm:$0xff] %v13308_v62 }
 0x6fe   :  { %v5318_v43 = vpop.f32.mrb[148].mxu1 }
 0x6ff   :  { %v8552_v26 = vadd.f32 %v13111_v48, %v5318_v43  ;;  %v5320_v59 = vpop.f32.mrb[149].mxu1 }
 0x700   :  { %v5321_v52 = vpop.f32.mrb[150].mxu1 }
 0x701   :  { %v13314_v4 = vadd.f32 %v8552_v26, %v13145_v51  ;;  %v8553_v45 = vadd.f32 %v13111_v48, %v5321_v52  ;;  %v5323_v19 = vpop.f32.mrb[151].mxu1  ;;  %v9463_v52 = vld [vmem:[#allocation4 + $0xe8] sm:$0xff]  }
 0x703   :  { %14111 = vst [vmem:[#allocation127_spill] sm:$0xff] %v13314_v4  ;;  %v13318_v53 = vadd.f32 %v8553_v45, %v13150_v20  ;;  %6192 = vmatmul.mubr.bf16.gmra.mrb[196].mxu0 %v12877_v30  ;;  %v9462_v30 = vld [vmem:[#allocation4 + $0xa0] sm:$0xff]   ;;  %v9464_v45 = vld [vmem:[#allocation4 + $0xa8] sm:$0xff]  }
 0x704   :  { %7817 = vmatpush3.bf16.msra.mxu0 %v9462_v30 }
 0x705   :  { %14112 = vst [vmem:[#allocation23_spill] sm:$0xff] %v13318_v53  ;;  %7818 = vmatprep.subr.bf16.mxu0 %v9463_v52 }
 0x706   :  { %v5326_v47 = vpop.f32.mrb[152].mxu1 }
 0x707   :  { %v8554_v42 = vadd.f32 %v13111_v48, %v5326_v47  ;;  %v5328_v44 = vpop.f32.mrb[153].mxu1 }
 0x708   :  { %v5329_v31 = vpop.f32.mrb[154].mxu1  ;;  %7819 = vmatpush3.bf16.msra.mxu0 %v9464_v45 }
 0x709   :  { %v13323_v36 = vadd.f32 %v8554_v42, %v13177_v39  ;;  %v8555_v35 = vadd.f32 %v13111_v48, %v5329_v31  ;;  %v5331_v51 = vpop.f32.mrb[155].mxu1 }
 0x70b   :  { %14113 = vst [vmem:[#allocation24_spill] sm:$0xff] %v13323_v36  ;;  %v13327_v2 = vadd.f32 %v8555_v35, %v13185_v46 }
 0x70d   :  { %14114 = vst [vmem:[#allocation25_spill] sm:$0xff] %v13327_v2 }
 0x70e   :  { %v5334_v21 = vpop.f32.mrb[156].mxu1 }
 0x70f   :  { %v8556_v20 = vadd.f32 %v13111_v48, %v5334_v21  ;;  %v5336_v11 = vpop.f32.mrb[157].mxu1  ;;  %v9465_v21 = vld [vmem:[#allocation4 + $0xf0] sm:$0xff]  }
 0x710   :  { %v5337_v23 = vpop.f32.mrb[158].mxu1  ;;  %v9466_v11 = vld [vmem:[#allocation4 + $0xb0] sm:$0xff]   ;;  %7820 = vmatprep.subr.bf16.mxu0 %v9465_v21 }
 0x711   :  { %v13331_v16 = vadd.f32 %v8556_v20, %v13174_v22  ;;  %v8557_v28 = vadd.f32 %v13111_v48, %v5337_v23  ;;  %v5339_v39 = vpop.f32.mrb[159].mxu1  ;;  %7821 = vmatpush3.bf16.msra.mxu0 %v9466_v11 }
 0x712   :  { %v9468_v39 = vld [vmem:[#allocation4 + $0xb8] sm:$0xff]  }
 0x713   :  { %14115 = vst [vmem:[#allocation26_spill] sm:$0xff] %v13331_v16  ;;  %v13335_v6 = vadd.f32 %v8557_v28, %v13179_v34  ;;  %v9467_v28 = vld [vmem:[#allocation4 + $0xf8] sm:$0xff]  }
 0x714   :  { %7822 = vmatprep.subr.bf16.mxu0 %v9467_v28  ;;  %v5534_v28 = vmax.f32 %v13121_v58, 0.0 }
 0x715   :  { %14116 = vst [vmem:[#allocation130_spill] sm:$0xff] %v13335_v6  ;;  %7823 = vmatpush3.bf16.msra.mxu0 %v9468_v39 }
 0x716   :  { %v8196_v46 = vpop.f32.mrb[160].mxu1 }
 0x717   :  { %v6234_v3 = vpop.f32.mrb[161].mxu1 }
 0x718   :  { %v13337_v54 = vpop.f32.mrb[162].mxu1 }
 0x719   :  { %v6237_v29 = vpop.f32.mrb[163].mxu1 }
 0x71e   :  { %v13339_v43 = vpop.f32.mrb[164].mxu1 }
 0x71f   :  { %v13341_v26 = vpop.f32.mrb[165].mxu1 }
 0x720   :  { %v13343_v59 = vpop.f32.mrb[166].mxu1 }
 0x721   :  { %v13345_v22 = vpop.f32.mrb[167].mxu1 }
 0x726   :  { %v13347_v19 = vpop.f32.mrb[168].mxu1 }
 0x727   :  { %v13349_v47 = vpop.f32.mrb[169].mxu1 }
 0x728   :  { %v13351_v34 = vpop.f32.mrb[170].mxu1 }
 0x729   :  { %v13353_v42 = vpop.f32.mrb[171].mxu1 }
 0x72e   :  { %v13355_v44 = vpop.f32.mrb[172].mxu1 }
 0x72f   :  { %v13357_v31 = vpop.f32.mrb[173].mxu1 }
 0x730   :  { %v13359_v35 = vpop.f32.mrb[174].mxu1 }
 0x731   :  { %v13361_v51 = vpop.f32.mrb[175].mxu1 }
 0x736   :  { %v13363_v20 = vpop.f32.mrb[176].mxu1 }
 0x737   :  { %v13365_v61 = vpop.f32.mrb[177].mxu1 }
 0x738   :  { %v13367_v30 = vpop.f32.mrb[178].mxu1 }
 0x739   :  { %v13369_v23 = vpop.f32.mrb[179].mxu1 }
 0x73e   :  { %v6041_v52 = vpop.f32.mrb[120].mxu0  ;;  %v13371_v45 = vpop.f32.mrb[180].mxu1 }
 0x73f   :  { %v8558_v6 = vadd.f32 %v13111_v48, %v6041_v52  ;;  %v6043_v16 = vpop.f32.mrb[121].mxu0  ;;  %v13374_v2 = vpop.f32.mrb[181].mxu1  ;;  %v5535_v52 = vmax.f32 %v13127_v57, 0.0 }
 0x740   :  { %v6044_v36 = vpop.f32.mrb[122].mxu0  ;;  %v13376_v53 = vpop.f32.mrb[182].mxu1 }
 0x741   :  { %v6235_v21 = vadd.f32 %v8558_v6, %v6234_v3  ;;  %v8559_v11 = vadd.f32 %v13111_v48, %v6044_v36  ;;  %v6046_v4 = vpop.f32.mrb[123].mxu0  ;;  %v13379_v62 = vpop.f32.mrb[183].mxu1 }
 0x743   :  { %v6393_v39 = vmax.f32 %v6235_v21, 0.0  ;;  %v6238_v63 = vadd.f32 %v8559_v11, %v6237_v29 }
 0x745   :  { %v6433_v16 = vmax.f32 %v5534_v28, %v6393_v39  ;;  %v6394_v1 = vmax.f32 %v6238_v63, 0.0  ;;  %v5536_v63 = vmax.f32 %v13135_v9, 0.0 }
 0x746   :  { %v6049_v38 = vpop.f32.mrb[124].mxu0  ;;  %v13385_v10 = vpop.f32.mrb[184].mxu1 }
 0x747   :  { %14117 = vst [vmem:[#allocation131_spill] sm:$0xff] %v13385_v10  ;;  %v6434_v6 = vmax.f32 %v5535_v52, %v6394_v1  ;;  %v8560_v4 = vadd.f32 %v13111_v48, %v6049_v38  ;;  %v6051_v36 = vpop.f32.mrb[125].mxu0  ;;  %v13389_v3 = vpop.f32.mrb[185].mxu1  ;;  %v14119_v1 = vld [vmem:[#allocation17_spill] sm:$0xff] }
 0x748   :  { %v6052_v58 = vpop.f32.mrb[126].mxu0  ;;  %v13391_v21 = vpop.f32.mrb[186].mxu1  ;;  %v5537_v52 = vmax.f32 %v14119_v1, 0.0 }
 0x749   :  { %14118 = vst [vmem:[#allocation27_spill] sm:$0xff] %v13391_v21  ;;  %v6243_v29 = vadd.f32 %v8560_v4, %v8196_v46  ;;  %v8561_v11 = vadd.f32 %v13111_v48, %v6052_v58  ;;  %v6054_v57 = vpop.f32.mrb[127].mxu0  ;;  %v13394_v28 = vpop.f32.mrb[187].mxu1 }
 0x74b   :  { %v6395_v39 = vmax.f32 %v6243_v29, 0.0  ;;  %v6246_v12 = vadd.f32 %v8561_v11, %v13337_v54 }
 0x74d   :  { %v6435_v38 = vmax.f32 %v5536_v63, %v6395_v39  ;;  %v6396_v36 = vmax.f32 %v6246_v12, 0.0  ;;  %v5538_v12 = vmax.f32 %v13153_v13, 0.0 }
 0x74e   :  { %v6057_v15 = vpop.f32.mrb[128].mxu0  ;;  %v13399_v10 = vpop.f32.mrb[188].mxu1 }
 0x74f   :  { %14120 = vst [vmem:[#allocation28_spill] sm:$0xff] %v13399_v10  ;;  %v6436_v5 = vmax.f32 %v5537_v52, %v6396_v36  ;;  %v8562_v46 = vadd.f32 %v13111_v48, %v6057_v15  ;;  %v6059_v4 = vpop.f32.mrb[129].mxu0  ;;  %v13402_v58 = vpop.f32.mrb[189].mxu1  ;;  %v5539_v15 = vmax.f32 %v13159_v7, 0.0 }
 0x750   :  { %v6060_v57 = vpop.f32.mrb[130].mxu0  ;;  %v13404_v21 = vpop.f32.mrb[190].mxu1 }
 0x751   :  { %14121 = vst [vmem:[#allocation29_spill] sm:$0xff] %v13404_v21  ;;  %v6251_v9 = vadd.f32 %v8562_v46, %v13341_v26  ;;  %v8563_v54 = vadd.f32 %v13111_v48, %v6060_v57  ;;  %v6062_v29 = vpop.f32.mrb[131].mxu0  ;;  %v13408_v11 = vpop.f32.mrb[191].mxu1 }
 0x752   :  { %14122 = vst [vmem:[#allocation30_spill] sm:$0xff] %v13408_v11 }
 0x753   :  { %v6397_v63 = vmax.f32 %v6251_v9, 0.0  ;;  %v6254_v39 = vadd.f32 %v8563_v54, %v13345_v22 }
 0x755   :  { %v6437_v1 = vmax.f32 %v5538_v12, %v6397_v63  ;;  %v6398_v52 = vmax.f32 %v6254_v39, 0.0  ;;  %v14124_v12 = vld [vmem:[#allocation18_spill] sm:$0xff] }
 0x756   :  { %v6065_v36 = vpop.f32.mrb[132].mxu0  ;;  %v13413_v4 = vpop.f32.mrb[192].mxu1  ;;  %v5540_v63 = vmax.f32 %v14124_v12, 0.0 }
 0x757   :  { %v6473_v21 = vmax.f32 %v6433_v16, %v6437_v1  ;;  %v6438_v10 = vmax.f32 %v5539_v15, %v6398_v52  ;;  %v8564_v26 = vadd.f32 %v13111_v48, %v6065_v36  ;;  %v6067_v46 = vpop.f32.mrb[133].mxu0  ;;  %v13416_v57 = vpop.f32.mrb[193].mxu1  ;;  %v14125_v1 = vld [vmem:[#allocation123_spill] sm:$0xff] }
 0x758   :  { %v6068_v29 = vpop.f32.mrb[134].mxu0  ;;  %v13418_v11 = vpop.f32.mrb[194].mxu1  ;;  %v5541_v52 = vmax.f32 %v14125_v1, 0.0  ;;  %v5543_v1 = vmax.f32 %v13188_v50, 0.0  ;;  %v5545_v50 = vmax.f32 %v13198_v40, 0.0  ;;  %v5547_v40 = vmax.f32 %v13208_v27, 0.0 }
 0x759   :  { %14123 = vst [vmem:[#allocation132_spill] sm:$0xff] %v13418_v11  ;;  %v6474_v13 = vmax.f32 %v6434_v6, %v6438_v10  ;;  %v6259_v22 = vadd.f32 %v8564_v26, %v13339_v43  ;;  %v8565_v7 = vadd.f32 %v13111_v48, %v6068_v29  ;;  %v6070_v9 = vpop.f32.mrb[135].mxu0  ;;  %v13422_v54 = vpop.f32.mrb[195].mxu1 }
 0x75b   :  { %v13425_v16 = vpack.c.bf16 %v6474_v13, %v6473_v21  ;;  %v6399_v39 = vmax.f32 %v6259_v22, 0.0  ;;  %v6262_v15 = vadd.f32 %v8565_v7, %v13343_v59 }
 0x75d   :  { %v6439_v36 = vmax.f32 %v5540_v63, %v6399_v39  ;;  %v6400_v46 = vmax.f32 %v6262_v15, 0.0  ;;  %v5542_v39 = vmax.f32 %v13182_v55, 0.0 }
 0x75e   :  { %v6073_v11 = vpop.f32.mrb[136].mxu0  ;;  %v13429_v10 = vpop.f32.mrb[196].mxu1 }
 0x75f   :  { %v6475_v43 = vmax.f32 %v6435_v38, %v6439_v36  ;;  %v6440_v6 = vmax.f32 %v5541_v52, %v6400_v46  ;;  %v8566_v26 = vadd.f32 %v13111_v48, %v6073_v11  ;;  %v6075_v29 = vpop.f32.mrb[137].mxu0  ;;  %v13432_v9 = vpop.f32.mrb[197].mxu1 }
 0x760   :  { %v6076_v12 = vpop.f32.mrb[138].mxu0  ;;  %v13434_v21 = vpop.f32.mrb[198].mxu1 }
 0x761   :  { %v6476_v13 = vmax.f32 %v6436_v5, %v6440_v6  ;;  %v6267_v59 = vadd.f32 %v8566_v26, %v13349_v47  ;;  %v8567_v22 = vadd.f32 %v13111_v48, %v6076_v12  ;;  %v6078_v7 = vpop.f32.mrb[139].mxu0  ;;  %v13438_v63 = vpop.f32.mrb[199].mxu1 }
 0x763   :  { %v13441_v38 = vpack.c.bf16 %v6476_v13, %v6475_v43  ;;  %v6401_v15 = vmax.f32 %v6267_v59, 0.0  ;;  %v6270_v11 = vadd.f32 %v8567_v22, %v13353_v42  ;;  %v5544_v43 = vmax.f32 %v13194_v41, 0.0 }
 0x764   :  { %v5546_v41 = vmax.f32 %v13204_v24, 0.0 }
 0x765   :  { %v6441_v52 = vmax.f32 %v5542_v39, %v6401_v15  ;;  %v6402_v36 = vmax.f32 %v6270_v11, 0.0 }
 0x766   :  { %v6081_v46 = vpop.f32.mrb[140].mxu0 }
 0x767   :  { %v6442_v5 = vmax.f32 %v5543_v1, %v6402_v36  ;;  %v8568_v47 = vadd.f32 %v13111_v48, %v6081_v46  ;;  %v6083_v6 = vpop.f32.mrb[141].mxu0 }
 0x768   :  { %v6084_v26 = vpop.f32.mrb[142].mxu0 }
 0x769   :  { %v6275_v29 = vadd.f32 %v8568_v47, %v13347_v19  ;;  %v8569_v12 = vadd.f32 %v13111_v48, %v6084_v26  ;;  %v6086_v55 = vpop.f32.mrb[143].mxu0 }
 0x76b   :  { %v6403_v13 = vmax.f32 %v6275_v29, 0.0  ;;  %v6278_v42 = vadd.f32 %v8569_v12, %v13351_v34 }
 0x76d   :  { %v6443_v59 = vmax.f32 %v5544_v43, %v6403_v13  ;;  %v6404_v22 = vmax.f32 %v6278_v42, 0.0 }
 0x76e   :  { %v6089_v7 = vpop.f32.mrb[144].mxu0 }
 0x76f   :  { %v6444_v39 = vmax.f32 %v5545_v50, %v6404_v22  ;;  %v8570_v15 = vadd.f32 %v13111_v48, %v6089_v7  ;;  %v6091_v11 = vpop.f32.mrb[145].mxu0  ;;  %v5548_v7 = vmax.f32 %v13214_v18, 0.0 }
 0x770   :  { %v6092_v1 = vpop.f32.mrb[146].mxu0  ;;  %v9470_v11 = vld [vmem:[#allocation4 + $0x108] sm:$0xff]  }
 0x771   :  { %v6283_v19 = vadd.f32 %v8570_v15, %v13357_v31  ;;  %v8571_v36 = vadd.f32 %v13111_v48, %v6092_v1  ;;  %v6094_v46 = vpop.f32.mrb[147].mxu0  ;;  %v5549_v1 = vmax.f32 %v13218_v60, 0.0 }
 0x773   :  { %v6405_v47 = vmax.f32 %v6283_v19, 0.0  ;;  %v6286_v34 = vadd.f32 %v8571_v36, %v13361_v51 }
 0x775   :  { %v6445_v6 = vmax.f32 %v5546_v41, %v6405_v47  ;;  %v6406_v26 = vmax.f32 %v6286_v34, 0.0 }
 0x776   :  { %v6097_v29 = vpop.f32.mrb[148].mxu0 }
 0x777   :  { %v6446_v12 = vmax.f32 %v5547_v40, %v6406_v26  ;;  %v8572_v55 = vadd.f32 %v13111_v48, %v6097_v29  ;;  %v6099_v43 = vpop.f32.mrb[149].mxu0  ;;  %v6477_v13 = vmax.f32 %v6441_v52, %v6445_v6  ;;  %v5550_v6 = vmax.f32 %v13224_v56, 0.0 }
 0x778   :  { %v6100_v42 = vpop.f32.mrb[150].mxu0 }
 0x779   :  { %v6291_v31 = vadd.f32 %v8572_v55, %v13355_v44  ;;  %v8573_v50 = vadd.f32 %v13111_v48, %v6100_v42  ;;  %v6102_v22 = vpop.f32.mrb[151].mxu0  ;;  %v6478_v24 = vmax.f32 %v6442_v5, %v6446_v12 }
 0x77b   :  { %v6407_v51 = vmax.f32 %v6291_v31, 0.0  ;;  %v6294_v27 = vadd.f32 %v8573_v50, %v13359_v35  ;;  %v6495_v15 = vpack.c.bf16 %v6478_v24, %v6477_v13  ;;  %v9471_v35 = vld [vmem:[#allocation4 + $0x110] sm:$0xff]  }
 0x77d   :  { %v6447_v19 = vmax.f32 %v5548_v7, %v6407_v51  ;;  %v6408_v36 = vmax.f32 %v6294_v27, 0.0  ;;  %6859 = vmatprep.mubr.bf16.mxu1 %v6495_v15  ;;  %v5553_v7 = vmax.f32 %v13238_v32, 0.0 }
 0x77e   :  { %v6105_v52 = vpop.f32.mrb[152].mxu0  ;;  %6860 = vmatmul.mubr.bf16.vlgmr.msra.gmra.mrb[200].mxu1 %v13425_v16 }
 0x77f   :  { %v6448_v44 = vmax.f32 %v5549_v1, %v6408_v36  ;;  %v8574_v46 = vadd.f32 %v13111_v48, %v6105_v52  ;;  %v6107_v41 = vpop.f32.mrb[153].mxu0  ;;  %v6479_v5 = vmax.f32 %v6443_v59, %v6447_v19  ;;  %8235 = vmatpush3.bf16.msra.mxu1 %v13382_v49  ;;  %v9472_v59 = vld [vmem:[#allocation4 + $0x118] sm:$0xff]   ;;  %v5551_v49 = vmax.f32 %v13228_v37, 0.0  ;;  %v9475_v36 = vld [vmem:[#allocation4 + $0x130] sm:$0xff]  }
 0x780   :  { %v6108_v18 = vpop.f32.mrb[154].mxu0  ;;  %8236 = vmatprep.subr.bf16.mxu1 %v9470_v11  ;;  %v5552_v37 = vmax.f32 %v13234_v17, 0.0  ;;  %v9476_v41 = vld [vmem:[#allocation4 + $0x138] sm:$0xff]  }
 0x781   :  { %v6299_v47 = vadd.f32 %v8574_v46, %v13365_v61  ;;  %v8575_v60 = vadd.f32 %v13111_v48, %v6108_v18  ;;  %v6110_v34 = vpop.f32.mrb[155].mxu0  ;;  %v6480_v40 = vmax.f32 %v6444_v39, %v6448_v44  ;;  %v5554_v44 = vmax.f32 %v13244_v14, 0.0 }
 0x783   :  { %v6409_v26 = vmax.f32 %v6299_v47, 0.0  ;;  %v6302_v16 = vadd.f32 %v8575_v60, %v13369_v23  ;;  %v6496_v29 = vpack.c.bf16 %v6480_v40, %v6479_v5  ;;  %8237 = vmatpush3.bf16.msra.mxu1 %v9470_v11  ;;  %v9473_v23 = vld [vmem:[#allocation4 + $0x120] sm:$0xff]   ;;  %v5555_v5 = vmax.f32 %v13248_v8, 0.0 }
 0x784   :  { %8238 = vmatprep.subr.bf16.mxu1 %v9471_v35 }
 0x785   :  { %v6449_v12 = vmax.f32 %v5550_v6, %v6409_v26  ;;  %v6410_v55 = vmax.f32 %v6302_v16, 0.0  ;;  %6867 = vmatprep.mubr.bf16.mxu1 %v6496_v29  ;;  %v5556_v29 = vmax.f32 %v13254_v0, 0.0 }
 0x786   :  { %v6113_v43 = vpop.f32.mrb[156].mxu0  ;;  %6868 = vmatmul.mubr.bf16.gmra.mrb[204].mxu1 %v13441_v38  ;;  %v9474_v38 = vld [vmem:[#allocation4 + $0x128] sm:$0xff]  }
 0x787   :  { %v6450_v61 = vmax.f32 %v5551_v49, %v6410_v55  ;;  %v8576_v39 = vadd.f32 %v13111_v48, %v6113_v43  ;;  %v6115_v13 = vpop.f32.mrb[157].mxu0  ;;  %8239 = vmatpush3.bf16.msra.mxu1 %v9471_v35 }
 0x788   :  { %v6116_v56 = vpop.f32.mrb[158].mxu0  ;;  %8240 = vmatprep.subr.bf16.mxu1 %v9472_v59 }
 0x789   :  { %v6307_v42 = vadd.f32 %v8576_v39, %v13363_v20  ;;  %v8577_v31 = vadd.f32 %v13111_v48, %v6116_v56  ;;  %v6118_v50 = vpop.f32.mrb[159].mxu0 }
 0x78b   :  { %v6411_v22 = vmax.f32 %v6307_v42, 0.0  ;;  %v6310_v24 = vadd.f32 %v8577_v31, %v13367_v30  ;;  %8241 = vmatpush3.bf16.msra.mxu1 %v9472_v59 }
 0x78c   :  { %8242 = vmatprep.subr.bf16.mxu1 %v9473_v23 }
 0x78d   :  { %v6451_v51 = vmax.f32 %v5552_v37, %v6411_v22  ;;  %v6412_v27 = vmax.f32 %v6310_v24, 0.0  ;;  %v14126_v24 = vld [vmem:[#allocation120_spill] sm:$0xff] }
 0x78e   :  { %v6121_v15 = vpop.f32.mrb[160].mxu0 }
 0x78f   :  { %v6452_v11 = vmax.f32 %v5553_v7, %v6412_v27  ;;  %v8578_v1 = vadd.f32 %v13111_v48, %v6121_v15  ;;  %v6123_v20 = vpop.f32.mrb[161].mxu0  ;;  %8243 = vmatpush3.bf16.msra.mxu1 %v9473_v23 }
 0x790   :  { %v6124_v19 = vpop.f32.mrb[162].mxu0  ;;  %8244 = vmatprep.subr.bf16.mxu1 %v9474_v38  ;;  %v14127_v20 = vld [vmem:[#allocation131_spill] sm:$0xff] }
 0x791   :  { %v6315_v17 = vadd.f32 %v8578_v1, %v13374_v2  ;;  %v8579_v30 = vadd.f32 %v13111_v48, %v6124_v19  ;;  %v6126_v52 = vpop.f32.mrb[163].mxu0 }
 0x793   :  { %v6413_v46 = vmax.f32 %v6315_v17, 0.0  ;;  %v6318_v32 = vadd.f32 %v8579_v30, %v13379_v62  ;;  %8245 = vmatpush3.bf16.msra.mxu1 %v9474_v38  ;;  %v13489_v62 = vld [vmem:[%s13576_s6 + $0x1] ss:$0 sm:$0xff]  ;;  %v5559_v38 = vmax.f32 %v14126_v24, 0.0 }
 0x794   :  { %8246 = vmatprep.subr.bf16.mxu1 %v9475_v36  ;;  %v14128_v17 = vld [vmem:[#allocation124_spill] sm:$0xff] }
 0x795   :  { %v6453_v18 = vmax.f32 %v5554_v44, %v6413_v46  ;;  %v6414_v35 = vmax.f32 %v6318_v32, 0.0  ;;  %v5560_v30 = vmax.f32 %v14128_v17, 0.0  ;;  %v14129_v44 = vld [vmem:[#allocation27_spill] sm:$0xff]  ;;  %v14130_v46 = vld [vmem:[#allocation122_spill] sm:$0xff] }
 0x796   :  { %v6129_v47 = vpop.f32.mrb[164].mxu0  ;;  %v5561_v32 = vmax.f32 %v14130_v46, 0.0 }
 0x797   :  { %v6481_v60 = vmax.f32 %v6449_v12, %v6453_v18  ;;  %v6454_v34 = vmax.f32 %v5555_v5, %v6414_v35  ;;  %v8580_v2 = vadd.f32 %v13111_v48, %v6129_v47  ;;  %v6131_v40 = vpop.f32.mrb[165].mxu0  ;;  %8247 = vmatpush3.bf16.msra.mxu1 %v9475_v36  ;;  %v5557_v12 = vmax.f32 %v13258_v25, 0.0 }
 0x798   :  { %v6132_v6 = vpop.f32.mrb[166].mxu0  ;;  %8248 = vmatprep.subr.bf16.mxu1 %v9476_v41 }
 0x799   :  { %v6482_v14 = vmax.f32 %v6450_v61, %v6454_v34  ;;  %v6323_v26 = vadd.f32 %v8580_v2, %v13371_v45  ;;  %v8581_v8 = vadd.f32 %v13489_v62, %v6132_v6  ;;  %v6134_v16 = vpop.f32.mrb[167].mxu0 }
 0x79a   :  { %v14132_v16 = vld [vmem:[#allocation30_spill] sm:$0xff] }
 0x79b   :  { %v13493_v59 = vpack.c.bf16 %v6482_v14, %v6481_v60  ;;  %v6415_v48 = vmax.f32 %v6323_v26, 0.0  ;;  %v6326_v49 = vadd.f32 %v8581_v8, %v13376_v53  ;;  %8249 = vmatpush3.bf16.msra.mxu1 %v9476_v41  ;;  %v5558_v53 = vmax.f32 %v13264_v33, 0.0  ;;  %v14131_v14 = vld [vmem:[#allocation19_spill] sm:$0xff] }
 0x79c   :  { %v5562_v26 = vmax.f32 %v14131_v14, 0.0 }
 0x79d   :  { %v6455_v55 = vmax.f32 %v5556_v29, %v6415_v48  ;;  %v6416_v45 = vmax.f32 %v6326_v49, 0.0  ;;  %v14133_v48 = vld [vmem:[#allocation20_spill] sm:$0xff] }
 0x79e   :  { %v6137_v43 = vpop.f32.mrb[168].mxu0  ;;  %v5563_v49 = vmax.f32 %v14133_v48, 0.0  ;;  %v14142_v48 = vld [vmem:[#allocation23_spill] sm:$0xff] }
 0x79f   :  { %v6483_v61 = vmax.f32 %v6451_v51, %v6455_v55  ;;  %v6456_v39 = vmax.f32 %v5557_v12, %v6416_v45  ;;  %v8582_v13 = vadd.f32 %v13489_v62, %v6137_v43  ;;  %v6139_v56 = vpop.f32.mrb[169].mxu0 }
 0x7a0   :  { %v6140_v23 = vpop.f32.mrb[170].mxu0 }
 0x7a1   :  { %v6484_v42 = vmax.f32 %v6452_v11, %v6456_v39  ;;  %v6331_v0 = vadd.f32 %v8582_v13, %v13389_v3  ;;  %v8583_v31 = vadd.f32 %v13489_v62, %v6140_v23  ;;  %v6142_v50 = vpop.f32.mrb[171].mxu0 }
 0x7a2   :  { %v14135_v50 = vld [vmem:[#allocation21_spill] sm:$0xff] }
 0x7a3   :  { %v13501_v37 = vpack.c.bf16 %v6484_v42, %v6483_v61  ;;  %v6417_v25 = vmax.f32 %v6331_v0, 0.0  ;;  %v6334_v22 = vadd.f32 %v8583_v31, %v13394_v28 }
 0x7a5   :  { %v6457_v7 = vmax.f32 %v5558_v53, %v6417_v25  ;;  %v6418_v51 = vmax.f32 %v6334_v22, 0.0  ;;  %v5564_v53 = vmax.f32 %v14135_v50, 0.0  ;;  %v14136_v22 = vld [vmem:[#allocation29_spill] sm:$0xff] }
 0x7a6   :  { %v6145_v27 = vpop.f32.mrb[172].mxu0 }
 0x7a7   :  { %v6458_v15 = vmax.f32 %v5559_v38, %v6418_v51  ;;  %v8584_v11 = vadd.f32 %v13489_v62, %v6145_v27  ;;  %v6147_v1 = vpop.f32.mrb[173].mxu0  ;;  %v14137_v51 = vld [vmem:[#allocation22_spill] sm:$0xff] }
 0x7a8   :  { %v6148_v3 = vpop.f32.mrb[174].mxu0  ;;  %v5565_v27 = vmax.f32 %v14137_v51, 0.0 }
 0x7a9   :  { %v6339_v19 = vadd.f32 %v8584_v11, %v14127_v20  ;;  %v8585_v36 = vadd.f32 %v13489_v62, %v6148_v3  ;;  %v6150_v33 = vpop.f32.mrb[175].mxu0 }
 0x7ab   :  { %v6419_v52 = vmax.f32 %v6339_v19, 0.0  ;;  %v6342_v28 = vadd.f32 %v8585_v36, %v14129_v44  ;;  %v14138_v44 = vld [vmem:[#allocation125_spill] sm:$0xff] }
 0x7ad   :  { %v6459_v41 = vmax.f32 %v5560_v30, %v6419_v52  ;;  %v6420_v5 = vmax.f32 %v6342_v28, 0.0  ;;  %v5566_v28 = vmax.f32 %v14138_v44, 0.0 }
 0x7ae   :  { %v6153_v18 = vpop.f32.mrb[176].mxu0 }
 0x7af   :  { %v6460_v35 = vmax.f32 %v5561_v32, %v6420_v5  ;;  %v8586_v47 = vadd.f32 %v13489_v62, %v6153_v18  ;;  %v6155_v60 = vpop.f32.mrb[177].mxu0  ;;  %v14139_v18 = vld [vmem:[#allocation129_spill] sm:$0xff] }
 0x7b0   :  { %v6156_v34 = vpop.f32.mrb[178].mxu0 }
 0x7b1   :  { %v6347_v2 = vadd.f32 %v8586_v47, %v13402_v58  ;;  %v8587_v40 = vadd.f32 %v13489_v62, %v6156_v34  ;;  %v6158_v6 = vpop.f32.mrb[179].mxu0  ;;  %v14134_v58 = vld [vmem:[#allocation28_spill] sm:$0xff] }
 0x7b3   :  { %v6421_v8 = vmax.f32 %v6347_v2, 0.0  ;;  %v6350_v29 = vadd.f32 %v8587_v40, %v14132_v16  ;;  %v14141_v16 = vld [vmem:[#allocation132_spill] sm:$0xff] }
 0x7b5   :  { %v6461_v12 = vmax.f32 %v5562_v26, %v6421_v8  ;;  %v6422_v55 = vmax.f32 %v6350_v29, 0.0 }
 0x7b6   :  { %v6161_v45 = vpop.f32.mrb[180].mxu0 }
 0x7b7   :  { %v6462_v43 = vmax.f32 %v5563_v49, %v6422_v55  ;;  %v8588_v61 = vadd.f32 %v13489_v62, %v6161_v45  ;;  %v6163_v39 = vpop.f32.mrb[181].mxu0  ;;  %v6485_v13 = vmax.f32 %v6457_v7, %v6461_v12  ;;  %v5569_v49 = vmax.f32 %v14142_v48, 0.0 }
 0x7b8   :  { %v6164_v56 = vpop.f32.mrb[182].mxu0 }
 0x7b9   :  { %v6355_v23 = vadd.f32 %v8588_v61, %v14134_v58  ;;  %v8589_v42 = vadd.f32 %v13489_v62, %v6164_v56  ;;  %v6166_v0 = vpop.f32.mrb[183].mxu0  ;;  %v6486_v31 = vmax.f32 %v6458_v15, %v6462_v43  ;;  %v14143_v58 = vld [vmem:[#allocation24_spill] sm:$0xff] }
 0x7bb   :  { %v6423_v25 = vmax.f32 %v6355_v23, 0.0  ;;  %v6358_v24 = vadd.f32 %v8589_v42, %v14136_v22  ;;  %v6499_v38 = vpack.c.bf16 %v6486_v31, %v6485_v13  ;;  %v5570_v23 = vmax.f32 %v14143_v58, 0.0  ;;  %v14144_v31 = vld [vmem:[#allocation25_spill] sm:$0xff] }
 0x7bc   :  { %v5571_v50 = vmax.f32 %v14144_v31, 0.0 }
 0x7bd   :  { %v6463_v11 = vmax.f32 %v5564_v53, %v6423_v25  ;;  %v6424_v1 = vmax.f32 %v6358_v24, 0.0  ;;  %6908 = vmatprep.mubr.bf16.mxu0 %v6499_v38 }
 0x7be   :  { %v6169_v3 = vpop.f32.mrb[184].mxu0  ;;  %6909 = vmatmul.mubr.bf16.vlgmr.msra.gmra.mrb[200].mxu0 %v13493_v59  ;;  %v5567_v59 = vmax.f32 %v14139_v18, 0.0  ;;  %v9481_v18 = vld [vmem:[#allocation6 + $0x20] sm:$0xff]  }
 0x7bf   :  { %v6464_v7 = vmax.f32 %v5565_v27, %v6424_v1  ;;  %v8590_v20 = vadd.f32 %v13489_v62, %v6169_v3  ;;  %v6171_v19 = vpop.f32.mrb[185].mxu0  ;;  %v6487_v36 = vmax.f32 %v6459_v41, %v6463_v11 }
 0x7c0   :  { %v6172_v15 = vpop.f32.mrb[186].mxu0 }
 0x7c1   :  { %v6363_v33 = vadd.f32 %v8590_v20, %v13416_v57  ;;  %v8591_v17 = vadd.f32 %v13489_v62, %v6172_v15  ;;  %v6174_v30 = vpop.f32.mrb[187].mxu0  ;;  %v6488_v52 = vmax.f32 %v6460_v35, %v6464_v7  ;;  %v14145_v20 = vld [vmem:[#allocation26_spill] sm:$0xff] }
 0x7c2   :  { %v5572_v19 = vmax.f32 %v14145_v20, 0.0 }
 0x7c3   :  { %v6425_v46 = vmax.f32 %v6363_v33, 0.0  ;;  %v6366_v32 = vadd.f32 %v8591_v17, %v13422_v54  ;;  %v6500_v5 = vpack.c.bf16 %v6488_v52, %v6487_v36  ;;  %v14140_v54 = vld [vmem:[#allocation127_spill] sm:$0xff]  ;;  %v14146_v33 = vld [vmem:[#allocation130_spill] sm:$0xff] }
 0x7c4   :  { %v5568_v26 = vmax.f32 %v14140_v54, 0.0  ;;  %v5573_v17 = vmax.f32 %v14146_v33, 0.0 }
 0x7c5   :  { %v6465_v47 = vmax.f32 %v5566_v28, %v6425_v46  ;;  %v6426_v60 = vmax.f32 %v6366_v32, 0.0  ;;  %6916 = vmatprep.mubr.bf16.mxu0 %v6500_v5  ;;  %v9479_v5 = vld [vmem:[#allocation6 + $0x10] sm:$0xff]  }
 0x7c6   :  { %v6177_v34 = vpop.f32.mrb[188].mxu0  ;;  %6917 = vmatmul.mubr.bf16.gmra.mrb[204].mxu0 %v13501_v37 }
 0x7c7   :  { %v6466_v41 = vmax.f32 %v5567_v59, %v6426_v60  ;;  %v8592_v57 = vadd.f32 %v13489_v62, %v6177_v34  ;;  %v6179_v2 = vpop.f32.mrb[189].mxu0  ;;  %v9482_v59 = vld [vmem:[#allocation6 + $0x28] sm:$0xff]   ;;  %v9484_v60 = vld [vmem:[#allocation6 + $0x38] sm:$0xff]   ;;  %v9485_v34 = vld [vmem:[#allocation7] sm:$0xff]  }
 0x7c8   :  { %v6180_v40 = vpop.f32.mrb[190].mxu0  ;;  %8274 = vmatprep.subr.bf16.mxu1 %v9485_v34  ;;  %v9488_v2 = vld [vmem:[#allocation7 + $0x18] sm:$0xff]  }
 0x7c9   :  { %v6371_v35 = vadd.f32 %v8592_v57, %v13413_v4  ;;  %v8593_v6 = vadd.f32 %v13489_v62, %v6180_v40  ;;  %v6182_v14 = vpop.f32.mrb[191].mxu0  ;;  %v9487_v57 = vld [vmem:[#allocation7 + $0x10] sm:$0xff]   ;;  %v9489_v40 = vld [vmem:[#allocation7 + $0x20] sm:$0xff]  }
 0x7cb   :  { %v6427_v8 = vmax.f32 %v6371_v35, 0.0  ;;  %v6374_v29 = vadd.f32 %v8593_v6, %v14141_v16 }
 0x7cd   :  { %v6467_v12 = vmax.f32 %v5568_v26, %v6427_v8  ;;  %v6428_v55 = vmax.f32 %v6374_v29, 0.0  ;;  %v9490_v26 = vld [vmem:[#allocation7 + $0x28] sm:$0xff]  }
 0x7ce   :  { %v6185_v37 = vpop.f32.mrb[192].mxu0 }
 0x7cf   :  { %v6468_v45 = vmax.f32 %v5569_v49, %v6428_v55  ;;  %v8594_v43 = vadd.f32 %v13489_v62, %v6185_v37  ;;  %v6187_v61 = vpop.f32.mrb[193].mxu0 }
 0x7d0   :  { %v6188_v39 = vpop.f32.mrb[194].mxu0 }
 0x7d1   :  { %v6379_v4 = vadd.f32 %v8594_v43, %v13432_v9  ;;  %v8595_v13 = vadd.f32 %v13489_v62, %v6188_v39  ;;  %v6190_v56 = vpop.f32.mrb[195].mxu0 }
 0x7d3   :  { %v6429_v42 = vmax.f32 %v6379_v4, 0.0  ;;  %v6382_v0 = vadd.f32 %v8595_v13, %v13438_v63 }
 0x7d5   :  { %v6469_v53 = vmax.f32 %v5570_v23, %v6429_v42  ;;  %v6430_v25 = vmax.f32 %v6382_v0, 0.0 }
 0x7d6   :  { %v6193_v22 = vpop.f32.mrb[196].mxu0 }
 0x7d7   :  { %v6470_v24 = vmax.f32 %v5571_v50, %v6430_v25  ;;  %v8596_v38 = vadd.f32 %v13489_v62, %v6193_v22  ;;  %v6195_v51 = vpop.f32.mrb[197].mxu0  ;;  %v6489_v27 = vmax.f32 %v6465_v47, %v6469_v53  ;;  %v9483_v47 = vld [vmem:[#allocation6 + $0x30] sm:$0xff]  }
 0x7d8   :  { %v6196_v11 = vpop.f32.mrb[198].mxu0 }
 0x7d9   :  { %v6387_v9 = vadd.f32 %v8596_v38, %v13429_v10  ;;  %v8597_v1 = vadd.f32 %v13489_v62, %v6196_v11  ;;  %v6198_v3 = vpop.f32.mrb[199].mxu0  ;;  %v6490_v7 = vmax.f32 %v6466_v41, %v6470_v24  ;;  %v9477_v10 = vld [vmem:[#allocation6] sm:$0xff]   ;;  %v9478_v62 = vld [vmem:[#allocation6 + $0x8] sm:$0xff]  }
 0x7da   :  { %8254 = vmatprep.subr.bf16.mxu0 %v9477_v10  ;;  %v9486_v41 = vld [vmem:[#allocation7 + $0x8] sm:$0xff]  }
 0x7db   :  { %v6431_v63 = vmax.f32 %v6387_v9, 0.0  ;;  %v6390_v36 = vadd.f32 %v8597_v1, %v13434_v21  ;;  %v6501_v15 = vpack.c.bf16 %v6490_v7, %v6489_v27  ;;  %8255 = vmatpush3.bf16.msra.mxu0 %v9477_v10  ;;  %v9480_v21 = vld [vmem:[#allocation6 + $0x18] sm:$0xff]  }
 0x7dc   :  { %8256 = vmatprep.subr.bf16.mxu0 %v9478_v62 }
 0x7dd   :  { %v6471_v30 = vmax.f32 %v5572_v19, %v6431_v63  ;;  %v6432_v52 = vmax.f32 %v6390_v36, 0.0  ;;  %8250 = vmatprep.mubr.bf16.mxu1 %v6501_v15 }
 0x7df   :  { %v6491_v44 = vmax.f32 %v6467_v12, %v6471_v30  ;;  %v6472_v28 = vmax.f32 %v5573_v17, %v6432_v52  ;;  %8257 = vmatpush3.bf16.msra.mxu0 %v9478_v62 }
 0x7e0   :  { %8258 = vmatprep.subr.bf16.mxu0 %v9479_v5 }
 0x7e1   :  { %v6492_v46 = vmax.f32 %v6468_v45, %v6472_v28  ;;  %v7537_v45 = vld [vmem:[%s13576_s6 + $0x2] ss:$0 sm:$0xff]  ;;  %v9491_v28 = vld [vmem:[#allocation7 + $0x30] sm:$0xff]  }
 0x7e3   :  { %v6502_v32 = vpack.c.bf16 %v6492_v46, %v6491_v44  ;;  %8259 = vmatpush3.bf16.msra.mxu0 %v9479_v5  ;;  %v9492_v46 = vld [vmem:[#allocation7 + $0x38] sm:$0xff]  }
 0x7e4   :  { %8260 = vmatprep.subr.bf16.mxu0 %v9480_v21 }
 0x7e5   :  { %8251 = vmatmul.mubr.bf16.vlgmr.msra.gmra.mrb[208].mxu1 %v6502_v32  ;;  %v7578_v32 = vld [vmem:[%s13576_s6 + $0x3] ss:$0 sm:$0xff] }
 0x7e6   :  { %8275 = vmatpush3.bf16.msra.mxu1 %v9485_v34 }
 0x7e7   :  { %8261 = vmatpush3.bf16.msra.mxu0 %v9480_v21  ;;  %8276 = vmatprep.subr.bf16.mxu1 %v9486_v41 }
 0x7e8   :  { %8262 = vmatprep.subr.bf16.mxu0 %v9481_v18 }
 0x7ea   :  { %8277 = vmatpush3.bf16.msra.mxu1 %v9486_v41 }
 0x7eb   :  { %8263 = vmatpush3.bf16.msra.mxu0 %v9481_v18  ;;  %8278 = vmatprep.subr.bf16.mxu1 %v9487_v57 }
 0x7ec   :  { %8264 = vmatprep.subr.bf16.mxu0 %v9482_v59 }
 0x7ee   :  { %8279 = vmatpush3.bf16.msra.mxu1 %v9487_v57 }
 0x7ef   :  { %8265 = vmatpush3.bf16.msra.mxu0 %v9482_v59  ;;  %8280 = vmatprep.subr.bf16.mxu1 %v9488_v2 }
 0x7f0   :  { %8266 = vmatprep.subr.bf16.mxu0 %v9483_v47 }
 0x7f2   :  { %8281 = vmatpush3.bf16.msra.mxu1 %v9488_v2 }
 0x7f3   :  { %8267 = vmatpush3.bf16.msra.mxu0 %v9483_v47  ;;  %8282 = vmatprep.subr.bf16.mxu1 %v9489_v40 }
 0x7f4   :  { %8268 = vmatprep.subr.bf16.mxu0 %v9484_v60 }
 0x7f6   :  { %8283 = vmatpush3.bf16.msra.mxu1 %v9489_v40 }
 0x7f7   :  { %8269 = vmatpush3.bf16.msra.mxu0 %v9484_v60  ;;  %8284 = vmatprep.subr.bf16.mxu1 %v9490_v26 }
 0x7fa   :  { %8285 = vmatpush3.bf16.msra.mxu1 %v9490_v26 }
 0x7fb   :  { %8286 = vmatprep.subr.bf16.mxu1 %v9491_v28 }
 0x7fe   :  { %8287 = vmatpush3.bf16.msra.mxu1 %v9491_v28 }
 0x7ff   :  { %8288 = vmatprep.subr.bf16.mxu1 %v9492_v46 }
 0x802   :  { %8289 = vmatpush3.bf16.msra.mxu1 %v9492_v46 }
 0x851   :  { %v7796_v35 = vpop.f32.mrb[200].mxu1 }
 0x852   :  { %v7797_v6 = vpop.f32.mrb[201].mxu1 }
 0x853   :  { %v7798_v14 = vadd.f32 %v7797_v6, %v7796_v35  ;;  %v7799_v54 = vpop.f32.mrb[202].mxu1  ;;  %v7587_v6 = vld [vmem:[%s13576_s6 + $0x4] ss:$0 sm:$0xff] }
 0x854   :  { %v7800_v8 = vpop.f32.mrb[203].mxu1 }
 0x855   :  { %v7801_v16 = vadd.f32 %v7800_v8, %v7799_v54  ;;  %v6862_v39 = vadd.f32 %v7798_v14, %v7537_v45 }
 0x857   :  { %v6865_v58 = vadd.f32 %v7801_v16, %v7537_v45 }
 0x859   :  { %v7802_v29 = vpop.f32.mrb[204].mxu1 }
 0x85a   :  { %v7803_v48 = vpop.f32.mrb[205].mxu1 }
 0x85b   :  { %v7804_v49 = vadd.f32 %v7803_v48, %v7802_v29  ;;  %v7805_v12 = vpop.f32.mrb[206].mxu1 }
 0x85c   :  { %v7806_v55 = vpop.f32.mrb[207].mxu1 }
 0x85d   :  { %v7807_v37 = vadd.f32 %v7806_v55, %v7805_v12  ;;  %v6870_v53 = vadd.f32 %v7804_v49, %v7537_v45 }
 0x85f   :  { %v6873_v38 = vadd.f32 %v7807_v37, %v7537_v45 }
 0x891   :  { %v7824_v43 = vpop.f32.mrb[200].mxu0 }
 0x892   :  { %v7825_v61 = vpop.f32.mrb[201].mxu0 }
 0x893   :  { %v7826_v4 = vadd.f32 %v7825_v61, %v7824_v43  ;;  %v7827_v13 = vpop.f32.mrb[202].mxu0 }
 0x894   :  { %v7828_v56 = vpop.f32.mrb[203].mxu0 }
 0x895   :  { %v7829_v23 = vadd.f32 %v7828_v56, %v7827_v13  ;;  %v6911_v42 = vadd.f32 %v7826_v4, %v6862_v39 }
 0x897   :  { %v6914_v0 = vadd.f32 %v7829_v23, %v6865_v58 }
 0x899   :  { %v7830_v31 = vpop.f32.mrb[204].mxu0 }
 0x89a   :  { %v7831_v50 = vpop.f32.mrb[205].mxu0 }
 0x89b   :  { %v7832_v25 = vadd.f32 %v7831_v50, %v7830_v31  ;;  %v7833_v22 = vpop.f32.mrb[206].mxu0 }
 0x89c   :  { %v7834_v24 = vpop.f32.mrb[207].mxu0 }
 0x89d   :  { %v7835_v51 = vadd.f32 %v7834_v24, %v7833_v22  ;;  %v6919_v27 = vadd.f32 %v7832_v25, %v6870_v53 }
 0x89f   :  { %v6922_v11 = vadd.f32 %v7835_v51, %v6873_v38 }
 0x8b8   :  { %v8252_v9 = vpop.f32.mrb[208].mxu1 }
 0x8b9   :  { %v6968_v1 = vadd.f32 %v8252_v9, %v6919_v27  ;;  %v6959_v3 = vpop.f32.mrb[209].mxu1 }
 0x8ba   :  { %v6960_v7 = vadd.f32 %v6959_v3, %v6911_v42  ;;  %v8253_v20 = vpop.f32.mrb[210].mxu1 }
 0x8bb   :  { %v6971_v19 = vadd.f32 %v8253_v20, %v6922_v11  ;;  %v6962_v63 = vpop.f32.mrb[211].mxu1  ;;  %v6976_v15 = vmax.f32 %v6968_v1, 0.0 }
 0x8bc   :  { %v6963_v36 = vadd.f32 %v6962_v63, %v6914_v0  ;;  %v6974_v17 = vmax.f32 %v6960_v7, 0.0 }
 0x8bd   :  { %v6977_v33 = vmax.f32 %v6971_v19, 0.0 }
 0x8be   :  { %v6975_v30 = vmax.f32 %v6963_v36, 0.0 }
 0x8bf   :  { %v6979_v52 = vpack.c.bf16 %v6977_v33, %v6976_v15 }
 0x8c0   :  { %v6978_v44 = vpack.c.bf16 %v6975_v30, %v6974_v17 }
 0x8c2   :  { %8270 = vmatprep.mubr.bf16.mxu0 %v6978_v44 }
 0x8c3   :  { %8271 = vmatmul.mubr.bf16.vlgmr.msra.gmra.mrb[208].mxu0 %v6979_v52 }
 0x996   :  { %v8272_v10 = vpop.f32.mrb[208].mxu0 }
 0x997   :  { %v7091_v62 = vadd.f32 %v8272_v10, %v7578_v32  ;;  %v7082_v5 = vpop.f32.mrb[209].mxu0 }
 0x998   :  { %v7083_v21 = vadd.f32 %v7578_v32, %v7082_v5  ;;  %v8273_v18 = vpop.f32.mrb[210].mxu0 }
 0x999   :  { %v7094_v59 = vadd.f32 %v8273_v18, %v7578_v32  ;;  %v7085_v47 = vpop.f32.mrb[211].mxu0  ;;  %v7099_v34 = vmax.f32 %v7091_v62, 0.0 }
 0x99a   :  { %v7086_v60 = vadd.f32 %v7578_v32, %v7085_v47  ;;  %v7097_v57 = vmax.f32 %v7083_v21, 0.0 }
 0x99b   :  { %v7100_v41 = vmax.f32 %v7094_v59, 0.0 }
 0x99c   :  { %v7098_v2 = vmax.f32 %v7086_v60, 0.0 }
 0x99d   :  { %v7102_v40 = vpack.c.bf16 %v7100_v41, %v7099_v34 }
 0x99e   :  { %v7101_v35 = vpack.c.bf16 %v7098_v2, %v7097_v57 }
 0x9a0   :  { %8290 = vmatprep.mubr.bf16.mxu1 %v7101_v35 }
 0x9a1   :  { %8291 = vmatmul.mubr.bf16.vlgmr.msra.gmra.mrb[212].mxu1 %v7102_v40 }
 0xa74   :  { %v8292_v14 = vpop.f32.mrb[212].mxu1 }
 0xa75   :  { %v7214_v54 = vadd.f32 %v8292_v14, %v7587_v6  ;;  %v7205_v26 = vpop.f32.mrb[213].mxu1 }
 0xa76   :  { %v7206_v8 = vadd.f32 %v7587_v6, %v7205_v26  ;;  %v8293_v16 = vpop.f32.mrb[214].mxu1 }
 0xa77   :  { %7222 = vst [vmem:[%s13577_s7 + $0x10] sm:$0xff] %v7214_v54  ;;  %v7217_v29 = vadd.f32 %v8293_v16, %v7587_v6  ;;  %v7208_v48 = vpop.f32.mrb[215].mxu1 }
 0xa78   :  { %7220 = vst [vmem:[%s13577_s7] sm:$0xff] %v7206_v8  ;;  %v7209_v49 = vadd.f32 %v7587_v6, %v7208_v48 }
 0xa79   :  { %7223 = vst [vmem:[%s13577_s7 + $0x18] sm:$0xff] %v7217_v29 }
 0xa7a   :  { %7221 = vst [vmem:[%s13577_s7 + $0x8] sm:$0xff] %v7209_v49 }
 0xa7b   :  { %7228 = vsyncpa [#allocation3], 1 }
 0xa7c   :  { %7229 = vsyncpa [#allocation5], 1 }
 0xa7d   :  { %7230 = vsyncpa [#allocation8], 1 }

</bundles_post_ra>
